<compile_context>
chip_gen: v6e
topology: v6e:2x2x1
jax: 0.10.0
libtpu: 0.0.40
codegen_flags: <defaults>
</compile_context>

<pallas_src>
import math
import numpy as np
import jax
import jax.numpy as jnp
from jax.experimental import pallas as pl
from jax.experimental.pallas import tpu as pltpu

# ----------------------- configuration (args / data) -----------------------
FIELD_DIMS = np.array([6, 5, 4, 3, 7, 4, 5, 6], dtype=np.int32)   # data['field_dims']
NUM_FIELDS = int(len(FIELD_DIMS))        # F = 8
EMBED_DIM = 32                           # args.embed_dim
NUM_HEADS = 2                            # args.num_heads
HEAD_DIM = EMBED_DIM // NUM_HEADS
NUM_LAYERS = 2                           # args.num_layers
DIM_FF = 2048                            # PyTorch TransformerEncoderLayer default dim_feedforward
BATCH = 8
FB = NUM_FIELDS * BATCH                  # 64 rows processed as one slab
LN_EPS = 1e-5


# ------------------------------- Pallas kernel ------------------------------
def autoint_kernel(x_ref,                               # (F*B, E) f32
                   wq_ref, bq_ref,                      # (L, H, E, Dh) bf16, (L, H, 1, Dh) f32
                   wk_ref, bk_ref,
                   wv_ref, bv_ref,
                   wo_ref, ob_ref,                      # (L, H, Dh, E) bf16, (L, 1, E) f32
                   f1w_ref, f1b_ref,                    # (L, E, Dff) bf16, (L, 1, Dff) f32
                   f2w_ref, f2b_ref,                    # (L, Dff, E) bf16, (L, 1, E) f32
                   ln1g_ref, ln1b_ref,                  # (L, 1, E) each
                   ln2g_ref, ln2b_ref,                  # (L, 1, E) each
                   fng_ref, fnb_ref,                    # (1, E) each (final LayerNorm)
                   pw_ref, pb_ref,                      # (1, E), (1, 1) (prediction linear)
                   out_ref, logit_ref):                 # (B, E), (B, 1)
    x = x_ref[...]                                      # (FB, E) f32

    def layer_norm(v, g, b):
        mu = jnp.mean(v, axis=-1, keepdims=True)
        var = jnp.mean((v - mu) ** 2, axis=-1, keepdims=True)
        return (v - mu) * jax.lax.rsqrt(var + LN_EPS) * g + b

    scale = 1.0 / math.sqrt(HEAD_DIM)

    for l in range(NUM_LAYERS):
        # ---- multi-head self-attention (per field, over the B "sequence" rows) ----
        x16 = x.astype(jnp.bfloat16)
        attn = ob_ref[l]                                # (1, E) bias, broadcasts up
        for h in range(NUM_HEADS):
            qh = jnp.dot(x16, wq_ref[l, h], preferred_element_type=jnp.float32) + bq_ref[l, h]
            kh = jnp.dot(x16, wk_ref[l, h], preferred_element_type=jnp.float32) + bk_ref[l, h]
            vh = jnp.dot(x16, wv_ref[l, h], preferred_element_type=jnp.float32) + bv_ref[l, h]
            q3 = qh.reshape(NUM_FIELDS, BATCH, HEAD_DIM).astype(jnp.bfloat16)
            k3 = kh.reshape(NUM_FIELDS, BATCH, HEAD_DIM).astype(jnp.bfloat16)
            v3 = vh.reshape(NUM_FIELDS, BATCH, HEAD_DIM).astype(jnp.bfloat16)

            # per-field scores (F, B, B), softmax in f32
            s = jnp.einsum('fqd,fkd->fqk', q3, k3,
                           preferred_element_type=jnp.float32) * scale
            s = s - jnp.max(s, axis=-1, keepdims=True)
            p = jnp.exp(s)
            p = p * pl.reciprocal(jnp.sum(p, axis=-1, keepdims=True), approx=True)

            ctx = jnp.einsum('fqk,fkd->fqd', p.astype(jnp.bfloat16), v3,
                             preferred_element_type=jnp.float32)          # (F, B, Dh)
            # per-head slice of the output projection -> no concat needed
            attn = attn + jnp.dot(ctx.reshape(FB, HEAD_DIM).astype(jnp.bfloat16),
                                  wo_ref[l, h], preferred_element_type=jnp.float32)

        x = layer_norm(x + attn, ln1g_ref[l], ln1b_ref[l])

        # ---- feed-forward (relu), bf16 operands / f32 accumulate ----
        x16 = x.astype(jnp.bfloat16)
        h1 = jnp.maximum(
            jnp.dot(x16, f1w_ref[l], preferred_element_type=jnp.float32) + f1b_ref[l], 0.0)
        ff = jnp.dot(h1.astype(jnp.bfloat16), f2w_ref[l],
                     preferred_element_type=jnp.float32) + f2b_ref[l]

        x = layer_norm(x + ff, ln2g_ref[l], ln2b_ref[l])

    # ---- TransformerBlock.norm (final LayerNorm) ----
    x = layer_norm(x, fng_ref[...], fnb_ref[...])

    # ---- torch.sum(out, dim=1): sum over fields (static sublane slices, 7 adds) ----
    out_sum = x[0:BATCH, :]
    for f in range(1, NUM_FIELDS):
        out_sum = out_sum + x[f * BATCH:(f + 1) * BATCH, :]
    out_ref[...] = out_sum

    # ---- PredictionLayer: Linear(E, 1) as VPU multiply + lane reduce ----
    logit_ref[...] = jnp.sum(out_sum * pw_ref[...], axis=-1, keepdims=True) + pb_ref[...]


# ------------------------------- JAX wrapper --------------------------------
def _full_spec(shape):
    n = len(shape)
    return pl.BlockSpec(shape, lambda i, _n=n: (0,) * _n)


def autoint_forward(x_idx, params):
    """x_idx: (B, F) int32 field indices. Returns (logits (B,), summed features (B, E))."""
    offsets = jnp.asarray(
        np.concatenate([[0], np.cumsum(FIELD_DIMS)[:-1]]).astype(np.int32))
    idx = x_idx + offsets[None, :]                            # (B, F)
    embed = params['emb_table'][idx]                          # (B, F, E) embedding gather (glue)
    # (B, F, E) -> (F, B, E) -> single (F*B, E) slab; field f occupies rows [f*B, (f+1)*B)
    x = jnp.transpose(embed, (1, 0, 2)).reshape(FB, EMBED_DIM).astype(jnp.float32)

    B, E, L, H, Dh, Dff = BATCH, EMBED_DIM, NUM_LAYERS, NUM_HEADS, HEAD_DIM, DIM_FF

    in_specs = [
        _full_spec((FB, E)),                                  # x slab
        _full_spec((L, H, E, Dh)), _full_spec((L, H, 1, Dh)),  # wq, bq
        _full_spec((L, H, E, Dh)), _full_spec((L, H, 1, Dh)),  # wk, bk
        _full_spec((L, H, E, Dh)), _full_spec((L, H, 1, Dh)),  # wv, bv
        _full_spec((L, H, Dh, E)), _full_spec((L, 1, E)),      # wo, ob
        _full_spec((L, E, Dff)), _full_spec((L, 1, Dff)),      # f1w, f1b
        _full_spec((L, Dff, E)), _full_spec((L, 1, E)),        # f2w, f2b
        _full_spec((L, 1, E)), _full_spec((L, 1, E)),          # ln1 gamma/beta
        _full_spec((L, 1, E)), _full_spec((L, 1, E)),          # ln2 gamma/beta
        _full_spec((1, E)), _full_spec((1, E)),                # final norm gamma/beta
        _full_spec((1, E)), _full_spec((1, 1)),                # pred weight row, bias
    ]
    out_specs = [
        pl.BlockSpec((B, E), lambda i: (0, 0)),
        pl.BlockSpec((B, 1), lambda i: (0, 0)),
    ]

    out_sum, logits = pl.pallas_call(
        autoint_kernel,
        out_shape=(jax.ShapeDtypeStruct((B, E), jnp.float32),
                   jax.ShapeDtypeStruct((B, 1), jnp.float32)),
        grid_spec=pltpu.PrefetchScalarGridSpec(
            num_scalar_prefetch=0,
            grid=(1,),                                        # single step: whole model fused
            in_specs=in_specs,
            out_specs=out_specs,
        ),
        compiler_params=pltpu.CompilerParams(
            dimension_semantics=("arbitrary",)),
    )(x,
      params['wq'], params['bq'], params['wk'], params['bk'],
      params['wv'], params['bv'], params['wo'], params['ob'],
      params['f1w'], params['f1b'], params['f2w'], params['f2b'],
      params['ln1g'], params['ln1b'], params['ln2g'], params['ln2b'],
      params['fng'], params['fnb'], params['pw'], params['pb'])

    return logits[:, 0], out_sum


# ------------------------------ parameter init ------------------------------
def init_params(key):
    E, L, H, Dh, Dff = EMBED_DIM, NUM_LAYERS, NUM_HEADS, HEAD_DIM, DIM_FF
    vocab = int(FIELD_DIMS.sum())
    ks = jax.random.split(key, 8)

    def rnd(k, shape, scale, dtype=jnp.float32):
        return (jax.random.normal(k, shape, jnp.float32) * scale).astype(dtype)

    bf16 = jnp.bfloat16
    p = {}
    p['emb_table'] = rnd(ks[0], (vocab, E), 1.0 / math.sqrt(E))
    # attention projections, pre-split per head, pre-transposed for x @ W, stored in bf16
    p['wq'] = rnd(ks[1], (L, H, E, Dh), 1.0 / math.sqrt(E), bf16)
    p['wk'] = rnd(ks[2], (L, H, E, Dh), 1.0 / math.sqrt(E), bf16)
    p['wv'] = rnd(ks[3], (L, H, E, Dh), 1.0 / math.sqrt(E), bf16)
    p['bq'] = jnp.zeros((L, H, 1, Dh), jnp.float32)
    p['bk'] = jnp.zeros((L, H, 1, Dh), jnp.float32)
    p['bv'] = jnp.zeros((L, H, 1, Dh), jnp.float32)
    p['wo'] = rnd(ks[4], (L, H, Dh, E), 1.0 / math.sqrt(E), bf16)
    p['ob'] = jnp.zeros((L, 1, E), jnp.float32)
    # feed-forward (bf16 weights, f32 biases)
    p['f1w'] = rnd(ks[5], (L, E, Dff), 1.0 / math.sqrt(E), bf16)
    p['f1b'] = jnp.zeros((L, 1, Dff), jnp.float32)
    p['f2w'] = rnd(ks[6], (L, Dff, E), 1.0 / math.sqrt(Dff), bf16)
    p['f2b'] = jnp.zeros((L, 1, E), jnp.float32)
    # layer norms (f32)
    p['ln1g'] = jnp.ones((L, 1, E), jnp.float32)
    p['ln1b'] = jnp.zeros((L, 1, E), jnp.float32)
    p['ln2g'] = jnp.ones((L, 1, E), jnp.float32)
    p['ln2b'] = jnp.zeros((L, 1, E), jnp.float32)
    p['fng'] = jnp.ones((1, E), jnp.float32)
    p['fnb'] = jnp.zeros((1, E), jnp.float32)
    # prediction head
    p['pw'] = rnd(ks[7], (1, E), 1.0 / math.sqrt(E))
    p['pb'] = jnp.zeros((1, 1), jnp.float32)
    return p


if __name__ == "__main__":
    key = jax.random.PRNGKey(0)
    pkey, xkey = jax.random.split(key)
    params = init_params(pkey)

    # (B, F) categorical indices, each column valid for its field cardinality.
    raw = jax.random.randint(xkey, (BATCH, NUM_FIELDS), 0, 10_000, dtype=jnp.int32)
    x_idx = raw % jnp.asarray(FIELD_DIMS, dtype=jnp.int32)

    logits, out = autoint_forward(x_idx, params)
    jax.block_until_ready((logits, out))

    assert logits.shape == (BATCH,), logits.shape
    assert out.shape == (BATCH, EMBED_DIM), out.shape
    assert bool(jnp.all(jnp.isfinite(logits))) and bool(jnp.all(jnp.isfinite(out)))
    print("KERNEL_OK")
</pallas_src>

<mosaic_0001>
module attributes {stable_mosaic.version = 11 : i64} {
  func.func @autoint_kernel(%arg0: i32, %arg1: memref<64x32xf32, #tpu.memory_space<vmem>>, %arg2: memref<2x2x32x16xbf16, #tpu.memory_space<vmem>>, %arg3: memref<2x2x1x16xf32, #tpu.memory_space<vmem>>, %arg4: memref<2x2x32x16xbf16, #tpu.memory_space<vmem>>, %arg5: memref<2x2x1x16xf32, #tpu.memory_space<vmem>>, %arg6: memref<2x2x32x16xbf16, #tpu.memory_space<vmem>>, %arg7: memref<2x2x1x16xf32, #tpu.memory_space<vmem>>, %arg8: memref<2x2x16x32xbf16, #tpu.memory_space<vmem>>, %arg9: memref<2x1x32xf32, #tpu.memory_space<vmem>>, %arg10: memref<2x32x2048xbf16, #tpu.memory_space<vmem>>, %arg11: memref<2x1x2048xf32, #tpu.memory_space<vmem>>, %arg12: memref<2x2048x32xbf16, #tpu.memory_space<vmem>>, %arg13: memref<2x1x32xf32, #tpu.memory_space<vmem>>, %arg14: memref<2x1x32xf32, #tpu.memory_space<vmem>>, %arg15: memref<2x1x32xf32, #tpu.memory_space<vmem>>, %arg16: memref<2x1x32xf32, #tpu.memory_space<vmem>>, %arg17: memref<2x1x32xf32, #tpu.memory_space<vmem>>, %arg18: memref<1x32xf32, #tpu.memory_space<vmem>>, %arg19: memref<1x32xf32, #tpu.memory_space<vmem>>, %arg20: memref<1x32xf32, #tpu.memory_space<vmem>>, %arg21: memref<1x1xf32, #tpu.memory_space<vmem>>, %arg22: memref<8x32xf32, #tpu.memory_space<vmem>>, %arg23: memref<8x1xf32, #tpu.memory_space<vmem>>) attributes {dimension_semantics = [#tpu.dimension_semantics<arbitrary>], iteration_bounds = array<i64: 1>, scalar_prefetch = 0 : i64, scratch_operands = 0 : i64, tpu.core_type = #tpu.core_type<tc>, window_params = [{pipeline_mode = #tpu.pipeline_mode<synchronous>, transform_indices = @transform_0, window_bounds = array<i64: 64, 32>}, {pipeline_mode = #tpu.pipeline_mode<synchronous>, transform_indices = @transform_1, window_bounds = array<i64: 2, 2, 32, 16>}, {pipeline_mode = #tpu.pipeline_mode<synchronous>, transform_indices = @transform_2, window_bounds = array<i64: 2, 2, 1, 16>}, {pipeline_mode = #tpu.pipeline_mode<synchronous>, transform_indices = @transform_3, window_bounds = array<i64: 2, 2, 32, 16>}, {pipeline_mode = #tpu.pipeline_mode<synchronous>, transform_indices = @transform_4, window_bounds = array<i64: 2, 2, 1, 16>}, {pipeline_mode = #tpu.pipeline_mode<synchronous>, transform_indices = @transform_5, window_bounds = array<i64: 2, 2, 32, 16>}, {pipeline_mode = #tpu.pipeline_mode<synchronous>, transform_indices = @transform_6, window_bounds = array<i64: 2, 2, 1, 16>}, {pipeline_mode = #tpu.pipeline_mode<synchronous>, transform_indices = @transform_7, window_bounds = array<i64: 2, 2, 16, 32>}, {pipeline_mode = #tpu.pipeline_mode<synchronous>, transform_indices = @transform_8, window_bounds = array<i64: 2, 1, 32>}, {pipeline_mode = #tpu.pipeline_mode<synchronous>, transform_indices = @transform_9, window_bounds = array<i64: 2, 32, 2048>}, {pipeline_mode = #tpu.pipeline_mode<synchronous>, transform_indices = @transform_10, window_bounds = array<i64: 2, 1, 2048>}, {pipeline_mode = #tpu.pipeline_mode<synchronous>, transform_indices = @transform_11, window_bounds = array<i64: 2, 2048, 32>}, {pipeline_mode = #tpu.pipeline_mode<synchronous>, transform_indices = @transform_12, window_bounds = array<i64: 2, 1, 32>}, {pipeline_mode = #tpu.pipeline_mode<synchronous>, transform_indices = @transform_13, window_bounds = array<i64: 2, 1, 32>}, {pipeline_mode = #tpu.pipeline_mode<synchronous>, transform_indices = @transform_14, window_bounds = array<i64: 2, 1, 32>}, {pipeline_mode = #tpu.pipeline_mode<synchronous>, transform_indices = @transform_15, window_bounds = array<i64: 2, 1, 32>}, {pipeline_mode = #tpu.pipeline_mode<synchronous>, transform_indices = @transform_16, window_bounds = array<i64: 2, 1, 32>}, {pipeline_mode = #tpu.pipeline_mode<synchronous>, transform_indices = @transform_17, window_bounds = array<i64: 1, 32>}, {pipeline_mode = #tpu.pipeline_mode<synchronous>, transform_indices = @transform_18, window_bounds = array<i64: 1, 32>}, {pipeline_mode = #tpu.pipeline_mode<synchronous>, transform_indices = @transform_19, window_bounds = array<i64: 1, 32>}, {pipeline_mode = #tpu.pipeline_mode<synchronous>, transform_indices = @transform_20, window_bounds = array<i64: 1, 1>}, {pipeline_mode = #tpu.pipeline_mode<synchronous>, transform_indices = @transform_21, window_bounds = array<i64: 8, 32>}, {pipeline_mode = #tpu.pipeline_mode<synchronous>, transform_indices = @transform_22, window_bounds = array<i64: 8, 1>}]} {
    %c0 = arith.constant 0 : index
    %c0_0 = arith.constant 0 : index
    %0 = vector.load %arg1[%c0, %c0_0] : memref<64x32xf32, #tpu.memory_space<vmem>>, vector<64x32xf32>
    %1 = arith.truncf %0 : vector<64x32xf32> to vector<64x32xbf16>
    %c0_1 = arith.constant 0 : index
    %c0_2 = arith.constant 0 : index
    %c0_3 = arith.constant 0 : index
    %2 = vector.load %arg9[%c0_1, %c0_2, %c0_3] : memref<2x1x32xf32, #tpu.memory_space<vmem>>, vector<1x1x32xf32>
    %3 = vector.shape_cast %2 : vector<1x1x32xf32> to vector<1x32xf32>
    %c0_4 = arith.constant 0 : index
    %c0_5 = arith.constant 0 : index
    %c0_6 = arith.constant 0 : index
    %c0_7 = arith.constant 0 : index
    %4 = vector.load %arg2[%c0_4, %c0_5, %c0_6, %c0_7] : memref<2x2x32x16xbf16, #tpu.memory_space<vmem>>, vector<1x1x32x16xbf16>
    %5 = vector.shape_cast %4 : vector<1x1x32x16xbf16> to vector<32x16xbf16>
    %cst = arith.constant dense<0.000000e+00> : vector<64x16xf32>
    %6 = tpu.matmul %1, %5, %cst {dimension_numbers = #tpu.dot_dimension_numbers<[1], [0], [0], [1], [0, 0, 1, 1], [], []>} : vector<64x32xbf16>, vector<32x16xbf16>, vector<64x16xf32> -> vector<64x16xf32>
    %c0_8 = arith.constant 0 : index
    %c0_9 = arith.constant 0 : index
    %c0_10 = arith.constant 0 : index
    %c0_11 = arith.constant 0 : index
    %7 = vector.load %arg3[%c0_8, %c0_9, %c0_10, %c0_11] : memref<2x2x1x16xf32, #tpu.memory_space<vmem>>, vector<1x1x1x16xf32>
    %8 = vector.shape_cast %7 : vector<1x1x1x16xf32> to vector<1x16xf32>
    %9 = vector.broadcast %8 : vector<1x16xf32> to vector<64x16xf32>
    %10 = arith.addf %6, %9 : vector<64x16xf32>
    %c0_12 = arith.constant 0 : index
    %c0_13 = arith.constant 0 : index
    %c0_14 = arith.constant 0 : index
    %c0_15 = arith.constant 0 : index
    %11 = vector.load %arg4[%c0_12, %c0_13, %c0_14, %c0_15] : memref<2x2x32x16xbf16, #tpu.memory_space<vmem>>, vector<1x1x32x16xbf16>
    %12 = vector.shape_cast %11 : vector<1x1x32x16xbf16> to vector<32x16xbf16>
    %cst_16 = arith.constant dense<0.000000e+00> : vector<64x16xf32>
    %13 = tpu.matmul %1, %12, %cst_16 {dimension_numbers = #tpu.dot_dimension_numbers<[1], [0], [0], [1], [0, 0, 1, 1], [], []>} : vector<64x32xbf16>, vector<32x16xbf16>, vector<64x16xf32> -> vector<64x16xf32>
    %c0_17 = arith.constant 0 : index
    %c0_18 = arith.constant 0 : index
    %c0_19 = arith.constant 0 : index
    %c0_20 = arith.constant 0 : index
    %14 = vector.load %arg5[%c0_17, %c0_18, %c0_19, %c0_20] : memref<2x2x1x16xf32, #tpu.memory_space<vmem>>, vector<1x1x1x16xf32>
    %15 = vector.shape_cast %14 : vector<1x1x1x16xf32> to vector<1x16xf32>
    %16 = vector.broadcast %15 : vector<1x16xf32> to vector<64x16xf32>
    %17 = arith.addf %13, %16 : vector<64x16xf32>
    %c0_21 = arith.constant 0 : index
    %c0_22 = arith.constant 0 : index
    %c0_23 = arith.constant 0 : index
    %c0_24 = arith.constant 0 : index
    %18 = vector.load %arg6[%c0_21, %c0_22, %c0_23, %c0_24] : memref<2x2x32x16xbf16, #tpu.memory_space<vmem>>, vector<1x1x32x16xbf16>
    %19 = vector.shape_cast %18 : vector<1x1x32x16xbf16> to vector<32x16xbf16>
    %cst_25 = arith.constant dense<0.000000e+00> : vector<64x16xf32>
    %20 = tpu.matmul %1, %19, %cst_25 {dimension_numbers = #tpu.dot_dimension_numbers<[1], [0], [0], [1], [0, 0, 1, 1], [], []>} : vector<64x32xbf16>, vector<32x16xbf16>, vector<64x16xf32> -> vector<64x16xf32>
    %c0_26 = arith.constant 0 : index
    %c0_27 = arith.constant 0 : index
    %c0_28 = arith.constant 0 : index
    %c0_29 = arith.constant 0 : index
    %21 = vector.load %arg7[%c0_26, %c0_27, %c0_28, %c0_29] : memref<2x2x1x16xf32, #tpu.memory_space<vmem>>, vector<1x1x1x16xf32>
    %22 = vector.shape_cast %21 : vector<1x1x1x16xf32> to vector<1x16xf32>
    %23 = vector.broadcast %22 : vector<1x16xf32> to vector<64x16xf32>
    %24 = arith.addf %20, %23 : vector<64x16xf32>
    %25 = vector.shape_cast %10 : vector<64x16xf32> to vector<8x8x16xf32>
    %26 = arith.truncf %25 : vector<8x8x16xf32> to vector<8x8x16xbf16>
    %27 = vector.shape_cast %17 : vector<64x16xf32> to vector<8x8x16xf32>
    %28 = arith.truncf %27 : vector<8x8x16xf32> to vector<8x8x16xbf16>
    %29 = vector.shape_cast %24 : vector<64x16xf32> to vector<8x8x16xf32>
    %30 = arith.truncf %29 : vector<8x8x16xf32> to vector<8x8x16xbf16>
    "tpu.trace_start"() <{level = 10 : i32, message = "fqd,fkd->fqk"}> : () -> ()
    %cst_30 = arith.constant dense<0.000000e+00> : vector<8x8x8xf32>
    %31 = tpu.matmul %26, %28, %cst_30 {dimension_numbers = #tpu.dot_dimension_numbers<[2], [2], [1], [1], [0, 0, 0, 1, 1, 1], [0], [0]>} : vector<8x8x16xbf16>, vector<8x8x16xbf16>, vector<8x8x8xf32> -> vector<8x8x8xf32>
    "tpu.trace_stop"() : () -> ()
    %cst_31 = arith.constant 2.500000e-01 : f32
    %32 = vector.broadcast %cst_31 : f32 to vector<8x8x8xf32>
    %33 = arith.mulf %31, %32 : vector<8x8x8xf32>
    %cst_32 = arith.constant dense<0xFF800000> : vector<8x8xf32>
    %34 = vector.multi_reduction <maximumf>, %33, %cst_32 [2] : vector<8x8x8xf32> to vector<8x8xf32>
    %35 = vector.shape_cast %34 : vector<8x8xf32> to vector<8x8x1xf32>
    %36 = vector.broadcast %35 : vector<8x8x1xf32> to vector<8x8x8xf32>
    %37 = arith.subf %33, %36 : vector<8x8x8xf32>
    %38 = math.exp %37 : vector<8x8x8xf32>
    %cst_33 = arith.constant dense<0.000000e+00> : vector<8x8xf32>
    %39 = vector.multi_reduction <add>, %38, %cst_33 [2] : vector<8x8x8xf32> to vector<8x8xf32>
    %40 = vector.shape_cast %39 : vector<8x8xf32> to vector<8x8x1xf32>
    %41 = tpu.reciprocal %40 {approx = true} : vector<8x8x1xf32> -> vector<8x8x1xf32>
    %42 = vector.broadcast %41 : vector<8x8x1xf32> to vector<8x8x8xf32>
    %43 = arith.mulf %38, %42 : vector<8x8x8xf32>
    %44 = arith.truncf %43 : vector<8x8x8xf32> to vector<8x8x8xbf16>
    "tpu.trace_start"() <{level = 10 : i32, message = "fqk,fkd->fqd"}> : () -> ()
    %cst_34 = arith.constant dense<0.000000e+00> : vector<8x8x16xf32>
    %45 = tpu.matmul %44, %30, %cst_34 {dimension_numbers = #tpu.dot_dimension_numbers<[2], [1], [1], [2], [0, 0, 0, 1, 1, 2], [0], [0]>} : vector<8x8x8xbf16>, vector<8x8x16xbf16>, vector<8x8x16xf32> -> vector<8x8x16xf32>
    "tpu.trace_stop"() : () -> ()
    %46 = vector.shape_cast %45 : vector<8x8x16xf32> to vector<64x16xf32>
    %47 = arith.truncf %46 : vector<64x16xf32> to vector<64x16xbf16>
    %c0_35 = arith.constant 0 : index
    %c0_36 = arith.constant 0 : index
    %c0_37 = arith.constant 0 : index
    %c0_38 = arith.constant 0 : index
    %48 = vector.load %arg8[%c0_35, %c0_36, %c0_37, %c0_38] : memref<2x2x16x32xbf16, #tpu.memory_space<vmem>>, vector<1x1x16x32xbf16>
    %49 = vector.shape_cast %48 : vector<1x1x16x32xbf16> to vector<16x32xbf16>
    %cst_39 = arith.constant dense<0.000000e+00> : vector<64x32xf32>
    %50 = tpu.matmul %47, %49, %cst_39 {dimension_numbers = #tpu.dot_dimension_numbers<[1], [0], [0], [1], [0, 0, 1, 1], [], []>} : vector<64x16xbf16>, vector<16x32xbf16>, vector<64x32xf32> -> vector<64x32xf32>
    %51 = vector.broadcast %3 : vector<1x32xf32> to vector<64x32xf32>
    %52 = arith.addf %51, %50 : vector<64x32xf32>
    %c0_40 = arith.constant 0 : index
    %c1 = arith.constant 1 : index
    %c0_41 = arith.constant 0 : index
    %c0_42 = arith.constant 0 : index
    %53 = vector.load %arg2[%c0_40, %c1, %c0_41, %c0_42] : memref<2x2x32x16xbf16, #tpu.memory_space<vmem>>, vector<1x1x32x16xbf16>
    %54 = vector.shape_cast %53 : vector<1x1x32x16xbf16> to vector<32x16xbf16>
    %cst_43 = arith.constant dense<0.000000e+00> : vector<64x16xf32>
    %55 = tpu.matmul %1, %54, %cst_43 {dimension_numbers = #tpu.dot_dimension_numbers<[1], [0], [0], [1], [0, 0, 1, 1], [], []>} : vector<64x32xbf16>, vector<32x16xbf16>, vector<64x16xf32> -> vector<64x16xf32>
    %c0_44 = arith.constant 0 : index
    %c1_45 = arith.constant 1 : index
    %c0_46 = arith.constant 0 : index
    %c0_47 = arith.constant 0 : index
    %56 = vector.load %arg3[%c0_44, %c1_45, %c0_46, %c0_47] : memref<2x2x1x16xf32, #tpu.memory_space<vmem>>, vector<1x1x1x16xf32>
    %57 = vector.shape_cast %56 : vector<1x1x1x16xf32> to vector<1x16xf32>
    %58 = vector.broadcast %57 : vector<1x16xf32> to vector<64x16xf32>
    %59 = arith.addf %55, %58 : vector<64x16xf32>
    %c0_48 = arith.constant 0 : index
    %c1_49 = arith.constant 1 : index
    %c0_50 = arith.constant 0 : index
    %c0_51 = arith.constant 0 : index
    %60 = vector.load %arg4[%c0_48, %c1_49, %c0_50, %c0_51] : memref<2x2x32x16xbf16, #tpu.memory_space<vmem>>, vector<1x1x32x16xbf16>
    %61 = vector.shape_cast %60 : vector<1x1x32x16xbf16> to vector<32x16xbf16>
    %cst_52 = arith.constant dense<0.000000e+00> : vector<64x16xf32>
    %62 = tpu.matmul %1, %61, %cst_52 {dimension_numbers = #tpu.dot_dimension_numbers<[1], [0], [0], [1], [0, 0, 1, 1], [], []>} : vector<64x32xbf16>, vector<32x16xbf16>, vector<64x16xf32> -> vector<64x16xf32>
    %c0_53 = arith.constant 0 : index
    %c1_54 = arith.constant 1 : index
    %c0_55 = arith.constant 0 : index
    %c0_56 = arith.constant 0 : index
    %63 = vector.load %arg5[%c0_53, %c1_54, %c0_55, %c0_56] : memref<2x2x1x16xf32, #tpu.memory_space<vmem>>, vector<1x1x1x16xf32>
    %64 = vector.shape_cast %63 : vector<1x1x1x16xf32> to vector<1x16xf32>
    %65 = vector.broadcast %64 : vector<1x16xf32> to vector<64x16xf32>
    %66 = arith.addf %62, %65 : vector<64x16xf32>
    %c0_57 = arith.constant 0 : index
    %c1_58 = arith.constant 1 : index
    %c0_59 = arith.constant 0 : index
    %c0_60 = arith.constant 0 : index
    %67 = vector.load %arg6[%c0_57, %c1_58, %c0_59, %c0_60] : memref<2x2x32x16xbf16, #tpu.memory_space<vmem>>, vector<1x1x32x16xbf16>
    %68 = vector.shape_cast %67 : vector<1x1x32x16xbf16> to vector<32x16xbf16>
    %cst_61 = arith.constant dense<0.000000e+00> : vector<64x16xf32>
    %69 = tpu.matmul %1, %68, %cst_61 {dimension_numbers = #tpu.dot_dimension_numbers<[1], [0], [0], [1], [0, 0, 1, 1], [], []>} : vector<64x32xbf16>, vector<32x16xbf16>, vector<64x16xf32> -> vector<64x16xf32>
    %c0_62 = arith.constant 0 : index
    %c1_63 = arith.constant 1 : index
    %c0_64 = arith.constant 0 : index
    %c0_65 = arith.constant 0 : index
    %70 = vector.load %arg7[%c0_62, %c1_63, %c0_64, %c0_65] : memref<2x2x1x16xf32, #tpu.memory_space<vmem>>, vector<1x1x1x16xf32>
    %71 = vector.shape_cast %70 : vector<1x1x1x16xf32> to vector<1x16xf32>
    %72 = vector.broadcast %71 : vector<1x16xf32> to vector<64x16xf32>
    %73 = arith.addf %69, %72 : vector<64x16xf32>
    %74 = vector.shape_cast %59 : vector<64x16xf32> to vector<8x8x16xf32>
    %75 = arith.truncf %74 : vector<8x8x16xf32> to vector<8x8x16xbf16>
    %76 = vector.shape_cast %66 : vector<64x16xf32> to vector<8x8x16xf32>
    %77 = arith.truncf %76 : vector<8x8x16xf32> to vector<8x8x16xbf16>
    %78 = vector.shape_cast %73 : vector<64x16xf32> to vector<8x8x16xf32>
    %79 = arith.truncf %78 : vector<8x8x16xf32> to vector<8x8x16xbf16>
    "tpu.trace_start"() <{level = 10 : i32, message = "fqd,fkd->fqk"}> : () -> ()
    %cst_66 = arith.constant dense<0.000000e+00> : vector<8x8x8xf32>
    %80 = tpu.matmul %75, %77, %cst_66 {dimension_numbers = #tpu.dot_dimension_numbers<[2], [2], [1], [1], [0, 0, 0, 1, 1, 1], [0], [0]>} : vector<8x8x16xbf16>, vector<8x8x16xbf16>, vector<8x8x8xf32> -> vector<8x8x8xf32>
    "tpu.trace_stop"() : () -> ()
    %cst_67 = arith.constant 2.500000e-01 : f32
    %81 = vector.broadcast %cst_67 : f32 to vector<8x8x8xf32>
    %82 = arith.mulf %80, %81 : vector<8x8x8xf32>
    %cst_68 = arith.constant dense<0xFF800000> : vector<8x8xf32>
    %83 = vector.multi_reduction <maximumf>, %82, %cst_68 [2] : vector<8x8x8xf32> to vector<8x8xf32>
    %84 = vector.shape_cast %83 : vector<8x8xf32> to vector<8x8x1xf32>
    %85 = vector.broadcast %84 : vector<8x8x1xf32> to vector<8x8x8xf32>
    %86 = arith.subf %82, %85 : vector<8x8x8xf32>
    %87 = math.exp %86 : vector<8x8x8xf32>
    %cst_69 = arith.constant dense<0.000000e+00> : vector<8x8xf32>
    %88 = vector.multi_reduction <add>, %87, %cst_69 [2] : vector<8x8x8xf32> to vector<8x8xf32>
    %89 = vector.shape_cast %88 : vector<8x8xf32> to vector<8x8x1xf32>
    %90 = tpu.reciprocal %89 {approx = true} : vector<8x8x1xf32> -> vector<8x8x1xf32>
    %91 = vector.broadcast %90 : vector<8x8x1xf32> to vector<8x8x8xf32>
    %92 = arith.mulf %87, %91 : vector<8x8x8xf32>
    %93 = arith.truncf %92 : vector<8x8x8xf32> to vector<8x8x8xbf16>
    "tpu.trace_start"() <{level = 10 : i32, message = "fqk,fkd->fqd"}> : () -> ()
    %cst_70 = arith.constant dense<0.000000e+00> : vector<8x8x16xf32>
    %94 = tpu.matmul %93, %79, %cst_70 {dimension_numbers = #tpu.dot_dimension_numbers<[2], [1], [1], [2], [0, 0, 0, 1, 1, 2], [0], [0]>} : vector<8x8x8xbf16>, vector<8x8x16xbf16>, vector<8x8x16xf32> -> vector<8x8x16xf32>
    "tpu.trace_stop"() : () -> ()
    %95 = vector.shape_cast %94 : vector<8x8x16xf32> to vector<64x16xf32>
    %96 = arith.truncf %95 : vector<64x16xf32> to vector<64x16xbf16>
    %c0_71 = arith.constant 0 : index
    %c1_72 = arith.constant 1 : index
    %c0_73 = arith.constant 0 : index
    %c0_74 = arith.constant 0 : index
    %97 = vector.load %arg8[%c0_71, %c1_72, %c0_73, %c0_74] : memref<2x2x16x32xbf16, #tpu.memory_space<vmem>>, vector<1x1x16x32xbf16>
    %98 = vector.shape_cast %97 : vector<1x1x16x32xbf16> to vector<16x32xbf16>
    %cst_75 = arith.constant dense<0.000000e+00> : vector<64x32xf32>
    %99 = tpu.matmul %96, %98, %cst_75 {dimension_numbers = #tpu.dot_dimension_numbers<[1], [0], [0], [1], [0, 0, 1, 1], [], []>} : vector<64x16xbf16>, vector<16x32xbf16>, vector<64x32xf32> -> vector<64x32xf32>
    %100 = arith.addf %52, %99 : vector<64x32xf32>
    %101 = arith.addf %0, %100 : vector<64x32xf32>
    %c0_76 = arith.constant 0 : index
    %c0_77 = arith.constant 0 : index
    %c0_78 = arith.constant 0 : index
    %102 = vector.load %arg14[%c0_76, %c0_77, %c0_78] : memref<2x1x32xf32, #tpu.memory_space<vmem>>, vector<1x1x32xf32>
    %103 = vector.shape_cast %102 : vector<1x1x32xf32> to vector<1x32xf32>
    %c0_79 = arith.constant 0 : index
    %c0_80 = arith.constant 0 : index
    %c0_81 = arith.constant 0 : index
    %104 = vector.load %arg15[%c0_79, %c0_80, %c0_81] : memref<2x1x32xf32, #tpu.memory_space<vmem>>, vector<1x1x32xf32>
    %105 = vector.shape_cast %104 : vector<1x1x32xf32> to vector<1x32xf32>
    %cst_82 = arith.constant dense<0.000000e+00> : vector<64xf32>
    %106 = vector.multi_reduction <add>, %101, %cst_82 [1] : vector<64x32xf32> to vector<64xf32>
    %107 = vector.shape_cast %106 : vector<64xf32> to vector<64x1xf32>
    %cst_83 = arith.constant 3.200000e+01 : f32
    %108 = vector.broadcast %cst_83 : f32 to vector<64x1xf32>
    %109 = arith.divf %107, %108 : vector<64x1xf32>
    %110 = vector.broadcast %109 : vector<64x1xf32> to vector<64x32xf32>
    %111 = arith.subf %101, %110 : vector<64x32xf32>
    %112 = arith.mulf %111, %111 : vector<64x32xf32>
    %cst_84 = arith.constant dense<0.000000e+00> : vector<64xf32>
    %113 = vector.multi_reduction <add>, %112, %cst_84 [1] : vector<64x32xf32> to vector<64xf32>
    %114 = vector.shape_cast %113 : vector<64xf32> to vector<64x1xf32>
    %cst_85 = arith.constant 3.200000e+01 : f32
    %115 = vector.broadcast %cst_85 : f32 to vector<64x1xf32>
    %116 = arith.divf %114, %115 : vector<64x1xf32>
    %117 = vector.broadcast %109 : vector<64x1xf32> to vector<64x32xf32>
    %118 = arith.subf %101, %117 : vector<64x32xf32>
    %cst_86 = arith.constant 9.99999974E-6 : f32
    %119 = vector.broadcast %cst_86 : f32 to vector<64x1xf32>
    %120 = arith.addf %116, %119 : vector<64x1xf32>
    %121 = math.rsqrt %120 : vector<64x1xf32>
    %122 = vector.broadcast %121 : vector<64x1xf32> to vector<64x32xf32>
    %123 = arith.mulf %118, %122 : vector<64x32xf32>
    %124 = vector.broadcast %103 : vector<1x32xf32> to vector<64x32xf32>
    %125 = arith.mulf %123, %124 : vector<64x32xf32>
    %126 = vector.broadcast %105 : vector<1x32xf32> to vector<64x32xf32>
    %127 = arith.addf %125, %126 : vector<64x32xf32>
    %128 = arith.truncf %127 : vector<64x32xf32> to vector<64x32xbf16>
    %c0_87 = arith.constant 0 : index
    %c0_88 = arith.constant 0 : index
    %c0_89 = arith.constant 0 : index
    %129 = vector.load %arg10[%c0_87, %c0_88, %c0_89] : memref<2x32x2048xbf16, #tpu.memory_space<vmem>>, vector<1x32x2048xbf16>
    %130 = vector.shape_cast %129 : vector<1x32x2048xbf16> to vector<32x2048xbf16>
    %cst_90 = arith.constant dense<0.000000e+00> : vector<64x2048xf32>
    %131 = tpu.matmul %128, %130, %cst_90 {dimension_numbers = #tpu.dot_dimension_numbers<[1], [0], [0], [1], [0, 0, 1, 1], [], []>} : vector<64x32xbf16>, vector<32x2048xbf16>, vector<64x2048xf32> -> vector<64x2048xf32>
    %c0_91 = arith.constant 0 : index
    %c0_92 = arith.constant 0 : index
    %c0_93 = arith.constant 0 : index
    %132 = vector.load %arg11[%c0_91, %c0_92, %c0_93] : memref<2x1x2048xf32, #tpu.memory_space<vmem>>, vector<1x1x2048xf32>
    %133 = vector.shape_cast %132 : vector<1x1x2048xf32> to vector<1x2048xf32>
    %134 = vector.broadcast %133 : vector<1x2048xf32> to vector<64x2048xf32>
    %135 = arith.addf %131, %134 : vector<64x2048xf32>
    %cst_94 = arith.constant 0.000000e+00 : f32
    %136 = vector.broadcast %cst_94 : f32 to vector<64x2048xf32>
    %137 = arith.maximumf %135, %136 : vector<64x2048xf32>
    %138 = arith.truncf %137 : vector<64x2048xf32> to vector<64x2048xbf16>
    %c0_95 = arith.constant 0 : index
    %c0_96 = arith.constant 0 : index
    %c0_97 = arith.constant 0 : index
    %139 = vector.load %arg12[%c0_95, %c0_96, %c0_97] : memref<2x2048x32xbf16, #tpu.memory_space<vmem>>, vector<1x2048x32xbf16>
    %140 = vector.shape_cast %139 : vector<1x2048x32xbf16> to vector<2048x32xbf16>
    %cst_98 = arith.constant dense<0.000000e+00> : vector<64x32xf32>
    %141 = tpu.matmul %138, %140, %cst_98 {dimension_numbers = #tpu.dot_dimension_numbers<[1], [0], [0], [1], [0, 0, 1, 1], [], []>} : vector<64x2048xbf16>, vector<2048x32xbf16>, vector<64x32xf32> -> vector<64x32xf32>
    %c0_99 = arith.constant 0 : index
    %c0_100 = arith.constant 0 : index
    %c0_101 = arith.constant 0 : index
    %142 = vector.load %arg13[%c0_99, %c0_100, %c0_101] : memref<2x1x32xf32, #tpu.memory_space<vmem>>, vector<1x1x32xf32>
    %143 = vector.shape_cast %142 : vector<1x1x32xf32> to vector<1x32xf32>
    %144 = vector.broadcast %143 : vector<1x32xf32> to vector<64x32xf32>
    %145 = arith.addf %141, %144 : vector<64x32xf32>
    %146 = arith.addf %127, %145 : vector<64x32xf32>
    %c0_102 = arith.constant 0 : index
    %c0_103 = arith.constant 0 : index
    %c0_104 = arith.constant 0 : index
    %147 = vector.load %arg16[%c0_102, %c0_103, %c0_104] : memref<2x1x32xf32, #tpu.memory_space<vmem>>, vector<1x1x32xf32>
    %148 = vector.shape_cast %147 : vector<1x1x32xf32> to vector<1x32xf32>
    %c0_105 = arith.constant 0 : index
    %c0_106 = arith.constant 0 : index
    %c0_107 = arith.constant 0 : index
    %149 = vector.load %arg17[%c0_105, %c0_106, %c0_107] : memref<2x1x32xf32, #tpu.memory_space<vmem>>, vector<1x1x32xf32>
    %150 = vector.shape_cast %149 : vector<1x1x32xf32> to vector<1x32xf32>
    %cst_108 = arith.constant dense<0.000000e+00> : vector<64xf32>
    %151 = vector.multi_reduction <add>, %146, %cst_108 [1] : vector<64x32xf32> to vector<64xf32>
    %152 = vector.shape_cast %151 : vector<64xf32> to vector<64x1xf32>
    %cst_109 = arith.constant 3.200000e+01 : f32
    %153 = vector.broadcast %cst_109 : f32 to vector<64x1xf32>
    %154 = arith.divf %152, %153 : vector<64x1xf32>
    %155 = vector.broadcast %154 : vector<64x1xf32> to vector<64x32xf32>
    %156 = arith.subf %146, %155 : vector<64x32xf32>
    %157 = arith.mulf %156, %156 : vector<64x32xf32>
    %cst_110 = arith.constant dense<0.000000e+00> : vector<64xf32>
    %158 = vector.multi_reduction <add>, %157, %cst_110 [1] : vector<64x32xf32> to vector<64xf32>
    %159 = vector.shape_cast %158 : vector<64xf32> to vector<64x1xf32>
    %cst_111 = arith.constant 3.200000e+01 : f32
    %160 = vector.broadcast %cst_111 : f32 to vector<64x1xf32>
    %161 = arith.divf %159, %160 : vector<64x1xf32>
    %162 = vector.broadcast %154 : vector<64x1xf32> to vector<64x32xf32>
    %163 = arith.subf %146, %162 : vector<64x32xf32>
    %cst_112 = arith.constant 9.99999974E-6 : f32
    %164 = vector.broadcast %cst_112 : f32 to vector<64x1xf32>
    %165 = arith.addf %161, %164 : vector<64x1xf32>
    %166 = math.rsqrt %165 : vector<64x1xf32>
    %167 = vector.broadcast %166 : vector<64x1xf32> to vector<64x32xf32>
    %168 = arith.mulf %163, %167 : vector<64x32xf32>
    %169 = vector.broadcast %148 : vector<1x32xf32> to vector<64x32xf32>
    %170 = arith.mulf %168, %169 : vector<64x32xf32>
    %171 = vector.broadcast %150 : vector<1x32xf32> to vector<64x32xf32>
    %172 = arith.addf %170, %171 : vector<64x32xf32>
    %173 = arith.truncf %172 : vector<64x32xf32> to vector<64x32xbf16>
    %c1_113 = arith.constant 1 : index
    %c0_114 = arith.constant 0 : index
    %c0_115 = arith.constant 0 : index
    %174 = vector.load %arg9[%c1_113, %c0_114, %c0_115] : memref<2x1x32xf32, #tpu.memory_space<vmem>>, vector<1x1x32xf32>
    %175 = vector.shape_cast %174 : vector<1x1x32xf32> to vector<1x32xf32>
    %c1_116 = arith.constant 1 : index
    %c0_117 = arith.constant 0 : index
    %c0_118 = arith.constant 0 : index
    %c0_119 = arith.constant 0 : index
    %176 = vector.load %arg2[%c1_116, %c0_117, %c0_118, %c0_119] : memref<2x2x32x16xbf16, #tpu.memory_space<vmem>>, vector<1x1x32x16xbf16>
    %177 = vector.shape_cast %176 : vector<1x1x32x16xbf16> to vector<32x16xbf16>
    %cst_120 = arith.constant dense<0.000000e+00> : vector<64x16xf32>
    %178 = tpu.matmul %173, %177, %cst_120 {dimension_numbers = #tpu.dot_dimension_numbers<[1], [0], [0], [1], [0, 0, 1, 1], [], []>} : vector<64x32xbf16>, vector<32x16xbf16>, vector<64x16xf32> -> vector<64x16xf32>
    %c1_121 = arith.constant 1 : index
    %c0_122 = arith.constant 0 : index
    %c0_123 = arith.constant 0 : index
    %c0_124 = arith.constant 0 : index
    %179 = vector.load %arg3[%c1_121, %c0_122, %c0_123, %c0_124] : memref<2x2x1x16xf32, #tpu.memory_space<vmem>>, vector<1x1x1x16xf32>
    %180 = vector.shape_cast %179 : vector<1x1x1x16xf32> to vector<1x16xf32>
    %181 = vector.broadcast %180 : vector<1x16xf32> to vector<64x16xf32>
    %182 = arith.addf %178, %181 : vector<64x16xf32>
    %c1_125 = arith.constant 1 : index
    %c0_126 = arith.constant 0 : index
    %c0_127 = arith.constant 0 : index
    %c0_128 = arith.constant 0 : index
    %183 = vector.load %arg4[%c1_125, %c0_126, %c0_127, %c0_128] : memref<2x2x32x16xbf16, #tpu.memory_space<vmem>>, vector<1x1x32x16xbf16>
    %184 = vector.shape_cast %183 : vector<1x1x32x16xbf16> to vector<32x16xbf16>
    %cst_129 = arith.constant dense<0.000000e+00> : vector<64x16xf32>
    %185 = tpu.matmul %173, %184, %cst_129 {dimension_numbers = #tpu.dot_dimension_numbers<[1], [0], [0], [1], [0, 0, 1, 1], [], []>} : vector<64x32xbf16>, vector<32x16xbf16>, vector<64x16xf32> -> vector<64x16xf32>
    %c1_130 = arith.constant 1 : index
    %c0_131 = arith.constant 0 : index
    %c0_132 = arith.constant 0 : index
    %c0_133 = arith.constant 0 : index
    %186 = vector.load %arg5[%c1_130, %c0_131, %c0_132, %c0_133] : memref<2x2x1x16xf32, #tpu.memory_space<vmem>>, vector<1x1x1x16xf32>
    %187 = vector.shape_cast %186 : vector<1x1x1x16xf32> to vector<1x16xf32>
    %188 = vector.broadcast %187 : vector<1x16xf32> to vector<64x16xf32>
    %189 = arith.addf %185, %188 : vector<64x16xf32>
    %c1_134 = arith.constant 1 : index
    %c0_135 = arith.constant 0 : index
    %c0_136 = arith.constant 0 : index
    %c0_137 = arith.constant 0 : index
    %190 = vector.load %arg6[%c1_134, %c0_135, %c0_136, %c0_137] : memref<2x2x32x16xbf16, #tpu.memory_space<vmem>>, vector<1x1x32x16xbf16>
    %191 = vector.shape_cast %190 : vector<1x1x32x16xbf16> to vector<32x16xbf16>
    %cst_138 = arith.constant dense<0.000000e+00> : vector<64x16xf32>
    %192 = tpu.matmul %173, %191, %cst_138 {dimension_numbers = #tpu.dot_dimension_numbers<[1], [0], [0], [1], [0, 0, 1, 1], [], []>} : vector<64x32xbf16>, vector<32x16xbf16>, vector<64x16xf32> -> vector<64x16xf32>
    %c1_139 = arith.constant 1 : index
    %c0_140 = arith.constant 0 : index
    %c0_141 = arith.constant 0 : index
    %c0_142 = arith.constant 0 : index
    %193 = vector.load %arg7[%c1_139, %c0_140, %c0_141, %c0_142] : memref<2x2x1x16xf32, #tpu.memory_space<vmem>>, vector<1x1x1x16xf32>
    %194 = vector.shape_cast %193 : vector<1x1x1x16xf32> to vector<1x16xf32>
    %195 = vector.broadcast %194 : vector<1x16xf32> to vector<64x16xf32>
    %196 = arith.addf %192, %195 : vector<64x16xf32>
    %197 = vector.shape_cast %182 : vector<64x16xf32> to vector<8x8x16xf32>
    %198 = arith.truncf %197 : vector<8x8x16xf32> to vector<8x8x16xbf16>
    %199 = vector.shape_cast %189 : vector<64x16xf32> to vector<8x8x16xf32>
    %200 = arith.truncf %199 : vector<8x8x16xf32> to vector<8x8x16xbf16>
    %201 = vector.shape_cast %196 : vector<64x16xf32> to vector<8x8x16xf32>
    %202 = arith.truncf %201 : vector<8x8x16xf32> to vector<8x8x16xbf16>
    "tpu.trace_start"() <{level = 10 : i32, message = "fqd,fkd->fqk"}> : () -> ()
    %cst_143 = arith.constant dense<0.000000e+00> : vector<8x8x8xf32>
    %203 = tpu.matmul %198, %200, %cst_143 {dimension_numbers = #tpu.dot_dimension_numbers<[2], [2], [1], [1], [0, 0, 0, 1, 1, 1], [0], [0]>} : vector<8x8x16xbf16>, vector<8x8x16xbf16>, vector<8x8x8xf32> -> vector<8x8x8xf32>
    "tpu.trace_stop"() : () -> ()
    %cst_144 = arith.constant 2.500000e-01 : f32
    %204 = vector.broadcast %cst_144 : f32 to vector<8x8x8xf32>
    %205 = arith.mulf %203, %204 : vector<8x8x8xf32>
    %cst_145 = arith.constant dense<0xFF800000> : vector<8x8xf32>
    %206 = vector.multi_reduction <maximumf>, %205, %cst_145 [2] : vector<8x8x8xf32> to vector<8x8xf32>
    %207 = vector.shape_cast %206 : vector<8x8xf32> to vector<8x8x1xf32>
    %208 = vector.broadcast %207 : vector<8x8x1xf32> to vector<8x8x8xf32>
    %209 = arith.subf %205, %208 : vector<8x8x8xf32>
    %210 = math.exp %209 : vector<8x8x8xf32>
    %cst_146 = arith.constant dense<0.000000e+00> : vector<8x8xf32>
    %211 = vector.multi_reduction <add>, %210, %cst_146 [2] : vector<8x8x8xf32> to vector<8x8xf32>
    %212 = vector.shape_cast %211 : vector<8x8xf32> to vector<8x8x1xf32>
    %213 = tpu.reciprocal %212 {approx = true} : vector<8x8x1xf32> -> vector<8x8x1xf32>
    %214 = vector.broadcast %213 : vector<8x8x1xf32> to vector<8x8x8xf32>
    %215 = arith.mulf %210, %214 : vector<8x8x8xf32>
    %216 = arith.truncf %215 : vector<8x8x8xf32> to vector<8x8x8xbf16>
    "tpu.trace_start"() <{level = 10 : i32, message = "fqk,fkd->fqd"}> : () -> ()
    %cst_147 = arith.constant dense<0.000000e+00> : vector<8x8x16xf32>
    %217 = tpu.matmul %216, %202, %cst_147 {dimension_numbers = #tpu.dot_dimension_numbers<[2], [1], [1], [2], [0, 0, 0, 1, 1, 2], [0], [0]>} : vector<8x8x8xbf16>, vector<8x8x16xbf16>, vector<8x8x16xf32> -> vector<8x8x16xf32>
    "tpu.trace_stop"() : () -> ()
    %218 = vector.shape_cast %217 : vector<8x8x16xf32> to vector<64x16xf32>
    %219 = arith.truncf %218 : vector<64x16xf32> to vector<64x16xbf16>
    %c1_148 = arith.constant 1 : index
    %c0_149 = arith.constant 0 : index
    %c0_150 = arith.constant 0 : index
    %c0_151 = arith.constant 0 : index
    %220 = vector.load %arg8[%c1_148, %c0_149, %c0_150, %c0_151] : memref<2x2x16x32xbf16, #tpu.memory_space<vmem>>, vector<1x1x16x32xbf16>
    %221 = vector.shape_cast %220 : vector<1x1x16x32xbf16> to vector<16x32xbf16>
    %cst_152 = arith.constant dense<0.000000e+00> : vector<64x32xf32>
    %222 = tpu.matmul %219, %221, %cst_152 {dimension_numbers = #tpu.dot_dimension_numbers<[1], [0], [0], [1], [0, 0, 1, 1], [], []>} : vector<64x16xbf16>, vector<16x32xbf16>, vector<64x32xf32> -> vector<64x32xf32>
    %223 = vector.broadcast %175 : vector<1x32xf32> to vector<64x32xf32>
    %224 = arith.addf %223, %222 : vector<64x32xf32>
    %c1_153 = arith.constant 1 : index
    %c1_154 = arith.constant 1 : index
    %c0_155 = arith.constant 0 : index
    %c0_156 = arith.constant 0 : index
    %225 = vector.load %arg2[%c1_153, %c1_154, %c0_155, %c0_156] : memref<2x2x32x16xbf16, #tpu.memory_space<vmem>>, vector<1x1x32x16xbf16>
    %226 = vector.shape_cast %225 : vector<1x1x32x16xbf16> to vector<32x16xbf16>
    %cst_157 = arith.constant dense<0.000000e+00> : vector<64x16xf32>
    %227 = tpu.matmul %173, %226, %cst_157 {dimension_numbers = #tpu.dot_dimension_numbers<[1], [0], [0], [1], [0, 0, 1, 1], [], []>} : vector<64x32xbf16>, vector<32x16xbf16>, vector<64x16xf32> -> vector<64x16xf32>
    %c1_158 = arith.constant 1 : index
    %c1_159 = arith.constant 1 : index
    %c0_160 = arith.constant 0 : index
    %c0_161 = arith.constant 0 : index
    %228 = vector.load %arg3[%c1_158, %c1_159, %c0_160, %c0_161] : memref<2x2x1x16xf32, #tpu.memory_space<vmem>>, vector<1x1x1x16xf32>
    %229 = vector.shape_cast %228 : vector<1x1x1x16xf32> to vector<1x16xf32>
    %230 = vector.broadcast %229 : vector<1x16xf32> to vector<64x16xf32>
    %231 = arith.addf %227, %230 : vector<64x16xf32>
    %c1_162 = arith.constant 1 : index
    %c1_163 = arith.constant 1 : index
    %c0_164 = arith.constant 0 : index
    %c0_165 = arith.constant 0 : index
    %232 = vector.load %arg4[%c1_162, %c1_163, %c0_164, %c0_165] : memref<2x2x32x16xbf16, #tpu.memory_space<vmem>>, vector<1x1x32x16xbf16>
    %233 = vector.shape_cast %232 : vector<1x1x32x16xbf16> to vector<32x16xbf16>
    %cst_166 = arith.constant dense<0.000000e+00> : vector<64x16xf32>
    %234 = tpu.matmul %173, %233, %cst_166 {dimension_numbers = #tpu.dot_dimension_numbers<[1], [0], [0], [1], [0, 0, 1, 1], [], []>} : vector<64x32xbf16>, vector<32x16xbf16>, vector<64x16xf32> -> vector<64x16xf32>
    %c1_167 = arith.constant 1 : index
    %c1_168 = arith.constant 1 : index
    %c0_169 = arith.constant 0 : index
    %c0_170 = arith.constant 0 : index
    %235 = vector.load %arg5[%c1_167, %c1_168, %c0_169, %c0_170] : memref<2x2x1x16xf32, #tpu.memory_space<vmem>>, vector<1x1x1x16xf32>
    %236 = vector.shape_cast %235 : vector<1x1x1x16xf32> to vector<1x16xf32>
    %237 = vector.broadcast %236 : vector<1x16xf32> to vector<64x16xf32>
    %238 = arith.addf %234, %237 : vector<64x16xf32>
    %c1_171 = arith.constant 1 : index
    %c1_172 = arith.constant 1 : index
    %c0_173 = arith.constant 0 : index
    %c0_174 = arith.constant 0 : index
    %239 = vector.load %arg6[%c1_171, %c1_172, %c0_173, %c0_174] : memref<2x2x32x16xbf16, #tpu.memory_space<vmem>>, vector<1x1x32x16xbf16>
    %240 = vector.shape_cast %239 : vector<1x1x32x16xbf16> to vector<32x16xbf16>
    %cst_175 = arith.constant dense<0.000000e+00> : vector<64x16xf32>
    %241 = tpu.matmul %173, %240, %cst_175 {dimension_numbers = #tpu.dot_dimension_numbers<[1], [0], [0], [1], [0, 0, 1, 1], [], []>} : vector<64x32xbf16>, vector<32x16xbf16>, vector<64x16xf32> -> vector<64x16xf32>
    %c1_176 = arith.constant 1 : index
    %c1_177 = arith.constant 1 : index
    %c0_178 = arith.constant 0 : index
    %c0_179 = arith.constant 0 : index
    %242 = vector.load %arg7[%c1_176, %c1_177, %c0_178, %c0_179] : memref<2x2x1x16xf32, #tpu.memory_space<vmem>>, vector<1x1x1x16xf32>
    %243 = vector.shape_cast %242 : vector<1x1x1x16xf32> to vector<1x16xf32>
    %244 = vector.broadcast %243 : vector<1x16xf32> to vector<64x16xf32>
    %245 = arith.addf %241, %244 : vector<64x16xf32>
    %246 = vector.shape_cast %231 : vector<64x16xf32> to vector<8x8x16xf32>
    %247 = arith.truncf %246 : vector<8x8x16xf32> to vector<8x8x16xbf16>
    %248 = vector.shape_cast %238 : vector<64x16xf32> to vector<8x8x16xf32>
    %249 = arith.truncf %248 : vector<8x8x16xf32> to vector<8x8x16xbf16>
    %250 = vector.shape_cast %245 : vector<64x16xf32> to vector<8x8x16xf32>
    %251 = arith.truncf %250 : vector<8x8x16xf32> to vector<8x8x16xbf16>
    "tpu.trace_start"() <{level = 10 : i32, message = "fqd,fkd->fqk"}> : () -> ()
    %cst_180 = arith.constant dense<0.000000e+00> : vector<8x8x8xf32>
    %252 = tpu.matmul %247, %249, %cst_180 {dimension_numbers = #tpu.dot_dimension_numbers<[2], [2], [1], [1], [0, 0, 0, 1, 1, 1], [0], [0]>} : vector<8x8x16xbf16>, vector<8x8x16xbf16>, vector<8x8x8xf32> -> vector<8x8x8xf32>
    "tpu.trace_stop"() : () -> ()
    %cst_181 = arith.constant 2.500000e-01 : f32
    %253 = vector.broadcast %cst_181 : f32 to vector<8x8x8xf32>
    %254 = arith.mulf %252, %253 : vector<8x8x8xf32>
    %cst_182 = arith.constant dense<0xFF800000> : vector<8x8xf32>
    %255 = vector.multi_reduction <maximumf>, %254, %cst_182 [2] : vector<8x8x8xf32> to vector<8x8xf32>
    %256 = vector.shape_cast %255 : vector<8x8xf32> to vector<8x8x1xf32>
    %257 = vector.broadcast %256 : vector<8x8x1xf32> to vector<8x8x8xf32>
    %258 = arith.subf %254, %257 : vector<8x8x8xf32>
    %259 = math.exp %258 : vector<8x8x8xf32>
    %cst_183 = arith.constant dense<0.000000e+00> : vector<8x8xf32>
    %260 = vector.multi_reduction <add>, %259, %cst_183 [2] : vector<8x8x8xf32> to vector<8x8xf32>
    %261 = vector.shape_cast %260 : vector<8x8xf32> to vector<8x8x1xf32>
    %262 = tpu.reciprocal %261 {approx = true} : vector<8x8x1xf32> -> vector<8x8x1xf32>
    %263 = vector.broadcast %262 : vector<8x8x1xf32> to vector<8x8x8xf32>
    %264 = arith.mulf %259, %263 : vector<8x8x8xf32>
    %265 = arith.truncf %264 : vector<8x8x8xf32> to vector<8x8x8xbf16>
    "tpu.trace_start"() <{level = 10 : i32, message = "fqk,fkd->fqd"}> : () -> ()
    %cst_184 = arith.constant dense<0.000000e+00> : vector<8x8x16xf32>
    %266 = tpu.matmul %265, %251, %cst_184 {dimension_numbers = #tpu.dot_dimension_numbers<[2], [1], [1], [2], [0, 0, 0, 1, 1, 2], [0], [0]>} : vector<8x8x8xbf16>, vector<8x8x16xbf16>, vector<8x8x16xf32> -> vector<8x8x16xf32>
    "tpu.trace_stop"() : () -> ()
    %267 = vector.shape_cast %266 : vector<8x8x16xf32> to vector<64x16xf32>
    %268 = arith.truncf %267 : vector<64x16xf32> to vector<64x16xbf16>
    %c1_185 = arith.constant 1 : index
    %c1_186 = arith.constant 1 : index
    %c0_187 = arith.constant 0 : index
    %c0_188 = arith.constant 0 : index
    %269 = vector.load %arg8[%c1_185, %c1_186, %c0_187, %c0_188] : memref<2x2x16x32xbf16, #tpu.memory_space<vmem>>, vector<1x1x16x32xbf16>
    %270 = vector.shape_cast %269 : vector<1x1x16x32xbf16> to vector<16x32xbf16>
    %cst_189 = arith.constant dense<0.000000e+00> : vector<64x32xf32>
    %271 = tpu.matmul %268, %270, %cst_189 {dimension_numbers = #tpu.dot_dimension_numbers<[1], [0], [0], [1], [0, 0, 1, 1], [], []>} : vector<64x16xbf16>, vector<16x32xbf16>, vector<64x32xf32> -> vector<64x32xf32>
    %272 = arith.addf %224, %271 : vector<64x32xf32>
    %273 = arith.addf %172, %272 : vector<64x32xf32>
    %c1_190 = arith.constant 1 : index
    %c0_191 = arith.constant 0 : index
    %c0_192 = arith.constant 0 : index
    %274 = vector.load %arg14[%c1_190, %c0_191, %c0_192] : memref<2x1x32xf32, #tpu.memory_space<vmem>>, vector<1x1x32xf32>
    %275 = vector.shape_cast %274 : vector<1x1x32xf32> to vector<1x32xf32>
    %c1_193 = arith.constant 1 : index
    %c0_194 = arith.constant 0 : index
    %c0_195 = arith.constant 0 : index
    %276 = vector.load %arg15[%c1_193, %c0_194, %c0_195] : memref<2x1x32xf32, #tpu.memory_space<vmem>>, vector<1x1x32xf32>
    %277 = vector.shape_cast %276 : vector<1x1x32xf32> to vector<1x32xf32>
    %cst_196 = arith.constant dense<0.000000e+00> : vector<64xf32>
    %278 = vector.multi_reduction <add>, %273, %cst_196 [1] : vector<64x32xf32> to vector<64xf32>
    %279 = vector.shape_cast %278 : vector<64xf32> to vector<64x1xf32>
    %cst_197 = arith.constant 3.200000e+01 : f32
    %280 = vector.broadcast %cst_197 : f32 to vector<64x1xf32>
    %281 = arith.divf %279, %280 : vector<64x1xf32>
    %282 = vector.broadcast %281 : vector<64x1xf32> to vector<64x32xf32>
    %283 = arith.subf %273, %282 : vector<64x32xf32>
    %284 = arith.mulf %283, %283 : vector<64x32xf32>
    %cst_198 = arith.constant dense<0.000000e+00> : vector<64xf32>
    %285 = vector.multi_reduction <add>, %284, %cst_198 [1] : vector<64x32xf32> to vector<64xf32>
    %286 = vector.shape_cast %285 : vector<64xf32> to vector<64x1xf32>
    %cst_199 = arith.constant 3.200000e+01 : f32
    %287 = vector.broadcast %cst_199 : f32 to vector<64x1xf32>
    %288 = arith.divf %286, %287 : vector<64x1xf32>
    %289 = vector.broadcast %281 : vector<64x1xf32> to vector<64x32xf32>
    %290 = arith.subf %273, %289 : vector<64x32xf32>
    %cst_200 = arith.constant 9.99999974E-6 : f32
    %291 = vector.broadcast %cst_200 : f32 to vector<64x1xf32>
    %292 = arith.addf %288, %291 : vector<64x1xf32>
    %293 = math.rsqrt %292 : vector<64x1xf32>
    %294 = vector.broadcast %293 : vector<64x1xf32> to vector<64x32xf32>
    %295 = arith.mulf %290, %294 : vector<64x32xf32>
    %296 = vector.broadcast %275 : vector<1x32xf32> to vector<64x32xf32>
    %297 = arith.mulf %295, %296 : vector<64x32xf32>
    %298 = vector.broadcast %277 : vector<1x32xf32> to vector<64x32xf32>
    %299 = arith.addf %297, %298 : vector<64x32xf32>
    %300 = arith.truncf %299 : vector<64x32xf32> to vector<64x32xbf16>
    %c1_201 = arith.constant 1 : index
    %c0_202 = arith.constant 0 : index
    %c0_203 = arith.constant 0 : index
    %301 = vector.load %arg10[%c1_201, %c0_202, %c0_203] : memref<2x32x2048xbf16, #tpu.memory_space<vmem>>, vector<1x32x2048xbf16>
    %302 = vector.shape_cast %301 : vector<1x32x2048xbf16> to vector<32x2048xbf16>
    %cst_204 = arith.constant dense<0.000000e+00> : vector<64x2048xf32>
    %303 = tpu.matmul %300, %302, %cst_204 {dimension_numbers = #tpu.dot_dimension_numbers<[1], [0], [0], [1], [0, 0, 1, 1], [], []>} : vector<64x32xbf16>, vector<32x2048xbf16>, vector<64x2048xf32> -> vector<64x2048xf32>
    %c1_205 = arith.constant 1 : index
    %c0_206 = arith.constant 0 : index
    %c0_207 = arith.constant 0 : index
    %304 = vector.load %arg11[%c1_205, %c0_206, %c0_207] : memref<2x1x2048xf32, #tpu.memory_space<vmem>>, vector<1x1x2048xf32>
    %305 = vector.shape_cast %304 : vector<1x1x2048xf32> to vector<1x2048xf32>
    %306 = vector.broadcast %305 : vector<1x2048xf32> to vector<64x2048xf32>
    %307 = arith.addf %303, %306 : vector<64x2048xf32>
    %cst_208 = arith.constant 0.000000e+00 : f32
    %308 = vector.broadcast %cst_208 : f32 to vector<64x2048xf32>
    %309 = arith.maximumf %307, %308 : vector<64x2048xf32>
    %310 = arith.truncf %309 : vector<64x2048xf32> to vector<64x2048xbf16>
    %c1_209 = arith.constant 1 : index
    %c0_210 = arith.constant 0 : index
    %c0_211 = arith.constant 0 : index
    %311 = vector.load %arg12[%c1_209, %c0_210, %c0_211] : memref<2x2048x32xbf16, #tpu.memory_space<vmem>>, vector<1x2048x32xbf16>
    %312 = vector.shape_cast %311 : vector<1x2048x32xbf16> to vector<2048x32xbf16>
    %cst_212 = arith.constant dense<0.000000e+00> : vector<64x32xf32>
    %313 = tpu.matmul %310, %312, %cst_212 {dimension_numbers = #tpu.dot_dimension_numbers<[1], [0], [0], [1], [0, 0, 1, 1], [], []>} : vector<64x2048xbf16>, vector<2048x32xbf16>, vector<64x32xf32> -> vector<64x32xf32>
    %c1_213 = arith.constant 1 : index
    %c0_214 = arith.constant 0 : index
    %c0_215 = arith.constant 0 : index
    %314 = vector.load %arg13[%c1_213, %c0_214, %c0_215] : memref<2x1x32xf32, #tpu.memory_space<vmem>>, vector<1x1x32xf32>
    %315 = vector.shape_cast %314 : vector<1x1x32xf32> to vector<1x32xf32>
    %316 = vector.broadcast %315 : vector<1x32xf32> to vector<64x32xf32>
    %317 = arith.addf %313, %316 : vector<64x32xf32>
    %318 = arith.addf %299, %317 : vector<64x32xf32>
    %c1_216 = arith.constant 1 : index
    %c0_217 = arith.constant 0 : index
    %c0_218 = arith.constant 0 : index
    %319 = vector.load %arg16[%c1_216, %c0_217, %c0_218] : memref<2x1x32xf32, #tpu.memory_space<vmem>>, vector<1x1x32xf32>
    %320 = vector.shape_cast %319 : vector<1x1x32xf32> to vector<1x32xf32>
    %c1_219 = arith.constant 1 : index
    %c0_220 = arith.constant 0 : index
    %c0_221 = arith.constant 0 : index
    %321 = vector.load %arg17[%c1_219, %c0_220, %c0_221] : memref<2x1x32xf32, #tpu.memory_space<vmem>>, vector<1x1x32xf32>
    %322 = vector.shape_cast %321 : vector<1x1x32xf32> to vector<1x32xf32>
    %cst_222 = arith.constant dense<0.000000e+00> : vector<64xf32>
    %323 = vector.multi_reduction <add>, %318, %cst_222 [1] : vector<64x32xf32> to vector<64xf32>
    %324 = vector.shape_cast %323 : vector<64xf32> to vector<64x1xf32>
    %cst_223 = arith.constant 3.200000e+01 : f32
    %325 = vector.broadcast %cst_223 : f32 to vector<64x1xf32>
    %326 = arith.divf %324, %325 : vector<64x1xf32>
    %327 = vector.broadcast %326 : vector<64x1xf32> to vector<64x32xf32>
    %328 = arith.subf %318, %327 : vector<64x32xf32>
    %329 = arith.mulf %328, %328 : vector<64x32xf32>
    %cst_224 = arith.constant dense<0.000000e+00> : vector<64xf32>
    %330 = vector.multi_reduction <add>, %329, %cst_224 [1] : vector<64x32xf32> to vector<64xf32>
    %331 = vector.shape_cast %330 : vector<64xf32> to vector<64x1xf32>
    %cst_225 = arith.constant 3.200000e+01 : f32
    %332 = vector.broadcast %cst_225 : f32 to vector<64x1xf32>
    %333 = arith.divf %331, %332 : vector<64x1xf32>
    %334 = vector.broadcast %326 : vector<64x1xf32> to vector<64x32xf32>
    %335 = arith.subf %318, %334 : vector<64x32xf32>
    %cst_226 = arith.constant 9.99999974E-6 : f32
    %336 = vector.broadcast %cst_226 : f32 to vector<64x1xf32>
    %337 = arith.addf %333, %336 : vector<64x1xf32>
    %338 = math.rsqrt %337 : vector<64x1xf32>
    %339 = vector.broadcast %338 : vector<64x1xf32> to vector<64x32xf32>
    %340 = arith.mulf %335, %339 : vector<64x32xf32>
    %341 = vector.broadcast %320 : vector<1x32xf32> to vector<64x32xf32>
    %342 = arith.mulf %340, %341 : vector<64x32xf32>
    %343 = vector.broadcast %322 : vector<1x32xf32> to vector<64x32xf32>
    %344 = arith.addf %342, %343 : vector<64x32xf32>
    %c0_227 = arith.constant 0 : index
    %c0_228 = arith.constant 0 : index
    %345 = vector.load %arg18[%c0_227, %c0_228] : memref<1x32xf32, #tpu.memory_space<vmem>>, vector<1x32xf32>
    %c0_229 = arith.constant 0 : index
    %c0_230 = arith.constant 0 : index
    %346 = vector.load %arg19[%c0_229, %c0_230] : memref<1x32xf32, #tpu.memory_space<vmem>>, vector<1x32xf32>
    %cst_231 = arith.constant dense<0.000000e+00> : vector<64xf32>
    %347 = vector.multi_reduction <add>, %344, %cst_231 [1] : vector<64x32xf32> to vector<64xf32>
    %348 = vector.shape_cast %347 : vector<64xf32> to vector<64x1xf32>
    %cst_232 = arith.constant 3.200000e+01 : f32
    %349 = vector.broadcast %cst_232 : f32 to vector<64x1xf32>
    %350 = arith.divf %348, %349 : vector<64x1xf32>
    %351 = vector.broadcast %350 : vector<64x1xf32> to vector<64x32xf32>
    %352 = arith.subf %344, %351 : vector<64x32xf32>
    %353 = arith.mulf %352, %352 : vector<64x32xf32>
    %cst_233 = arith.constant dense<0.000000e+00> : vector<64xf32>
    %354 = vector.multi_reduction <add>, %353, %cst_233 [1] : vector<64x32xf32> to vector<64xf32>
    %355 = vector.shape_cast %354 : vector<64xf32> to vector<64x1xf32>
    %cst_234 = arith.constant 3.200000e+01 : f32
    %356 = vector.broadcast %cst_234 : f32 to vector<64x1xf32>
    %357 = arith.divf %355, %356 : vector<64x1xf32>
    %358 = vector.broadcast %350 : vector<64x1xf32> to vector<64x32xf32>
    %359 = arith.subf %344, %358 : vector<64x32xf32>
    %cst_235 = arith.constant 9.99999974E-6 : f32
    %360 = vector.broadcast %cst_235 : f32 to vector<64x1xf32>
    %361 = arith.addf %357, %360 : vector<64x1xf32>
    %362 = math.rsqrt %361 : vector<64x1xf32>
    %363 = vector.broadcast %362 : vector<64x1xf32> to vector<64x32xf32>
    %364 = arith.mulf %359, %363 : vector<64x32xf32>
    %365 = vector.broadcast %345 : vector<1x32xf32> to vector<64x32xf32>
    %366 = arith.mulf %364, %365 : vector<64x32xf32>
    %367 = vector.broadcast %346 : vector<1x32xf32> to vector<64x32xf32>
    %368 = arith.addf %366, %367 : vector<64x32xf32>
    %369 = vector.extract_strided_slice %368 {offsets = [0, 0], sizes = [8, 32], strides = [1, 1]} : vector<64x32xf32> to vector<8x32xf32>
    %370 = vector.extract_strided_slice %368 {offsets = [8, 0], sizes = [8, 32], strides = [1, 1]} : vector<64x32xf32> to vector<8x32xf32>
    %371 = arith.addf %369, %370 : vector<8x32xf32>
    %372 = vector.extract_strided_slice %368 {offsets = [16, 0], sizes = [8, 32], strides = [1, 1]} : vector<64x32xf32> to vector<8x32xf32>
    %373 = arith.addf %371, %372 : vector<8x32xf32>
    %374 = vector.extract_strided_slice %368 {offsets = [24, 0], sizes = [8, 32], strides = [1, 1]} : vector<64x32xf32> to vector<8x32xf32>
    %375 = arith.addf %373, %374 : vector<8x32xf32>
    %376 = vector.extract_strided_slice %368 {offsets = [32, 0], sizes = [8, 32], strides = [1, 1]} : vector<64x32xf32> to vector<8x32xf32>
    %377 = arith.addf %375, %376 : vector<8x32xf32>
    %378 = vector.extract_strided_slice %368 {offsets = [40, 0], sizes = [8, 32], strides = [1, 1]} : vector<64x32xf32> to vector<8x32xf32>
    %379 = arith.addf %377, %378 : vector<8x32xf32>
    %380 = vector.extract_strided_slice %368 {offsets = [48, 0], sizes = [8, 32], strides = [1, 1]} : vector<64x32xf32> to vector<8x32xf32>
    %381 = arith.addf %379, %380 : vector<8x32xf32>
    %382 = vector.extract_strided_slice %368 {offsets = [56, 0], sizes = [8, 32], strides = [1, 1]} : vector<64x32xf32> to vector<8x32xf32>
    %383 = arith.addf %381, %382 : vector<8x32xf32>
    %c0_236 = arith.constant 0 : index
    %c0_237 = arith.constant 0 : index
    %384 = vector.load %arg22[%c0_236, %c0_237] : memref<8x32xf32, #tpu.memory_space<vmem>>, vector<8x32xf32>
    tpu.vector_store %arg22[%c0_236, %c0_237], %383 {strides = array<i32>} : memref<8x32xf32, #tpu.memory_space<vmem>>, vector<8x32xf32>,
    %c0_238 = arith.constant 0 : index
    %c0_239 = arith.constant 0 : index
    %385 = vector.load %arg20[%c0_238, %c0_239] : memref<1x32xf32, #tpu.memory_space<vmem>>, vector<1x32xf32>
    %386 = vector.broadcast %385 : vector<1x32xf32> to vector<8x32xf32>
    %387 = arith.mulf %383, %386 : vector<8x32xf32>
    %cst_240 = arith.constant dense<0.000000e+00> : vector<8xf32>
    %388 = vector.multi_reduction <add>, %387, %cst_240 [1] : vector<8x32xf32> to vector<8xf32>
    %389 = vector.shape_cast %388 : vector<8xf32> to vector<8x1xf32>
    %c0_241 = arith.constant 0 : index
    %c0_242 = arith.constant 0 : index
    %390 = vector.load %arg21[%c0_241, %c0_242] : memref<1x1xf32, #tpu.memory_space<vmem>>, vector<1x1xf32>
    %391 = vector.broadcast %390 : vector<1x1xf32> to vector<8x1xf32>
    %392 = arith.addf %389, %391 : vector<8x1xf32>
    %c0_243 = arith.constant 0 : index
    %c0_244 = arith.constant 0 : index
    %393 = vector.load %arg23[%c0_243, %c0_244] : memref<8x1xf32, #tpu.memory_space<vmem>>, vector<8x1xf32>
    tpu.vector_store %arg23[%c0_243, %c0_244], %392 {strides = array<i32>} : memref<8x1xf32, #tpu.memory_space<vmem>>, vector<8x1xf32>,
    return
  }
  func.func @transform_0(%arg0: i32) -> (i32, i32) {
    %c0_i32 = arith.constant 0 : i32
    %c0_i32_0 = arith.constant 0 : i32
    %c0_i32_1 = arith.constant 0 : i32
    return %c0_i32, %c0_i32_0 : i32, i32
  }
  func.func @transform_1(%arg0: i32) -> (i32, i32, i32, i32) {
    %c0_i32 = arith.constant 0 : i32
    %c0_i32_0 = arith.constant 0 : i32
    %c0_i32_1 = arith.constant 0 : i32
    %c0_i32_2 = arith.constant 0 : i32
    %c0_i32_3 = arith.constant 0 : i32
    return %c0_i32, %c0_i32_0, %c0_i32_1, %c0_i32_2 : i32, i32, i32, i32
  }
  func.func @transform_2(%arg0: i32) -> (i32, i32, i32, i32) {
    %c0_i32 = arith.constant 0 : i32
    %c0_i32_0 = arith.constant 0 : i32
    %c0_i32_1 = arith.constant 0 : i32
    %c0_i32_2 = arith.constant 0 : i32
    %c0_i32_3 = arith.constant 0 : i32
    return %c0_i32, %c0_i32_0, %c0_i32_1, %c0_i32_2 : i32, i32, i32, i32
  }
  func.func @transform_3(%arg0: i32) -> (i32, i32, i32, i32) {
    %c0_i32 = arith.constant 0 : i32
    %c0_i32_0 = arith.constant 0 : i32
    %c0_i32_1 = arith.constant 0 : i32
    %c0_i32_2 = arith.constant 0 : i32
    %c0_i32_3 = arith.constant 0 : i32
    return %c0_i32, %c0_i32_0, %c0_i32_1, %c0_i32_2 : i32, i32, i32, i32
  }
  func.func @transform_4(%arg0: i32) -> (i32, i32, i32, i32) {
    %c0_i32 = arith.constant 0 : i32
    %c0_i32_0 = arith.constant 0 : i32
    %c0_i32_1 = arith.constant 0 : i32
    %c0_i32_2 = arith.constant 0 : i32
    %c0_i32_3 = arith.constant 0 : i32
    return %c0_i32, %c0_i32_0, %c0_i32_1, %c0_i32_2 : i32, i32, i32, i32
  }
  func.func @transform_5(%arg0: i32) -> (i32, i32, i32, i32) {
    %c0_i32 = arith.constant 0 : i32
    %c0_i32_0 = arith.constant 0 : i32
    %c0_i32_1 = arith.constant 0 : i32
    %c0_i32_2 = arith.constant 0 : i32
    %c0_i32_3 = arith.constant 0 : i32
    return %c0_i32, %c0_i32_0, %c0_i32_1, %c0_i32_2 : i32, i32, i32, i32
  }
  func.func @transform_6(%arg0: i32) -> (i32, i32, i32, i32) {
    %c0_i32 = arith.constant 0 : i32
    %c0_i32_0 = arith.constant 0 : i32
    %c0_i32_1 = arith.constant 0 : i32
    %c0_i32_2 = arith.constant 0 : i32
    %c0_i32_3 = arith.constant 0 : i32
    return %c0_i32, %c0_i32_0, %c0_i32_1, %c0_i32_2 : i32, i32, i32, i32
  }
  func.func @transform_7(%arg0: i32) -> (i32, i32, i32, i32) {
    %c0_i32 = arith.constant 0 : i32
    %c0_i32_0 = arith.constant 0 : i32
    %c0_i32_1 = arith.constant 0 : i32
    %c0_i32_2 = arith.constant 0 : i32
    %c0_i32_3 = arith.constant 0 : i32
    return %c0_i32, %c0_i32_0, %c0_i32_1, %c0_i32_2 : i32, i32, i32, i32
  }
  func.func @transform_8(%arg0: i32) -> (i32, i32, i32) {
    %c0_i32 = arith.constant 0 : i32
    %c0_i32_0 = arith.constant 0 : i32
    %c0_i32_1 = arith.constant 0 : i32
    %c0_i32_2 = arith.constant 0 : i32
    return %c0_i32, %c0_i32_0, %c0_i32_1 : i32, i32, i32
  }
  func.func @transform_9(%arg0: i32) -> (i32, i32, i32) {
    %c0_i32 = arith.constant 0 : i32
    %c0_i32_0 = arith.constant 0 : i32
    %c0_i32_1 = arith.constant 0 : i32
    %c0_i32_2 = arith.constant 0 : i32
    return %c0_i32, %c0_i32_0, %c0_i32_1 : i32, i32, i32
  }
  func.func @transform_10(%arg0: i32) -> (i32, i32, i32) {
    %c0_i32 = arith.constant 0 : i32
    %c0_i32_0 = arith.constant 0 : i32
    %c0_i32_1 = arith.constant 0 : i32
    %c0_i32_2 = arith.constant 0 : i32
    return %c0_i32, %c0_i32_0, %c0_i32_1 : i32, i32, i32
  }
  func.func @transform_11(%arg0: i32) -> (i32, i32, i32) {
    %c0_i32 = arith.constant 0 : i32
    %c0_i32_0 = arith.constant 0 : i32
    %c0_i32_1 = arith.constant 0 : i32
    %c0_i32_2 = arith.constant 0 : i32
    return %c0_i32, %c0_i32_0, %c0_i32_1 : i32, i32, i32
  }
  func.func @transform_12(%arg0: i32) -> (i32, i32, i32) {
    %c0_i32 = arith.constant 0 : i32
    %c0_i32_0 = arith.constant 0 : i32
    %c0_i32_1 = arith.constant 0 : i32
    %c0_i32_2 = arith.constant 0 : i32
    return %c0_i32, %c0_i32_0, %c0_i32_1 : i32, i32, i32
  }
  func.func @transform_13(%arg0: i32) -> (i32, i32, i32) {
    %c0_i32 = arith.constant 0 : i32
    %c0_i32_0 = arith.constant 0 : i32
    %c0_i32_1 = arith.constant 0 : i32
    %c0_i32_2 = arith.constant 0 : i32
    return %c0_i32, %c0_i32_0, %c0_i32_1 : i32, i32, i32
  }
  func.func @transform_14(%arg0: i32) -> (i32, i32, i32) {
    %c0_i32 = arith.constant 0 : i32
    %c0_i32_0 = arith.constant 0 : i32
    %c0_i32_1 = arith.constant 0 : i32
    %c0_i32_2 = arith.constant 0 : i32
    return %c0_i32, %c0_i32_0, %c0_i32_1 : i32, i32, i32
  }
  func.func @transform_15(%arg0: i32) -> (i32, i32, i32) {
    %c0_i32 = arith.constant 0 : i32
    %c0_i32_0 = arith.constant 0 : i32
    %c0_i32_1 = arith.constant 0 : i32
    %c0_i32_2 = arith.constant 0 : i32
    return %c0_i32, %c0_i32_0, %c0_i32_1 : i32, i32, i32
  }
  func.func @transform_16(%arg0: i32) -> (i32, i32, i32) {
    %c0_i32 = arith.constant 0 : i32
    %c0_i32_0 = arith.constant 0 : i32
    %c0_i32_1 = arith.constant 0 : i32
    %c0_i32_2 = arith.constant 0 : i32
    return %c0_i32, %c0_i32_0, %c0_i32_1 : i32, i32, i32
  }
  func.func @transform_17(%arg0: i32) -> (i32, i32) {
    %c0_i32 = arith.constant 0 : i32
    %c0_i32_0 = arith.constant 0 : i32
    %c0_i32_1 = arith.constant 0 : i32
    return %c0_i32, %c0_i32_0 : i32, i32
  }
  func.func @transform_18(%arg0: i32) -> (i32, i32) {
    %c0_i32 = arith.constant 0 : i32
    %c0_i32_0 = arith.constant 0 : i32
    %c0_i32_1 = arith.constant 0 : i32
    return %c0_i32, %c0_i32_0 : i32, i32
  }
  func.func @transform_19(%arg0: i32) -> (i32, i32) {
    %c0_i32 = arith.constant 0 : i32
    %c0_i32_0 = arith.constant 0 : i32
    %c0_i32_1 = arith.constant 0 : i32
    return %c0_i32, %c0_i32_0 : i32, i32
  }
  func.func @transform_20(%arg0: i32) -> (i32, i32) {
    %c0_i32 = arith.constant 0 : i32
    %c0_i32_0 = arith.constant 0 : i32
    %c0_i32_1 = arith.constant 0 : i32
    return %c0_i32, %c0_i32_0 : i32, i32
  }
  func.func @transform_21(%arg0: i32) -> (i32, i32) {
    %c0_i32 = arith.constant 0 : i32
    %c0_i32_0 = arith.constant 0 : i32
    %c0_i32_1 = arith.constant 0 : i32
    return %c0_i32, %c0_i32_0 : i32, i32
  }
  func.func @transform_22(%arg0: i32) -> (i32, i32) {
    %c0_i32 = arith.constant 0 : i32
    %c0_i32_0 = arith.constant 0 : i32
    %c0_i32_1 = arith.constant 0 : i32
    return %c0_i32, %c0_i32_0 : i32, i32
  }
}

</mosaic_0001>

<bundles_post_ra>
// kernel: tpu_custom_call.1
= control target key start
LH: loop header
LB: loop body
LE: loop exit
PB: predicated region body
PF: predicated region fallthrough
CT: control target
= control target key end

     0   :  { %s17532_s0 = inlined_call_operand.vmem [shape: f32[64,32], index: 0, kind: input, shape index: {}]   ;;  %s17533_s1 = inlined_call_operand.vmem [shape: bf16[2,2,32,16], index: 1, kind: input, shape index: {}]   ;;  %s17534_s2 = inlined_call_operand.vmem [shape: f32[2,2,1,16], index: 2, kind: input, shape index: {}]   ;;  %s17535_s3 = inlined_call_operand.vmem [shape: bf16[2,2,32,16], index: 3, kind: input, shape index: {}]   ;;  %s17536_s4 = inlined_call_operand.vmem [shape: f32[2,2,1,16], index: 4, kind: input, shape index: {}]   ;;  %s17537_s5 = inlined_call_operand.vmem [shape: bf16[2,2,32,16], index: 5, kind: input, shape index: {}]   ;;  %s17538_s6 = inlined_call_operand.vmem [shape: f32[2,2,1,16], index: 6, kind: input, shape index: {}]   ;;  %s17539_s7 = inlined_call_operand.vmem [shape: bf16[2,2,16,32], index: 7, kind: input, shape index: {}]   ;;  %s17540_s8 = inlined_call_operand.vmem [shape: f32[2,1,32], index: 8, kind: input, shape index: {}]   ;;  %s17541_s9 = inlined_call_operand.vmem [shape: bf16[2,32,2048], index: 9, kind: input, shape index: {}]   ;;  %s17542_s10 = inlined_call_operand.vmem [shape: f32[2,1,2048], index: 10, kind: input, shape index: {}]   ;;  %s17543_s11 = inlined_call_operand.vmem [shape: bf16[2,2048,32], index: 11, kind: input, shape index: {}]   ;;  %s17544_s12 = inlined_call_operand.vmem [shape: f32[2,1,32], index: 12, kind: input, shape index: {}]   ;;  %s17545_s13 = inlined_call_operand.vmem [shape: f32[2,1,32], index: 13, kind: input, shape index: {}]   ;;  %s17546_s14 = inlined_call_operand.vmem [shape: f32[2,1,32], index: 14, kind: input, shape index: {}]   ;;  %s17547_s15 = inlined_call_operand.vmem [shape: f32[2,1,32], index: 15, kind: input, shape index: {}]   ;;  %s17548_s16 = inlined_call_operand.vmem [shape: f32[2,1,32], index: 16, kind: input, shape index: {}]   ;;  %s17549_s17 = inlined_call_operand.vmem [shape: f32[1,32], index: 17, kind: input, shape index: {}]   ;;  %s17550_s18 = inlined_call_operand.vmem [shape: f32[1,32], index: 18, kind: input, shape index: {}]   ;;  %s17551_s19 = inlined_call_operand.vmem [shape: f32[1,32], index: 19, kind: input, shape index: {}]   ;;  %s17552_s20 = inlined_call_operand.<no memory space> [shape: f32[1,1], index: 20, kind: input, shape index: {}]   ;;  %s17553_s21 = inlined_call_operand.hbm [shape: f32[8,32], index: 21, kind: output, shape index: {0}]   ;;  %s17554_s22 = inlined_call_operand.vmem [shape: f32[8,1], index: 22, kind: output, shape index: {1}]  }
   0x1   :  { %17594 = sst [smem:[#allocation36_spill]] %s17532_s0  ;;  %v28_v0 = vstv %s17552_s20 }
   0x2   :  { %17595 = sst [smem:[#allocation37_spill]] %s17533_s1  ;;  %29 = vst [vmem:[#allocation2] sm:$0x1] %v28_v0 }
   0x3   :  { %17596 = sst [smem:[#allocation38_spill]] %s17534_s2 }
   0x4   :  { %17597 = sst [smem:[#allocation39_spill]] %s17535_s3 }
   0x5   :  { %17598 = sst [smem:[#allocation40_spill]] %s17536_s4 }
   0x6   :  { %17599 = sst [smem:[#allocation41_spill]] %s17537_s5 }
   0x7   :  { %17600 = sst [smem:[#allocation42_spill]] %s17538_s6 }
   0x8   :  { %s17601_s4 = sld [smem:[#allocation37_spill]]  ;;  %vm110_vm0 = vcmask 261120   ;;  %v17564_v19 = vmov 0.0   ;;  %vm13924_vm1 = vmmov 0  }
   0x9   :  { %s17602_s24 = sld [smem:[#allocation36_spill]] }
   0xa   :  { %s17603_s29 = sld [smem:[#allocation39_spill]] }
   0xb   :  { %s17604_s28 = sld [smem:[#allocation41_spill]] }
   0xe   :  { %v13401_v1 = vld [vmem:[%s17601_s4 + $0x8] sm:$0xff]   ;;  %v13402_v2 = vld [vmem:[%s17601_s4] sm:$0xff]  }
   0xf   :  { %13393 = vmatprep.subr.bf16.mxu1 %v13401_v1  ;;  %v78_v3 = vld [vmem:[%s17602_s24 + $0x20] sm:$0xff]  ;;  %v79_v4 = vld [vmem:[%s17602_s24 + $0x28] sm:$0xff]  ;;  %v80_v5 = vld [vmem:[%s17602_s24 + $0x30] sm:$0xff]  ;;  %12825 = vmatprep.subr.bf16.mxu0 %v13401_v1 }
  0x10   :  { %13395 = vmatpush3.bf16.msra.mxu1 %v13401_v1  ;;  %v14060_v6 = vpack.c.bf16 %v79_v4, %v78_v3  ;;  %v81_v7 = vld [vmem:[%s17602_s24 + $0x38] sm:$0xff]  ;;  %12826 = vmatpush3.bf16.msra.mxu0 %v13401_v1  ;;  %v13403_v8 = vld [vmem:[%s17603_s29 + $0x8] sm:$0xff]   ;;  %v74_v9 = vld [vmem:[%s17602_s24] sm:$0xff] }
  0x11   :  { %13394 = vmatprep.subr.bf16.mxu1 %v13402_v2  ;;  %12827 = vmatprep.subr.bf16.mxu0 %v13402_v2  ;;  %v75_v10 = vld [vmem:[%s17602_s24 + $0x8] sm:$0xff]  ;;  %v14076_v11 = vpack.c.bf16 %v81_v7, %v80_v5  ;;  %v76_v13 = vld [vmem:[%s17602_s24 + $0x10] sm:$0xff]  ;;  %v77_v14 = vld [vmem:[%s17602_s24 + $0x18] sm:$0xff] }
  0x12   :  { %12833 = vmatprep.mubr.msk.bf16.mxu1 %vm110_vm0, %v14060_v6  ;;  %v14078_v12 = vpack.c.bf16 %v75_v10, %v74_v9  ;;  %v13404_v15 = vld [vmem:[%s17603_s29] sm:$0xff]   ;;  %v13405_v16 = vld [vmem:[%s17604_s28 + $0x8] sm:$0xff]   ;;  %v14092_v17 = vpack.c.bf16 %v77_v14, %v76_v13 }
  0x13   :  { %v13406_v18 = vld [vmem:[%s17604_s28] sm:$0xff]  }
  0x14   :  { %13396 = vmatpush3.bf16.msra.mxu1 %v13402_v2  ;;  %12828 = vmatpush3.bf16.msra.mxu0 %v13402_v2 }
  0x15   :  { %12837 = vmatprep.subr.bf16.mxu1 %v13403_v8  ;;  %12829 = vmatprep.mubr.msk.bf16.mxu0 %vm110_vm0, %v14078_v12 }
  0x16   :  { %12849 = vmatprep.subr.bf16.mxu0 %v13405_v16 }
  0x17   :  { %12834 = vmatmul.mubr.msk.bf16.vlgmr.msra.gmra.mxu1 %vm110_vm0, %v14076_v11  ;;  %12830 = vmatmul.mubr.msk.bf16.vlgmr.msra.gmra.mxu0 %vm110_vm0, %v14092_v17 }
  0x18   :  { %12838 = vmatpush3.bf16.msra.mxu1 %v13403_v8  ;;  %12841 = vmatprep.mubr.msk.bf16.mxu1 %vm110_vm0, %v14078_v12 }
  0x19   :  { %12839 = vmatprep.subr.bf16.mxu1 %v13404_v15  ;;  %12850 = vmatpush3.bf16.msra.mxu0 %v13405_v16 }
  0x1a   :  { %12853 = vmatprep.mubr.msk.bf16.mxu0 %vm110_vm0, %v14078_v12  ;;  %12851 = vmatprep.subr.bf16.mxu0 %v13406_v18 }
  0x1c   :  { %12840 = vmatpush3.bf16.msra.mxu1 %v13404_v15 }
  0x1d   :  { %12852 = vmatpush3.bf16.msra.mxu0 %v13406_v18  ;;  %12861 = vmatprep.subr.bf16.mxu1 %v17564_v19 }
  0x1e   :  { %12873 = vmatprep.subr.bf16.mxu0 %v17564_v19 }
  0x1f   :  { %12842 = vmatmul.mubr.msk.bf16.vlgmr.msra.gmra.mxu1 %vm110_vm0, %v14092_v17 }
  0x20   :  { %12845 = vmatprep.mubr.msk.bf16.mxu1 %vm110_vm0, %v14060_v6  ;;  %12854 = vmatmul.mubr.msk.bf16.vlgmr.msra.gmra.mxu0 %vm110_vm0, %v14092_v17 }
  0x21   :  { %12857 = vmatprep.mubr.msk.bf16.mxu0 %vm110_vm0, %v14060_v6 }
  0x27   :  { %12846 = vmatmul.mubr.msk.bf16.gmra.mxu1 %vm110_vm0, %v14076_v11 }
  0x28   :  { %12858 = vmatmul.mubr.msk.bf16.gmra.mxu0 %vm110_vm0, %v14076_v11  ;;  %12863 = vmatprep.mubr.msk.bf16.mxu1 %vm13924_vm1, %v17564_v19 }
  0x29   :  { %12875 = vmatprep.mubr.msk.bf16.mxu0 %vm13924_vm1, %v17564_v19 }
  0x2a   :  { %30 = vsyncpa [#allocation4], 0  ;;  %s17605_s5 = sld [smem:[#allocation40_spill]]  ;;  %vm388_vm2 = vcmask 130048   ;;  %vm865_vm3 = vcmask 1043456   ;;  %vm765_vm4 = vcmask 64512  }
  0x2b   :  { %s17606_s20 = sld [smem:[#allocation38_spill]] }
  0x2c   :  { %s17607_s27 = sld [smem:[#allocation42_spill]] }
  0x30   :  { %v14132_v24 = vld [vmem:[%s17605_s5] ss:$0 sm:$0xff] }
  0x31   :  { %v14139_v31 = vld [vmem:[%s17606_s20] ss:$0 sm:$0xff] }
  0x32   :  { %v14200_v18 = vld [vmem:[%s17607_s27] ss:$0 sm:$0xff] }
  0xd7   :  { %v12835_v20 = vpop.f32.mrf.mxu1  ;;  %v12831_v27 = vpop.f32.mrf.mxu0 }
  0xd8   :  { %v166_v34 = vadd.f32 %v12831_v27, %v14139_v31  ;;  %v182_v1 = vadd.f32 %v12835_v20, %v14139_v31 }
  0xd9   :  { %v173_v21 = vpop.f32.mrf.mxu1  ;;  %v157_v36 = vpop.f32.mrf.mxu0 }
  0xda   :  { %v366_v41 = vpack.c.bf16 %v166_v34, %v166_v34  ;;  %v158_v42 = vadd.f32 %v14139_v31, %v157_v36  ;;  %v174_v55 = vadd.f32 %v14139_v31, %v173_v21  ;;  %v370_v4 = vpack.c.bf16 %v182_v1, %v182_v1 }
  0xdb   :  { %v14125_v22 = vpop.f32.mrf.mxu1  ;;  %v12832_v43 = vpop.f32.mrf.mxu0 }
  0xdc   :  { %v364_v47 = vpack.c.bf16 %v158_v42, %v158_v42  ;;  %v368_v60 = vpack.c.bf16 %v174_v55, %v174_v55  ;;  %v169_v2 = vadd.f32 %v12832_v43, %v14139_v31  ;;  %v185_v15 = vadd.f32 %v14125_v22, %v14139_v31 }
  0xdd   :  { %v14127_v23 = vpop.f32.mrf.mxu1  ;;  %v160_v50 = vpop.f32.mrf.mxu0 }
  0xde   :  { %v161_v56 = vadd.f32 %v14139_v31, %v160_v50  ;;  %v367_v5 = vpack.c.bf16 %v169_v2, %v169_v2  ;;  %v177_v9 = vadd.f32 %v14139_v31, %v14127_v23  ;;  %v371_v16 = vpack.c.bf16 %v185_v15, %v185_v15 }
  0xdf   :  { %v12843_v25 = vpop.f32.mrf.mxu1 }
  0xe0   :  { %v254_v26 = vadd.f32 %v12843_v25, %v14132_v24  ;;  %v365_v61 = vpack.c.bf16 %v161_v56, %v161_v56  ;;  %v369_v13 = vpack.c.bf16 %v177_v9, %v177_v9  ;;  %v12855_v20 = vpop.f32.mrf.mxu0 }
  0xe1   :  { %v245_v28 = vpop.f32.mrf.mxu1  ;;  %v14203_v21 = vadd.f32 %v12855_v20, %v14200_v18 }
  0xe2   :  { %v374_v29 = vpack.c.bf16 %v254_v26, %v254_v26  ;;  %v246_v30 = vadd.f32 %v14132_v24, %v245_v28  ;;  %v333_v23 = vpop.f32.mrf.mxu0 }
  0xe3   :  { %v12844_v32 = vpop.f32.mrf.mxu1  ;;  %v334_v22 = vadd.f32 %v14200_v18, %v333_v23 }
  0xe4   :  { %v485_v33 = vsel %vm388_vm2, %v374_v29, 0  ;;  %v372_v35 = vpack.c.bf16 %v246_v30, %v246_v30  ;;  %v257_v51 = vadd.f32 %v12844_v32, %v14132_v24 }
  0xe5   :  { %v248_v37 = vpop.f32.mrf.mxu1  ;;  %12874 = vmatpush3.bf16.xpose.msra.mxu0 %v485_v33  ;;  %v380_v25 = vpack.c.bf16 %v334_v22, %v334_v22 }
  0xe6   :  { %v393_v38 = vsel %vm388_vm2, %v372_v35, 0  ;;  %v249_v39 = vadd.f32 %v14132_v24, %v248_v37  ;;  %12885 = vmatprep.subr.bf16.mxu0 %v17564_v19  ;;  %v375_v58 = vpack.c.bf16 %v257_v51, %v257_v51 }
  0xe7   :  { %v12847_v40 = vpop.f32.mrf.mxu1  ;;  %12862 = vmatpush3.bf16.xpose.msra.mxu1 %v393_v38  ;;  %v867_v28 = vsel %vm865_vm3, %v380_v25, 0 }
  0xe8   :  { %12867 = vmatprep.subr.bf16.mxu1 %v17564_v19  ;;  %v373_v45 = vpack.c.bf16 %v249_v39, %v249_v39  ;;  %v270_v48 = vadd.f32 %v12847_v40, %v14132_v24  ;;  %v531_v63 = vsel %vm388_vm2, %v375_v58, 0 }
  0xe9   :  { %v261_v44 = vpop.f32.mrf.mxu1 }
  0xea   :  { %v262_v46 = vadd.f32 %v14132_v24, %v261_v44  ;;  %v439_v53 = vsel %vm388_vm2, %v373_v45, 0  ;;  %v378_v57 = vpack.c.bf16 %v270_v48, %v270_v48 }
  0xeb   :  { %v12848_v54 = vpop.f32.mrf.mxu1 }
  0xec   :  { %v376_v49 = vpack.c.bf16 %v262_v46, %v262_v46  ;;  %12876 = vmatmul.mubr.msk.bf16.vlgmr.msra.gmra.mxu0 %vm388_vm2, %v366_v41  ;;  %v669_v62 = vsel %vm388_vm2, %v378_v57, 0  ;;  %v273_v7 = vadd.f32 %v12848_v54, %v14132_v24 }
  0xed   :  { %12887 = vmatprep.mubr.msk.bf16.mxu0 %vm13924_vm1, %v17564_v19  ;;  %v264_v59 = vpop.f32.mrf.mxu1 }
  0xee   :  { %v577_v52 = vsel %vm388_vm2, %v376_v49, 0  ;;  %12864 = vmatmul.mubr.msk.bf16.vlgmr.msra.gmra.mxu1 %vm388_vm2, %v364_v47  ;;  %v265_v0 = vadd.f32 %v14132_v24, %v264_v59  ;;  %v379_v10 = vpack.c.bf16 %v273_v7, %v273_v7  ;;  %v12856_v24 = vpop.f32.mrf.mxu0 }
  0xef   :  { %12868 = vmatpush3.bf16.xpose.msra.mxu1 %v439_v53  ;;  %12886 = vmatpush3.bf16.xpose.msra.mxu0 %v577_v52  ;;  %v14207_v26 = vadd.f32 %v12856_v24, %v14200_v18 }
  0xf0   :  { %12869 = vmatprep.mubr.msk.bf16.mxu1 %vm13924_vm1, %v17564_v19  ;;  %12879 = vmatprep.subr.bf16.mxu1 %v17564_v19  ;;  %v377_v3 = vpack.c.bf16 %v265_v0, %v265_v0  ;;  %v715_v14 = vsel %vm388_vm2, %v379_v10, 0  ;;  %v336_v27 = vpop.f32.mrf.mxu0 }
  0xf1   :  { %12897 = vmatprep.subr.bf16.mxu0 %v17564_v19  ;;  %v337_v32 = vadd.f32 %v14200_v18, %v336_v27 }
  0xf2   :  { %v623_v8 = vsel %vm388_vm2, %v377_v3, 0  ;;  %v12859_v29 = vpop.f32.mrf.mxu0 }
  0xf3   :  { %v14211_v30 = vadd.f32 %v12859_v29, %v14200_v18  ;;  %v381_v36 = vpack.c.bf16 %v337_v32, %v337_v32 }
  0xf4   :  { %v349_v31 = vpop.f32.mrf.mxu0 }
  0xf5   :  { %v14216_v33 = vadd.f32 %v14200_v18, %v349_v31  ;;  %v913_v37 = vsel %vm865_vm3, %v381_v36, 0 }
  0xf6   :  { %12870 = vmatmul.mubr.msk.bf16.vlgmr.msra.gmra.mxu1 %vm388_vm2, %v365_v61  ;;  %12888 = vmatmul.mubr.msk.bf16.vlgmr.msra.gmra.mxu0 %vm388_vm2, %v368_v60  ;;  %v12860_v34 = vpop.f32.mrf.mxu0 }
  0xf7   :  { %12880 = vmatpush3.bf16.xpose.msra.mxu1 %v531_v63  ;;  %12898 = vmatpush3.bf16.xpose.msra.mxu0 %v669_v62  ;;  %v14219_v35 = vadd.f32 %v12860_v34, %v14200_v18 }
  0xf8   :  { %12881 = vmatprep.mubr.msk.bf16.mxu1 %vm13924_vm1, %v17564_v19  ;;  %12899 = vmatprep.mubr.msk.bf16.mxu0 %vm13924_vm1, %v17564_v19  ;;  %v14223_v38 = vpop.f32.mrf.mxu0 }
  0xf9   :  { %12891 = vmatprep.subr.bf16.mxu1 %v17564_v19  ;;  %12909 = vmatprep.subr.bf16.mxu0 %v17564_v19 }
  0xfe   :  { %12882 = vmatmul.mubr.msk.bf16.vlgmr.msra.gmra.mxu1 %vm388_vm2, %v367_v5  ;;  %12900 = vmatmul.mubr.msk.bf16.vlgmr.msra.gmra.mxu0 %vm388_vm2, %v370_v4 }
  0xff   :  { %12892 = vmatpush3.bf16.xpose.msra.mxu1 %v623_v8  ;;  %12893 = vmatprep.mubr.msk.bf16.mxu1 %vm13924_vm1, %v17564_v19 }
 0x100   :  { %12903 = vmatprep.subr.bf16.mxu1 %v17564_v19  ;;  %12911 = vmatprep.mubr.msk.bf16.mxu0 %vm13924_vm1, %v17564_v19 }
 0x101   :  { %12910 = vmatpush3.bf16.msra.mxu0 %v867_v28 }
 0x102   :  { %12921 = vmatprep.subr.bf16.mxu0 %v17564_v19 }
 0x106   :  { %12894 = vmatmul.mubr.msk.bf16.vlgmr.msra.gmra.mxu1 %vm388_vm2, %v369_v13 }
 0x107   :  { %12904 = vmatpush3.bf16.xpose.msra.mxu1 %v715_v14  ;;  %12905 = vmatprep.mubr.msk.bf16.mxu1 %vm13924_vm1, %v17564_v19 }
 0x108   :  { %12915 = vmatprep.subr.bf16.mxu1 %v17564_v19 }
 0x10e   :  { %12906 = vmatmul.mubr.msk.bf16.vlgmr.msra.gmra.mxu1 %vm388_vm2, %v371_v16 }
 0x10f   :  { %12917 = vmatprep.mubr.msk.bf16.mxu1 %vm13924_vm1, %v17564_v19  ;;  %12916 = vmatpush3.bf16.msra.mxu1 %v913_v37 }
 0x110   :  { %12927 = vmatprep.subr.bf16.mxu1 %v17564_v19 }
 0x1ac   :  { %v521_v39 = vpop.f32.mrf.mxu0 }
 0x1ad   :  { %v759_v40 = vmul.f32 0.25, %v521_v39 }
 0x1ae   :  { %v429_v41 = vpop.f32.mrf.mxu1  ;;  %v12877_v42 = vpop.f32.mrf.mxu0 }
 0x1af   :  { %v757_v43 = vmul.f32 0.25, %v429_v41  ;;  %v772_v44 = vsel %vm765_vm4, %v759_v40, -inf }
 0x1b0   :  { %773 = vmax.xlane.f32.xlu1 %v772_v44  ;;  %v12865_v45 = vpop.f32.mrf.mxu1  ;;  %v524_v46 = vpop.f32.mrf.mxu0 }
 0x1b1   :  { %v766_v47 = vsel %vm765_vm4, %v757_v43, -inf }
 0x1b2   :  { %v12878_v48 = vpop.f32.mrf.mxu0  ;;  %767 = vmax.xlane.f32.xlu0 %v766_v47  ;;  %v432_v49 = vpop.f32.mrf.mxu1 }
 0x1b4   :  { %v12866_v50 = vpop.f32.mrf.mxu1 }
 0x1b6   :  { %v475_v51 = vpop.f32.mrf.mxu1  ;;  %v613_v52 = vpop.f32.mrf.mxu0 }
 0x1b7   :  { %v758_v53 = vmul.f32 0.25, %v475_v51  ;;  %v761_v56 = vmul.f32 0.25, %v613_v52 }
 0x1b8   :  { %v12871_v54 = vpop.f32.mrf.mxu1  ;;  %v12889_v55 = vpop.f32.mrf.mxu0 }
 0x1b9   :  { %v769_v57 = vsel %vm765_vm4, %v758_v53, -inf  ;;  %v778_v62 = vsel %vm765_vm4, %v761_v56, -inf }
 0x1ba   :  { %v616_v58 = vpop.f32.mrf.mxu0  ;;  %770 = vmax.xlane.f32.xlu0 %v769_v57  ;;  %v478_v59 = vpop.f32.mrf.mxu1 }
 0x1bc   :  { %v12872_v60 = vpop.f32.mrf.mxu1  ;;  %v12890_v61 = vpop.f32.mrf.mxu0 }
 0x1be   :  { %v705_v63 = vpop.f32.mrf.mxu0  ;;  %779 = vmax.xlane.f32.xlu0 %v778_v62  ;;  %v567_v0 = vpop.f32.mrf.mxu1 }
 0x1bf   :  { %v763_v1 = vmul.f32 0.25, %v705_v63  ;;  %v760_v2 = vmul.f32 0.25, %v567_v0 }
 0x1c0   :  { %v12883_v3 = vpop.f32.mrf.mxu1  ;;  %v12901_v4 = vpop.f32.mrf.mxu0 }
 0x1c1   :  { %v784_v5 = vsel %vm765_vm4, %v763_v1, -inf  ;;  %v775_v7 = vsel %vm765_vm4, %v760_v2, -inf }
 0x1c2   :  { %v708_v8 = vpop.f32.mrf.mxu0  ;;  %785 = vmax.xlane.f32.xlu0 %v784_v5  ;;  %776 = vmax.xlane.f32.xlu1 %v775_v7  ;;  %v570_v9 = vpop.f32.mrf.mxu1 }
 0x1c4   :  { %v12884_v10 = vpop.f32.mrf.mxu1  ;;  %v12902_v13 = vpop.f32.mrf.mxu0 }
 0x1c6   :  { %v659_v14 = vpop.f32.mrf.mxu1 }
 0x1c7   :  { %v762_v15 = vmul.f32 0.25, %v659_v14 }
 0x1c8   :  { %v12895_v16 = vpop.f32.mrf.mxu1 }
 0x1c9   :  { %v781_v20 = vsel %vm765_vm4, %v762_v15, -inf }
 0x1ca   :  { %782 = vmax.xlane.f32.xlu1 %v781_v20  ;;  %v662_v23 = vpop.f32.mrf.mxu1 }
 0x1cc   :  { %v12896_v22 = vpop.f32.mrf.mxu1 }
 0x1cd   :  { %v382_v22 = vpack.c.bf16 %v14203_v21, %v14203_v21  ;;  %v383_v21 = vpack.c.bf16 %v14207_v26, %v14207_v26  ;;  %v353_v26 = vadd.f32 %v14200_v18, %v14223_v38 }
 0x1ce   :  { %v751_v24 = vpop.f32.mrf.mxu1 }
 0x1cf   :  { %v764_v25 = vmul.f32 0.25, %v751_v24 }
 0x1d0   :  { %v12907_v27 = vpop.f32.mrf.mxu1 }
 0x1d1   :  { %v787_v28 = vsel %vm765_vm4, %v764_v25, -inf }
 0x1d2   :  { %788 = vmax.xlane.f32.xlu1 %v787_v28  ;;  %v754_v29 = vpop.f32.mrf.mxu1 }
 0x1d4   :  { %v12908_v31 = vpop.f32.mrf.mxu1 }
 0x1d5   :  { %v959_v31 = vsel %vm865_vm3, %v382_v22, 0 }
 0x239   :  { %v774_v32 = vpop.xlane.xlu1 %773 }
 0x23a   :  { %v792_v34 = vsub.f32 %v759_v40, %v774_v32 }
 0x23b   :  { %v768_v36 = vpop.xlane.xlu0 %767 }
 0x23c   :  { %v790_v37 = vsub.f32 %v757_v43, %v768_v36  ;;  %v802_v39 = vmul.f32 1.442695, %v792_v34  ;;  %v384_v36 = vpack.c.bf16 %v14216_v33, %v14216_v33 }
 0x23e   :  { %v798_v41 = vmul.f32 1.442695, %v790_v37 }
 0x240   :  { %13685 = vpow2.f32 %v798_v41 }
 0x241   :  { %13687 = vpow2.f32 %v802_v39 }
 0x243   :  { %v771_v42 = vpop.xlane.xlu0 %770 }
 0x244   :  { %v791_v44 = vsub.f32 %v758_v53, %v771_v42 }
 0x246   :  { %v800_v45 = vmul.f32 1.442695, %v791_v44 }
 0x247   :  { %v780_v46 = vpop.xlane.xlu0 %779 }
 0x248   :  { %13689 = vpow2.f32 %v800_v45  ;;  %v794_v47 = vsub.f32 %v761_v56, %v780_v46  ;;  %v1005_v45 = vsel %vm865_vm3, %v383_v21, 0  ;;  %v1051_v46 = vsel %vm865_vm3, %v384_v36, 0 }
 0x24a   :  { %v806_v48 = vmul.f32 1.442695, %v794_v47 }
 0x24b   :  { %v786_v49 = vpop.xlane.xlu0 %785  ;;  %v777_v50 = vpop.xlane.xlu1 %776 }
 0x24c   :  { %13691 = vpow2.f32 %v806_v48  ;;  %v796_v51 = vsub.f32 %v763_v1, %v786_v49  ;;  %v793_v52 = vsub.f32 %v760_v2, %v777_v50  ;;  %v386_v48 = vpack.c.bf16 %v14211_v30, %v14211_v30 }
 0x24d   :  { %v13686_v54 = vpop.eup %13685  ;;  %v385_v49 = vpack.c.bf16 %v353_v26, %v353_v26 }
 0x24e   :  { %v810_v40 = vmul.f32 1.442695, %v796_v51  ;;  %v804_v55 = vmul.f32 1.442695, %v793_v52  ;;  %v814_v43 = vsel %vm765_vm4, %v13686_v54, 0.0  ;;  %v13688_v57 = vpop.eup %13687 }
 0x24f   :  { %815 = vadd.xlane.f32.xlu0 %v814_v43  ;;  %v820_v53 = vsel %vm765_vm4, %v13688_v57, 0.0 }
 0x250   :  { %13693 = vpow2.f32 %v810_v40  ;;  %v1097_v40 = vsel %vm865_vm3, %v385_v49, 0  ;;  %v13412_v49 = vld [vmem:[%s17604_s28 + $0x18] sm:$0xff]  }
 0x251   :  { %13695 = vpow2.f32 %v804_v55 }
 0x253   :  { %821 = vadd.xlane.f32.xlu0 %v820_v53  ;;  %v783_v58 = vpop.xlane.xlu1 %782 }
 0x254   :  { %v795_v56 = vsub.f32 %v762_v15, %v783_v58 }
 0x255   :  { %v13690_v59 = vpop.eup %13689 }
 0x256   :  { %v808_v60 = vmul.f32 1.442695, %v795_v56  ;;  %v817_v61 = vsel %vm765_vm4, %v13690_v59, 0.0 }
 0x257   :  { %818 = vadd.xlane.f32.xlu1 %v817_v61 }
 0x258   :  { %13697 = vpow2.f32 %v808_v60 }
 0x259   :  { %v13692_v62 = vpop.eup %13691 }
 0x25a   :  { %v826_v63 = vsel %vm765_vm4, %v13692_v62, 0.0 }
 0x25b   :  { %827 = vadd.xlane.f32.xlu0 %v826_v63  ;;  %v789_v0 = vpop.xlane.xlu1 %788  ;;  %v13409_v63 = vld [vmem:[%s17601_s4 + $0x18] sm:$0xff]  }
 0x25c   :  { %v797_v1 = vsub.f32 %v764_v25, %v789_v0  ;;  %v13411_v0 = vld [vmem:[%s17601_s4 + $0x10] sm:$0xff]  }
 0x25d   :  { %v14237_v2 = vpop.eup %13693 }
 0x25e   :  { %v13696_v3 = vpop.eup %13695  ;;  %v812_v4 = vmul.f32 1.442695, %v797_v1  ;;  %v832_v5 = vsel %vm765_vm4, %v14237_v2, 0.0 }
 0x25f   :  { %833 = vadd.xlane.f32.xlu0 %v832_v5  ;;  %v823_v7 = vsel %vm765_vm4, %v13696_v3, 0.0 }
 0x260   :  { %13699 = vpow2.f32 %v812_v4  ;;  %824 = vadd.xlane.f32.xlu1 %v823_v7 }
 0x265   :  { %v14242_v8 = vpop.eup %13697 }
 0x266   :  { %v829_v9 = vsel %vm765_vm4, %v14242_v8, 0.0 }
 0x267   :  { %830 = vadd.xlane.f32.xlu1 %v829_v9 }
 0x26d   :  { %v14246_v10 = vpop.eup %13699 }
 0x26e   :  { %v835_v13 = vsel %vm765_vm4, %v14246_v10, 0.0 }
 0x26f   :  { %836 = vadd.xlane.f32.xlu1 %v835_v13 }
 0x2d8   :  { %v816_v14 = vpop.xlane.xlu0 %815 }
 0x2d9   :  { %13701 = vrcp.f32 %v816_v14 }
 0x2dc   :  { %v822_v15 = vpop.xlane.xlu0 %821 }
 0x2dd   :  { %13703 = vrcp.f32 %v822_v15 }
 0x2e0   :  { %v819_v16 = vpop.xlane.xlu1 %818 }
 0x2e1   :  { %13705 = vrcp.f32 %v819_v16 }
 0x2e4   :  { %v828_v20 = vpop.xlane.xlu0 %827 }
 0x2e5   :  { %13707 = vrcp.f32 %v828_v20 }
 0x2e6   :  { %v13702_v23 = vpop.eup %13701 }
 0x2e7   :  { %v846_v24 = vmul.f32 %v13702_v23, %v13686_v54  ;;  %v1143_v54 = vsel %vm865_vm3, %v386_v48, 0 }
 0x2e8   :  { %v834_v29 = vpop.xlane.xlu0 %833 }
 0x2e9   :  { %v825_v25 = vpop.xlane.xlu1 %824  ;;  %v854_v27 = vpack.c.bf16 %v846_v24, %v846_v24 }
 0x2ea   :  { %v13704_v28 = vpop.eup %13703  ;;  %13709 = vrcp.f32 %v825_v25  ;;  %v13410_v25 = vld [vmem:[%s17603_s29 + $0x10] sm:$0xff]  }
 0x2eb   :  { %12912 = vmatmul.mubr.msk.bf16.vlgmr.msra.gmra.mxu0 %vm765_vm4, %v854_v27  ;;  %13711 = vrcp.f32 %v834_v29  ;;  %v848_v32 = vmul.f32 %v13704_v28, %v13688_v57  ;;  %v387_v57 = vpack.c.bf16 %v14219_v35, %v14219_v35  ;;  %v13407_v35 = vld [vmem:[%s17539_s7] sm:$0xff]  }
 0x2ec   :  { %12922 = vmatpush3.bf16.msra.mxu0 %v959_v31  ;;  %12923 = vmatprep.mubr.msk.bf16.mxu0 %vm13924_vm1, %v17564_v19 }
 0x2ed   :  { %12933 = vmatprep.subr.bf16.mxu0 %v17564_v19  ;;  %v856_v42 = vpack.c.bf16 %v848_v32, %v848_v32  ;;  %v1189_v56 = vsel %vm865_vm3, %v387_v57, 0 }
 0x2ee   :  { %v13706_v34 = vpop.eup %13705 }
 0x2ef   :  { %v847_v37 = vmul.f32 %v13706_v34, %v13690_v59 }
 0x2f0   :  { %v831_v39 = vpop.xlane.xlu1 %830 }
 0x2f1   :  { %13713 = vrcp.f32 %v831_v39  ;;  %v855_v41 = vpack.c.bf16 %v847_v37, %v847_v37 }
 0x2f2   :  { %v13708_v44 = vpop.eup %13707 }
 0x2f3   :  { %12918 = vmatmul.mubr.msk.bf16.vlgmr.msra.gmra.mxu1 %vm765_vm4, %v855_v41  ;;  %12924 = vmatmul.mubr.msk.bf16.vlgmr.msra.gmra.mxu0 %vm765_vm4, %v856_v42  ;;  %v850_v33 = vmul.f32 %v13708_v44, %v13692_v62  ;;  %v13408_v62 = vld [vmem:[%s17603_s29 + $0x18] sm:$0xff]  }
 0x2f4   :  { %12928 = vmatpush3.bf16.msra.mxu1 %v1005_v45  ;;  %12934 = vmatpush3.bf16.msra.mxu0 %v1051_v46 }
 0x2f5   :  { %12929 = vmatprep.mubr.msk.bf16.mxu1 %vm13924_vm1, %v17564_v19  ;;  %12935 = vmatprep.mubr.msk.bf16.mxu0 %vm13924_vm1, %v17564_v19  ;;  %v858_v38 = vpack.c.bf16 %v850_v33, %v850_v33 }
 0x2f6   :  { %12939 = vmatprep.subr.bf16.mxu1 %v17564_v19  ;;  %12945 = vmatprep.subr.bf16.mxu0 %v17564_v19 }
 0x2f7   :  { %v13710_v47 = vpop.eup %13709 }
 0x2f8   :  { %v837_v50 = vpop.xlane.xlu1 %836  ;;  %v849_v18 = vmul.f32 %v13710_v47, %v13696_v3  ;;  %v13712_v51 = vpop.eup %13711 }
 0x2f9   :  { %13715 = vrcp.f32 %v837_v50  ;;  %v852_v30 = vmul.f32 %v13712_v51, %v14237_v2 }
 0x2fa   :  { %v857_v52 = vpack.c.bf16 %v849_v18, %v849_v18 }
 0x2fb   :  { %12936 = vmatmul.mubr.msk.bf16.vlgmr.msra.gmra.mxu0 %vm765_vm4, %v858_v38  ;;  %v860_v58 = vpack.c.bf16 %v852_v30, %v852_v30  ;;  %v11110_v30 = vld [vmem:[%s17605_s5 + $0x1] ss:$0 sm:$0xff] }
 0x2fc   :  { %12930 = vmatmul.mubr.msk.bf16.vlgmr.msra.gmra.mxu1 %vm765_vm4, %v857_v52  ;;  %12946 = vmatpush3.bf16.msra.mxu0 %v1143_v54 }
 0x2fd   :  { %12940 = vmatpush3.bf16.msra.mxu1 %v1097_v40  ;;  %12941 = vmatprep.mubr.msk.bf16.mxu1 %vm13924_vm1, %v17564_v19 }
 0x2fe   :  { %v13714_v55 = vpop.eup %13713  ;;  %12947 = vmatprep.mubr.msk.bf16.mxu0 %vm13924_vm1, %v17564_v19  ;;  %12951 = vmatprep.subr.bf16.mxu1 %v17564_v19 }
 0x2ff   :  { %v851_v43 = vmul.f32 %v13714_v55, %v14242_v8  ;;  %12957 = vmatprep.subr.bf16.mxu0 %v13407_v35 }
 0x301   :  { %v859_v53 = vpack.c.bf16 %v851_v43, %v851_v43 }
 0x303   :  { %12948 = vmatmul.mubr.msk.bf16.vlgmr.msra.gmra.mxu0 %vm765_vm4, %v860_v58 }
 0x304   :  { %12942 = vmatmul.mubr.msk.bf16.vlgmr.msra.gmra.mxu1 %vm765_vm4, %v859_v53  ;;  %12958 = vmatpush3.bf16.msra.mxu0 %v13407_v35 }
 0x305   :  { %12952 = vmatpush3.bf16.msra.mxu1 %v1189_v56  ;;  %12953 = vmatprep.mubr.msk.bf16.mxu1 %vm13924_vm1, %v17564_v19  ;;  %v14372_v56 = vld [vmem:[%s17606_s20 + $0x1] ss:$0 sm:$0xff] }
 0x306   :  { %v13716_v59 = vpop.eup %13715  ;;  %12979 = vmatprep.subr.bf16.mxu0 %v13408_v62  ;;  %12967 = vmatprep.subr.bf16.mxu1 %v13409_v63 }
 0x307   :  { %v853_v60 = vmul.f32 %v13716_v59, %v14246_v10 }
 0x309   :  { %v861_v61 = vpack.c.bf16 %v853_v60, %v853_v60 }
 0x30c   :  { %12954 = vmatmul.mubr.msk.bf16.vlgmr.msra.gmra.mxu1 %vm765_vm4, %v861_v61 }
 0x30d   :  { %12971 = vmatprep.mubr.msk.bf16.mxu1 %vm110_vm0, %v14078_v12  ;;  %12968 = vmatpush3.bf16.msra.mxu1 %v13409_v63 }
 0x30e   :  { %12969 = vmatprep.subr.bf16.mxu1 %v13411_v0 }
 0x311   :  { %12970 = vmatpush3.bf16.msra.mxu1 %v13411_v0 }
 0x312   :  { %12991 = vmatprep.subr.bf16.mxu1 %v13412_v49 }
 0x314   :  { %12972 = vmatmul.mubr.msk.bf16.vlgmr.msra.gmra.mxu1 %vm110_vm0, %v14092_v17 }
 0x315   :  { %12975 = vmatprep.mubr.msk.bf16.mxu1 %vm110_vm0, %v14060_v6  ;;  %12992 = vmatpush3.bf16.msra.mxu1 %v13412_v49 }
 0x31c   :  { %12976 = vmatmul.mubr.msk.bf16.gmra.mxu1 %vm110_vm0, %v14076_v11 }
 0x31d   :  { %12995 = vmatprep.mubr.msk.bf16.mxu1 %vm110_vm0, %v14078_v12 }
 0x3ab   :  { %v903_v1 = vpop.f32.mrf.mxu0 }
 0x3ad   :  { %v12913_v2 = vpop.f32.mrf.mxu0 }
 0x3af   :  { %v906_v3 = vpop.f32.mrf.mxu0 }
 0x3b1   :  { %v12914_v4 = vpop.f32.mrf.mxu0 }
 0x3b3   :  { %v949_v5 = vpop.f32.mrf.mxu1  ;;  %v995_v7 = vpop.f32.mrf.mxu0 }
 0x3b4   :  { %v1231_v8 = vpack.c.bf16 %v949_v5, %v903_v1 }
 0x3b5   :  { %v12919_v9 = vpop.f32.mrf.mxu1  ;;  %v12925_v10 = vpop.f32.mrf.mxu0 }
 0x3b6   :  { %12959 = vmatprep.mubr.msk.bf16.mxu0 %vm388_vm2, %v1231_v8 }
 0x3b7   :  { %v952_v13 = vpop.f32.mrf.mxu1  ;;  %v998_v14 = vpop.f32.mrf.mxu0 }
 0x3b9   :  { %v12920_v15 = vpop.f32.mrf.mxu1  ;;  %v12926_v16 = vpop.f32.mrf.mxu0 }
 0x3bb   :  { %v1087_v20 = vpop.f32.mrf.mxu0 }
 0x3bc   :  { %v1041_v23 = vpop.f32.mrf.mxu1 }
 0x3bd   :  { %v1232_v22 = vpack.c.bf16 %v1041_v23, %v995_v7  ;;  %v12937_v24 = vpop.f32.mrf.mxu0 }
 0x3be   :  { %v12931_v27 = vpop.f32.mrf.mxu1 }
 0x3bf   :  { %12960 = vmatmul.mubr.msk.bf16.vlgmr.msra.gmra.mxu0 %vm388_vm2, %v1232_v22  ;;  %v1090_v28 = vpop.f32.mrf.mxu0 }
 0x3c0   :  { %v1044_v29 = vpop.f32.mrf.mxu1  ;;  %12980 = vmatpush3.bf16.msra.mxu0 %v13408_v62 }
 0x3c1   :  { %v12938_v31 = vpop.f32.mrf.mxu0  ;;  %12981 = vmatprep.subr.bf16.mxu0 %v13410_v25 }
 0x3c2   :  { %v12932_v32 = vpop.f32.mrf.mxu1 }
 0x3c3   :  { %v1179_v34 = vpop.f32.mrf.mxu0 }
 0x3c4   :  { %v1133_v21 = vpop.f32.mrf.mxu1  ;;  %12982 = vmatpush3.bf16.msra.mxu0 %v13410_v25 }
 0x3c5   :  { %v1233_v36 = vpack.c.bf16 %v1133_v21, %v1087_v20  ;;  %v12949_v37 = vpop.f32.mrf.mxu0  ;;  %13003 = vmatprep.subr.bf16.mxu0 %v17564_v19 }
 0x3c6   :  { %v12943_v39 = vpop.f32.mrf.mxu1 }
 0x3c7   :  { %12963 = vmatprep.mubr.msk.bf16.mxu0 %vm388_vm2, %v1233_v36  ;;  %v1182_v41 = vpop.f32.mrf.mxu0 }
 0x3c8   :  { %v1136_v42 = vpop.f32.mrf.mxu1 }
 0x3c9   :  { %v12950_v44 = vpop.f32.mrf.mxu0 }
 0x3ca   :  { %v12944_v45 = vpop.f32.mrf.mxu1 }
 0x3cc   :  { %v1225_v46 = vpop.f32.mrf.mxu1 }
 0x3cd   :  { %v1234_v26 = vpack.c.bf16 %v1225_v46, %v1179_v34 }
 0x3ce   :  { %v12955_v33 = vpop.f32.mrf.mxu1 }
 0x3cf   :  { %12964 = vmatmul.mubr.msk.bf16.gmra.mxu0 %vm388_vm2, %v1234_v26 }
 0x3d0   :  { %v1228_v47 = vpop.f32.mrf.mxu1  ;;  %12983 = vmatprep.mubr.msk.bf16.mxu0 %vm110_vm0, %v14078_v12  ;;  %v13413_v12 = vld [vmem:[%s17604_s28 + $0x10] sm:$0xff]  }
 0x3d1   :  { %12993 = vmatprep.subr.bf16.mxu1 %v13413_v12 }
 0x3d2   :  { %v12956_v48 = vpop.f32.mrf.mxu1  ;;  %12994 = vmatpush3.bf16.msra.mxu1 %v13413_v12 }
 0x3d3   :  { %13009 = vmatprep.subr.bf16.mxu1 %v17564_v19 }
 0x3d5   :  { %12996 = vmatmul.mubr.msk.bf16.vlgmr.msra.gmra.mxu1 %vm110_vm0, %v14092_v17 }
 0x3d6   :  { %12999 = vmatprep.mubr.msk.bf16.mxu1 %vm110_vm0, %v14060_v6 }
 0x3d7   :  { %12984 = vmatmul.mubr.msk.bf16.vlgmr.msra.gmra.mxu0 %vm110_vm0, %v14092_v17 }
 0x3d8   :  { %12987 = vmatprep.mubr.msk.bf16.mxu0 %vm110_vm0, %v14060_v6 }
 0x3dd   :  { %13000 = vmatmul.mubr.msk.bf16.gmra.mxu1 %vm110_vm0, %v14076_v11 }
 0x3de   :  { %13011 = vmatprep.mubr.msk.bf16.mxu1 %vm13924_vm1, %v17564_v19 }
 0x3df   :  { %12988 = vmatmul.mubr.msk.bf16.gmra.mxu0 %vm110_vm0, %v14076_v11  ;;  %v12973_v11 = vpop.f32.mrf.mxu1 }
 0x3e0   :  { %13005 = vmatprep.mubr.msk.bf16.mxu0 %vm13924_vm1, %v17564_v19  ;;  %v1402_v23 = vadd.f32 %v12973_v11, %v14372_v56 }
 0x3e1   :  { %v1393_v43 = vpop.f32.mrf.mxu1 }
 0x3e2   :  { %v1394_v0 = vadd.f32 %v14372_v56, %v1393_v43  ;;  %v1606_v29 = vpack.c.bf16 %v1402_v23, %v1402_v23 }
 0x3e3   :  { %v12974_v59 = vpop.f32.mrf.mxu1 }
 0x3e4   :  { %v1604_v9 = vpack.c.bf16 %v1394_v0, %v1394_v0  ;;  %v1405_v31 = vadd.f32 %v12974_v59, %v14372_v56 }
 0x3e5   :  { %v1396_v2 = vpop.f32.mrf.mxu1 }
 0x3e6   :  { %v1397_v10 = vadd.f32 %v14372_v56, %v1396_v2  ;;  %v1607_v37 = vpack.c.bf16 %v1405_v31, %v1405_v31 }
 0x3e7   :  { %v12977_v13 = vpop.f32.mrf.mxu1 }
 0x3e8   :  { %v1605_v22 = vpack.c.bf16 %v1397_v10, %v1397_v10  ;;  %v1418_v48 = vadd.f32 %v12977_v13, %v14372_v56 }
 0x3e9   :  { %v1409_v24 = vpop.f32.mrf.mxu1 }
 0x3ea   :  { %v1410_v39 = vadd.f32 %v14372_v56, %v1409_v24  ;;  %v1610_v11 = vpack.c.bf16 %v1418_v48, %v1418_v48 }
 0x3eb   :  { %v12978_v32 = vpop.f32.mrf.mxu1 }
 0x3ec   :  { %v1608_v46 = vpack.c.bf16 %v1410_v39, %v1410_v39 }
 0x3ed   :  { %v1412_v41 = vpop.f32.mrf.mxu1 }
 0x3ee   :  { %v1413_v26 = vadd.f32 %v14372_v56, %v1412_v41 }
 0x3f0   :  { %v1609_v49 = vpack.c.bf16 %v1413_v26, %v1413_v26 }
 0x47f   :  { %v14350_v50 = vpop.f32.mrf.mxu0 }
 0x481   :  { %v14352_v18 = vpop.f32.mrf.mxu0 }
 0x483   :  { %v14354_v38 = vpop.f32.mrf.mxu0 }
 0x485   :  { %v14356_v51 = vpop.f32.mrf.mxu0 }
 0x48f   :  { %v14358_v52 = vpop.f32.mrf.mxu0 }
 0x491   :  { %v14360_v17 = vpop.f32.mrf.mxu0 }
 0x493   :  { %v14362_v54 = vpop.f32.mrf.mxu0 }
 0x495   :  { %v14364_v6 = vpop.f32.mrf.mxu0  ;;  %v12997_v43 = vpop.f32.mrf.mxu1 }
 0x497   :  { %v12985_v40 = vpop.f32.mrf.mxu0 }
 0x498   :  { %v1492_v61 = vadd.f32 %v12985_v40, %v11110_v30  ;;  %v1421_v40 = vadd.f32 %v12978_v32, %v14372_v56 }
 0x499   :  { %v1483_v55 = vpop.f32.mrf.mxu0 }
 0x49a   :  { %v1484_v57 = vadd.f32 %v11110_v30, %v1483_v55  ;;  %v1614_v4 = vpack.c.bf16 %v1492_v61, %v1492_v61  ;;  %v14425_v55 = vld [vmem:[%s17607_s27 + $0x1] ss:$0 sm:$0xff] }
 0x49b   :  { %v12986_v53 = vpop.f32.mrf.mxu0 }
 0x49c   :  { %v1612_v58 = vpack.c.bf16 %v1484_v57, %v1484_v57  ;;  %v1495_v5 = vadd.f32 %v12986_v53, %v11110_v30  ;;  %v1724_v14 = vsel %vm388_vm2, %v1614_v4, 0  ;;  %v14428_v57 = vadd.f32 %v12997_v43, %v14425_v55  ;;  %v1573_v53 = vpop.f32.mrf.mxu1 }
 0x49d   :  { %v1486_v60 = vpop.f32.mrf.mxu0 }
 0x49e   :  { %v1632_v35 = vsel %vm388_vm2, %v1612_v58, 0  ;;  %v1487_v62 = vadd.f32 %v11110_v30, %v1486_v60  ;;  %v1615_v15 = vpack.c.bf16 %v1495_v5, %v1495_v5  ;;  %v1574_v58 = vadd.f32 %v14425_v55, %v1573_v53  ;;  %v12998_v56 = vpop.f32.mrf.mxu1 }
 0x49f   :  { %13004 = vmatpush3.bf16.xpose.msra.mxu0 %v1632_v35  ;;  %v12989_v63 = vpop.f32.mrf.mxu0  ;;  %v14432_v60 = vadd.f32 %v12998_v56, %v14425_v55 }
 0x4a0   :  { %v1613_v1 = vpack.c.bf16 %v1487_v62, %v1487_v62  ;;  %13015 = vmatprep.subr.bf16.mxu0 %v17564_v19  ;;  %v1770_v25 = vsel %vm388_vm2, %v1615_v15, 0  ;;  %v1508_v34 = vadd.f32 %v12989_v63, %v11110_v30  ;;  %v1620_v59 = vpack.c.bf16 %v1574_v58, %v1574_v58  ;;  %v1576_v61 = vpop.f32.mrf.mxu1 }
 0x4a1   :  { %v1499_v3 = vpop.f32.mrf.mxu0  ;;  %v1577_v62 = vadd.f32 %v14425_v55, %v1576_v61 }
 0x4a2   :  { %v1678_v7 = vsel %vm388_vm2, %v1613_v1, 0  ;;  %v1500_v16 = vadd.f32 %v11110_v30, %v1499_v3  ;;  %v1618_v42 = vpack.c.bf16 %v1508_v34, %v1508_v34  ;;  %v2104_v35 = vsel %vm865_vm3, %v1620_v59, 0  ;;  %v13001_v63 = vpop.f32.mrf.mxu1 }
 0x4a3   :  { %13010 = vmatpush3.bf16.xpose.msra.mxu1 %v1678_v7  ;;  %v12990_v8 = vpop.f32.mrf.mxu0  ;;  %v1621_v0 = vpack.c.bf16 %v1577_v62, %v1577_v62  ;;  %v14437_v1 = vadd.f32 %v13001_v63, %v14425_v55 }
 0x4a4   :  { %13021 = vmatprep.subr.bf16.mxu1 %v17564_v19  ;;  %v1616_v27 = vpack.c.bf16 %v1500_v16, %v1500_v16  ;;  %v1511_v44 = vadd.f32 %v12990_v8, %v11110_v30  ;;  %v1908_v33 = vsel %vm388_vm2, %v1618_v42, 0  ;;  %v1589_v2 = vpop.f32.mrf.mxu1 }
 0x4a5   :  { %v1502_v20 = vpop.f32.mrf.mxu0  ;;  %v14441_v3 = vadd.f32 %v14425_v55, %v1589_v2  ;;  %v2150_v4 = vsel %vm865_vm3, %v1621_v0, 0 }
 0x4a6   :  { %13006 = vmatmul.mubr.msk.bf16.vlgmr.msra.gmra.mxu0 %vm388_vm2, %v1604_v9  ;;  %v1503_v28 = vadd.f32 %v11110_v30, %v1502_v20  ;;  %v1816_v21 = vsel %vm388_vm2, %v1616_v27, 0  ;;  %v1619_v47 = vpack.c.bf16 %v1511_v44, %v1511_v44  ;;  %v1611_v30 = vpack.c.bf16 %v1421_v40, %v1421_v40  ;;  %v13002_v5 = vpop.f32.mrf.mxu1 }
 0x4a7   :  { %13016 = vmatpush3.bf16.xpose.msra.mxu0 %v1724_v14  ;;  %13017 = vmatprep.mubr.msk.bf16.mxu0 %vm13924_vm1, %v17564_v19  ;;  %v14445_v7 = vadd.f32 %v13002_v5, %v14425_v55 }
 0x4a8   :  { %13027 = vmatprep.subr.bf16.mxu0 %v17564_v19  ;;  %v1617_v36 = vpack.c.bf16 %v1503_v28, %v1503_v28  ;;  %v1954_v12 = vsel %vm388_vm2, %v1619_v47, 0  ;;  %v14448_v10 = vpop.f32.mrf.mxu1 }
 0x4aa   :  { %13012 = vmatmul.mubr.msk.bf16.vlgmr.msra.gmra.mxu1 %vm388_vm2, %v1605_v22  ;;  %v1862_v45 = vsel %vm388_vm2, %v1617_v36, 0 }
 0x4ab   :  { %13022 = vmatpush3.bf16.xpose.msra.mxu1 %v1770_v25  ;;  %13023 = vmatprep.mubr.msk.bf16.mxu1 %vm13924_vm1, %v17564_v19 }
 0x4ac   :  { %13033 = vmatprep.subr.bf16.mxu1 %v17564_v19 }
 0x4ae   :  { %13018 = vmatmul.mubr.msk.bf16.vlgmr.msra.gmra.mxu0 %vm388_vm2, %v1606_v29 }
 0x4af   :  { %13028 = vmatpush3.bf16.xpose.msra.mxu0 %v1816_v21  ;;  %13029 = vmatprep.mubr.msk.bf16.mxu0 %vm13924_vm1, %v17564_v19 }
 0x4b0   :  { %13039 = vmatprep.subr.bf16.mxu0 %v17564_v19 }
 0x4b2   :  { %13024 = vmatmul.mubr.msk.bf16.vlgmr.msra.gmra.mxu1 %vm388_vm2, %v1607_v37 }
 0x4b3   :  { %13034 = vmatpush3.bf16.xpose.msra.mxu1 %v1862_v45  ;;  %13035 = vmatprep.mubr.msk.bf16.mxu1 %vm13924_vm1, %v17564_v19 }
 0x4b4   :  { %13045 = vmatprep.subr.bf16.mxu1 %v17564_v19 }
 0x4b6   :  { %13030 = vmatmul.mubr.msk.bf16.vlgmr.msra.gmra.mxu0 %vm388_vm2, %v1608_v46 }
 0x4b7   :  { %13040 = vmatpush3.bf16.xpose.msra.mxu0 %v1908_v33  ;;  %13041 = vmatprep.mubr.msk.bf16.mxu0 %vm13924_vm1, %v17564_v19 }
 0x4b8   :  { %13051 = vmatprep.subr.bf16.mxu0 %v17564_v19 }
 0x4ba   :  { %13036 = vmatmul.mubr.msk.bf16.vlgmr.msra.gmra.mxu1 %vm388_vm2, %v1609_v49 }
 0x4bb   :  { %13046 = vmatpush3.bf16.xpose.msra.mxu1 %v1954_v12  ;;  %13047 = vmatprep.mubr.msk.bf16.mxu1 %vm13924_vm1, %v17564_v19 }
 0x4bc   :  { %13057 = vmatprep.subr.bf16.mxu1 %v17564_v19 }
 0x4be   :  { %13042 = vmatmul.mubr.msk.bf16.vlgmr.msra.gmra.mxu0 %vm388_vm2, %v1610_v11 }
 0x4bf   :  { %13053 = vmatprep.mubr.msk.bf16.mxu0 %vm13924_vm1, %v17564_v19  ;;  %13052 = vmatpush3.bf16.msra.mxu0 %v2104_v35 }
 0x4c0   :  { %13063 = vmatprep.subr.bf16.mxu0 %v17564_v19 }
 0x4c2   :  { %13048 = vmatmul.mubr.msk.bf16.vlgmr.msra.gmra.mxu1 %vm388_vm2, %v1611_v30 }
 0x4c3   :  { %13059 = vmatprep.mubr.msk.bf16.mxu1 %vm13924_vm1, %v17564_v19  ;;  %13058 = vmatpush3.bf16.msra.mxu1 %v2150_v4 }
 0x4c4   :  { %13069 = vmatprep.subr.bf16.mxu1 %v17564_v19 }
 0x566   :  { %v1668_v8 = vpop.f32.mrf.mxu0 }
 0x567   :  { %v1996_v9 = vmul.f32 0.25, %v1668_v8 }
 0x568   :  { %v13007_v13 = vpop.f32.mrf.mxu0 }
 0x569   :  { %v2004_v14 = vsel %vm765_vm4, %v1996_v9, -inf }
 0x56a   :  { %v1714_v15 = vpop.f32.mrf.mxu1  ;;  %2005 = vmax.xlane.f32.xlu0 %v2004_v14  ;;  %v1671_v16 = vpop.f32.mrf.mxu0 }
 0x56b   :  { %v1997_v20 = vmul.f32 0.25, %v1714_v15 }
 0x56c   :  { %v13008_v23 = vpop.f32.mrf.mxu0  ;;  %v13013_v22 = vpop.f32.mrf.mxu1 }
 0x56d   :  { %v2007_v24 = vsel %vm765_vm4, %v1997_v20, -inf }
 0x56e   :  { %2008 = vmax.xlane.f32.xlu1 %v2007_v24  ;;  %v1717_v25 = vpop.f32.mrf.mxu1  ;;  %v1760_v27 = vpop.f32.mrf.mxu0 }
 0x56f   :  { %v1998_v28 = vmul.f32 0.25, %v1760_v27 }
 0x570   :  { %v13014_v29 = vpop.f32.mrf.mxu1  ;;  %v13019_v31 = vpop.f32.mrf.mxu0 }
 0x571   :  { %v2010_v32 = vsel %vm765_vm4, %v1998_v28, -inf }
 0x572   :  { %v1806_v34 = vpop.f32.mrf.mxu1  ;;  %2011 = vmax.xlane.f32.xlu0 %v2010_v32  ;;  %v1763_v21 = vpop.f32.mrf.mxu0 }
 0x573   :  { %v1999_v36 = vmul.f32 0.25, %v1806_v34 }
 0x574   :  { %v13020_v37 = vpop.f32.mrf.mxu0  ;;  %v13025_v39 = vpop.f32.mrf.mxu1 }
 0x575   :  { %v2013_v41 = vsel %vm765_vm4, %v1999_v36, -inf }
 0x576   :  { %2014 = vmax.xlane.f32.xlu1 %v2013_v41  ;;  %v1809_v42 = vpop.f32.mrf.mxu1  ;;  %v1852_v44 = vpop.f32.mrf.mxu0 }
 0x577   :  { %v2000_v45 = vmul.f32 0.25, %v1852_v44 }
 0x578   :  { %v13026_v46 = vpop.f32.mrf.mxu1  ;;  %v13031_v26 = vpop.f32.mrf.mxu0 }
 0x579   :  { %v2016_v33 = vsel %vm765_vm4, %v2000_v45, -inf }
 0x57a   :  { %v1898_v47 = vpop.f32.mrf.mxu1  ;;  %2017 = vmax.xlane.f32.xlu0 %v2016_v33  ;;  %v1855_v48 = vpop.f32.mrf.mxu0 }
 0x57b   :  { %v2001_v49 = vmul.f32 0.25, %v1898_v47 }
 0x57c   :  { %v13032_v12 = vpop.f32.mrf.mxu0  ;;  %v13037_v11 = vpop.f32.mrf.mxu1 }
 0x57d   :  { %v2019_v40 = vsel %vm765_vm4, %v2001_v49, -inf }
 0x57e   :  { %2020 = vmax.xlane.f32.xlu1 %v2019_v40  ;;  %v1901_v30 = vpop.f32.mrf.mxu1  ;;  %v1944_v43 = vpop.f32.mrf.mxu0 }
 0x57f   :  { %v2002_v53 = vmul.f32 0.25, %v1944_v43 }
 0x580   :  { %v13038_v58 = vpop.f32.mrf.mxu1  ;;  %v13043_v56 = vpop.f32.mrf.mxu0 }
 0x581   :  { %v2022_v59 = vsel %vm765_vm4, %v2002_v53, -inf }
 0x582   :  { %v1990_v61 = vpop.f32.mrf.mxu1  ;;  %2023 = vmax.xlane.f32.xlu0 %v2022_v59  ;;  %v1947_v35 = vpop.f32.mrf.mxu0 }
 0x583   :  { %v2003_v62 = vmul.f32 0.25, %v1990_v61 }
 0x584   :  { %v13044_v63 = vpop.f32.mrf.mxu0  ;;  %v13049_v0 = vpop.f32.mrf.mxu1 }
 0x585   :  { %v2025_v2 = vsel %vm765_vm4, %v2003_v62, -inf }
 0x586   :  { %2026 = vmax.xlane.f32.xlu1 %v2025_v2  ;;  %v1993_v4 = vpop.f32.mrf.mxu1  ;;  %v1622_v2 = vpack.c.bf16 %v14428_v57, %v14428_v57 }
 0x588   :  { %v13050_v5 = vpop.f32.mrf.mxu1 }
 0x5f3   :  { %v2006_v8 = vpop.xlane.xlu0 %2005 }
 0x5f4   :  { %v2028_v13 = vsub.f32 %v1996_v9, %v2006_v8 }
 0x5f6   :  { %v2036_v14 = vmul.f32 1.442695, %v2028_v13 }
 0x5f7   :  { %v2009_v15 = vpop.xlane.xlu1 %2008 }
 0x5f8   :  { %13717 = vpow2.f32 %v2036_v14  ;;  %v2029_v16 = vsub.f32 %v1997_v20, %v2009_v15  ;;  %v2196_v14 = vsel %vm865_vm3, %v1622_v2, 0  ;;  %v1623_v15 = vpack.c.bf16 %v14432_v60, %v14432_v60 }
 0x5f9   :  { %v1593_v60 = vadd.f32 %v14425_v55, %v14448_v10 }
 0x5fa   :  { %v2038_v23 = vmul.f32 1.442695, %v2029_v16 }
 0x5fb   :  { %v2012_v22 = vpop.xlane.xlu0 %2011 }
 0x5fc   :  { %13719 = vpow2.f32 %v2038_v23  ;;  %v2030_v24 = vsub.f32 %v1998_v28, %v2012_v22 }
 0x5fe   :  { %v2040_v25 = vmul.f32 1.442695, %v2030_v24  ;;  %v2242_v24 = vsel %vm865_vm3, %v1623_v15, 0 }
 0x5ff   :  { %v2015_v27 = vpop.xlane.xlu1 %2014 }
 0x600   :  { %13721 = vpow2.f32 %v2040_v25  ;;  %v2031_v29 = vsub.f32 %v1999_v36, %v2015_v27  ;;  %v1624_v25 = vpack.c.bf16 %v14441_v3, %v14441_v3 }
 0x602   :  { %v2042_v31 = vmul.f32 1.442695, %v2031_v29 }
 0x603   :  { %v2018_v32 = vpop.xlane.xlu0 %2017 }
 0x604   :  { %13723 = vpow2.f32 %v2042_v31  ;;  %v2032_v34 = vsub.f32 %v2000_v45, %v2018_v32 }
 0x605   :  { %v13718_v21 = vpop.eup %13717 }
 0x606   :  { %v2044_v37 = vmul.f32 1.442695, %v2032_v34  ;;  %v2052_v9 = vsel %vm765_vm4, %v13718_v21, 0.0  ;;  %v2288_v34 = vsel %vm865_vm3, %v1624_v25, 0 }
 0x607   :  { %v2021_v39 = vpop.xlane.xlu1 %2020  ;;  %2053 = vadd.xlane.f32.xlu0 %v2052_v9  ;;  %v1626_v9 = vpack.c.bf16 %v14437_v1, %v14437_v1 }
 0x608   :  { %13725 = vpow2.f32 %v2044_v37  ;;  %v2033_v20 = vsub.f32 %v2001_v49, %v2021_v39 }
 0x609   :  { %v13720_v41 = vpop.eup %13719 }
 0x60a   :  { %v2046_v42 = vmul.f32 1.442695, %v2033_v20  ;;  %v2055_v28 = vsel %vm765_vm4, %v13720_v41, 0.0 }
 0x60b   :  { %2056 = vadd.xlane.f32.xlu1 %v2055_v28  ;;  %v2024_v44 = vpop.xlane.xlu0 %2023  ;;  %v2380_v28 = vsel %vm865_vm3, %v1626_v9, 0 }
 0x60c   :  { %13727 = vpow2.f32 %v2046_v42  ;;  %v2034_v36 = vsub.f32 %v2002_v53, %v2024_v44  ;;  %v1627_v44 = vpack.c.bf16 %v14445_v7, %v14445_v7 }
 0x60d   :  { %v13722_v46 = vpop.eup %13721 }
 0x60e   :  { %v2048_v26 = vmul.f32 1.442695, %v2034_v36  ;;  %v2058_v45 = vsel %vm765_vm4, %v13722_v46, 0.0 }
 0x60f   :  { %v2027_v33 = vpop.xlane.xlu1 %2026  ;;  %2059 = vadd.xlane.f32.xlu0 %v2058_v45 }
 0x610   :  { %13729 = vpow2.f32 %v2048_v26  ;;  %v2035_v47 = vsub.f32 %v2003_v62, %v2027_v33  ;;  %v2426_v26 = vsel %vm865_vm3, %v1627_v44, 0 }
 0x611   :  { %v13724_v48 = vpop.eup %13723 }
 0x612   :  { %v2050_v12 = vmul.f32 1.442695, %v2035_v47  ;;  %v2061_v49 = vsel %vm765_vm4, %v13724_v48, 0.0 }
 0x613   :  { %2062 = vadd.xlane.f32.xlu1 %v2061_v49 }
 0x614   :  { %13731 = vpow2.f32 %v2050_v12  ;;  %v13414_v12 = vld [vmem:[%s17539_s7 + $0x8] sm:$0xff]  }
 0x615   :  { %v14462_v11 = vpop.eup %13725 }
 0x616   :  { %v2064_v40 = vsel %vm765_vm4, %v14462_v11, 0.0 }
 0x617   :  { %2065 = vadd.xlane.f32.xlu0 %v2064_v40 }
 0x619   :  { %v14466_v30 = vpop.eup %13727 }
 0x61a   :  { %v2067_v43 = vsel %vm765_vm4, %v14466_v30, 0.0 }
 0x61b   :  { %2068 = vadd.xlane.f32.xlu1 %v2067_v43 }
 0x61d   :  { %v14470_v53 = vpop.eup %13729 }
 0x61e   :  { %v2070_v58 = vsel %vm765_vm4, %v14470_v53, 0.0 }
 0x61f   :  { %2071 = vadd.xlane.f32.xlu0 %v2070_v58 }
 0x621   :  { %v14474_v56 = vpop.eup %13731 }
 0x622   :  { %v2073_v59 = vsel %vm765_vm4, %v14474_v56, 0.0 }
 0x623   :  { %2074 = vadd.xlane.f32.xlu1 %v2073_v59 }
 0x690   :  { %v2054_v61 = vpop.xlane.xlu0 %2053 }
 0x691   :  { %13733 = vrcp.f32 %v2054_v61 }
 0x694   :  { %v2057_v35 = vpop.xlane.xlu1 %2056 }
 0x695   :  { %13735 = vrcp.f32 %v2057_v35 }
 0x698   :  { %v2060_v62 = vpop.xlane.xlu0 %2059 }
 0x699   :  { %13737 = vrcp.f32 %v2060_v62 }
 0x69c   :  { %v2063_v63 = vpop.xlane.xlu1 %2062 }
 0x69d   :  { %13739 = vrcp.f32 %v2063_v63 }
 0x69e   :  { %v13734_v0 = vpop.eup %13733 }
 0x69f   :  { %v2084_v4 = vmul.f32 %v13734_v0, %v13718_v21  ;;  %v1625_v21 = vpack.c.bf16 %v1593_v60, %v1593_v60 }
 0x6a0   :  { %v2066_v5 = vpop.xlane.xlu0 %2065 }
 0x6a1   :  { %13741 = vrcp.f32 %v2066_v5  ;;  %v2092_v8 = vpack.c.bf16 %v2084_v4, %v2084_v4  ;;  %v2334_v39 = vsel %vm865_vm3, %v1625_v21, 0 }
 0x6a2   :  { %v13736_v13 = vpop.eup %13735 }
 0x6a3   :  { %13054 = vmatmul.mubr.msk.bf16.vlgmr.msra.gmra.mxu0 %vm765_vm4, %v2092_v8  ;;  %v2085_v16 = vmul.f32 %v13736_v13, %v13720_v41 }
 0x6a4   :  { %13064 = vmatpush3.bf16.msra.mxu0 %v2196_v14  ;;  %v2069_v23 = vpop.xlane.xlu1 %2068  ;;  %13065 = vmatprep.mubr.msk.bf16.mxu0 %vm13924_vm1, %v17564_v19 }
 0x6a5   :  { %13743 = vrcp.f32 %v2069_v23  ;;  %v2093_v57 = vpack.c.bf16 %v2085_v16, %v2085_v16  ;;  %13075 = vmatprep.subr.bf16.mxu0 %v17564_v19 }
 0x6a6   :  { %v13738_v22 = vpop.eup %13737 }
 0x6a7   :  { %13060 = vmatmul.mubr.msk.bf16.vlgmr.msra.gmra.mxu1 %vm765_vm4, %v2093_v57  ;;  %v2086_v27 = vmul.f32 %v13738_v22, %v13722_v46 }
 0x6a8   :  { %13070 = vmatpush3.bf16.msra.mxu1 %v2242_v24  ;;  %v2072_v29 = vpop.xlane.xlu0 %2071  ;;  %13071 = vmatprep.mubr.msk.bf16.mxu1 %vm13924_vm1, %v17564_v19 }
 0x6a9   :  { %13745 = vrcp.f32 %v2072_v29  ;;  %v2094_v31 = vpack.c.bf16 %v2086_v27, %v2086_v27  ;;  %13081 = vmatprep.subr.bf16.mxu1 %v17564_v19 }
 0x6aa   :  { %v13740_v32 = vpop.eup %13739 }
 0x6ab   :  { %13066 = vmatmul.mubr.msk.bf16.vlgmr.msra.gmra.mxu0 %vm765_vm4, %v2094_v31  ;;  %v2087_v3 = vmul.f32 %v13740_v32, %v13724_v48 }
 0x6ac   :  { %13076 = vmatpush3.bf16.msra.mxu0 %v2288_v34  ;;  %v2075_v55 = vpop.xlane.xlu1 %2074  ;;  %13077 = vmatprep.mubr.msk.bf16.mxu0 %vm13924_vm1, %v17564_v19 }
 0x6ad   :  { %13747 = vrcp.f32 %v2075_v55  ;;  %v2095_v10 = vpack.c.bf16 %v2087_v3, %v2087_v3  ;;  %13087 = vmatprep.subr.bf16.mxu0 %v17564_v19 }
 0x6ae   :  { %v13742_v37 = vpop.eup %13741 }
 0x6af   :  { %13072 = vmatmul.mubr.msk.bf16.vlgmr.msra.gmra.mxu1 %vm765_vm4, %v2095_v10  ;;  %v2088_v20 = vmul.f32 %v13742_v37, %v14462_v11  ;;  %v11092_v10 = vld [vmem:[%s17540_s8] ss:$0 sm:$0xff] }
 0x6b0   :  { %13082 = vmatpush3.bf16.msra.mxu1 %v2334_v39  ;;  %13083 = vmatprep.mubr.msk.bf16.mxu1 %vm13924_vm1, %v17564_v19  ;;  %v1328_v9 = vadd.f32 %v14350_v50, %v11092_v10  ;;  %v1326_v39 = vadd.f32 %v11092_v10, %v14352_v18  ;;  %v1329_v44 = vadd.f32 %v14354_v38, %v11092_v10  ;;  %v13894_v18 = vld [vmem:[%s17602_s24 + $0x10] sm:$0xff]  ;;  %v13895_v38 = vld [vmem:[%s17602_s24 + $0x8] sm:$0xff] }
 0x6b1   :  { %v2096_v41 = vpack.c.bf16 %v2088_v20, %v2088_v20  ;;  %13093 = vmatprep.subr.bf16.mxu1 %v17564_v19 }
 0x6b2   :  { %v13744_v42 = vpop.eup %13743 }
 0x6b3   :  { %13078 = vmatmul.mubr.msk.bf16.vlgmr.msra.gmra.mxu0 %vm765_vm4, %v2096_v41  ;;  %v2089_v1 = vmul.f32 %v13744_v42, %v14466_v30 }
 0x6b4   :  { %13088 = vmatpush3.bf16.msra.mxu0 %v2380_v28  ;;  %13089 = vmatprep.mubr.msk.bf16.mxu0 %vm13924_vm1, %v17564_v19 }
 0x6b5   :  { %v2097_v36 = vpack.c.bf16 %v2089_v1, %v2089_v1  ;;  %13099 = vmatprep.subr.bf16.mxu0 %v13414_v12  ;;  %v1327_v1 = vadd.f32 %v11092_v10, %v14356_v51 }
 0x6b6   :  { %v13746_v46 = vpop.eup %13745 }
 0x6b7   :  { %13084 = vmatmul.mubr.msk.bf16.vlgmr.msra.gmra.mxu1 %vm765_vm4, %v2097_v36  ;;  %v2090_v45 = vmul.f32 %v13746_v46, %v14470_v53  ;;  %v13893_v36 = vld [vmem:[%s17602_s24] sm:$0xff] }
 0x6b8   :  { %13094 = vmatpush3.bf16.msra.mxu1 %v2426_v26  ;;  %13095 = vmatprep.mubr.msk.bf16.mxu1 %vm13924_vm1, %v17564_v19 }
 0x6b9   :  { %v2098_v7 = vpack.c.bf16 %v2090_v45, %v2090_v45 }
 0x6ba   :  { %v13748_v33 = vpop.eup %13747 }
 0x6bb   :  { %13090 = vmatmul.mubr.msk.bf16.vlgmr.msra.gmra.mxu0 %vm765_vm4, %v2098_v7  ;;  %v2091_v47 = vmul.f32 %v13748_v33, %v14474_v56 }
 0x6bc   :  { %13100 = vmatpush3.bf16.msra.mxu0 %v13414_v12  ;;  %v13896_v12 = vld [vmem:[%s17602_s24 + $0x18] sm:$0xff] }
 0x6bd   :  { %v2099_v48 = vpack.c.bf16 %v2091_v47, %v2091_v47 }
 0x6bf   :  { %13096 = vmatmul.mubr.msk.bf16.vlgmr.msra.gmra.mxu1 %vm765_vm4, %v2099_v48 }
 0x763   :  { %v2140_v49 = vpop.f32.mrf.mxu0 }
 0x765   :  { %v13055_v11 = vpop.f32.mrf.mxu0 }
 0x767   :  { %v2143_v40 = vpop.f32.mrf.mxu0  ;;  %v2186_v30 = vpop.f32.mrf.mxu1 }
 0x768   :  { %v2468_v43 = vpack.c.bf16 %v2186_v30, %v2140_v49  ;;  %v1332_v30 = vadd.f32 %v14358_v52, %v11092_v10 }
 0x769   :  { %v13056_v53 = vpop.f32.mrf.mxu0  ;;  %v13061_v58 = vpop.f32.mrf.mxu1 }
 0x76a   :  { %13101 = vmatprep.mubr.msk.bf16.mxu0 %vm388_vm2, %v2468_v43  ;;  %v1330_v43 = vadd.f32 %v11092_v10, %v14360_v17  ;;  %v13898_v17 = vld [vmem:[%s17602_s24 + $0x30] sm:$0xff] }
 0x76b   :  { %v2189_v59 = vpop.f32.mrf.mxu1  ;;  %v2232_v56 = vpop.f32.mrf.mxu0 }
 0x76d   :  { %v13062_v61 = vpop.f32.mrf.mxu1  ;;  %v13067_v35 = vpop.f32.mrf.mxu0 }
 0x76e   :  { %v1333_v61 = vadd.f32 %v14362_v54, %v11092_v10  ;;  %v1331_v35 = vadd.f32 %v11092_v10, %v14364_v6  ;;  %v13899_v54 = vld [vmem:[%s17602_s24 + $0x28] sm:$0xff] }
 0x76f   :  { %v2235_v62 = vpop.f32.mrf.mxu0  ;;  %v2278_v63 = vpop.f32.mrf.mxu1 }
 0x770   :  { %v2469_v0 = vpack.c.bf16 %v2278_v63, %v2232_v56  ;;  %v13897_v62 = vld [vmem:[%s17602_s24 + $0x20] sm:$0xff] }
 0x771   :  { %v13068_v2 = vpop.f32.mrf.mxu0  ;;  %v13073_v4 = vpop.f32.mrf.mxu1 }
 0x772   :  { %13102 = vmatmul.mubr.msk.bf16.vlgmr.msra.gmra.mxu0 %vm388_vm2, %v2469_v0 }
 0x773   :  { %v2281_v5 = vpop.f32.mrf.mxu1  ;;  %v2324_v8 = vpop.f32.mrf.mxu0 }
 0x775   :  { %v13074_v13 = vpop.f32.mrf.mxu1  ;;  %v13079_v14 = vpop.f32.mrf.mxu0 }
 0x776   :  { %v13900_v14 = vld [vmem:[%s17602_s24 + $0x38] sm:$0xff] }
 0x777   :  { %v2327_v15 = vpop.f32.mrf.mxu0  ;;  %v2370_v16 = vpop.f32.mrf.mxu1 }
 0x778   :  { %v2470_v23 = vpack.c.bf16 %v2370_v16, %v2324_v8 }
 0x779   :  { %v13080_v57 = vpop.f32.mrf.mxu0  ;;  %v13085_v22 = vpop.f32.mrf.mxu1 }
 0x77a   :  { %13105 = vmatprep.mubr.msk.bf16.mxu0 %vm388_vm2, %v2470_v23 }
 0x77b   :  { %v2373_v24 = vpop.f32.mrf.mxu1  ;;  %v2416_v25 = vpop.f32.mrf.mxu0 }
 0x77d   :  { %v13086_v60 = vpop.f32.mrf.mxu1  ;;  %v13091_v27 = vpop.f32.mrf.mxu0 }
 0x77f   :  { %v2419_v29 = vpop.f32.mrf.mxu0  ;;  %v2462_v31 = vpop.f32.mrf.mxu1 }
 0x780   :  { %v2471_v32 = vpack.c.bf16 %v2462_v31, %v2416_v25 }
 0x781   :  { %v13092_v34 = vpop.f32.mrf.mxu0  ;;  %v13097_v21 = vpop.f32.mrf.mxu1 }
 0x782   :  { %13106 = vmatmul.mubr.msk.bf16.gmra.mxu0 %vm388_vm2, %v2471_v32 }
 0x783   :  { %v2465_v3 = vpop.f32.mrf.mxu1 }
 0x785   :  { %v13098_v55 = vpop.f32.mrf.mxu1 }
 0x832   :  { %v13103_v37 = vpop.f32.mrf.mxu0 }
 0x833   :  { %v2560_v41 = vadd.f32 %v13103_v37, %v1328_v9 }
 0x834   :  { %v2527_v20 = vpop.f32.mrf.mxu0 }
 0x835   :  { %v2558_v42 = vadd.f32 %v2527_v20, %v1326_v39  ;;  %v2568_v33 = vadd.f32 %v13894_v18, %v2560_v41 }
 0x836   :  { %v13104_v28 = vpop.f32.mrf.mxu0 }
 0x837   :  { %v2566_v46 = vadd.f32 %v13893_v36, %v2558_v42  ;;  %v2561_v45 = vadd.f32 %v13104_v28, %v1329_v44  ;;  %v2582_v47 = vsel %vm110_vm0, %v2568_v33, 0.0 }
 0x838   :  { %v2530_v26 = vpop.f32.mrf.mxu0 }
 0x839   :  { %v2559_v7 = vadd.f32 %v2530_v26, %v1327_v1  ;;  %v2576_v50 = vsel %vm110_vm0, %v2566_v46, 0.0  ;;  %v2569_v49 = vadd.f32 %v13896_v12, %v2561_v45 }
 0x83a   :  { %2577 = vadd.xlane.f32.xlu0 %v2576_v50 }
 0x83b   :  { %v2567_v51 = vadd.f32 %v13895_v38, %v2559_v7  ;;  %v2585_v11 = vsel %vm110_vm0, %v2569_v49, 0.0 }
 0x83d   :  { %v2579_v48 = vsel %vm110_vm0, %v2567_v51, 0.0 }
 0x83e   :  { %2583 = vadd.xlane.f32.xlu0 %v2582_v47  ;;  %2580 = vadd.xlane.f32.xlu1 %v2579_v48 }
 0x842   :  { %2586 = vadd.xlane.f32.xlu1 %v2585_v11  ;;  %v13107_v40 = vpop.f32.mrf.mxu0 }
 0x843   :  { %v2564_v58 = vadd.f32 %v13107_v40, %v1332_v30  ;;  %v2729_v30 = vld [vmem:[%s17541_s9 + $0x80] sm:$0xff] }
 0x844   :  { %v2543_v53 = vpop.f32.mrf.mxu0 }
 0x845   :  { %v2562_v59 = vadd.f32 %v2543_v53, %v1330_v43  ;;  %v2572_v5 = vadd.f32 %v13898_v17, %v2564_v58  ;;  %v2737_v43 = vld [vmem:[%s17541_s9 + $0xc0] sm:$0xff]  ;;  %v2730_v53 = vld [vmem:[%s17541_s9 + $0x88] sm:$0xff] }
 0x846   :  { %v13108_v56 = vpop.f32.mrf.mxu0  ;;  %v11171_v58 = vcombine.high %v2729_v30, %v2737_v43 }
 0x847   :  { %v2570_v63 = vadd.f32 %v13897_v62, %v2562_v59  ;;  %v2565_v2 = vadd.f32 %v13108_v56, %v1333_v61  ;;  %v2594_v8 = vsel %vm110_vm0, %v2572_v5, 0.0  ;;  %v2738_v59 = vld [vmem:[%s17541_s9 + $0xc8] sm:$0xff]  ;;  %v11170_v56 = vcombine.low %v2729_v30, %v2737_v43  ;;  %v2713_v62 = vld [vmem:[%s17541_s9] sm:$0xff] }
 0x848   :  { %v2546_v0 = vpop.f32.mrf.mxu0  ;;  %v11172_v61 = vcombine.low %v2730_v53, %v2738_v59  ;;  %3013 = vmatprep.subr.bf16.mxu1 %v11171_v58 }
 0x849   :  { %v2563_v4 = vadd.f32 %v2546_v0, %v1331_v35  ;;  %v2588_v52 = vsel %vm110_vm0, %v2570_v63, 0.0  ;;  %v2573_v15 = vadd.f32 %v13900_v14, %v2565_v2  ;;  %v11173_v35 = vcombine.high %v2730_v53, %v2738_v59  ;;  %3014 = vmatpush1.bf16.msra.mxu1 %v11170_v56  ;;  %v2714_v0 = vld [vmem:[%s17541_s9 + $0x8] sm:$0xff] }
 0x84a   :  { %2589 = vadd.xlane.f32.xlu0 %v2588_v52 }
 0x84b   :  { %v2571_v6 = vadd.f32 %v13899_v54, %v2563_v4  ;;  %v2597_v16 = vsel %vm110_vm0, %v2573_v15, 0.0  ;;  %3086 = vmatprep.subr.bf16.mxu0 %v11173_v35  ;;  %v2722_v4 = vld [vmem:[%s17541_s9 + $0x48] sm:$0xff]  ;;  %v17562_v54 = vmov 0   ;;  %v2723_v35 = vld [vmem:[%s17541_s9 + $0x50] sm:$0xff] }
 0x84c   :  { %3087 = vmatpush1.bf16.msra.mxu0 %v11172_v61  ;;  %v11156_v17 = vcombine.low %v2714_v0, %v2722_v4  ;;  %3033 = vmatprep.mubr.bf16.mxu1 %v17562_v54 }
 0x84d   :  { %v2591_v13 = vsel %vm110_vm0, %v2571_v6, 0.0  ;;  %3106 = vmatprep.mubr.bf16.mxu0 %v17562_v54 }
 0x84e   :  { %2595 = vadd.xlane.f32.xlu0 %v2594_v8  ;;  %2592 = vadd.xlane.f32.xlu1 %v2591_v13  ;;  %v14648_v8 = vld [vmem:[%s17541_s9 + $0xd0] sm:$0xff]  ;;  %v14653_v13 = vld [vmem:[%s17541_s9 + $0x98] sm:$0xff] }
 0x852   :  { %2598 = vadd.xlane.f32.xlu1 %v2597_v16  ;;  %v14662_v16 = vld [vmem:[%s17541_s9 + $0xd8] sm:$0xff] }
 0x8c3   :  { %v2578_v23 = vpop.xlane.xlu0 %2577 }
 0x8c4   :  { %v2601_v57 = vmul.f32 0.03125, %v2578_v23  ;;  %v11176_v23 = vcombine.low %v14653_v13, %v14662_v16 }
 0x8c6   :  { %v14574_v22 = vsub.f32 %v2566_v46, %v2601_v57  ;;  %v11177_v57 = vcombine.high %v14653_v13, %v14662_v16 }
 0x8c7   :  { %v2584_v24 = vpop.xlane.xlu0 %2583  ;;  %v2581_v25 = vpop.xlane.xlu1 %2580 }
 0x8c8   :  { %v2603_v60 = vmul.f32 0.03125, %v2584_v24  ;;  %v2602_v27 = vmul.f32 0.03125, %v2581_v25  ;;  %v2617_v29 = vmul.f32 %v14574_v22, %v14574_v22 }
 0x8ca   :  { %v14578_v31 = vsub.f32 %v2568_v33, %v2603_v60  ;;  %v14580_v32 = vsub.f32 %v2567_v51, %v2602_v27  ;;  %v2625_v34 = vsel %vm110_vm0, %v2617_v29, 0.0 }
 0x8cb   :  { %v2587_v21 = vpop.xlane.xlu1 %2586  ;;  %2626 = vadd.xlane.f32.xlu0 %v2625_v34 }
 0x8cc   :  { %v2604_v3 = vmul.f32 0.03125, %v2587_v21  ;;  %v2619_v55 = vmul.f32 %v14578_v31, %v14578_v31  ;;  %v2618_v10 = vmul.f32 %v14580_v32, %v14580_v32 }
 0x8ce   :  { %v14587_v37 = vsub.f32 %v2569_v49, %v2604_v3  ;;  %v2631_v9 = vsel %vm110_vm0, %v2619_v55, 0.0  ;;  %v2628_v39 = vsel %vm110_vm0, %v2618_v10, 0.0 }
 0x8cf   :  { %2632 = vadd.xlane.f32.xlu0 %v2631_v9  ;;  %2629 = vadd.xlane.f32.xlu1 %v2628_v39 }
 0x8d0   :  { %v2620_v20 = vmul.f32 %v14587_v37, %v14587_v37 }
 0x8d2   :  { %v2634_v41 = vsel %vm110_vm0, %v2620_v20, 0.0 }
 0x8d3   :  { %v2590_v42 = vpop.xlane.xlu0 %2589  ;;  %2635 = vadd.xlane.f32.xlu1 %v2634_v41 }
 0x8d4   :  { %v2605_v28 = vmul.f32 0.03125, %v2590_v42 }
 0x8d6   :  { %v14594_v44 = vsub.f32 %v2570_v63, %v2605_v28  ;;  %v2721_v63 = vld [vmem:[%s17541_s9 + $0x40] sm:$0xff] }
 0x8d7   :  { %v2596_v1 = vpop.xlane.xlu0 %2595  ;;  %v2593_v36 = vpop.xlane.xlu1 %2592  ;;  %v11155_v2 = vcombine.high %v2713_v62, %v2721_v63  ;;  %v11154_v52 = vcombine.low %v2713_v62, %v2721_v63  ;;  %v2724_v62 = vld [vmem:[%s17541_s9 + $0x58] sm:$0xff] }
 0x8d8   :  { %v2607_v46 = vmul.f32 0.03125, %v2596_v1  ;;  %v2606_v26 = vmul.f32 0.03125, %v2593_v36  ;;  %v2621_v45 = vmul.f32 %v14594_v44, %v14594_v44 }
 0x8d9   :  { %3015 = vmatprep.subr.bf16.mxu1 %v11155_v2 }
 0x8da   :  { %v14598_v7 = vsub.f32 %v2572_v5, %v2607_v46  ;;  %v14600_v50 = vsub.f32 %v2571_v6, %v2606_v26  ;;  %v2637_v18 = vsel %vm110_vm0, %v2621_v45, 0.0  ;;  %v11157_v5 = vcombine.high %v2714_v0, %v2722_v4  ;;  %3016 = vmatpush1.bf16.msra.mxu1 %v11154_v52  ;;  %v14643_v6 = vld [vmem:[%s17541_s9 + $0x90] sm:$0xff]  ;;  %v14672_v26 = vld [vmem:[%s17545_s13] ss:$0 sm:$0xff] }
 0x8db   :  { %2638 = vadd.xlane.f32.xlu0 %v2637_v18  ;;  %v2599_v33 = vpop.xlane.xlu1 %2598  ;;  %v11174_v14 = vcombine.low %v14643_v6, %v14648_v8  ;;  %v14710_v4 = vld [vmem:[%s17541_s9 + $0xa0] sm:$0xff] }
 0x8dc   :  { %v2608_v38 = vmul.f32 0.03125, %v2599_v33  ;;  %v2623_v51 = vmul.f32 %v14598_v7, %v14598_v7  ;;  %v2622_v47 = vmul.f32 %v14600_v50, %v14600_v50  ;;  %3088 = vmatprep.subr.bf16.mxu0 %v11157_v5  ;;  %v14725_v5 = vld [vmem:[%s17541_s9 + $0xa8] sm:$0xff] }
 0x8dd   :  { %3089 = vmatpush1.bf16.msra.mxu0 %v11156_v17  ;;  %v14720_v17 = vld [vmem:[%s17541_s9 + $0xe0] sm:$0xff] }
 0x8de   :  { %v14607_v48 = vsub.f32 %v2573_v15, %v2608_v38  ;;  %v2643_v12 = vsel %vm110_vm0, %v2623_v51, 0.0  ;;  %v2640_v49 = vsel %vm110_vm0, %v2622_v47, 0.0  ;;  %v11175_v15 = vcombine.high %v14643_v6, %v14648_v8  ;;  %3232 = vmatprep.subr.bf16.mxu0 %v11177_v57 }
 0x8df   :  { %2644 = vadd.xlane.f32.xlu0 %v2643_v12  ;;  %2641 = vadd.xlane.f32.xlu1 %v2640_v49 }
 0x8e0   :  { %v2624_v11 = vmul.f32 %v14607_v48, %v14607_v48  ;;  %3159 = vmatprep.subr.bf16.mxu1 %v11175_v15  ;;  %v14730_v15 = vld [vmem:[%s17541_s9 + $0xe8] sm:$0xff] }
 0x8e2   :  { %v2646_v40 = vsel %vm110_vm0, %v2624_v11, 0.0 }
 0x8e3   :  { %2647 = vadd.xlane.f32.xlu1 %v2646_v40 }
 0x954   :  { %v2627_v24 = vpop.xlane.xlu0 %2626 }
 0x955   :  { %v2649_v25 = vmul.f32 0.03125, %v2627_v24 }
 0x957   :  { %v2657_v60 = vadd.f32 1e-05, %v2649_v25 }
 0x958   :  { %v2633_v27 = vpop.xlane.xlu0 %2632  ;;  %v2630_v29 = vpop.xlane.xlu1 %2629 }
 0x959   :  { %13749 = vrsqrt.f32 %v2657_v60  ;;  %v2651_v34 = vmul.f32 0.03125, %v2633_v27  ;;  %v2650_v21 = vmul.f32 0.03125, %v2630_v29  ;;  %v11179_v27 = vcombine.high %v14710_v4, %v14720_v17 }
 0x95a   :  { %v11181_v29 = vcombine.high %v14725_v5, %v14730_v15 }
 0x95b   :  { %v2658_v3 = vadd.f32 1e-05, %v2650_v21  ;;  %v2659_v55 = vadd.f32 1e-05, %v2651_v34 }
 0x95c   :  { %v2636_v10 = vpop.xlane.xlu1 %2635 }
 0x95d   :  { %v2652_v9 = vmul.f32 0.03125, %v2636_v10  ;;  %13751 = vrsqrt.f32 %v2658_v3 }
 0x95e   :  { %13753 = vrsqrt.f32 %v2659_v55 }
 0x95f   :  { %v2660_v39 = vadd.f32 1e-05, %v2652_v9 }
 0x961   :  { %13755 = vrsqrt.f32 %v2660_v39 }
 0x964   :  { %v2639_v20 = vpop.xlane.xlu0 %2638 }
 0x965   :  { %v2653_v41 = vmul.f32 0.03125, %v2639_v20 }
 0x966   :  { %v13750_v42 = vpop.eup %13749 }
 0x967   :  { %v2661_v28 = vadd.f32 1e-05, %v2653_v41  ;;  %v2673_v1 = vmul.f32 %v13750_v42, %v14574_v22  ;;  %v14679_v22 = vld [vmem:[%s17546_s14] ss:$0 sm:$0xff] }
 0x968   :  { %v2645_v36 = vpop.xlane.xlu0 %2644  ;;  %v2642_v46 = vpop.xlane.xlu1 %2641  ;;  %v2717_v42 = vld [vmem:[%s17541_s9 + $0x20] sm:$0xff] }
 0x969   :  { %13757 = vrsqrt.f32 %v2661_v28  ;;  %v2655_v45 = vmul.f32 0.03125, %v2645_v36  ;;  %v2654_v18 = vmul.f32 0.03125, %v2642_v46  ;;  %v2687_v51 = vmul.f32 %v14672_v26, %v2673_v1  ;;  %v2725_v28 = vld [vmem:[%s17541_s9 + $0x60] sm:$0xff]  ;;  %v2718_v1 = vld [vmem:[%s17541_s9 + $0x28] sm:$0xff] }
 0x96a   :  { %v13752_v33 = vpop.eup %13751  ;;  %v2726_v36 = vld [vmem:[%s17541_s9 + $0x68] sm:$0xff]  ;;  %v11178_v46 = vcombine.low %v14710_v4, %v14720_v17  ;;  %v13418_v4 = vld [vmem:[%s17543_s11 + $0xb8] sm:$0xff]   ;;  %v13420_v17 = vld [vmem:[%s17543_s11 + $0xf0] sm:$0xff]  }
 0x96b   :  { %v2662_v38 = vadd.f32 1e-05, %v2654_v18  ;;  %v2674_v47 = vmul.f32 %v13752_v33, %v14580_v32  ;;  %v2663_v12 = vadd.f32 1e-05, %v2655_v45  ;;  %v13754_v11 = vpop.eup %13753  ;;  %v2715_v32 = vld [vmem:[%s17541_s9 + $0x10] sm:$0xff]  ;;  %v14687_v59 = vadd.f32 %v14679_v22, %v2687_v51  ;;  %v2736_v51 = vld [vmem:[%s17541_s9 + $0xb8] sm:$0xff] }
 0x96c   :  { %v2648_v49 = vpop.xlane.xlu1 %2647  ;;  %v2675_v56 = vmul.f32 %v13754_v11, %v14578_v31  ;;  %v11159_v0 = vcombine.high %v2715_v32, %v2723_v35  ;;  %v11158_v25 = vcombine.low %v2715_v32, %v2723_v35  ;;  %v11163_v45 = vcombine.high %v2717_v42, %v2725_v28  ;;  %v2735_v33 = vld [vmem:[%s17541_s9 + $0xb0] sm:$0xff] }
 0x96d   :  { %v2656_v40 = vmul.f32 0.03125, %v2648_v49  ;;  %v2688_v43 = vmul.f32 %v14672_v26, %v2674_v47  ;;  %13759 = vrsqrt.f32 %v2662_v38  ;;  %v11165_v18 = vcombine.high %v2718_v1, %v2726_v36  ;;  %v2743_v38 = vld [vmem:[%s17541_s9 + $0xf0] sm:$0xff]  ;;  %v2744_v47 = vld [vmem:[%s17541_s9 + $0xf8] sm:$0xff] }
 0x96e   :  { %v13756_v30 = vpop.eup %13755  ;;  %13761 = vrsqrt.f32 %v2663_v12  ;;  %v2689_v52 = vmul.f32 %v14672_v26, %v2675_v56  ;;  %v11162_v12 = vcombine.low %v2717_v42, %v2725_v28  ;;  %v11164_v49 = vcombine.low %v2718_v1, %v2726_v36  ;;  %v13442_v42 = vld [vmem:[%s17543_s11 + $0x88] sm:$0xff]   ;;  %v13443_v28 = vld [vmem:[%s17543_s11 + $0x40] sm:$0xff]  }
 0x96f   :  { %v2676_v53 = vmul.f32 %v13756_v30, %v14587_v37  ;;  %v2664_v58 = vadd.f32 1e-05, %v2656_v40  ;;  %v14691_v61 = vadd.f32 %v14679_v22, %v2688_v43  ;;  %v2716_v37 = vld [vmem:[%s17541_s9 + $0x18] sm:$0xff]  ;;  %v11183_v11 = vcombine.high %v2735_v33, %v2743_v38  ;;  %v2719_v40 = vld [vmem:[%s17541_s9 + $0x30] sm:$0xff]  ;;  %v13444_v1 = vld [vmem:[%s17543_s11 + $0xc0] sm:$0xff]  }
 0x970   :  { %v11161_v2 = vcombine.high %v2716_v37, %v2724_v62  ;;  %v11160_v60 = vcombine.low %v2716_v37, %v2724_v62  ;;  %v14748_v34 = vadd.f32 %v14679_v22, %v2689_v52  ;;  %v2727_v30 = vld [vmem:[%s17541_s9 + $0x70] sm:$0xff]  ;;  %v2720_v43 = vld [vmem:[%s17541_s9 + $0x38] sm:$0xff]  ;;  %v11184_v32 = vcombine.low %v2736_v51, %v2744_v47  ;;  %v13445_v36 = vld [vmem:[%s17543_s11] sm:$0xff]  }
 0x971   :  { %13763 = vrsqrt.f32 %v2664_v58  ;;  %v14704_v31 = vpack.c.bf16 %v14691_v61, %v14687_v59  ;;  %v2690_v63 = vmul.f32 %v14672_v26, %v2676_v53  ;;  %v2728_v53 = vld [vmem:[%s17541_s9 + $0x78] sm:$0xff]  ;;  %v11182_v58 = vcombine.low %v2735_v33, %v2743_v38  ;;  %v13419_v52 = vld [vmem:[%s17543_s11 + $0x70] sm:$0xff]  }
 0x972   :  { %17609 = vst [vmem:[#allocation7_spill] sm:$0xff] %v14748_v34  ;;  %v11167_v56 = vcombine.high %v2719_v40, %v2727_v30  ;;  %v11169_v35 = vcombine.high %v2720_v43, %v2728_v53  ;;  %v11166_v37 = vcombine.low %v2719_v40, %v2727_v30  ;;  %v11168_v62 = vcombine.low %v2720_v43, %v2728_v53 }
 0x973   :  { %11186 = vmatmul.mubr.msk.bf16.vlgmr.msra.gmra.mxu1 %vm110_vm0, %v14704_v31  ;;  %11190 = vmatmul.mubr.msk.bf16.vlgmr.msra.gmra.mxu0 %vm110_vm0, %v14704_v31  ;;  %v14735_v24 = vadd.f32 %v14679_v22, %v2690_v63  ;;  %v13415_v63 = vld [vmem:[%s17543_s11 + $0x78] sm:$0xff]  }
 0x974   :  { %3043 = vmatprep.mubr.bf16.mxu1 %v17562_v54  ;;  %3116 = vmatprep.mubr.bf16.mxu0 %v17562_v54 }
 0x975   :  { %17608 = vst [vmem:[#allocation6_spill] sm:$0xff] %v14735_v24  ;;  %3160 = vmatpush1.bf16.msra.mxu1 %v11174_v14  ;;  %3233 = vmatpush1.bf16.msra.mxu0 %v11176_v23  ;;  %v14753_v8 = vpack.c.bf16 %v14735_v24, %v14748_v34 }
 0x976   :  { %v13758_v57 = vpop.eup %13757  ;;  %3161 = vmatprep.subr.bf16.mxu1 %v11159_v0  ;;  %3234 = vmatprep.subr.bf16.mxu0 %v11161_v2  ;;  %v13416_v0 = vld [vmem:[%s17543_s11 + $0xf8] sm:$0xff]  }
 0x977   :  { %v2677_v6 = vmul.f32 %v13758_v57, %v14594_v44  ;;  %v13417_v2 = vld [vmem:[%s17543_s11 + $0x38] sm:$0xff]   ;;  %v13424_v57 = vld [vmem:[%s17543_s11 + $0xe8] sm:$0xff]  }
 0x979   :  { %3162 = vmatpush1.bf16.msra.mxu1 %v11158_v25  ;;  %3235 = vmatpush1.bf16.msra.mxu0 %v11160_v60  ;;  %v2691_v14 = vmul.f32 %v14672_v26, %v2677_v6  ;;  %v13425_v25 = vld [vmem:[%s17543_s11 + $0x28] sm:$0xff]   ;;  %v13429_v6 = vld [vmem:[%s17543_s11 + $0x20] sm:$0xff]  }
 0x97a   :  { %v13760_v13 = vpop.eup %13759  ;;  %3305 = vmatprep.subr.bf16.mxu1 %v11179_v27  ;;  %3378 = vmatprep.subr.bf16.mxu0 %v11181_v29  ;;  %v13426_v60 = vld [vmem:[%s17543_s11 + $0xa8] sm:$0xff]   ;;  %v13427_v27 = vld [vmem:[%s17543_s11 + $0x60] sm:$0xff]  }
 0x97b   :  { %v2678_v16 = vmul.f32 %v13760_v13, %v14600_v50  ;;  %11187 = vmatmul.mubr.msk.bf16.gmra.mxu1 %vm110_vm0, %v14753_v8  ;;  %11191 = vmatmul.mubr.msk.bf16.gmra.mxu0 %vm110_vm0, %v14753_v8  ;;  %v13762_v44 = vpop.eup %13761  ;;  %v14766_v55 = vadd.f32 %v14679_v22, %v2691_v14  ;;  %v13428_v29 = vld [vmem:[%s17543_s11 + $0xe0] sm:$0xff]   ;;  %v13432_v14 = vld [vmem:[%s17543_s11 + $0xd8] sm:$0xff]  }
 0x97c   :  { %3053 = vmatprep.mubr.bf16.mxu1 %v17562_v54  ;;  %3126 = vmatprep.mubr.bf16.mxu0 %v17562_v54  ;;  %v2679_v50 = vmul.f32 %v13762_v44, %v14598_v7  ;;  %v13430_v13 = vld [vmem:[%s17543_s11 + $0xa0] sm:$0xff]   ;;  %v13434_v44 = vld [vmem:[%s17543_s11 + $0x98] sm:$0xff]  }
 0x97d   :  { %v2692_v21 = vmul.f32 %v14672_v26, %v2678_v16  ;;  %17610 = vst [vmem:[#allocation8_spill] sm:$0xff] %v14766_v55  ;;  %v13433_v16 = vld [vmem:[%s17543_s11 + $0x18] sm:$0xff]  }
 0x97e   :  { %v13764_v23 = vpop.eup %13763  ;;  %v2693_v20 = vmul.f32 %v14672_v26, %v2679_v50  ;;  %v13438_v50 = vld [vmem:[%s17543_s11 + $0x90] sm:$0xff]  }
 0x97f   :  { %v2680_v3 = vmul.f32 %v13764_v23, %v14607_v48  ;;  %v14770_v10 = vadd.f32 %v14679_v22, %v2692_v21  ;;  %v13435_v23 = vld [vmem:[%s17543_s11 + $0x50] sm:$0xff]  }
 0x980   :  { %v14788_v48 = vadd.f32 %v14679_v22, %v2693_v20  ;;  %v13436_v21 = vld [vmem:[%s17543_s11 + $0xd0] sm:$0xff]   ;;  %v13441_v20 = vld [vmem:[%s17543_s11 + $0x8] sm:$0xff]  }
 0x981   :  { %17611 = vst [vmem:[#allocation9_spill] sm:$0xff] %v14770_v10  ;;  %v14774_v9 = vpack.c.bf16 %v14770_v10, %v14766_v55  ;;  %v2694_v39 = vmul.f32 %v14672_v26, %v2680_v3  ;;  %v11180_v26 = vcombine.low %v14725_v5, %v14730_v15  ;;  %v13421_v5 = vld [vmem:[%s17543_s11 + $0x30] sm:$0xff]  }
 0x982   :  { %17613 = vst [vmem:[#allocation11_spill] sm:$0xff] %v14788_v48  ;;  %v13422_v15 = vld [vmem:[%s17543_s11 + $0xb0] sm:$0xff]  }
 0x983   :  { %11188 = vmatmul.mubr.msk.bf16.gmra.mxu1 %vm110_vm0, %v14774_v9  ;;  %11192 = vmatmul.mubr.msk.bf16.gmra.mxu0 %vm110_vm0, %v14774_v9  ;;  %v14785_v7 = vadd.f32 %v14679_v22, %v2694_v39  ;;  %v11185_v22 = vcombine.high %v2736_v51, %v2744_v47  ;;  %v13437_v3 = vld [vmem:[%s17543_s11 + $0x10] sm:$0xff]   ;;  %v13440_v39 = vld [vmem:[%s17543_s11 + $0xc8] sm:$0xff]  }
 0x984   :  { %3063 = vmatprep.mubr.bf16.mxu1 %v17562_v54  ;;  %3136 = vmatprep.mubr.bf16.mxu0 %v17562_v54 }
 0x985   :  { %17612 = vst [vmem:[#allocation10_spill] sm:$0xff] %v14785_v7  ;;  %v14792_v41 = vpack.c.bf16 %v14785_v7, %v14788_v48 }
 0x98b   :  { %11189 = vmatmul.mubr.msk.bf16.gmra.mxu1 %vm110_vm0, %v14792_v41  ;;  %11193 = vmatmul.mubr.msk.bf16.gmra.mxu0 %vm110_vm0, %v14792_v41 }
 0x98c   :  { %3179 = vmatprep.mubr.bf16.mxu1 %v17562_v54  ;;  %3252 = vmatprep.mubr.bf16.mxu0 %v17562_v54 }
 0x993   :  { %11194 = vmatmul.mubr.msk.bf16.vlgmr.msra.gmra.mxu1 %vm110_vm0, %v14704_v31  ;;  %11198 = vmatmul.mubr.msk.bf16.vlgmr.msra.gmra.mxu0 %vm110_vm0, %v14704_v31 }
 0x994   :  { %3189 = vmatprep.mubr.bf16.mxu1 %v17562_v54  ;;  %3262 = vmatprep.mubr.bf16.mxu0 %v17562_v54 }
 0x995   :  { %3306 = vmatpush1.bf16.msra.mxu1 %v11178_v46  ;;  %3379 = vmatpush1.bf16.msra.mxu0 %v11180_v26  ;;  %v13446_v46 = vld [vmem:[%s17543_s11 + $0x80] sm:$0xff]   ;;  %v13447_v26 = vld [vmem:[%s17543_s11 + $0x178] sm:$0xff]  }
 0x996   :  { %3307 = vmatprep.subr.bf16.mxu1 %v11163_v45  ;;  %3380 = vmatprep.subr.bf16.mxu0 %v11165_v18  ;;  %v2749_v45 = vlaneseq }
 0x998   :  { %v15012_v18 = vshrl.u32 %v2749_v45, 7 }
 0x999   :  { %3308 = vmatpush1.bf16.msra.mxu1 %v11162_v12  ;;  %3381 = vmatpush1.bf16.msra.mxu0 %v11164_v49  ;;  %v15029_v12 = vld [vmem:[%s17542_s10] sm:$0xff] }
 0x99a   :  { %3451 = vmatprep.subr.bf16.mxu1 %v11183_v11  ;;  %3524 = vmatprep.subr.bf16.mxu0 %v11185_v22  ;;  %v15015_v33 = vsub.s32 1, %v15012_v18  ;;  %v15018_v38 = vsub.s32 3, %v15012_v18  ;;  %v15021_v51 = vsub.s32 0, %v15012_v18  ;;  %v15024_v47 = vsub.s32 2, %v15012_v18 }
 0x99b   :  { %11195 = vmatmul.mubr.msk.bf16.gmra.mxu1 %vm110_vm0, %v14753_v8  ;;  %11199 = vmatmul.mubr.msk.bf16.gmra.mxu0 %vm110_vm0, %v14753_v8 }
 0x99c   :  { %3199 = vmatprep.mubr.bf16.mxu1 %v17562_v54  ;;  %3272 = vmatprep.mubr.bf16.mxu0 %v17562_v54  ;;  %17614 = vst [vmem:[#allocation12_spill] sm:$0xff] %v15015_v33  ;;  %17615 = vst [vmem:[#allocation13_spill] sm:$0xff] %v15018_v38  ;;  %v15033_v22 = vrot.slane %v15029_v12, %v15015_v33  ;;  %v15037_v40 = vrot.slane %v15029_v12, %v15018_v38 }
 0x99d   :  { %17616 = vst [vmem:[#allocation14_spill] sm:$0xff] %v15021_v51  ;;  %17617 = vst [vmem:[#allocation15_spill] sm:$0xff] %v15024_v47  ;;  %v15041_v30 = vrot.slane %v15029_v12, %v15021_v51  ;;  %v15045_v43 = vrot.slane %v15029_v12, %v15024_v47 }
 0x9a3   :  { %11196 = vmatmul.mubr.msk.bf16.gmra.mxu1 %vm110_vm0, %v14774_v9  ;;  %11200 = vmatmul.mubr.msk.bf16.gmra.mxu0 %vm110_vm0, %v14774_v9 }
 0x9a4   :  { %3209 = vmatprep.mubr.bf16.mxu1 %v17562_v54  ;;  %3282 = vmatprep.mubr.bf16.mxu0 %v17562_v54 }
 0x9ab   :  { %11197 = vmatmul.mubr.msk.bf16.gmra.mxu1 %vm110_vm0, %v14792_v41  ;;  %11201 = vmatmul.mubr.msk.bf16.gmra.mxu0 %vm110_vm0, %v14792_v41 }
 0x9ac   :  { %3325 = vmatprep.mubr.bf16.mxu1 %v17562_v54  ;;  %3398 = vmatprep.mubr.bf16.mxu0 %v17562_v54 }
 0x9b3   :  { %11202 = vmatmul.mubr.msk.bf16.vlgmr.msra.gmra.mxu1 %vm110_vm0, %v14704_v31  ;;  %11206 = vmatmul.mubr.msk.bf16.vlgmr.msra.gmra.mxu0 %vm110_vm0, %v14704_v31 }
 0x9b4   :  { %3335 = vmatprep.mubr.bf16.mxu1 %v17562_v54  ;;  %3408 = vmatprep.mubr.bf16.mxu0 %v17562_v54 }
 0x9b5   :  { %3452 = vmatpush1.bf16.msra.mxu1 %v11182_v58  ;;  %3525 = vmatpush1.bf16.msra.mxu0 %v11184_v32 }
 0x9b6   :  { %3453 = vmatprep.subr.bf16.mxu1 %v11167_v56  ;;  %3526 = vmatprep.subr.bf16.mxu0 %v11169_v35 }
 0x9b9   :  { %3454 = vmatpush1.bf16.msra.mxu1 %v11166_v37  ;;  %3527 = vmatpush1.bf16.msra.mxu0 %v11168_v62 }
 0x9ba   :  { %12075 = vmatprep.subr.bf16.mxu1 %v13415_v63  ;;  %12115 = vmatprep.subr.bf16.mxu0 %v13416_v0 }
 0x9bb   :  { %11203 = vmatmul.mubr.msk.bf16.gmra.mxu1 %vm110_vm0, %v14753_v8  ;;  %11207 = vmatmul.mubr.msk.bf16.gmra.mxu0 %vm110_vm0, %v14753_v8 }
 0x9bc   :  { %3345 = vmatprep.mubr.bf16.mxu1 %v17562_v54  ;;  %3418 = vmatprep.mubr.bf16.mxu0 %v17562_v54 }
 0x9c3   :  { %11204 = vmatmul.mubr.msk.bf16.gmra.mxu1 %vm110_vm0, %v14774_v9  ;;  %11208 = vmatmul.mubr.msk.bf16.gmra.mxu0 %vm110_vm0, %v14774_v9 }
 0x9c4   :  { %3355 = vmatprep.mubr.bf16.mxu1 %v17562_v54  ;;  %3428 = vmatprep.mubr.bf16.mxu0 %v17562_v54 }
 0x9cb   :  { %11205 = vmatmul.mubr.msk.bf16.gmra.mxu1 %vm110_vm0, %v14792_v41  ;;  %11209 = vmatmul.mubr.msk.bf16.gmra.mxu0 %vm110_vm0, %v14792_v41 }
 0x9cc   :  { %3471 = vmatprep.mubr.bf16.mxu1 %v17562_v54  ;;  %3544 = vmatprep.mubr.bf16.mxu0 %v17562_v54 }
 0x9d3   :  { %11210 = vmatmul.mubr.msk.bf16.vlgmr.msra.gmra.mxu1 %vm110_vm0, %v14704_v31  ;;  %11214 = vmatmul.mubr.msk.bf16.vlgmr.msra.gmra.mxu0 %vm110_vm0, %v14704_v31  ;;  %v13423_v31 = vld [vmem:[%s17543_s11 + $0x68] sm:$0xff]  }
 0x9d4   :  { %3481 = vmatprep.mubr.bf16.mxu1 %v17562_v54  ;;  %3554 = vmatprep.mubr.bf16.mxu0 %v17562_v54 }
 0x9d5   :  { %12076 = vmatpush3.bf16.msra.mxu1 %v13417_v2  ;;  %12116 = vmatpush3.bf16.msra.mxu0 %v13418_v4 }
 0x9d6   :  { %12077 = vmatprep.subr.bf16.mxu1 %v13419_v52  ;;  %12117 = vmatprep.subr.bf16.mxu0 %v13420_v17 }
 0x9d9   :  { %12078 = vmatpush3.bf16.msra.mxu1 %v13421_v5  ;;  %12118 = vmatpush3.bf16.msra.mxu0 %v13422_v15 }
 0x9da   :  { %12079 = vmatprep.subr.bf16.mxu1 %v13423_v31  ;;  %12119 = vmatprep.subr.bf16.mxu0 %v13424_v57 }
 0x9db   :  { %11211 = vmatmul.mubr.msk.bf16.gmra.mxu1 %vm110_vm0, %v14753_v8  ;;  %11215 = vmatmul.mubr.msk.bf16.gmra.mxu0 %vm110_vm0, %v14753_v8  ;;  %v13431_v8 = vld [vmem:[%s17543_s11 + $0x58] sm:$0xff]  }
 0x9dc   :  { %3491 = vmatprep.mubr.bf16.mxu1 %v17562_v54  ;;  %3564 = vmatprep.mubr.bf16.mxu0 %v17562_v54 }
 0x9dd   :  { %12080 = vmatpush3.bf16.msra.mxu1 %v13425_v25  ;;  %12120 = vmatpush3.bf16.msra.mxu0 %v13426_v60 }
 0x9de   :  { %12081 = vmatprep.subr.bf16.mxu1 %v13427_v27  ;;  %12121 = vmatprep.subr.bf16.mxu0 %v13428_v29 }
 0x9e1   :  { %12082 = vmatpush3.bf16.msra.mxu1 %v13429_v6  ;;  %12122 = vmatpush3.bf16.msra.mxu0 %v13430_v13 }
 0x9e2   :  { %12083 = vmatprep.subr.bf16.mxu1 %v13431_v8  ;;  %12123 = vmatprep.subr.bf16.mxu0 %v13432_v14 }
 0x9e3   :  { %11212 = vmatmul.mubr.msk.bf16.gmra.mxu1 %vm110_vm0, %v14774_v9  ;;  %11216 = vmatmul.mubr.msk.bf16.gmra.mxu0 %vm110_vm0, %v14774_v9  ;;  %v13439_v9 = vld [vmem:[%s17543_s11 + $0x48] sm:$0xff]  }
 0x9e4   :  { %3501 = vmatprep.mubr.bf16.mxu1 %v17562_v54  ;;  %3574 = vmatprep.mubr.bf16.mxu0 %v17562_v54 }
 0x9e5   :  { %12084 = vmatpush3.bf16.msra.mxu1 %v13433_v16  ;;  %12124 = vmatpush3.bf16.msra.mxu0 %v13434_v44 }
 0x9e6   :  { %12085 = vmatprep.subr.bf16.mxu1 %v13435_v23  ;;  %12125 = vmatprep.subr.bf16.mxu0 %v13436_v21  ;;  %v13449_v21 = vld [vmem:[%s17543_s11 + $0x138] sm:$0xff]  }
 0x9e9   :  { %12086 = vmatpush3.bf16.msra.mxu1 %v13437_v3  ;;  %12126 = vmatpush3.bf16.msra.mxu0 %v13438_v50  ;;  %v13450_v3 = vld [vmem:[%s17543_s11 + $0x1b8] sm:$0xff]  }
 0x9ea   :  { %12087 = vmatprep.subr.bf16.mxu1 %v13439_v9  ;;  %12127 = vmatprep.subr.bf16.mxu0 %v13440_v39 }
 0x9eb   :  { %11213 = vmatmul.mubr.msk.bf16.gmra.mxu1 %vm110_vm0, %v14792_v41  ;;  %11217 = vmatmul.mubr.msk.bf16.gmra.mxu0 %vm110_vm0, %v14792_v41  ;;  %v13448_v41 = vld [vmem:[%s17543_s11 + $0x1f8] sm:$0xff]  }
 0x9ed   :  { %12088 = vmatpush3.bf16.msra.mxu1 %v13441_v20  ;;  %12128 = vmatpush3.bf16.msra.mxu0 %v13442_v42  ;;  %v13451_v42 = vld [vmem:[%s17543_s11 + $0x170] sm:$0xff]  }
 0x9ee   :  { %12089 = vmatprep.subr.bf16.mxu1 %v13443_v28  ;;  %12129 = vmatprep.subr.bf16.mxu0 %v13444_v1  ;;  %v13452_v28 = vld [vmem:[%s17543_s11 + $0x1f0] sm:$0xff]  }
 0x9f1   :  { %12090 = vmatpush3.bf16.msra.mxu1 %v13445_v36  ;;  %12130 = vmatpush3.bf16.msra.mxu0 %v13446_v46 }
 0x9f2   :  { %12155 = vmatprep.subr.bf16.mxu1 %v13447_v26  ;;  %12195 = vmatprep.subr.bf16.mxu0 %v13448_v41 }
 0xa33   :  { %v3035_v49 = vpop.f32.mrf.mxu1  ;;  %v3108_v11 = vpop.f32.mrf.mxu0 }
 0xa34   :  { %v3036_v0 = vadd.f32 %v3035_v49, %v15041_v30  ;;  %v3109_v2 = vadd.f32 %v3108_v11, %v15045_v43 }
 0xa35   :  { %v3037_v53 = vpop.f32.mrf.mxu1  ;;  %v3110_v58 = vpop.f32.mrf.mxu0 }
 0xa36   :  { %v3038_v35 = vadd.f32 %v3037_v53, %v15033_v22  ;;  %v3111_v37 = vadd.f32 %v3110_v58, %v15037_v40  ;;  %v3585_v13 = vmax.f32 %v3036_v0, 0.0  ;;  %v3587_v8 = vmax.f32 %v3109_v2, 0.0  ;;  %v13455_v0 = vld [vmem:[%s17543_s11 + $0x168] sm:$0xff]  }
 0xa37   :  { %v3039_v32 = vpop.f32.mrf.mxu1  ;;  %v3112_v56 = vpop.f32.mrf.mxu0  ;;  %v13456_v2 = vld [vmem:[%s17543_s11 + $0x1e8] sm:$0xff]  }
 0xa38   :  { %v3040_v62 = vadd.f32 %v3039_v32, %v15041_v30  ;;  %v3113_v63 = vadd.f32 %v3112_v56, %v15045_v43  ;;  %v3586_v60 = vmax.f32 %v3038_v35, 0.0  ;;  %v3588_v27 = vmax.f32 %v3111_v37, 0.0  ;;  %v13453_v32 = vld [vmem:[%s17543_s11 + $0x130] sm:$0xff]  }
 0xa39   :  { %v3041_v4 = vpop.f32.mrf.mxu1  ;;  %v3114_v52 = vpop.f32.mrf.mxu0  ;;  %v13454_v56 = vld [vmem:[%s17543_s11 + $0x1b0] sm:$0xff]  }
 0xa3a   :  { %v3042_v17 = vadd.f32 %v3041_v4, %v15033_v22  ;;  %v3115_v5 = vadd.f32 %v3114_v52, %v15037_v40  ;;  %v3601_v15 = vmax.f32 %v3040_v62, 0.0  ;;  %v3603_v31 = vmax.f32 %v3113_v63, 0.0 }
 0xa3b   :  { %v3045_v57 = vpop.f32.mrf.mxu1  ;;  %v3118_v25 = vpop.f32.mrf.mxu0 }
 0xa3c   :  { %v3602_v29 = vmax.f32 %v3042_v17, 0.0  ;;  %v3604_v6 = vmax.f32 %v3115_v5, 0.0  ;;  %v3713_v50 = vpack.c.bf16 %v3601_v15, %v3585_v13  ;;  %v3715_v9 = vpack.c.bf16 %v3603_v31, %v3587_v8 }
 0xa3d   :  { %v3047_v14 = vpop.f32.mrf.mxu1  ;;  %v3120_v16 = vpop.f32.mrf.mxu0  ;;  %v3046_v26 = vadd.f32 %v3045_v57, %v15041_v30  ;;  %v3119_v41 = vadd.f32 %v3118_v25, %v15045_v43 }
 0xa3e   :  { %v3714_v44 = vpack.c.bf16 %v3602_v29, %v3586_v60  ;;  %v3716_v23 = vpack.c.bf16 %v3604_v6, %v3588_v27  ;;  %v3048_v1 = vadd.f32 %v3047_v14, %v15033_v22  ;;  %v3121_v45 = vadd.f32 %v3120_v16, %v15037_v40  ;;  %v13457_v27 = vld [vmem:[%s17543_s11 + $0x128] sm:$0xff]  }
 0xa3f   :  { %v3049_v39 = vpop.f32.mrf.mxu1  ;;  %v3122_v20 = vpop.f32.mrf.mxu0  ;;  %v3617_v5 = vmax.f32 %v3046_v26, 0.0  ;;  %v3619_v15 = vmax.f32 %v3119_v41, 0.0  ;;  %v13458_v16 = vld [vmem:[%s17543_s11 + $0x1a8] sm:$0xff]  }
 0xa40   :  { %v3050_v36 = vadd.f32 %v3049_v39, %v15041_v30  ;;  %v3123_v46 = vadd.f32 %v3122_v20, %v15045_v43  ;;  %4840 = vmatprep.mubr.bf16.mxu1 %v3714_v44  ;;  %4905 = vmatprep.mubr.bf16.mxu0 %v3716_v23  ;;  %v3618_v4 = vmax.f32 %v3048_v1, 0.0  ;;  %v3620_v31 = vmax.f32 %v3121_v45, 0.0  ;;  %v13459_v44 = vld [vmem:[%s17543_s11 + $0x160] sm:$0xff]  }
 0xa41   :  { %v3051_v49 = vpop.f32.mrf.mxu1  ;;  %v3124_v11 = vpop.f32.mrf.mxu0  ;;  %4841 = vmatmul.mubr.bf16.vlgmr.msra.gmra.mxu1 %v3713_v50  ;;  %4906 = vmatmul.mubr.bf16.vlgmr.msra.gmra.mxu0 %v3715_v9  ;;  %v13460_v9 = vld [vmem:[%s17543_s11 + $0x1e0] sm:$0xff]  }
 0xa42   :  { %v3052_v53 = vadd.f32 %v3051_v49, %v15033_v22  ;;  %v3125_v58 = vadd.f32 %v3124_v11, %v15037_v40  ;;  %12156 = vmatpush3.bf16.msra.mxu1 %v13449_v21  ;;  %12196 = vmatpush3.bf16.msra.mxu0 %v13450_v3  ;;  %v3633_v35 = vmax.f32 %v3050_v36, 0.0  ;;  %v3635_v37 = vmax.f32 %v3123_v46, 0.0  ;;  %v13461_v46 = vld [vmem:[%s17543_s11 + $0x120] sm:$0xff]  }
 0xa43   :  { %v3055_v62 = vpop.f32.mrf.mxu1  ;;  %v3128_v63 = vpop.f32.mrf.mxu0  ;;  %12157 = vmatprep.subr.bf16.mxu1 %v13451_v42  ;;  %12197 = vmatprep.subr.bf16.mxu0 %v13452_v28  ;;  %v13462_v11 = vld [vmem:[%s17543_s11 + $0x1a0] sm:$0xff]  }
 0xa44   :  { %v3634_v52 = vmax.f32 %v3052_v53, 0.0  ;;  %v3636_v17 = vmax.f32 %v3125_v58, 0.0  ;;  %v3729_v29 = vpack.c.bf16 %v3633_v35, %v3617_v5  ;;  %v3731_v6 = vpack.c.bf16 %v3635_v37, %v3619_v15  ;;  %v13463_v53 = vld [vmem:[%s17543_s11 + $0x158] sm:$0xff]  }
 0xa45   :  { %v3057_v57 = vpop.f32.mrf.mxu1  ;;  %v3130_v25 = vpop.f32.mrf.mxu0  ;;  %v3056_v39 = vadd.f32 %v3055_v62, %v15041_v30  ;;  %v3129_v20 = vadd.f32 %v3128_v63, %v15045_v43  ;;  %v15123_v5 = vsub.s32 5, %v15012_v18 }
 0xa46   :  { %12158 = vmatpush3.bf16.msra.mxu1 %v13453_v32  ;;  %12198 = vmatpush3.bf16.msra.mxu0 %v13454_v56  ;;  %v3730_v60 = vpack.c.bf16 %v3634_v52, %v3618_v4  ;;  %v3732_v14 = vpack.c.bf16 %v3636_v17, %v3620_v31  ;;  %v3058_v23 = vadd.f32 %v3057_v57, %v15033_v22  ;;  %v13465_v17 = vld [vmem:[%s17543_s11 + $0x118] sm:$0xff]  }
 0xa47   :  { %v3059_v13 = vpop.f32.mrf.mxu1  ;;  %v3132_v8 = vpop.f32.mrf.mxu0  ;;  %12159 = vmatprep.subr.bf16.mxu1 %v13455_v0  ;;  %12199 = vmatprep.subr.bf16.mxu0 %v13456_v2  ;;  %v3131_v21 = vadd.f32 %v3130_v25, %v15037_v40  ;;  %v3649_v37 = vmax.f32 %v3056_v39, 0.0  ;;  %v3651_v62 = vmax.f32 %v3129_v20, 0.0  ;;  %v13464_v2 = vld [vmem:[%s17543_s11 + $0x1d8] sm:$0xff]   ;;  %17618 = vst [vmem:[#allocation16_spill] sm:$0xff] %v15123_v5 }
 0xa48   :  { %v3060_v3 = vadd.f32 %v3059_v13, %v15041_v30  ;;  %v3133_v50 = vadd.f32 %v3132_v8, %v15045_v43  ;;  %4848 = vmatprep.mubr.bf16.mxu1 %v3730_v60  ;;  %4913 = vmatprep.mubr.bf16.mxu0 %v3732_v14  ;;  %v3650_v58 = vmax.f32 %v3058_v23, 0.0 }
 0xa49   :  { %v3061_v42 = vpop.f32.mrf.mxu1  ;;  %v3134_v28 = vpop.f32.mrf.mxu0  ;;  %4849 = vmatmul.mubr.bf16.gmra.mxu1 %v3729_v29  ;;  %4914 = vmatmul.mubr.bf16.gmra.mxu0 %v3731_v6  ;;  %v3652_v32 = vmax.f32 %v3131_v21, 0.0  ;;  %v15130_v29 = vsub.s32 7, %v15012_v18  ;;  %v13467_v6 = vld [vmem:[%s17543_s11 + $0x150] sm:$0xff]  }
 0xa4a   :  { %v3062_v1 = vadd.f32 %v3061_v42, %v15033_v22  ;;  %v3135_v36 = vadd.f32 %v3134_v28, %v15037_v40  ;;  %12160 = vmatpush3.bf16.msra.mxu1 %v13457_v27  ;;  %v3665_v26 = vmax.f32 %v3060_v3, 0.0  ;;  %v3667_v41 = vmax.f32 %v3133_v50, 0.0  ;;  %12200 = vmatpush3.bf16.msra.mxu0 %v13458_v16  ;;  %v13466_v27 = vld [vmem:[%s17543_s11 + $0x198] sm:$0xff]   ;;  %v13468_v16 = vld [vmem:[%s17543_s11 + $0x1d0] sm:$0xff]  }
 0xa4b   :  { %v3065_v45 = vpop.f32.mrf.mxu1  ;;  %v3138_v49 = vpop.f32.mrf.mxu0  ;;  %12161 = vmatprep.subr.bf16.mxu1 %v13459_v44  ;;  %12201 = vmatprep.subr.bf16.mxu0 %v13460_v9  ;;  %17619 = vst [vmem:[#allocation17_spill] sm:$0xff] %v15130_v29  ;;  %v15144_v50 = vsub.s32 4, %v15012_v18  ;;  %v15147_v9 = vsub.s32 6, %v15012_v18  ;;  %v15160_v18 = vrot.slane %v15029_v12, %v15130_v29 }
 0xa4c   :  { %v3666_v56 = vmax.f32 %v3062_v1, 0.0  ;;  %v3668_v35 = vmax.f32 %v3135_v36, 0.0  ;;  %v3745_v15 = vpack.c.bf16 %v3665_v26, %v3649_v37  ;;  %v3747_v31 = vpack.c.bf16 %v3667_v41, %v3651_v62 }
 0xa4d   :  { %v3067_v63 = vpop.f32.mrf.mxu1  ;;  %v3140_v0 = vpop.f32.mrf.mxu0  ;;  %v3066_v44 = vadd.f32 %v3065_v45, %v15041_v30  ;;  %v3139_v23 = vadd.f32 %v3138_v49, %v15045_v43  ;;  %17620 = vst [vmem:[#allocation18_spill] sm:$0xff] %v15144_v50  ;;  %17621 = vst [vmem:[#allocation19_spill] sm:$0xff] %v15147_v9  ;;  %v15156_v36 = vrot.slane %v15029_v12, %v15123_v5 }
 0xa4e   :  { %12162 = vmatpush3.bf16.msra.mxu1 %v13461_v46  ;;  %v3746_v4 = vpack.c.bf16 %v3666_v56, %v3650_v58  ;;  %v3748_v52 = vpack.c.bf16 %v3668_v35, %v3652_v32  ;;  %v3068_v57 = vadd.f32 %v3067_v63, %v15033_v22  ;;  %12202 = vmatpush3.bf16.msra.mxu0 %v13462_v11  ;;  %v13472_v35 = vld [vmem:[%s17543_s11 + $0x1c8] sm:$0xff]  }
 0xa4f   :  { %v3069_v25 = vpop.f32.mrf.mxu1  ;;  %v3142_v60 = vpop.f32.mrf.mxu0  ;;  %12163 = vmatprep.subr.bf16.mxu1 %v13463_v53  ;;  %v3141_v13 = vadd.f32 %v3140_v0, %v15037_v40  ;;  %12203 = vmatprep.subr.bf16.mxu0 %v13464_v2  ;;  %v3681_v49 = vmax.f32 %v3066_v44, 0.0  ;;  %v3683_v11 = vmax.f32 %v3139_v23, 0.0  ;;  %v15170_v53 = vrot.slane %v15029_v12, %v15144_v50  ;;  %v13473_v63 = vld [vmem:[%s17543_s11 + $0x108] sm:$0xff]   ;;  %v13477_v44 = vld [vmem:[%s17543_s11 + $0x100] sm:$0xff]  }
 0xa50   :  { %v3070_v8 = vadd.f32 %v3069_v25, %v15041_v30  ;;  %v3143_v14 = vadd.f32 %v3142_v60, %v15045_v43  ;;  %4856 = vmatprep.mubr.bf16.mxu1 %v3746_v4  ;;  %4921 = vmatprep.mubr.bf16.mxu0 %v3748_v52  ;;  %v13469_v30 = vld [vmem:[%s17543_s11 + $0x110] sm:$0xff]   ;;  %v3682_v46 = vmax.f32 %v3068_v57, 0.0  ;;  %v15174_v58 = vrot.slane %v15029_v12, %v15147_v9  ;;  %v13476_v60 = vld [vmem:[%s17543_s11 + $0x1c0] sm:$0xff]  }
 0xa51   :  { %v3071_v21 = vpop.f32.mrf.mxu1  ;;  %v3144_v3 = vpop.f32.mrf.mxu0  ;;  %4857 = vmatmul.mubr.bf16.gmra.mxu1 %v3745_v15  ;;  %4922 = vmatmul.mubr.bf16.gmra.mxu0 %v3747_v31  ;;  %v3684_v26 = vmax.f32 %v3141_v13, 0.0  ;;  %v13475_v15 = vld [vmem:[%s17543_s11 + $0x140] sm:$0xff]  }
 0xa52   :  { %v3072_v39 = vadd.f32 %v3071_v21, %v15033_v22  ;;  %v3145_v20 = vadd.f32 %v3144_v3, %v15037_v40  ;;  %12164 = vmatpush3.bf16.msra.mxu1 %v13465_v17  ;;  %v3697_v43 = vmax.f32 %v3070_v8, 0.0  ;;  %v3699_v42 = vmax.f32 %v3143_v14, 0.0  ;;  %12204 = vmatpush3.bf16.msra.mxu0 %v13466_v27  ;;  %v13470_v22 = vld [vmem:[%s17543_s11 + $0x190] sm:$0xff]   ;;  %v13471_v40 = vld [vmem:[%s17543_s11 + $0x148] sm:$0xff]  }
 0xa53   :  { %v3181_v28 = vpop.f32.mrf.mxu1  ;;  %v3254_v1 = vpop.f32.mrf.mxu0  ;;  %12165 = vmatprep.subr.bf16.mxu1 %v13467_v6  ;;  %12205 = vmatprep.subr.bf16.mxu0 %v13468_v16  ;;  %v13474_v17 = vld [vmem:[%s17543_s11 + $0x188] sm:$0xff]  }
 0xa54   :  { %v3698_v41 = vmax.f32 %v3072_v39, 0.0  ;;  %v3700_v45 = vmax.f32 %v3145_v20, 0.0  ;;  %v3761_v0 = vpack.c.bf16 %v3697_v43, %v3681_v49  ;;  %v3763_v2 = vpack.c.bf16 %v3699_v42, %v3683_v11  ;;  %v13478_v20 = vld [vmem:[%s17543_s11 + $0x180] sm:$0xff]   ;;  %v13481_v11 = vld [vmem:[%s17543_s11 + $0x238] sm:$0xff]  }
 0xa55   :  { %v3183_v32 = vpop.f32.mrf.mxu1  ;;  %v3256_v56 = vpop.f32.mrf.mxu0  ;;  %v3182_v27 = vadd.f32 %v3181_v28, %v15170_v53  ;;  %v3255_v6 = vadd.f32 %v3254_v1, %v15174_v58 }
 0xa56   :  { %12166 = vmatpush3.bf16.msra.mxu1 %v13469_v30  ;;  %v3762_v37 = vpack.c.bf16 %v3698_v41, %v3682_v46  ;;  %v3764_v62 = vpack.c.bf16 %v3700_v45, %v3684_v26  ;;  %v3184_v4 = vadd.f32 %v3183_v32, %v15156_v36  ;;  %12206 = vmatpush3.bf16.msra.mxu0 %v13470_v22  ;;  %v13479_v30 = vld [vmem:[%s17543_s11 + $0x278] sm:$0xff]  }
 0xa57   :  { %v3185_v12 = vpop.f32.mrf.mxu1  ;;  %v3258_v52 = vpop.f32.mrf.mxu0  ;;  %12167 = vmatprep.subr.bf16.mxu1 %v13471_v40  ;;  %v3257_v31 = vadd.f32 %v3256_v56, %v15160_v18  ;;  %12207 = vmatprep.subr.bf16.mxu0 %v13472_v35  ;;  %v3589_v22 = vmax.f32 %v3182_v27, 0.0  ;;  %v3591_v40 = vmax.f32 %v3255_v6, 0.0  ;;  %v13480_v41 = vld [vmem:[%s17543_s11 + $0x2f8] sm:$0xff]   ;;  %v13485_v27 = vld [vmem:[%s17543_s11 + $0x230] sm:$0xff]  }
 0xa58   :  { %v3186_v57 = vadd.f32 %v3185_v12, %v15170_v53  ;;  %v3259_v25 = vadd.f32 %v3258_v52, %v15174_v58  ;;  %4864 = vmatprep.mubr.bf16.mxu1 %v3762_v37  ;;  %4929 = vmatprep.mubr.bf16.mxu0 %v3764_v62  ;;  %v3590_v43 = vmax.f32 %v3184_v4, 0.0  ;;  %v13484_v52 = vld [vmem:[%s17543_s11 + $0x2f0] sm:$0xff]  }
 0xa59   :  { %v3187_v13 = vpop.f32.mrf.mxu1  ;;  %v3260_v8 = vpop.f32.mrf.mxu0  ;;  %4865 = vmatmul.mubr.bf16.gmra.mxu1 %v3761_v0  ;;  %4930 = vmatmul.mubr.bf16.gmra.mxu0 %v3763_v2  ;;  %v3592_v42 = vmax.f32 %v3257_v31, 0.0  ;;  %v13483_v0 = vld [vmem:[%s17543_s11 + $0x270] sm:$0xff]  }
 0xa5a   :  { %v3188_v14 = vadd.f32 %v3187_v13, %v15156_v36  ;;  %v3261_v16 = vadd.f32 %v3260_v8, %v15160_v18  ;;  %12168 = vmatpush3.bf16.msra.mxu1 %v13473_v63  ;;  %v3605_v23 = vmax.f32 %v3186_v57, 0.0  ;;  %v3607_v21 = vmax.f32 %v3259_v25, 0.0  ;;  %12208 = vmatpush3.bf16.msra.mxu0 %v13474_v17  ;;  %v13482_v63 = vld [vmem:[%s17543_s11 + $0x2b8] sm:$0xff]  }
 0xa5b   :  { %v3191_v3 = vpop.f32.mrf.mxu1  ;;  %v3264_v39 = vpop.f32.mrf.mxu0  ;;  %12169 = vmatprep.subr.bf16.mxu1 %v13475_v15  ;;  %12209 = vmatprep.subr.bf16.mxu0 %v13476_v60 }
 0xa5c   :  { %v3606_v28 = vmax.f32 %v3188_v14, 0.0  ;;  %v3608_v1 = vmax.f32 %v3261_v16, 0.0  ;;  %v3717_v32 = vpack.c.bf16 %v3605_v23, %v3589_v22  ;;  %v3719_v56 = vpack.c.bf16 %v3607_v21, %v3591_v40  ;;  %v13486_v16 = vld [vmem:[%s17543_s11 + $0x2b0] sm:$0xff]   ;;  %v13489_v40 = vld [vmem:[%s17543_s11 + $0x228] sm:$0xff]  }
 0xa5d   :  { %v3193_v46 = vpop.f32.mrf.mxu1  ;;  %v3266_v26 = vpop.f32.mrf.mxu0  ;;  %v3192_v17 = vadd.f32 %v3191_v3, %v15170_v53  ;;  %v3265_v15 = vadd.f32 %v3264_v39, %v15174_v58 }
 0xa5e   :  { %12170 = vmatpush3.bf16.msra.mxu1 %v13477_v44  ;;  %v3718_v45 = vpack.c.bf16 %v3606_v28, %v3590_v43  ;;  %v3720_v49 = vpack.c.bf16 %v3608_v1, %v3592_v42  ;;  %v3194_v35 = vadd.f32 %v3193_v46, %v15156_v36  ;;  %12210 = vmatpush3.bf16.msra.mxu0 %v13478_v20  ;;  %v13487_v44 = vld [vmem:[%s17543_s11 + $0x268] sm:$0xff]  }
 0xa5f   :  { %v3195_v37 = vpop.f32.mrf.mxu1  ;;  %v3268_v62 = vpop.f32.mrf.mxu0  ;;  %12235 = vmatprep.subr.bf16.mxu1 %v13479_v30  ;;  %v3267_v2 = vadd.f32 %v3266_v26, %v15160_v18  ;;  %12275 = vmatprep.subr.bf16.mxu0 %v13480_v41  ;;  %v3621_v20 = vmax.f32 %v3192_v17, 0.0  ;;  %v3623_v30 = vmax.f32 %v3265_v15, 0.0  ;;  %v13488_v28 = vld [vmem:[%s17543_s11 + $0x2e8] sm:$0xff]   ;;  %v13493_v17 = vld [vmem:[%s17543_s11 + $0x220] sm:$0xff]  }
 0xa60   :  { %v3196_v4 = vadd.f32 %v3195_v37, %v15170_v53  ;;  %v3269_v12 = vadd.f32 %v3268_v62, %v15174_v58  ;;  %4970 = vmatprep.mubr.bf16.mxu1 %v3718_v45  ;;  %5035 = vmatprep.mubr.bf16.mxu0 %v3720_v49  ;;  %v3622_v23 = vmax.f32 %v3194_v35, 0.0  ;;  %v13492_v62 = vld [vmem:[%s17543_s11 + $0x2e0] sm:$0xff]  }
 0xa61   :  { %v3197_v31 = vpop.f32.mrf.mxu1  ;;  %v3270_v57 = vpop.f32.mrf.mxu0  ;;  %4971 = vmatmul.mubr.bf16.vlgmr.msra.gmra.mxu1 %v3717_v32  ;;  %5036 = vmatmul.mubr.bf16.vlgmr.msra.gmra.mxu0 %v3719_v56  ;;  %v3624_v21 = vmax.f32 %v3267_v2, 0.0  ;;  %v13491_v32 = vld [vmem:[%s17543_s11 + $0x260] sm:$0xff]  }
 0xa62   :  { %v3198_v25 = vadd.f32 %v3197_v31, %v15156_v36  ;;  %v3271_v60 = vadd.f32 %v3270_v57, %v15160_v18  ;;  %12236 = vmatpush3.bf16.msra.mxu1 %v13481_v11  ;;  %v3637_v6 = vmax.f32 %v3196_v4, 0.0  ;;  %v3639_v13 = vmax.f32 %v3269_v12, 0.0  ;;  %12276 = vmatpush3.bf16.msra.mxu0 %v13482_v63  ;;  %v13490_v11 = vld [vmem:[%s17543_s11 + $0x2a8] sm:$0xff]  }
 0xa63   :  { %v3201_v8 = vpop.f32.mrf.mxu1  ;;  %v3274_v14 = vpop.f32.mrf.mxu0  ;;  %12237 = vmatprep.subr.bf16.mxu1 %v13483_v0  ;;  %12277 = vmatprep.subr.bf16.mxu0 %v13484_v52 }
 0xa64   :  { %v3638_v3 = vmax.f32 %v3198_v25, 0.0  ;;  %v3640_v39 = vmax.f32 %v3271_v60, 0.0  ;;  %v3733_v46 = vpack.c.bf16 %v3637_v6, %v3621_v20  ;;  %v3735_v26 = vpack.c.bf16 %v3639_v13, %v3623_v30  ;;  %v13494_v60 = vld [vmem:[%s17543_s11 + $0x2a0] sm:$0xff]   ;;  %v13497_v30 = vld [vmem:[%s17543_s11 + $0x218] sm:$0xff]  }
 0xa65   :  { %v3203_v43 = vpop.f32.mrf.mxu1  ;;  %v3276_v42 = vpop.f32.mrf.mxu0  ;;  %v3202_v63 = vadd.f32 %v3201_v8, %v15170_v53  ;;  %v3275_v0 = vadd.f32 %v3274_v14, %v15174_v58 }
 0xa66   :  { %12238 = vmatpush3.bf16.msra.mxu1 %v13485_v27  ;;  %v3734_v1 = vpack.c.bf16 %v3638_v3, %v3622_v23  ;;  %v3736_v22 = vpack.c.bf16 %v3640_v39, %v3624_v21  ;;  %v3204_v41 = vadd.f32 %v3203_v43, %v15156_v36  ;;  %12278 = vmatpush3.bf16.msra.mxu0 %v13486_v16  ;;  %v13495_v27 = vld [vmem:[%s17543_s11 + $0x258] sm:$0xff]  }
 0xa67   :  { %v3205_v45 = vpop.f32.mrf.mxu1  ;;  %v3278_v49 = vpop.f32.mrf.mxu0  ;;  %12239 = vmatprep.subr.bf16.mxu1 %v13487_v44  ;;  %v3277_v56 = vadd.f32 %v3276_v42, %v15160_v18  ;;  %12279 = vmatprep.subr.bf16.mxu0 %v13488_v28  ;;  %v3653_v16 = vmax.f32 %v3202_v63, 0.0  ;;  %v3655_v44 = vmax.f32 %v3275_v0, 0.0  ;;  %v13496_v3 = vld [vmem:[%s17543_s11 + $0x2d8] sm:$0xff]   ;;  %v15298_v63 = vld [vmem:[%s17542_s10 + $0x8] sm:$0xff] }
 0xa68   :  { %v3206_v35 = vadd.f32 %v3205_v45, %v15170_v53  ;;  %v3279_v37 = vadd.f32 %v3278_v49, %v15174_v58  ;;  %4978 = vmatprep.mubr.bf16.mxu1 %v3734_v1  ;;  %5043 = vmatprep.mubr.bf16.mxu0 %v3736_v22  ;;  %v3654_v6 = vmax.f32 %v3204_v41, 0.0  ;;  %v13500_v49 = vld [vmem:[%s17543_s11 + $0x2d0] sm:$0xff]  }
 0xa69   :  { %v3207_v2 = vpop.f32.mrf.mxu1  ;;  %v3280_v4 = vpop.f32.mrf.mxu0  ;;  %4979 = vmatmul.mubr.bf16.gmra.mxu1 %v3733_v46  ;;  %5044 = vmatmul.mubr.bf16.gmra.mxu0 %v3735_v26  ;;  %v3656_v13 = vmax.f32 %v3277_v56, 0.0  ;;  %v13499_v46 = vld [vmem:[%s17543_s11 + $0x250] sm:$0xff]  }
 0xa6a   :  { %v3208_v12 = vadd.f32 %v3207_v2, %v15156_v36  ;;  %v3281_v52 = vadd.f32 %v3280_v4, %v15160_v18  ;;  %12240 = vmatpush3.bf16.msra.mxu1 %v13489_v40  ;;  %v3669_v15 = vmax.f32 %v3206_v35, 0.0  ;;  %v3671_v31 = vmax.f32 %v3279_v37, 0.0  ;;  %12280 = vmatpush3.bf16.msra.mxu0 %v13490_v11  ;;  %v13498_v40 = vld [vmem:[%s17543_s11 + $0x298] sm:$0xff]  }
 0xa6b   :  { %v3211_v57 = vpop.f32.mrf.mxu1  ;;  %v3284_v25 = vpop.f32.mrf.mxu0  ;;  %12241 = vmatprep.subr.bf16.mxu1 %v13491_v32  ;;  %12281 = vmatprep.subr.bf16.mxu0 %v13492_v62 }
 0xa6c   :  { %v3670_v8 = vmax.f32 %v3208_v12, 0.0  ;;  %v3672_v14 = vmax.f32 %v3281_v52, 0.0  ;;  %v3749_v43 = vpack.c.bf16 %v3669_v15, %v3653_v16  ;;  %v3751_v42 = vpack.c.bf16 %v3671_v31, %v3655_v44  ;;  %v13502_v12 = vld [vmem:[%s17543_s11 + $0x290] sm:$0xff]   ;;  %v13503_v52 = vld [vmem:[%s17543_s11 + $0x248] sm:$0xff]  }
 0xa6d   :  { %v3213_v23 = vpop.f32.mrf.mxu1  ;;  %v3286_v21 = vpop.f32.mrf.mxu0  ;;  %v3212_v11 = vadd.f32 %v3211_v57, %v15170_v53  ;;  %v3285_v32 = vadd.f32 %v3284_v25, %v15174_v58 }
 0xa6e   :  { %12242 = vmatpush3.bf16.msra.mxu1 %v13493_v17  ;;  %v3750_v39 = vpack.c.bf16 %v3670_v8, %v3654_v6  ;;  %v3752_v20 = vpack.c.bf16 %v3672_v14, %v3656_v13  ;;  %v3214_v28 = vadd.f32 %v3213_v23, %v15156_v36  ;;  %12282 = vmatpush3.bf16.msra.mxu0 %v13494_v60  ;;  %v13504_v14 = vld [vmem:[%s17543_s11 + $0x2c8] sm:$0xff]  }
 0xa6f   :  { %v3215_v1 = vpop.f32.mrf.mxu1  ;;  %v3288_v22 = vpop.f32.mrf.mxu0  ;;  %12243 = vmatprep.subr.bf16.mxu1 %v13495_v27  ;;  %v3287_v26 = vadd.f32 %v3286_v21, %v15160_v18  ;;  %12283 = vmatprep.subr.bf16.mxu0 %v13496_v3  ;;  %v3685_v25 = vmax.f32 %v3212_v11, 0.0  ;;  %v3687_v60 = vmax.f32 %v3285_v32, 0.0  ;;  %v15319_v27 = vrot.slane %v15298_v63, %v15021_v51  ;;  %v13505_v23 = vld [vmem:[%s17543_s11 + $0x208] sm:$0xff]   ;;  %v13509_v32 = vld [vmem:[%s17543_s11 + $0x200] sm:$0xff]  }
 0xa70   :  { %v3216_v41 = vadd.f32 %v3215_v1, %v15170_v53  ;;  %v3289_v45 = vadd.f32 %v3288_v22, %v15174_v58  ;;  %4986 = vmatprep.mubr.bf16.mxu1 %v3750_v39  ;;  %5051 = vmatprep.mubr.bf16.mxu0 %v3752_v20  ;;  %v13501_v53 = vld [vmem:[%s17543_s11 + $0x210] sm:$0xff]   ;;  %v3686_v17 = vmax.f32 %v3214_v28, 0.0  ;;  %v15323_v6 = vrot.slane %v15298_v63, %v15024_v47 }
 0xa71   :  { %v3217_v56 = vpop.f32.mrf.mxu1  ;;  %v3290_v35 = vpop.f32.mrf.mxu0  ;;  %4987 = vmatmul.mubr.bf16.gmra.mxu1 %v3749_v43  ;;  %5052 = vmatmul.mubr.bf16.gmra.mxu0 %v3751_v42  ;;  %v3688_v15 = vmax.f32 %v3287_v26, 0.0  ;;  %v13506_v43 = vld [vmem:[%s17543_s11 + $0x288] sm:$0xff]   ;;  %v13507_v42 = vld [vmem:[%s17543_s11 + $0x240] sm:$0xff]  }
 0xa72   :  { %v3218_v37 = vadd.f32 %v3217_v56, %v15156_v36  ;;  %v3291_v62 = vadd.f32 %v3290_v35, %v15160_v18  ;;  %12244 = vmatpush3.bf16.msra.mxu1 %v13497_v30  ;;  %v3701_v58 = vmax.f32 %v3216_v41, 0.0  ;;  %v3703_v0 = vmax.f32 %v3289_v45, 0.0  ;;  %12284 = vmatpush3.bf16.msra.mxu0 %v13498_v40  ;;  %v13508_v40 = vld [vmem:[%s17543_s11 + $0x2c0] sm:$0xff]  }
 0xa73   :  { %v3327_v2 = vpop.f32.mrf.mxu1  ;;  %v3400_v4 = vpop.f32.mrf.mxu0  ;;  %v15305_v36 = vrot.slane %v15298_v63, %v15015_v33  ;;  %v15309_v18 = vrot.slane %v15298_v63, %v15018_v38  ;;  %12245 = vmatprep.subr.bf16.mxu1 %v13499_v46  ;;  %12285 = vmatprep.subr.bf16.mxu0 %v13500_v49 }
 0xa74   :  { %v3702_v31 = vmax.f32 %v3218_v37, 0.0  ;;  %v3704_v57 = vmax.f32 %v3291_v62, 0.0  ;;  %v3765_v21 = vpack.c.bf16 %v3701_v58, %v3685_v25  ;;  %v3767_v3 = vpack.c.bf16 %v3703_v0, %v3687_v60  ;;  %v13511_v58 = vld [vmem:[%s17543_s11 + $0x378] sm:$0xff]  }
 0xa75   :  { %v3329_v13 = vpop.f32.mrf.mxu1  ;;  %v3402_v8 = vpop.f32.mrf.mxu0  ;;  %v3328_v46 = vadd.f32 %v3327_v2, %v15319_v27  ;;  %v3401_v26 = vadd.f32 %v3400_v4, %v15323_v6 }
 0xa76   :  { %12246 = vmatpush3.bf16.msra.mxu1 %v13501_v53  ;;  %v3766_v16 = vpack.c.bf16 %v3702_v31, %v3686_v17  ;;  %v3768_v44 = vpack.c.bf16 %v3704_v57, %v3688_v15  ;;  %v3330_v39 = vadd.f32 %v3329_v13, %v15305_v36  ;;  %12286 = vmatpush3.bf16.msra.mxu0 %v13502_v12  ;;  %v13510_v53 = vld [vmem:[%s17543_s11 + $0x280] sm:$0xff]   ;;  %v13512_v57 = vld [vmem:[%s17543_s11 + $0x3f8] sm:$0xff]  }
 0xa77   :  { %v3331_v20 = vpop.f32.mrf.mxu1  ;;  %v3404_v30 = vpop.f32.mrf.mxu0  ;;  %12247 = vmatprep.subr.bf16.mxu1 %v13503_v52  ;;  %v3403_v28 = vadd.f32 %v3402_v8, %v15309_v18  ;;  %12287 = vmatprep.subr.bf16.mxu0 %v13504_v14  ;;  %v3593_v52 = vmax.f32 %v3328_v46, 0.0  ;;  %v3595_v17 = vmax.f32 %v3401_v26, 0.0  ;;  %v13513_v13 = vld [vmem:[%s17543_s11 + $0x338] sm:$0xff]   ;;  %v13517_v26 = vld [vmem:[%s17543_s11 + $0x330] sm:$0xff]  }
 0xa78   :  { %v3332_v1 = vadd.f32 %v3331_v20, %v15319_v27  ;;  %v3405_v22 = vadd.f32 %v3404_v30, %v15323_v6  ;;  %4994 = vmatprep.mubr.bf16.mxu1 %v3766_v16  ;;  %5059 = vmatprep.mubr.bf16.mxu0 %v3768_v44  ;;  %v3594_v0 = vmax.f32 %v3330_v39, 0.0 }
 0xa79   :  { %v3333_v41 = vpop.f32.mrf.mxu1  ;;  %v3406_v45 = vpop.f32.mrf.mxu0  ;;  %4995 = vmatmul.mubr.bf16.gmra.mxu1 %v3765_v21  ;;  %5060 = vmatmul.mubr.bf16.gmra.mxu0 %v3767_v3  ;;  %v3596_v2 = vmax.f32 %v3403_v28, 0.0  ;;  %v13514_v21 = vld [vmem:[%s17543_s11 + $0x3b8] sm:$0xff]   ;;  %v13515_v3 = vld [vmem:[%s17543_s11 + $0x370] sm:$0xff]  }
 0xa7a   :  { %v3334_v49 = vadd.f32 %v3333_v41, %v15305_v36  ;;  %v3407_v11 = vadd.f32 %v3406_v45, %v15309_v18  ;;  %12248 = vmatpush3.bf16.msra.mxu1 %v13505_v23  ;;  %v3609_v56 = vmax.f32 %v3332_v1, 0.0  ;;  %v3611_v35 = vmax.f32 %v3405_v22, 0.0  ;;  %12288 = vmatpush3.bf16.msra.mxu0 %v13506_v43  ;;  %v13516_v43 = vld [vmem:[%s17543_s11 + $0x3f0] sm:$0xff]  }
 0xa7b   :  { %v3337_v37 = vpop.f32.mrf.mxu1  ;;  %v3410_v62 = vpop.f32.mrf.mxu0  ;;  %12249 = vmatprep.subr.bf16.mxu1 %v13507_v42  ;;  %12289 = vmatprep.subr.bf16.mxu0 %v13508_v40 }
 0xa7c   :  { %v3610_v4 = vmax.f32 %v3334_v49, 0.0  ;;  %v3612_v12 = vmax.f32 %v3407_v11, 0.0  ;;  %v3721_v8 = vpack.c.bf16 %v3609_v56, %v3593_v52  ;;  %v3723_v14 = vpack.c.bf16 %v3611_v35, %v3595_v17  ;;  %v13519_v56 = vld [vmem:[%s17543_s11 + $0x368] sm:$0xff]  }
 0xa7d   :  { %v3339_v15 = vpop.f32.mrf.mxu1  ;;  %v3412_v31 = vpop.f32.mrf.mxu0  ;;  %v3338_v42 = vadd.f32 %v3337_v37, %v15319_v27  ;;  %v3411_v28 = vadd.f32 %v3410_v62, %v15323_v6 }
 0xa7e   :  { %12250 = vmatpush3.bf16.msra.mxu1 %v13509_v32  ;;  %v3722_v25 = vpack.c.bf16 %v3610_v4, %v3594_v0  ;;  %v3724_v60 = vpack.c.bf16 %v3612_v12, %v3596_v2  ;;  %v3340_v16 = vadd.f32 %v3339_v15, %v15305_v36  ;;  %12290 = vmatpush3.bf16.msra.mxu0 %v13510_v53  ;;  %v13518_v32 = vld [vmem:[%s17543_s11 + $0x3b0] sm:$0xff]   ;;  %v13520_v12 = vld [vmem:[%s17543_s11 + $0x3e8] sm:$0xff]  }
 0xa7f   :  { %v3341_v44 = vpop.f32.mrf.mxu1  ;;  %v3414_v23 = vpop.f32.mrf.mxu0  ;;  %12315 = vmatprep.subr.bf16.mxu1 %v13511_v58  ;;  %v3413_v39 = vadd.f32 %v3412_v31, %v15309_v18  ;;  %12355 = vmatprep.subr.bf16.mxu0 %v13512_v57  ;;  %v3625_v58 = vmax.f32 %v3338_v42, 0.0  ;;  %v3627_v0 = vmax.f32 %v3411_v28, 0.0  ;;  %v13521_v15 = vld [vmem:[%s17543_s11 + $0x328] sm:$0xff]   ;;  %v13525_v28 = vld [vmem:[%s17543_s11 + $0x320] sm:$0xff]  }
 0xa80   :  { %v3342_v20 = vadd.f32 %v3341_v44, %v15319_v27  ;;  %v3415_v30 = vadd.f32 %v3414_v23, %v15323_v6  ;;  %5100 = vmatprep.mubr.bf16.mxu1 %v3722_v25  ;;  %5165 = vmatprep.mubr.bf16.mxu0 %v3724_v60  ;;  %v3626_v35 = vmax.f32 %v3340_v16, 0.0 }
 0xa81   :  { %v3343_v1 = vpop.f32.mrf.mxu1  ;;  %v3416_v22 = vpop.f32.mrf.mxu0  ;;  %5101 = vmatmul.mubr.bf16.vlgmr.msra.gmra.mxu1 %v3721_v8  ;;  %5166 = vmatmul.mubr.bf16.vlgmr.msra.gmra.mxu0 %v3723_v14  ;;  %v3628_v37 = vmax.f32 %v3413_v39, 0.0  ;;  %v13522_v8 = vld [vmem:[%s17543_s11 + $0x3a8] sm:$0xff]   ;;  %v13523_v14 = vld [vmem:[%s17543_s11 + $0x360] sm:$0xff]  }
 0xa82   :  { %v3344_v40 = vadd.f32 %v3343_v1, %v15305_v36  ;;  %v3417_v46 = vadd.f32 %v3416_v22, %v15309_v18  ;;  %12316 = vmatpush3.bf16.msra.mxu1 %v13513_v13  ;;  %v3641_v41 = vmax.f32 %v3342_v20, 0.0  ;;  %v3643_v45 = vmax.f32 %v3415_v30, 0.0  ;;  %12356 = vmatpush3.bf16.msra.mxu0 %v13514_v21  ;;  %v13524_v21 = vld [vmem:[%s17543_s11 + $0x3e0] sm:$0xff]  }
 0xa83   :  { %v3347_v49 = vpop.f32.mrf.mxu1  ;;  %v3420_v11 = vpop.f32.mrf.mxu0  ;;  %12317 = vmatprep.subr.bf16.mxu1 %v13515_v3  ;;  %12357 = vmatprep.subr.bf16.mxu0 %v13516_v43 }
 0xa84   :  { %v3642_v62 = vmax.f32 %v3344_v40, 0.0  ;;  %v3644_v53 = vmax.f32 %v3417_v46, 0.0  ;;  %v3737_v31 = vpack.c.bf16 %v3641_v41, %v3625_v58  ;;  %v3739_v57 = vpack.c.bf16 %v3643_v45, %v3627_v0  ;;  %v13527_v41 = vld [vmem:[%s17543_s11 + $0x358] sm:$0xff]  }
 0xa85   :  { %v3349_v2 = vpop.f32.mrf.mxu1  ;;  %v3422_v4 = vpop.f32.mrf.mxu0  ;;  %v3348_v3 = vadd.f32 %v3347_v49, %v15319_v27  ;;  %v3421_v39 = vadd.f32 %v3420_v11, %v15323_v6 }
 0xa86   :  { %12318 = vmatpush3.bf16.msra.mxu1 %v13517_v26  ;;  %v3738_v52 = vpack.c.bf16 %v3642_v62, %v3626_v35  ;;  %v3740_v17 = vpack.c.bf16 %v3644_v53, %v3628_v37  ;;  %v3350_v25 = vadd.f32 %v3349_v2, %v15305_v36  ;;  %12358 = vmatpush3.bf16.msra.mxu0 %v13518_v32  ;;  %v13526_v26 = vld [vmem:[%s17543_s11 + $0x3a0] sm:$0xff]   ;;  %v13528_v53 = vld [vmem:[%s17543_s11 + $0x3d8] sm:$0xff]  }
 0xa87   :  { %v3351_v60 = vpop.f32.mrf.mxu1  ;;  %v3424_v13 = vpop.f32.mrf.mxu0  ;;  %12319 = vmatprep.subr.bf16.mxu1 %v13519_v56  ;;  %v3423_v16 = vadd.f32 %v3422_v4, %v15309_v18  ;;  %12359 = vmatprep.subr.bf16.mxu0 %v13520_v12  ;;  %v3657_v56 = vmax.f32 %v3348_v3, 0.0  ;;  %v3659_v35 = vmax.f32 %v3421_v39, 0.0  ;;  %v13529_v2 = vld [vmem:[%s17543_s11 + $0x318] sm:$0xff]   ;;  %v13533_v39 = vld [vmem:[%s17543_s11 + $0x310] sm:$0xff]  }
 0xa88   :  { %v3352_v44 = vadd.f32 %v3351_v60, %v15319_v27  ;;  %v3425_v23 = vadd.f32 %v3424_v13, %v15323_v6  ;;  %5108 = vmatprep.mubr.bf16.mxu1 %v3738_v52  ;;  %5173 = vmatprep.mubr.bf16.mxu0 %v3740_v17  ;;  %v3658_v45 = vmax.f32 %v3350_v25, 0.0 }
 0xa89   :  { %v3353_v20 = vpop.f32.mrf.mxu1  ;;  %v3426_v30 = vpop.f32.mrf.mxu0  ;;  %5109 = vmatmul.mubr.bf16.gmra.mxu1 %v3737_v31  ;;  %5174 = vmatmul.mubr.bf16.gmra.mxu0 %v3739_v57  ;;  %v3660_v49 = vmax.f32 %v3423_v16, 0.0  ;;  %v13530_v31 = vld [vmem:[%s17543_s11 + $0x398] sm:$0xff]   ;;  %v13531_v57 = vld [vmem:[%s17543_s11 + $0x350] sm:$0xff]  }
 0xa8a   :  { %v3354_v43 = vadd.f32 %v3353_v20, %v15305_v36  ;;  %v3427_v42 = vadd.f32 %v3426_v30, %v15309_v18  ;;  %12320 = vmatpush3.bf16.msra.mxu1 %v13521_v15  ;;  %v3673_v1 = vmax.f32 %v3352_v44, 0.0  ;;  %v3675_v22 = vmax.f32 %v3425_v23, 0.0  ;;  %12360 = vmatpush3.bf16.msra.mxu0 %v13522_v8  ;;  %v13532_v8 = vld [vmem:[%s17543_s11 + $0x3d0] sm:$0xff]  }
 0xa8b   :  { %v3357_v40 = vpop.f32.mrf.mxu1  ;;  %v3430_v46 = vpop.f32.mrf.mxu0  ;;  %12321 = vmatprep.subr.bf16.mxu1 %v13523_v14  ;;  %12361 = vmatprep.subr.bf16.mxu0 %v13524_v21 }
 0xa8c   :  { %v3674_v11 = vmax.f32 %v3354_v43, 0.0  ;;  %v3676_v32 = vmax.f32 %v3427_v42, 0.0  ;;  %v3753_v4 = vpack.c.bf16 %v3673_v1, %v3657_v56  ;;  %v3755_v12 = vpack.c.bf16 %v3675_v22, %v3659_v35  ;;  %v13535_v42 = vld [vmem:[%s17543_s11 + $0x348] sm:$0xff]  }
 0xa8d   :  { %v3359_v37 = vpop.f32.mrf.mxu1  ;;  %v3432_v62 = vpop.f32.mrf.mxu0  ;;  %v3358_v14 = vadd.f32 %v3357_v40, %v15319_v27  ;;  %v3431_v16 = vadd.f32 %v3430_v46, %v15323_v6 }
 0xa8e   :  { %12322 = vmatpush3.bf16.msra.mxu1 %v13525_v28  ;;  %v3754_v58 = vpack.c.bf16 %v3674_v11, %v3658_v45  ;;  %v3756_v0 = vpack.c.bf16 %v3676_v32, %v3660_v49  ;;  %v3360_v52 = vadd.f32 %v3359_v37, %v15305_v36  ;;  %12362 = vmatpush3.bf16.msra.mxu0 %v13526_v26  ;;  %v13536_v32 = vld [vmem:[%s17543_s11 + $0x3c8] sm:$0xff]  }
 0xa8f   :  { %v3361_v17 = vpop.f32.mrf.mxu1  ;;  %v3434_v15 = vpop.f32.mrf.mxu0  ;;  %12323 = vmatprep.subr.bf16.mxu1 %v13527_v41  ;;  %v3433_v25 = vadd.f32 %v3432_v62, %v15309_v18  ;;  %12363 = vmatprep.subr.bf16.mxu0 %v13528_v53  ;;  %v3689_v46 = vmax.f32 %v3358_v14, 0.0  ;;  %v3691_v26 = vmax.f32 %v3431_v16, 0.0  ;;  %v15463_v41 = vrot.slane %v15298_v63, %v15144_v50  ;;  %v13537_v37 = vld [vmem:[%s17543_s11 + $0x308] sm:$0xff]   ;;  %v13541_v14 = vld [vmem:[%s17543_s11 + $0x300] sm:$0xff]  }
 0xa90   :  { %v3362_v60 = vadd.f32 %v3361_v17, %v15319_v27  ;;  %v3435_v13 = vadd.f32 %v3434_v15, %v15323_v6  ;;  %5116 = vmatprep.mubr.bf16.mxu1 %v3754_v58  ;;  %5181 = vmatprep.mubr.bf16.mxu0 %v3756_v0  ;;  %v15449_v6 = vrot.slane %v15298_v63, %v15123_v5  ;;  %v3690_v28 = vmax.f32 %v3360_v52, 0.0  ;;  %v13540_v15 = vld [vmem:[%s17543_s11 + $0x3c0] sm:$0xff]  }
 0xa91   :  { %v3363_v44 = vpop.f32.mrf.mxu1  ;;  %v3436_v23 = vpop.f32.mrf.mxu0  ;;  %5117 = vmatmul.mubr.bf16.gmra.mxu1 %v3753_v4  ;;  %5182 = vmatmul.mubr.bf16.gmra.mxu0 %v3755_v12  ;;  %v3692_v1 = vmax.f32 %v3433_v25, 0.0  ;;  %v15467_v45 = vrot.slane %v15298_v63, %v15147_v9  ;;  %v13539_v4 = vld [vmem:[%s17543_s11 + $0x340] sm:$0xff]  }
 0xa92   :  { %v3364_v21 = vadd.f32 %v3363_v44, %v15305_v36  ;;  %v3437_v3 = vadd.f32 %v3436_v23, %v15309_v18  ;;  %12324 = vmatpush3.bf16.msra.mxu1 %v13529_v2  ;;  %v3705_v20 = vmax.f32 %v3362_v60, 0.0  ;;  %v3707_v30 = vmax.f32 %v3435_v13, 0.0  ;;  %12364 = vmatpush3.bf16.msra.mxu0 %v13530_v31  ;;  %v13534_v18 = vld [vmem:[%s17543_s11 + $0x390] sm:$0xff]   ;;  %v13538_v2 = vld [vmem:[%s17543_s11 + $0x388] sm:$0xff]  }
 0xa93   :  { %v3473_v27 = vpop.f32.mrf.mxu1  ;;  %v3546_v43 = vpop.f32.mrf.mxu0  ;;  %v15453_v36 = vrot.slane %v15298_v63, %v15130_v29  ;;  %12325 = vmatprep.subr.bf16.mxu1 %v13531_v57  ;;  %12365 = vmatprep.subr.bf16.mxu0 %v13532_v8 }
 0xa94   :  { %v3706_v22 = vmax.f32 %v3364_v21, 0.0  ;;  %v3708_v40 = vmax.f32 %v3437_v3, 0.0  ;;  %v3769_v62 = vpack.c.bf16 %v3705_v20, %v3689_v46  ;;  %v3771_v53 = vpack.c.bf16 %v3707_v30, %v3691_v26  ;;  %v13542_v3 = vld [vmem:[%s17543_s11 + $0x380] sm:$0xff]  }
 0xa95   :  { %v3475_v49 = vpop.f32.mrf.mxu1  ;;  %v3548_v11 = vpop.f32.mrf.mxu0  ;;  %v3474_v31 = vadd.f32 %v3473_v27, %v15463_v41  ;;  %v3547_v57 = vadd.f32 %v3546_v43, %v15467_v45 }
 0xa96   :  { %12326 = vmatpush3.bf16.msra.mxu1 %v13533_v39  ;;  %v3770_v56 = vpack.c.bf16 %v3706_v22, %v3690_v28  ;;  %v3772_v35 = vpack.c.bf16 %v3708_v40, %v3692_v1  ;;  %v3476_v58 = vadd.f32 %v3475_v49, %v15449_v6  ;;  %12366 = vmatpush3.bf16.msra.mxu0 %v13534_v18 }
 0xa97   :  { %v3477_v63 = vpop.f32.mrf.mxu1  ;;  %v3550_v0 = vpop.f32.mrf.mxu0  ;;  %12327 = vmatprep.subr.bf16.mxu1 %v13535_v42  ;;  %v3549_v12 = vadd.f32 %v3548_v11, %v15453_v36  ;;  %12367 = vmatprep.subr.bf16.mxu0 %v13536_v32  ;;  %v3597_v43 = vmax.f32 %v3474_v31, 0.0  ;;  %v3599_v18 = vmax.f32 %v3547_v57, 0.0 }
 0xa98   :  { %v3478_v52 = vadd.f32 %v3477_v63, %v15463_v41  ;;  %v3551_v17 = vadd.f32 %v3550_v0, %v15467_v45  ;;  %5124 = vmatprep.mubr.bf16.mxu1 %v3770_v56  ;;  %5189 = vmatprep.mubr.bf16.mxu0 %v3772_v35  ;;  %v3598_v39 = vmax.f32 %v3476_v58, 0.0 }
 0xa99   :  { %v3479_v25 = vpop.f32.mrf.mxu1  ;;  %v3552_v60 = vpop.f32.mrf.mxu0  ;;  %5125 = vmatmul.mubr.bf16.gmra.mxu1 %v3769_v62  ;;  %5190 = vmatmul.mubr.bf16.gmra.mxu0 %v3771_v53  ;;  %v3600_v20 = vmax.f32 %v3549_v12, 0.0 }
 0xa9a   :  { %v3480_v13 = vadd.f32 %v3479_v25, %v15449_v6  ;;  %v3553_v8 = vadd.f32 %v3552_v60, %v15453_v36  ;;  %12328 = vmatpush3.bf16.msra.mxu1 %v13537_v37  ;;  %v3613_v16 = vmax.f32 %v3478_v52, 0.0  ;;  %v3615_v44 = vmax.f32 %v3551_v17, 0.0  ;;  %12368 = vmatpush3.bf16.msra.mxu0 %v13538_v2 }
 0xa9b   :  { %v3483_v23 = vpop.f32.mrf.mxu1  ;;  %v3556_v21 = vpop.f32.mrf.mxu0  ;;  %12329 = vmatprep.subr.bf16.mxu1 %v13539_v4  ;;  %12369 = vmatprep.subr.bf16.mxu0 %v13540_v15 }
 0xa9c   :  { %v3614_v30 = vmax.f32 %v3480_v13, 0.0  ;;  %v3616_v27 = vmax.f32 %v3553_v8, 0.0  ;;  %v3725_v40 = vpack.c.bf16 %v3613_v16, %v3597_v43  ;;  %v3727_v46 = vpack.c.bf16 %v3615_v44, %v3599_v18 }
 0xa9d   :  { %v3485_v42 = vpop.f32.mrf.mxu1  ;;  %v3558_v28 = vpop.f32.mrf.mxu0  ;;  %v3484_v37 = vadd.f32 %v3483_v23, %v15463_v41  ;;  %v3557_v62 = vadd.f32 %v3556_v21, %v15467_v45 }
 0xa9e   :  { %12330 = vmatpush3.bf16.msra.mxu1 %v13541_v14  ;;  %v3726_v1 = vpack.c.bf16 %v3614_v30, %v3598_v39  ;;  %v3728_v22 = vpack.c.bf16 %v3616_v27, %v3600_v20  ;;  %v3486_v26 = vadd.f32 %v3485_v42, %v15449_v6  ;;  %12370 = vmatpush3.bf16.msra.mxu0 %v13542_v3 }
 0xa9f   :  { %v3487_v49 = vpop.f32.mrf.mxu1  ;;  %v3560_v11 = vpop.f32.mrf.mxu0  ;;  %v3559_v32 = vadd.f32 %v3558_v28, %v15453_v36  ;;  %v3629_v25 = vmax.f32 %v3484_v37, 0.0  ;;  %v3631_v60 = vmax.f32 %v3557_v62, 0.0 }
 0xaa0   :  { %v3488_v56 = vadd.f32 %v3487_v49, %v15463_v41  ;;  %v3561_v35 = vadd.f32 %v3560_v11, %v15467_v45  ;;  %5230 = vmatprep.mubr.bf16.mxu1 %v3726_v1  ;;  %5295 = vmatprep.mubr.bf16.mxu0 %v3728_v22  ;;  %v3630_v17 = vmax.f32 %v3486_v26, 0.0 }
 0xaa1   :  { %v3489_v53 = vpop.f32.mrf.mxu1  ;;  %v3562_v58 = vpop.f32.mrf.mxu0  ;;  %5231 = vmatmul.mubr.bf16.vlgmr.msra.gmra.mxu1 %v3725_v40  ;;  %5296 = vmatmul.mubr.bf16.vlgmr.msra.gmra.mxu0 %v3727_v46  ;;  %v3632_v15 = vmax.f32 %v3559_v32, 0.0 }
 0xaa2   :  { %v3490_v63 = vadd.f32 %v3489_v53, %v15449_v6  ;;  %v3563_v0 = vadd.f32 %v3562_v58, %v15453_v36  ;;  %v3645_v2 = vmax.f32 %v3488_v56, 0.0  ;;  %v3647_v4 = vmax.f32 %v3561_v35, 0.0 }
 0xaa3   :  { %v3493_v12 = vpop.f32.mrf.mxu1  ;;  %v3566_v52 = vpop.f32.mrf.mxu0 }
 0xaa4   :  { %v3646_v31 = vmax.f32 %v3490_v63, 0.0  ;;  %v3648_v57 = vmax.f32 %v3563_v0, 0.0  ;;  %v3741_v44 = vpack.c.bf16 %v3645_v2, %v3629_v25  ;;  %v3743_v23 = vpack.c.bf16 %v3647_v4, %v3631_v60 }
 0xaa5   :  { %v3495_v13 = vpop.f32.mrf.mxu1  ;;  %v3568_v8 = vpop.f32.mrf.mxu0  ;;  %v3494_v43 = vadd.f32 %v3493_v12, %v15463_v41  ;;  %v3567_v18 = vadd.f32 %v3566_v52, %v15467_v45 }
 0xaa6   :  { %v3742_v14 = vpack.c.bf16 %v3646_v31, %v3630_v17  ;;  %v3744_v16 = vpack.c.bf16 %v3648_v57, %v3632_v15  ;;  %v3496_v21 = vadd.f32 %v3495_v13, %v15449_v6  ;;  %v3569_v20 = vadd.f32 %v3568_v8, %v15453_v36 }
 0xaa7   :  { %v3497_v3 = vpop.f32.mrf.mxu1  ;;  %v3570_v39 = vpop.f32.mrf.mxu0  ;;  %v3661_v37 = vmax.f32 %v3494_v43, 0.0  ;;  %v3663_v62 = vmax.f32 %v3567_v18, 0.0 }
 0xaa8   :  { %v3498_v30 = vadd.f32 %v3497_v3, %v15463_v41  ;;  %v3571_v27 = vadd.f32 %v3570_v39, %v15467_v45  ;;  %5238 = vmatprep.mubr.bf16.mxu1 %v3742_v14  ;;  %5303 = vmatprep.mubr.bf16.mxu0 %v3744_v16  ;;  %v3662_v11 = vmax.f32 %v3496_v21, 0.0  ;;  %v3664_v32 = vmax.f32 %v3569_v20, 0.0 }
 0xaa9   :  { %v3499_v42 = vpop.f32.mrf.mxu1  ;;  %v3572_v28 = vpop.f32.mrf.mxu0  ;;  %5239 = vmatmul.mubr.bf16.gmra.mxu1 %v3741_v44  ;;  %5304 = vmatmul.mubr.bf16.gmra.mxu0 %v3743_v23 }
 0xaaa   :  { %v3500_v1 = vadd.f32 %v3499_v42, %v15449_v6  ;;  %v3573_v22 = vadd.f32 %v3572_v28, %v15453_v36  ;;  %v3677_v40 = vmax.f32 %v3498_v30, 0.0  ;;  %v3679_v46 = vmax.f32 %v3571_v27, 0.0 }
 0xaab   :  { %v3503_v26 = vpop.f32.mrf.mxu1  ;;  %v3576_v49 = vpop.f32.mrf.mxu0 }
 0xaac   :  { %v3678_v56 = vmax.f32 %v3500_v1, 0.0  ;;  %v3680_v35 = vmax.f32 %v3573_v22, 0.0  ;;  %v3757_v2 = vpack.c.bf16 %v3677_v40, %v3661_v37  ;;  %v3759_v4 = vpack.c.bf16 %v3679_v46, %v3663_v62 }
 0xaad   :  { %v3505_v53 = vpop.f32.mrf.mxu1  ;;  %v3578_v58 = vpop.f32.mrf.mxu0  ;;  %v3504_v25 = vadd.f32 %v3503_v26, %v15463_v41  ;;  %v3577_v8 = vadd.f32 %v3576_v49, %v15467_v45 }
 0xaae   :  { %v3758_v63 = vpack.c.bf16 %v3678_v56, %v3662_v11  ;;  %v3760_v0 = vpack.c.bf16 %v3680_v35, %v3664_v32  ;;  %v3506_v12 = vadd.f32 %v3505_v53, %v15449_v6  ;;  %v3579_v15 = vadd.f32 %v3578_v58, %v15453_v36 }
 0xaaf   :  { %v3507_v52 = vpop.f32.mrf.mxu1  ;;  %v3580_v17 = vpop.f32.mrf.mxu0  ;;  %v3693_v30 = vmax.f32 %v3504_v25, 0.0  ;;  %v3695_v27 = vmax.f32 %v3577_v8, 0.0 }
 0xab0   :  { %v3508_v31 = vadd.f32 %v3507_v52, %v15463_v41  ;;  %v3581_v57 = vadd.f32 %v3580_v17, %v15467_v45  ;;  %5246 = vmatprep.mubr.bf16.mxu1 %v3758_v63  ;;  %5311 = vmatprep.mubr.bf16.mxu0 %v3760_v0  ;;  %v3694_v44 = vmax.f32 %v3506_v12, 0.0  ;;  %v3696_v21 = vmax.f32 %v3579_v15, 0.0 }
 0xab1   :  { %v3509_v60 = vpop.f32.mrf.mxu1  ;;  %v3582_v13 = vpop.f32.mrf.mxu0  ;;  %5247 = vmatmul.mubr.bf16.gmra.mxu1 %v3757_v2  ;;  %5312 = vmatmul.mubr.bf16.gmra.mxu0 %v3759_v4 }
 0xab2   :  { %v3510_v14 = vadd.f32 %v3509_v60, %v15449_v6  ;;  %v3583_v16 = vadd.f32 %v3582_v13, %v15453_v36  ;;  %v3709_v23 = vmax.f32 %v3508_v31, 0.0  ;;  %v3711_v3 = vmax.f32 %v3581_v57, 0.0  ;;  %v11218_v36 = vld [vmem:[%s17544_s12] ss:$0 sm:$0xff] }
 0xab4   :  { %v3710_v39 = vmax.f32 %v3510_v14, 0.0  ;;  %v3712_v20 = vmax.f32 %v3583_v16, 0.0  ;;  %v3773_v18 = vpack.c.bf16 %v3709_v23, %v3693_v30  ;;  %v3775_v42 = vpack.c.bf16 %v3711_v3, %v3695_v27 }
 0xab6   :  { %v3774_v43 = vpack.c.bf16 %v3710_v39, %v3694_v44  ;;  %v3776_v41 = vpack.c.bf16 %v3712_v20, %v3696_v21 }
 0xab8   :  { %5254 = vmatprep.mubr.bf16.mxu1 %v3774_v43  ;;  %5319 = vmatprep.mubr.bf16.mxu0 %v3776_v41 }
 0xab9   :  { %5255 = vmatmul.mubr.bf16.gmra.mxu1 %v3773_v18  ;;  %5320 = vmatmul.mubr.bf16.gmra.mxu0 %v3775_v42 }
 0xb01   :  { %v12091_v6 = vpop.f32.mrf.mxu1  ;;  %v12131_v45 = vpop.f32.mrf.mxu0 }
 0xb03   :  { %v12092_v28 = vpop.f32.mrf.mxu1  ;;  %v12132_v1 = vpop.f32.mrf.mxu0 }
 0xb04   :  { %v12093_v22 = vadd.f32 %v12092_v28, %v12091_v6  ;;  %v12133_v40 = vadd.f32 %v12132_v1, %v12131_v45 }
 0xb05   :  { %v12094_v46 = vpop.f32.mrf.mxu1  ;;  %v12134_v26 = vpop.f32.mrf.mxu0 }
 0xb06   :  { %v4843_v49 = vadd.f32 %v12093_v22, %v11218_v36 }
 0xb07   :  { %v12095_v11 = vpop.f32.mrf.mxu1  ;;  %v12135_v32 = vpop.f32.mrf.mxu0 }
 0xb08   :  { %v15525_v56 = vadd.f32 %v12133_v40, %v4843_v49  ;;  %v12096_v35 = vadd.f32 %v12095_v11, %v12094_v46  ;;  %v12136_v53 = vadd.f32 %v12135_v32, %v12134_v26 }
 0xb09   :  { %v12097_v37 = vpop.f32.mrf.mxu1  ;;  %v12137_v58 = vpop.f32.mrf.mxu0 }
 0xb0a   :  { %v4846_v62 = vadd.f32 %v12096_v35, %v11218_v36 }
 0xb0b   :  { %v12098_v63 = vpop.f32.mrf.mxu1  ;;  %v12138_v4 = vpop.f32.mrf.mxu0 }
 0xb0c   :  { %v15527_v0 = vadd.f32 %v12136_v53, %v4846_v62  ;;  %v12099_v2 = vadd.f32 %v12098_v63, %v12097_v37  ;;  %v12139_v12 = vadd.f32 %v12138_v4, %v12137_v58 }
 0xb0d   :  { %v12100_v52 = vpop.f32.mrf.mxu1  ;;  %v12140_v15 = vpop.f32.mrf.mxu0 }
 0xb0e   :  { %v4851_v17 = vadd.f32 %v12099_v2, %v11218_v36 }
 0xb0f   :  { %v12101_v31 = vpop.f32.mrf.mxu1  ;;  %v12141_v60 = vpop.f32.mrf.mxu0 }
 0xb10   :  { %v15529_v57 = vadd.f32 %v12139_v12, %v4851_v17  ;;  %v12102_v25 = vadd.f32 %v12101_v31, %v12100_v52  ;;  %v12142_v14 = vadd.f32 %v12141_v60, %v12140_v15 }
 0xb11   :  { %v12103_v13 = vpop.f32.mrf.mxu1  ;;  %v12143_v16 = vpop.f32.mrf.mxu0 }
 0xb12   :  { %v4854_v8 = vadd.f32 %v12102_v25, %v11218_v36 }
 0xb13   :  { %v12104_v44 = vpop.f32.mrf.mxu1  ;;  %v12144_v3 = vpop.f32.mrf.mxu0 }
 0xb14   :  { %v15531_v23 = vadd.f32 %v12142_v14, %v4854_v8  ;;  %v12105_v21 = vadd.f32 %v12104_v44, %v12103_v13  ;;  %v12145_v39 = vadd.f32 %v12144_v3, %v12143_v16 }
 0xb15   :  { %v12106_v20 = vpop.f32.mrf.mxu1  ;;  %v12146_v27 = vpop.f32.mrf.mxu0 }
 0xb16   :  { %v4859_v30 = vadd.f32 %v12105_v21, %v11218_v36 }
 0xb17   :  { %v12107_v43 = vpop.f32.mrf.mxu1  ;;  %v12147_v42 = vpop.f32.mrf.mxu0 }
 0xb18   :  { %v15533_v41 = vadd.f32 %v12145_v39, %v4859_v30  ;;  %v12108_v18 = vadd.f32 %v12107_v43, %v12106_v20  ;;  %v12148_v28 = vadd.f32 %v12147_v42, %v12146_v27 }
 0xb19   :  { %v12109_v6 = vpop.f32.mrf.mxu1  ;;  %v12149_v1 = vpop.f32.mrf.mxu0 }
 0xb1a   :  { %v4862_v45 = vadd.f32 %v12108_v18, %v11218_v36 }
 0xb1b   :  { %v12110_v22 = vpop.f32.mrf.mxu1  ;;  %v12150_v26 = vpop.f32.mrf.mxu0 }
 0xb1c   :  { %v15535_v40 = vadd.f32 %v12148_v28, %v4862_v45  ;;  %v12111_v46 = vadd.f32 %v12110_v22, %v12109_v6  ;;  %v12151_v49 = vadd.f32 %v12150_v26, %v12149_v1 }
 0xb1d   :  { %v12112_v11 = vpop.f32.mrf.mxu1  ;;  %v12152_v35 = vpop.f32.mrf.mxu0 }
 0xb1e   :  { %v4867_v32 = vadd.f32 %v12111_v46, %v11218_v36 }
 0xb1f   :  { %v12113_v37 = vpop.f32.mrf.mxu1  ;;  %v12153_v58 = vpop.f32.mrf.mxu0 }
 0xb20   :  { %v15537_v62 = vadd.f32 %v12151_v49, %v4867_v32  ;;  %v12114_v53 = vadd.f32 %v12113_v37, %v12112_v11  ;;  %v12154_v4 = vadd.f32 %v12153_v58, %v12152_v35 }
 0xb21   :  { %v12171_v63 = vpop.f32.mrf.mxu1  ;;  %v12211_v12 = vpop.f32.mrf.mxu0 }
 0xb22   :  { %17622 = vst [vmem:[#allocation20_spill] sm:$0xff] %v15537_v62  ;;  %v4870_v2 = vadd.f32 %v12114_v53, %v11218_v36 }
 0xb23   :  { %v12172_v52 = vpop.f32.mrf.mxu1  ;;  %v12212_v15 = vpop.f32.mrf.mxu0 }
 0xb24   :  { %v15539_v17 = vadd.f32 %v12154_v4, %v4870_v2  ;;  %v12213_v62 = vadd.f32 %v12212_v15, %v12211_v12 }
 0xb25   :  { %v12174_v31 = vpop.f32.mrf.mxu1  ;;  %v15541_v25 = vpop.f32.mrf.mxu0 }
 0xb26   :  { %17623 = vst [vmem:[#allocation21_spill] sm:$0xff] %v15539_v17 }
 0xb27   :  { %v12175_v60 = vpop.f32.mrf.mxu1  ;;  %v15543_v13 = vpop.f32.mrf.mxu0 }
 0xb29   :  { %v12177_v8 = vpop.f32.mrf.mxu1  ;;  %v15545_v14 = vpop.f32.mrf.mxu0 }
 0xb2b   :  { %v12178_v16 = vpop.f32.mrf.mxu1  ;;  %v15547_v44 = vpop.f32.mrf.mxu0 }
 0xb2d   :  { %v15549_v21 = vpop.f32.mrf.mxu1  ;;  %v15551_v36 = vpop.f32.mrf.mxu0 }
 0xb2f   :  { %v12181_v3 = vpop.f32.mrf.mxu1  ;;  %v15553_v39 = vpop.f32.mrf.mxu0 }
 0xb30   :  { %v12182_v15 = vadd.f32 %v12181_v3, %v15549_v21 }
 0xb31   :  { %v15555_v20 = vpop.f32.mrf.mxu1  ;;  %v15557_v30 = vpop.f32.mrf.mxu0 }
 0xb33   :  { %v15559_v27 = vpop.f32.mrf.mxu1  ;;  %v15561_v43 = vpop.f32.mrf.mxu0 }
 0xb35   :  { %v15563_v18 = vpop.f32.mrf.mxu1  ;;  %v15565_v42 = vpop.f32.mrf.mxu0 }
 0xb37   :  { %v15567_v6 = vpop.f32.mrf.mxu1  ;;  %v15569_v45 = vpop.f32.mrf.mxu0 }
 0xb38   :  { %17624 = vst [vmem:[#allocation22_spill] sm:$0xff] %v15569_v45 }
 0xb39   :  { %v15571_v28 = vpop.f32.mrf.mxu1  ;;  %v15573_v1 = vpop.f32.mrf.mxu0 }
 0xb3a   :  { %17625 = vst [vmem:[#allocation23_spill] sm:$0xff] %v15573_v1 }
 0xb3b   :  { %v15575_v22 = vpop.f32.mrf.mxu1  ;;  %v15577_v46 = vpop.f32.mrf.mxu0 }
 0xb3c   :  { %17626 = vst [vmem:[#allocation24_spill] sm:$0xff] %v15577_v46 }
 0xb3d   :  { %v15579_v26 = vpop.f32.mrf.mxu1  ;;  %v15581_v49 = vpop.f32.mrf.mxu0 }
 0xb3e   :  { %17627 = vst [vmem:[#allocation25_spill] sm:$0xff] %v15579_v26  ;;  %17628 = vst [vmem:[#allocation26_spill] sm:$0xff] %v15581_v49  ;;  %v12173_v49 = vadd.f32 %v12172_v52, %v12171_v63  ;;  %v12179_v63 = vadd.f32 %v12178_v16, %v12177_v8 }
 0xb3f   :  { %v15583_v11 = vpop.f32.mrf.mxu1  ;;  %v15585_v32 = vpop.f32.mrf.mxu0 }
 0xb40   :  { %17629 = vst [vmem:[#allocation27_spill] sm:$0xff] %v15583_v11  ;;  %17630 = vst [vmem:[#allocation28_spill] sm:$0xff] %v15585_v32  ;;  %v4973_v34 = vadd.f32 %v12173_v49, %v15525_v56  ;;  %v12176_v11 = vadd.f32 %v12175_v60, %v12174_v31  ;;  %v12216_v56 = vadd.f32 %v15543_v13, %v15541_v25 }
 0xb41   :  { %v12251_v35 = vpop.f32.mrf.mxu1  ;;  %v12291_v37 = vpop.f32.mrf.mxu0  ;;  %v4981_v12 = vadd.f32 %v12179_v63, %v15529_v57  ;;  %v12185_v57 = vadd.f32 %v15559_v27, %v15555_v20 }
 0xb43   :  { %v12252_v53 = vpop.f32.mrf.mxu1  ;;  %v12292_v58 = vpop.f32.mrf.mxu0  ;;  %v4989_v27 = vadd.f32 %v12185_v57, %v15533_v41 }
 0xb45   :  { %v12254_v2 = vpop.f32.mrf.mxu1  ;;  %v12294_v4 = vpop.f32.mrf.mxu0 }
 0xb47   :  { %v12255_v54 = vpop.f32.mrf.mxu1  ;;  %v12295_v19 = vpop.f32.mrf.mxu0 }
 0xb48   :  { %v12256_v60 = vadd.f32 %v12255_v54, %v12254_v2  ;;  %v12296_v21 = vadd.f32 %v12295_v19, %v12294_v4 }
 0xb49   :  { %v12257_v9 = vpop.f32.mrf.mxu1  ;;  %v15587_v50 = vpop.f32.mrf.mxu0 }
 0xb4b   :  { %v12258_v29 = vpop.f32.mrf.mxu1  ;;  %v15589_v5 = vpop.f32.mrf.mxu0 }
 0xb4c   :  { %v12299_v19 = vadd.f32 %v15589_v5, %v15587_v50 }
 0xb4d   :  { %v12260_v47 = vpop.f32.mrf.mxu1  ;;  %v15591_v51 = vpop.f32.mrf.mxu0 }
 0xb4f   :  { %v12261_v38 = vpop.f32.mrf.mxu1  ;;  %v15593_v33 = vpop.f32.mrf.mxu0 }
 0xb51   :  { %v15595_v7 = vpop.f32.mrf.mxu1  ;;  %v15597_v48 = vpop.f32.mrf.mxu0 }
 0xb52   :  { %17631 = vst [vmem:[#allocation29_spill] sm:$0xff] %v15597_v48 }
 0xb53   :  { %v15599_v10 = vpop.f32.mrf.mxu1  ;;  %v15601_v55 = vpop.f32.mrf.mxu0 }
 0xb54   :  { %17632 = vst [vmem:[#allocation30_spill] sm:$0xff] %v15601_v55  ;;  %v12253_v55 = vadd.f32 %v12252_v53, %v12251_v35 }
 0xb55   :  { %v15603_v32 = vpop.f32.mrf.mxu1  ;;  %v15605_v24 = vpop.f32.mrf.mxu0 }
 0xb56   :  { %17633 = vst [vmem:[#allocation31_spill] sm:$0xff] %v15605_v24  ;;  %v5038_v24 = vadd.f32 %v12213_v62, %v4973_v34  ;;  %v12293_v34 = vadd.f32 %v12292_v58, %v12291_v37 }
 0xb57   :  { %v15607_v17 = vpop.f32.mrf.mxu1  ;;  %v15609_v46 = vpop.f32.mrf.mxu0 }
 0xb58   :  { %17634 = vst [vmem:[#allocation32_spill] sm:$0xff] %v15607_v17  ;;  %17635 = vst [vmem:[#allocation33_spill] sm:$0xff] %v15609_v46  ;;  %v4976_v17 = vadd.f32 %v12176_v11, %v15527_v0  ;;  %v5103_v31 = vadd.f32 %v12253_v55, %v5038_v24  ;;  %v12219_v0 = vadd.f32 %v15547_v44, %v15545_v14 }
 0xb59   :  { %v15611_v1 = vpop.f32.mrf.mxu1  ;;  %v15614_v26 = vpop.f32.mrf.mxu0  ;;  %v12259_v11 = vadd.f32 %v12258_v29, %v12257_v9  ;;  %v4984_v55 = vadd.f32 %v12182_v15, %v15531_v23  ;;  %v12222_v14 = vadd.f32 %v15553_v39, %v15551_v36  ;;  %v12262_v9 = vadd.f32 %v12261_v38, %v12260_v47 }
 0xb5a   :  { %17636 = vst [vmem:[#allocation34_spill] sm:$0xff] %v15611_v1  ;;  %v5041_v16 = vadd.f32 %v12216_v56, %v4976_v17  ;;  %v5168_v53 = vadd.f32 %v12293_v34, %v5103_v31  ;;  %v5046_v54 = vadd.f32 %v12219_v0, %v4981_v12  ;;  %v12188_v23 = vadd.f32 %v15567_v6, %v15563_v18 }
 0xb5b   :  { %v15616_v48 = vpop.f32.mrf.mxu1  ;;  %v15618_v45 = vpop.f32.mrf.mxu0  ;;  %v5049_v31 = vadd.f32 %v12222_v14, %v4984_v55  ;;  %v12225_v47 = vadd.f32 %v15561_v43, %v15557_v30  ;;  %v12265_v18 = vadd.f32 %v15599_v10, %v15595_v7  ;;  %v12302_v30 = vadd.f32 %v15593_v33, %v15591_v51 }
 0xb5c   :  { %v5111_v29 = vadd.f32 %v12259_v11, %v5046_v54  ;;  %v4992_v15 = vadd.f32 %v12188_v23, %v15535_v40  ;;  %v17640_v54 = vld [vmem:[#allocation20_spill] sm:$0xff] }
 0xb5d   :  { %v15620_v52 = vpop.f32.mrf.mxu1  ;;  %v15623_v46 = vpop.f32.mrf.mxu0 }
 0xb5e   :  { %17637 = vst [vmem:[#allocation35_spill] sm:$0xff] %v15623_v46  ;;  %v5106_v46 = vadd.f32 %v12256_v60, %v5041_v16  ;;  %v5176_v39 = vadd.f32 %v12299_v19, %v5111_v29  ;;  %v17645_v29 = vld [vmem:[#allocation7_spill] sm:$0xff] }
 0xb5f   :  { %v15625_v1 = vpop.f32.mrf.mxu1  ;;  %v15629_v49 = vpop.f32.mrf.mxu0  ;;  %v17639_v40 = vld [vmem:[#allocation32_spill] sm:$0xff] }
 0xb60   :  { %v5171_v58 = vadd.f32 %v12296_v21, %v5106_v46  ;;  %v5114_v46 = vadd.f32 %v12262_v9, %v5049_v31 }
 0xb61   :  { %v12331_v8 = vpop.f32.mrf.mxu1  ;;  %v12371_v62 = vpop.f32.mrf.mxu0 }
 0xb62   :  { %v5179_v11 = vadd.f32 %v12302_v30, %v5114_v46  ;;  %v17654_v30 = vld [vmem:[#allocation28_spill] sm:$0xff] }
 0xb63   :  { %v12332_v35 = vpop.f32.mrf.mxu1  ;;  %v12372_v24 = vpop.f32.mrf.mxu0 }
 0xb64   :  { %v12333_v25 = vadd.f32 %v12332_v35, %v12331_v8  ;;  %v12373_v3 = vadd.f32 %v12372_v24, %v12371_v62  ;;  %v5054_v8 = vadd.f32 %v12225_v47, %v4989_v27  ;;  %v17638_v62 = vld [vmem:[#allocation22_spill] sm:$0xff]  ;;  %v12268_v35 = vadd.f32 %v17639_v40, %v15603_v32  ;;  %v17649_v47 = vld [vmem:[#allocation31_spill] sm:$0xff] }
 0xb65   :  { %v12334_v13 = vpop.f32.mrf.mxu1  ;;  %v12374_v37 = vpop.f32.mrf.mxu0  ;;  %v12228_v0 = vadd.f32 %v17638_v62, %v15565_v42  ;;  %v17643_v42 = vld [vmem:[#allocation29_spill] sm:$0xff] }
 0xb66   :  { %v5233_v17 = vadd.f32 %v12333_v25, %v5168_v53 }
 0xb67   :  { %v12335_v44 = vpop.f32.mrf.mxu1  ;;  %v12375_v56 = vpop.f32.mrf.mxu0  ;;  %v5057_v24 = vadd.f32 %v12228_v0, %v4992_v15 }
 0xb68   :  { %v5298_v2 = vadd.f32 %v12373_v3, %v5233_v17  ;;  %v12336_v63 = vadd.f32 %v12335_v44, %v12334_v13  ;;  %v12376_v60 = vadd.f32 %v12375_v56, %v12374_v37  ;;  %v17642_v13 = vld [vmem:[#allocation27_spill] sm:$0xff]  ;;  %v17644_v17 = vld [vmem:[#allocation30_spill] sm:$0xff] }
 0xb69   :  { %v12337_v20 = vpop.f32.mrf.mxu1  ;;  %v12377_v36 = vpop.f32.mrf.mxu0  ;;  %v12305_v3 = vadd.f32 %v17644_v17, %v17643_v42  ;;  %v17646_v44 = vld [vmem:[#allocation23_spill] sm:$0xff]  ;;  %v17648_v56 = vld [vmem:[#allocation34_spill] sm:$0xff] }
 0xb6a   :  { %v5236_v4 = vadd.f32 %v12336_v63, %v5171_v58  ;;  %v15646_v38 = vadd.f32 %v5298_v2, %v14687_v59  ;;  %v12191_v59 = vadd.f32 %v15575_v22, %v15571_v28  ;;  %v5119_v22 = vadd.f32 %v12265_v18, %v5054_v8  ;;  %v17647_v58 = vld [vmem:[#allocation24_spill] sm:$0xff]  ;;  %v17651_v18 = vld [vmem:[#allocation21_spill] sm:$0xff]  ;;  %v17656_v42 = vld [vmem:[#allocation35_spill] sm:$0xff] }
 0xb6b   :  { %v12338_v12 = vpop.f32.mrf.mxu1  ;;  %v12378_v50 = vpop.f32.mrf.mxu0  ;;  %v12231_v2 = vadd.f32 %v17647_v58, %v17646_v44  ;;  %v5122_v63 = vadd.f32 %v12268_v35, %v5057_v24  ;;  %v12271_v31 = vadd.f32 %v15616_v48, %v17648_v56  ;;  %v17652_v48 = vld [vmem:[#allocation6_spill] sm:$0xff]  ;;  %v12311_v35 = vadd.f32 %v15618_v45, %v15614_v26 }
 0xb6c   :  { %v5301_v6 = vadd.f32 %v12376_v60, %v5236_v4  ;;  %v12339_v5 = vadd.f32 %v12338_v12, %v12337_v20  ;;  %v5338_v41 = vsel %vm110_vm0, %v15646_v38, 0.0  ;;  %v12379_v34 = vadd.f32 %v12378_v50, %v12377_v36 }
 0xb6d   :  { %v12340_v43 = vpop.f32.mrf.mxu1  ;;  %5339 = vadd.xlane.f32.xlu0 %v5338_v41  ;;  %v12380_v10 = vpop.f32.mrf.mxu0  ;;  %v4997_v55 = vadd.f32 %v12191_v59, %v17640_v54  ;;  %v5184_v19 = vadd.f32 %v12305_v3, %v5119_v22  ;;  %v17653_v59 = vld [vmem:[#allocation26_spill] sm:$0xff]  ;;  %v12314_v45 = vadd.f32 %v15629_v49, %v17656_v42  ;;  %v13545_v42 = vld [vmem:[%s17603_s29 + $0x20] sm:$0xff]  }
 0xb6e   :  { %v5241_v16 = vadd.f32 %v12339_v5, %v5176_v39  ;;  %v15660_v7 = vadd.f32 %v5301_v6, %v14691_v61  ;;  %v17641_v61 = vld [vmem:[#allocation25_spill] sm:$0xff] }
 0xb6f   :  { %v12341_v28 = vpop.f32.mrf.mxu1  ;;  %v12381_v51 = vpop.f32.mrf.mxu0  ;;  %v12194_v57 = vadd.f32 %v17642_v13, %v17641_v61  ;;  %v5062_v36 = vadd.f32 %v12231_v2, %v4997_v55  ;;  %v17650_v39 = vld [vmem:[#allocation33_spill] sm:$0xff] }
 0xb70   :  { %v5306_v53 = vadd.f32 %v12379_v34, %v5241_v16  ;;  %v12342_v33 = vadd.f32 %v12341_v28, %v12340_v43  ;;  %v5341_v25 = vsel %vm110_vm0, %v15660_v7, 0.0  ;;  %v12382_v37 = vadd.f32 %v12381_v51, %v12380_v10 }
 0xb71   :  { %v12343_v21 = vpop.f32.mrf.mxu1  ;;  %5342 = vadd.xlane.f32.xlu1 %v5341_v25  ;;  %v12383_v14 = vpop.f32.mrf.mxu0  ;;  %v12308_v46 = vadd.f32 %v17650_v39, %v17649_v47  ;;  %v5000_v6 = vadd.f32 %v12194_v57, %v17651_v18  ;;  %v12234_v43 = vadd.f32 %v17654_v30, %v17653_v59  ;;  %v5127_v16 = vadd.f32 %v12271_v31, %v5062_v36  ;;  %v17655_v25 = vld [vmem:[#allocation8_spill] sm:$0xff] }
 0xb72   :  { %v5244_v32 = vadd.f32 %v12342_v33, %v5179_v11  ;;  %v15674_v9 = vadd.f32 %v5306_v53, %v17645_v29  ;;  %v12274_v10 = vadd.f32 %v15625_v1, %v15620_v52 }
 0xb73   :  { %v12344_v23 = vpop.f32.mrf.mxu1  ;;  %v12384_v4 = vpop.f32.mrf.mxu0  ;;  %v5187_v8 = vadd.f32 %v12308_v46, %v5122_v63  ;;  %v5065_v22 = vadd.f32 %v12234_v43, %v5000_v6  ;;  %v5192_v54 = vadd.f32 %v12311_v35, %v5127_v16 }
 0xb74   :  { %v5309_v20 = vadd.f32 %v12382_v37, %v5244_v32  ;;  %v12345_v27 = vadd.f32 %v12344_v23, %v12343_v21  ;;  %v5344_v60 = vsel %vm110_vm0, %v15674_v9, 0.0  ;;  %v12385_v50 = vadd.f32 %v12384_v4, %v12383_v14  ;;  %v17657_v32 = vld [vmem:[#allocation9_spill] sm:$0xff]  ;;  %v17658_v23 = vld [vmem:[#allocation11_spill] sm:$0xff] }
 0xb75   :  { %v12346_v12 = vpop.f32.mrf.mxu1  ;;  %5345 = vadd.xlane.f32.xlu0 %v5344_v60  ;;  %v12386_v41 = vpop.f32.mrf.mxu0  ;;  %v5130_v1 = vadd.f32 %v12274_v10, %v5065_v22 }
 0xb76   :  { %v5249_v5 = vadd.f32 %v12345_v27, %v5184_v19  ;;  %v15686_v15 = vadd.f32 %v5309_v20, %v17652_v48  ;;  %v17659_v27 = vld [vmem:[#allocation10_spill] sm:$0xff] }
 0xb77   :  { %v12347_v34 = vpop.f32.mrf.mxu1  ;;  %v12387_v11 = vpop.f32.mrf.mxu0  ;;  %v5195_v29 = vadd.f32 %v12314_v45, %v5130_v1  ;;  %v13546_v45 = vld [vmem:[%s17601_s4 + $0x20] sm:$0xff]  }
 0xb78   :  { %v5314_v62 = vadd.f32 %v12385_v50, %v5249_v5  ;;  %v12348_v0 = vadd.f32 %v12347_v34, %v12346_v12  ;;  %v5347_v40 = vsel %vm110_vm0, %v15686_v15, 0.0  ;;  %v12388_v33 = vadd.f32 %v12387_v11, %v12386_v41 }
 0xb79   :  { %v12349_v28 = vpop.f32.mrf.mxu1  ;;  %5348 = vadd.xlane.f32.xlu1 %v5347_v40  ;;  %v12389_v51 = vpop.f32.mrf.mxu0 }
 0xb7a   :  { %v5252_v53 = vadd.f32 %v12348_v0, %v5187_v8  ;;  %v5332_v24 = vadd.f32 %v5314_v62, %v17655_v25 }
 0xb7b   :  { %v12350_v55 = vpop.f32.mrf.mxu1  ;;  %v12390_v13 = vpop.f32.mrf.mxu0 }
 0xb7c   :  { %v5317_v52 = vadd.f32 %v12388_v33, %v5252_v53  ;;  %v12351_v61 = vadd.f32 %v12350_v55, %v12349_v28  ;;  %v5350_v57 = vsel %vm110_vm0, %v5332_v24, 0.0  ;;  %v12391_v17 = vadd.f32 %v12390_v13, %v12389_v51 }
 0xb7d   :  { %v12352_v21 = vpop.f32.mrf.mxu1  ;;  %5351 = vadd.xlane.f32.xlu0 %v5350_v57  ;;  %v12392_v3 = vpop.f32.mrf.mxu0  ;;  %v13543_v57 = vld [vmem:[%s17603_s29 + $0x28] sm:$0xff]  }
 0xb7e   :  { %v5257_v26 = vadd.f32 %v12351_v61, %v5192_v54  ;;  %v5333_v37 = vadd.f32 %v5317_v52, %v17657_v32  ;;  %13121 = vmatprep.subr.bf16.mxu0 %v13543_v57 }
 0xb7f   :  { %v12353_v14 = vpop.f32.mrf.mxu1  ;;  %v12393_v2 = vpop.f32.mrf.mxu0  ;;  %13122 = vmatpush3.bf16.msra.mxu0 %v13543_v57 }
 0xb80   :  { %v5322_v44 = vadd.f32 %v12391_v17, %v5257_v26  ;;  %v12354_v58 = vadd.f32 %v12353_v14, %v12352_v21  ;;  %v5353_v63 = vsel %vm110_vm0, %v5333_v37, 0.0  ;;  %v12394_v31 = vadd.f32 %v12393_v2, %v12392_v3  ;;  %v13544_v21 = vld [vmem:[%s17601_s4 + $0x28] sm:$0xff]   ;;  %13123 = vmatprep.subr.bf16.mxu0 %v13545_v42 }
 0xb81   :  { %5354 = vadd.xlane.f32.xlu1 %v5353_v63  ;;  %13109 = vmatprep.subr.bf16.mxu1 %v13544_v21  ;;  %v17660_v26 = vmov 0.0   ;;  %v15766_v17 = vld [vmem:[%s17604_s28 + $0x28] sm:$0xff]  }
 0xb82   :  { %v5260_v56 = vadd.f32 %v12354_v58, %v5195_v29  ;;  %v5334_v19 = vadd.f32 %v5322_v44, %v17658_v23  ;;  %13110 = vmatpush3.bf16.msra.mxu1 %v13544_v21 }
 0xb83   :  { %13111 = vmatprep.subr.bf16.mxu1 %v13546_v45  ;;  %13124 = vmatpush3.bf16.msra.mxu0 %v13545_v42 }
 0xb84   :  { %v5325_v20 = vadd.f32 %v12394_v31, %v5260_v56  ;;  %v5356_v49 = vsel %vm110_vm0, %v5334_v19, 0.0  ;;  %13145 = vmatprep.subr.bf16.mxu0 %v17660_v26 }
 0xb85   :  { %5357 = vadd.xlane.f32.xlu0 %v5356_v49 }
 0xb86   :  { %v5335_v4 = vadd.f32 %v5325_v20, %v17659_v27  ;;  %13112 = vmatpush3.bf16.msra.mxu1 %v13546_v45 }
 0xb87   :  { %13133 = vmatprep.subr.bf16.mxu1 %v15766_v17 }
 0xb88   :  { %v5359_v60 = vsel %vm110_vm0, %v5335_v4, 0.0 }
 0xb89   :  { %5360 = vadd.xlane.f32.xlu1 %v5359_v60  ;;  %v11347_v60 = vld [vmem:[%s17547_s15] ss:$0 sm:$0xff] }
 0xbf6   :  { %v5340_v36 = vpop.xlane.xlu0 %5339 }
 0xbf7   :  { %v5362_v47 = vmul.f32 0.03125, %v5340_v36 }
 0xbf9   :  { %v15707_v39 = vsub.f32 %v15646_v38, %v5362_v47 }
 0xbfa   :  { %v5343_v46 = vpop.xlane.xlu1 %5342 }
 0xbfb   :  { %v5363_v12 = vmul.f32 0.03125, %v5343_v46  ;;  %v5378_v18 = vmul.f32 %v15707_v39, %v15707_v39 }
 0xbfd   :  { %v15712_v6 = vsub.f32 %v15660_v7, %v5363_v12  ;;  %v5386_v5 = vsel %vm110_vm0, %v5378_v18, 0.0 }
 0xbfe   :  { %v5346_v50 = vpop.xlane.xlu0 %5345  ;;  %5387 = vadd.xlane.f32.xlu0 %v5386_v5 }
 0xbff   :  { %v5364_v41 = vmul.f32 0.03125, %v5346_v50  ;;  %v5379_v48 = vmul.f32 %v15712_v6, %v15712_v6  ;;  %v11348_v50 = vld [vmem:[%s17548_s16] ss:$0 sm:$0xff] }
 0xc01   :  { %v15718_v59 = vsub.f32 %v15674_v9, %v5364_v41  ;;  %v5389_v38 = vsel %vm110_vm0, %v5379_v48, 0.0 }
 0xc02   :  { %v5349_v30 = vpop.xlane.xlu1 %5348  ;;  %5390 = vadd.xlane.f32.xlu1 %v5389_v38 }
 0xc03   :  { %v5365_v43 = vmul.f32 0.03125, %v5349_v30  ;;  %v5380_v7 = vmul.f32 %v15718_v59, %v15718_v59 }
 0xc05   :  { %v15724_v8 = vsub.f32 %v15686_v15, %v5365_v43  ;;  %v5392_v16 = vsel %vm110_vm0, %v5380_v7, 0.0 }
 0xc06   :  { %v5352_v34 = vpop.xlane.xlu0 %5351  ;;  %5393 = vadd.xlane.f32.xlu0 %v5392_v16 }
 0xc07   :  { %v5366_v10 = vmul.f32 0.03125, %v5352_v34  ;;  %v5381_v9 = vmul.f32 %v15724_v8, %v15724_v8 }
 0xc09   :  { %v15729_v62 = vsub.f32 %v5332_v24, %v5366_v10  ;;  %v5395_v0 = vsel %vm110_vm0, %v5381_v9, 0.0 }
 0xc0a   :  { %v5355_v11 = vpop.xlane.xlu1 %5354  ;;  %5396 = vadd.xlane.f32.xlu1 %v5395_v0 }
 0xc0b   :  { %v5367_v40 = vmul.f32 0.03125, %v5355_v11  ;;  %v5382_v35 = vmul.f32 %v15729_v62, %v15729_v62 }
 0xc0d   :  { %v15734_v15 = vsub.f32 %v5333_v37, %v5367_v40  ;;  %v5398_v28 = vsel %vm110_vm0, %v5382_v35, 0.0 }
 0xc0e   :  { %5399 = vadd.xlane.f32.xlu0 %v5398_v28  ;;  %v5358_v22 = vpop.xlane.xlu0 %5357 }
 0xc0f   :  { %v5368_v53 = vmul.f32 0.03125, %v5358_v22  ;;  %v5383_v33 = vmul.f32 %v15734_v15, %v15734_v15 }
 0xc11   :  { %v15739_v51 = vsub.f32 %v5334_v19, %v5368_v53  ;;  %v5401_v25 = vsel %vm110_vm0, %v5383_v33, 0.0 }
 0xc12   :  { %5402 = vadd.xlane.f32.xlu1 %v5401_v25  ;;  %v5361_v24 = vpop.xlane.xlu1 %5360 }
 0xc13   :  { %v5369_v54 = vmul.f32 0.03125, %v5361_v24  ;;  %v5384_v55 = vmul.f32 %v15739_v51, %v15739_v51 }
 0xc15   :  { %v15744_v1 = vsub.f32 %v5335_v4, %v5369_v54  ;;  %v5404_v52 = vsel %vm110_vm0, %v5384_v55, 0.0 }
 0xc16   :  { %5405 = vadd.xlane.f32.xlu0 %v5404_v52 }
 0xc17   :  { %v5385_v61 = vmul.f32 %v15744_v1, %v15744_v1 }
 0xc19   :  { %v5407_v13 = vsel %vm110_vm0, %v5385_v61, 0.0 }
 0xc1a   :  { %5408 = vadd.xlane.f32.xlu1 %v5407_v13 }
 0xc87   :  { %v5388_v3 = vpop.xlane.xlu0 %5387 }
 0xc88   :  { %v5410_v32 = vmul.f32 0.03125, %v5388_v3 }
 0xc8a   :  { %v5418_v37 = vadd.f32 1e-05, %v5410_v32 }
 0xc8b   :  { %v5391_v14 = vpop.xlane.xlu1 %5390 }
 0xc8c   :  { %13765 = vrsqrt.f32 %v5418_v37  ;;  %v5411_v29 = vmul.f32 0.03125, %v5391_v14  ;;  %v15851_v37 = vld [vmem:[%s17605_s5 + $0x2] ss:$0 sm:$0xff] }
 0xc8e   :  { %v5419_v44 = vadd.f32 1e-05, %v5411_v29 }
 0xc8f   :  { %v5394_v58 = vpop.xlane.xlu0 %5393 }
 0xc90   :  { %13767 = vrsqrt.f32 %v5419_v44  ;;  %v5412_v2 = vmul.f32 0.03125, %v5394_v58 }
 0xc92   :  { %v5420_v63 = vadd.f32 1e-05, %v5412_v2 }
 0xc93   :  { %v5397_v56 = vpop.xlane.xlu1 %5396 }
 0xc94   :  { %13769 = vrsqrt.f32 %v5420_v63  ;;  %v5413_v31 = vmul.f32 0.03125, %v5397_v56 }
 0xc96   :  { %v5421_v23 = vadd.f32 1e-05, %v5413_v31 }
 0xc97   :  { %v5400_v19 = vpop.xlane.xlu0 %5399 }
 0xc98   :  { %13771 = vrsqrt.f32 %v5421_v23  ;;  %v5414_v20 = vmul.f32 0.03125, %v5400_v19 }
 0xc99   :  { %v13766_v49 = vpop.eup %13765 }
 0xc9a   :  { %v5434_v27 = vmul.f32 %v13766_v49, %v15707_v39  ;;  %v5422_v4 = vadd.f32 1e-05, %v5414_v20  ;;  %v15860_v20 = vld [vmem:[%s17606_s20 + $0x2] ss:$0 sm:$0xff] }
 0xc9b   :  { %v5403_v36 = vpop.xlane.xlu1 %5402 }
 0xc9c   :  { %13773 = vrsqrt.f32 %v5422_v4  ;;  %v5415_v47 = vmul.f32 0.03125, %v5403_v36  ;;  %v5448_v12 = vmul.f32 %v11347_v60, %v5434_v27 }
 0xc9d   :  { %v13768_v46 = vpop.eup %13767 }
 0xc9e   :  { %v5435_v18 = vmul.f32 %v13768_v46, %v15712_v6  ;;  %v5423_v5 = vadd.f32 1e-05, %v5415_v47  ;;  %v15778_v7 = vadd.f32 %v11348_v50, %v5448_v12 }
 0xc9f   :  { %v5406_v41 = vpop.xlane.xlu0 %5405 }
 0xca0   :  { %v5449_v48 = vmul.f32 %v11347_v60, %v5435_v18  ;;  %13775 = vrsqrt.f32 %v5423_v5  ;;  %v5416_v39 = vmul.f32 0.03125, %v5406_v41 }
 0xca1   :  { %v13770_v38 = vpop.eup %13769 }
 0xca2   :  { %v5436_v30 = vmul.f32 %v13770_v38, %v15718_v59  ;;  %v5424_v43 = vadd.f32 1e-05, %v5416_v39  ;;  %v15780_v16 = vadd.f32 %v11348_v50, %v5449_v48 }
 0xca3   :  { %v5409_v34 = vpop.xlane.xlu1 %5408 }
 0xca4   :  { %13777 = vrsqrt.f32 %v5424_v43  ;;  %v5417_v6 = vmul.f32 0.03125, %v5409_v34  ;;  %v15784_v10 = vpack.c.bf16 %v15780_v16, %v15778_v7  ;;  %v5450_v0 = vmul.f32 %v11347_v60, %v5436_v30 }
 0xca5   :  { %v13772_v9 = vpop.eup %13771 }
 0xca6   :  { %v5437_v11 = vmul.f32 %v13772_v9, %v15724_v8  ;;  %v5425_v40 = vadd.f32 1e-05, %v5417_v6  ;;  %13113 = vmatprep.mubr.msk.bf16.mxu1 %vm110_vm0, %v15784_v10  ;;  %13125 = vmatprep.mubr.msk.bf16.mxu0 %vm110_vm0, %v15784_v10  ;;  %v15791_v28 = vadd.f32 %v11348_v50, %v5450_v0  ;;  %v13548_v8 = vld [vmem:[%s17604_s28 + $0x20] sm:$0xff]  }
 0xca8   :  { %v5451_v59 = vmul.f32 %v11347_v60, %v5437_v11  ;;  %13779 = vrsqrt.f32 %v5425_v40 }
 0xca9   :  { %v13774_v35 = vpop.eup %13773 }
 0xcaa   :  { %v15793_v22 = vadd.f32 %v11348_v50, %v5451_v59  ;;  %v5438_v53 = vmul.f32 %v13774_v35, %v15729_v62 }
 0xcac   :  { %v15798_v33 = vpack.c.bf16 %v15793_v22, %v15791_v28  ;;  %v5452_v24 = vmul.f32 %v11347_v60, %v5438_v53  ;;  %v15884_v53 = vld [vmem:[%s17607_s27 + $0x2] ss:$0 sm:$0xff] }
 0xcad   :  { %v13776_v25 = vpop.eup %13775 }
 0xcae   :  { %v5439_v54 = vmul.f32 %v13776_v25, %v15734_v15  ;;  %13114 = vmatmul.mubr.msk.bf16.vlgmr.msra.gmra.mxu1 %vm110_vm0, %v15798_v33  ;;  %13126 = vmatmul.mubr.msk.bf16.vlgmr.msra.gmra.mxu0 %vm110_vm0, %v15798_v33  ;;  %v15810_v61 = vadd.f32 %v11348_v50, %v5452_v24 }
 0xcaf   :  { %13134 = vmatpush3.bf16.msra.mxu1 %v15766_v17 }
 0xcb0   :  { %v5453_v62 = vmul.f32 %v11347_v60, %v5439_v54  ;;  %13135 = vmatprep.subr.bf16.mxu1 %v13548_v8 }
 0xcb1   :  { %v13778_v55 = vpop.eup %13777 }
 0xcb2   :  { %v5440_v52 = vmul.f32 %v13778_v55, %v15739_v51  ;;  %v15812_v13 = vadd.f32 %v11348_v50, %v5453_v62 }
 0xcb3   :  { %13136 = vmatpush3.bf16.msra.mxu1 %v13548_v8 }
 0xcb4   :  { %v15816_v15 = vpack.c.bf16 %v15812_v13, %v15810_v61  ;;  %13151 = vmatprep.subr.bf16.mxu1 %v17660_v26  ;;  %v5454_v21 = vmul.f32 %v11347_v60, %v5440_v52 }
 0xcb5   :  { %v13780_v57 = vpop.eup %13779 }
 0xcb6   :  { %v5441_v42 = vmul.f32 %v13780_v57, %v15744_v1  ;;  %13117 = vmatprep.mubr.msk.bf16.mxu1 %vm110_vm0, %v15816_v15  ;;  %13129 = vmatprep.mubr.msk.bf16.mxu0 %vm110_vm0, %v15816_v15  ;;  %v15824_v45 = vadd.f32 %v11348_v50, %v5454_v21 }
 0xcb8   :  { %v5455_v51 = vmul.f32 %v11347_v60, %v5441_v42 }
 0xcba   :  { %v15826_v17 = vadd.f32 %v11348_v50, %v5455_v51 }
 0xcbc   :  { %v15830_v3 = vpack.c.bf16 %v15826_v17, %v15824_v45 }
 0xcbe   :  { %13118 = vmatmul.mubr.msk.bf16.gmra.mxu1 %vm110_vm0, %v15830_v3  ;;  %13130 = vmatmul.mubr.msk.bf16.gmra.mxu0 %vm110_vm0, %v15830_v3 }
 0xcbf   :  { %13137 = vmatprep.mubr.msk.bf16.mxu1 %vm110_vm0, %v15784_v10  ;;  %13147 = vmatprep.mubr.msk.bf16.mxu0 %vm13924_vm1, %v17660_v26 }
 0xcc6   :  { %13138 = vmatmul.mubr.msk.bf16.vlgmr.msra.gmra.mxu1 %vm110_vm0, %v15798_v33 }
 0xcc7   :  { %13141 = vmatprep.mubr.msk.bf16.mxu1 %vm110_vm0, %v15816_v15 }
 0xcce   :  { %13142 = vmatmul.mubr.msk.bf16.gmra.mxu1 %vm110_vm0, %v15830_v3 }
 0xccf   :  { %13153 = vmatprep.mubr.msk.bf16.mxu1 %vm13924_vm1, %v17660_v26 }
 0xd6e   :  { %v13115_v1 = vpop.f32.mrf.mxu1  ;;  %v13127_v32 = vpop.f32.mrf.mxu0 }
 0xd6f   :  { %v5646_v31 = vadd.f32 %v13127_v32, %v15851_v37  ;;  %v5556_v48 = vadd.f32 %v13115_v1, %v15860_v20 }
 0xd70   :  { %v5547_v14 = vpop.f32.mrf.mxu1  ;;  %v5637_v29 = vpop.f32.mrf.mxu0 }
 0xd71   :  { %v5638_v44 = vadd.f32 %v15851_v37, %v5637_v29  ;;  %v5548_v49 = vadd.f32 %v15860_v20, %v5547_v14  ;;  %v5768_v60 = vpack.c.bf16 %v5646_v31, %v5646_v31  ;;  %v5760_v0 = vpack.c.bf16 %v5556_v48, %v5556_v48 }
 0xd72   :  { %v13128_v58 = vpop.f32.mrf.mxu0  ;;  %v13116_v63 = vpop.f32.mrf.mxu1 }
 0xd73   :  { %v5766_v2 = vpack.c.bf16 %v5638_v44, %v5638_v44  ;;  %v5649_v36 = vadd.f32 %v13128_v58, %v15851_v37  ;;  %v5758_v46 = vpack.c.bf16 %v5548_v49, %v5548_v49  ;;  %v5878_v18 = vsel %vm388_vm2, %v5768_v60, 0 }
 0xd74   :  { %v5640_v56 = vpop.f32.mrf.mxu0  ;;  %v5550_v4 = vpop.f32.mrf.mxu1  ;;  %v5559_v11 = vadd.f32 %v13116_v63, %v15860_v20 }
 0xd75   :  { %v5786_v23 = vsel %vm388_vm2, %v5766_v2, 0  ;;  %v5641_v19 = vadd.f32 %v15851_v37, %v5640_v56  ;;  %v5551_v12 = vadd.f32 %v15860_v20, %v5550_v4  ;;  %v5769_v5 = vpack.c.bf16 %v5649_v36, %v5649_v36 }
 0xd76   :  { %13146 = vmatpush3.bf16.xpose.msra.mxu0 %v5786_v23  ;;  %v5761_v62 = vpack.c.bf16 %v5559_v11, %v5559_v11 }
 0xd77   :  { %v5767_v27 = vpack.c.bf16 %v5641_v19, %v5641_v19  ;;  %13157 = vmatprep.subr.bf16.mxu0 %v17660_v26  ;;  %v5759_v39 = vpack.c.bf16 %v5551_v12, %v5551_v12  ;;  %v5924_v43 = vsel %vm388_vm2, %v5769_v5, 0 }
 0xd79   :  { %v5832_v47 = vsel %vm388_vm2, %v5767_v27, 0 }
 0xd7a   :  { %13152 = vmatpush3.bf16.xpose.msra.mxu1 %v5832_v47 }
 0xd7b   :  { %13163 = vmatprep.subr.bf16.mxu1 %v17660_v26 }
 0xd7d   :  { %13148 = vmatmul.mubr.msk.bf16.vlgmr.msra.gmra.mxu0 %vm388_vm2, %v5758_v46 }
 0xd7e   :  { %v13119_v50 = vpop.f32.mrf.mxu1  ;;  %v13131_v41 = vpop.f32.mrf.mxu0  ;;  %13158 = vmatpush3.bf16.xpose.msra.mxu0 %v5878_v18  ;;  %13159 = vmatprep.mubr.msk.bf16.mxu0 %vm13924_vm1, %v17660_v26 }
 0xd7f   :  { %13169 = vmatprep.subr.bf16.mxu0 %v17660_v26  ;;  %v5662_v8 = vadd.f32 %v13131_v41, %v15851_v37  ;;  %v5572_v31 = vadd.f32 %v13119_v50, %v15860_v20 }
 0xd80   :  { %v5563_v38 = vpop.f32.mrf.mxu1  ;;  %v5653_v30 = vpop.f32.mrf.mxu0 }
 0xd81   :  { %v5654_v34 = vadd.f32 %v15851_v37, %v5653_v30  ;;  %13154 = vmatmul.mubr.msk.bf16.vlgmr.msra.gmra.mxu1 %vm388_vm2, %v5759_v39  ;;  %v5564_v55 = vadd.f32 %v15860_v20, %v5563_v38  ;;  %v5772_v42 = vpack.c.bf16 %v5662_v8, %v5662_v8  ;;  %v5764_v46 = vpack.c.bf16 %v5572_v31, %v5572_v31 }
 0xd82   :  { %v13120_v6 = vpop.f32.mrf.mxu1  ;;  %v13132_v9 = vpop.f32.mrf.mxu0  ;;  %13164 = vmatpush3.bf16.xpose.msra.mxu1 %v5924_v43  ;;  %13165 = vmatprep.mubr.msk.bf16.mxu1 %vm13924_vm1, %v17660_v26 }
 0xd83   :  { %v5770_v40 = vpack.c.bf16 %v5654_v34, %v5654_v34  ;;  %13175 = vmatprep.subr.bf16.mxu1 %v17660_v26  ;;  %v5665_v51 = vadd.f32 %v13132_v9, %v15851_v37  ;;  %v5762_v14 = vpack.c.bf16 %v5564_v55, %v5564_v55  ;;  %v5575_v12 = vadd.f32 %v13120_v6, %v15860_v20 }
 0xd84   :  { %v5566_v59 = vpop.f32.mrf.mxu1  ;;  %v5656_v35 = vpop.f32.mrf.mxu0 }
 0xd85   :  { %v5970_v25 = vsel %vm388_vm2, %v5770_v40, 0  ;;  %v5657_v24 = vadd.f32 %v15851_v37, %v5656_v35  ;;  %13160 = vmatmul.mubr.msk.bf16.vlgmr.msra.gmra.mxu0 %vm388_vm2, %v5760_v0  ;;  %v5567_v29 = vadd.f32 %v15860_v20, %v5566_v59  ;;  %v6062_v37 = vsel %vm388_vm2, %v5772_v42, 0 }
 0xd86   :  { %v13139_v54 = vpop.f32.mrf.mxu1  ;;  %13170 = vmatpush3.bf16.xpose.msra.mxu0 %v5970_v25  ;;  %13171 = vmatprep.mubr.msk.bf16.mxu0 %vm13924_vm1, %v17660_v26  ;;  %v5773_v2 = vpack.c.bf16 %v5665_v51, %v5665_v51  ;;  %v5765_v41 = vpack.c.bf16 %v5575_v12, %v5575_v12 }
 0xd87   :  { %v5771_v52 = vpack.c.bf16 %v5657_v24, %v5657_v24  ;;  %v15894_v57 = vadd.f32 %v13139_v54, %v15884_v53  ;;  %13181 = vmatprep.subr.bf16.mxu0 %v17660_v26  ;;  %v5763_v23 = vpack.c.bf16 %v5567_v29, %v5567_v29 }
 0xd88   :  { %v5727_v21 = vpop.f32.mrf.mxu1  ;;  %v6108_v27 = vsel %vm388_vm2, %v5773_v2, 0 }
 0xd89   :  { %13166 = vmatmul.mubr.msk.bf16.vlgmr.msra.gmra.mxu1 %vm388_vm2, %v5761_v62  ;;  %v6016_v1 = vsel %vm388_vm2, %v5771_v52, 0  ;;  %v5728_v63 = vadd.f32 %v15884_v53, %v5727_v21 }
 0xd8a   :  { %v13140_v32 = vpop.f32.mrf.mxu1  ;;  %13176 = vmatpush3.bf16.xpose.msra.mxu1 %v6016_v1  ;;  %13177 = vmatprep.mubr.msk.bf16.mxu1 %vm13924_vm1, %v17660_v26 }
 0xd8b   :  { %v15904_v44 = vadd.f32 %v13140_v32, %v15884_v53  ;;  %13187 = vmatprep.subr.bf16.mxu1 %v17660_v26  ;;  %v5774_v4 = vpack.c.bf16 %v5728_v63, %v5728_v63 }
 0xd8c   :  { %v5730_v58 = vpop.f32.mrf.mxu1 }
 0xd8d   :  { %13172 = vmatmul.mubr.msk.bf16.vlgmr.msra.gmra.mxu0 %vm388_vm2, %v5762_v14  ;;  %v5731_v60 = vadd.f32 %v15884_v53, %v5730_v58  ;;  %v6258_v5 = vsel %vm865_vm3, %v5774_v4, 0 }
 0xd8e   :  { %v13143_v56 = vpop.f32.mrf.mxu1  ;;  %13182 = vmatpush3.bf16.xpose.msra.mxu0 %v6062_v37  ;;  %13183 = vmatprep.mubr.msk.bf16.mxu0 %vm13924_vm1, %v17660_v26 }
 0xd8f   :  { %v15914_v19 = vadd.f32 %v13143_v56, %v15884_v53  ;;  %13193 = vmatprep.subr.bf16.mxu0 %v17660_v26  ;;  %v5775_v50 = vpack.c.bf16 %v5731_v60, %v5731_v60 }
 0xd90   :  { %v5743_v49 = vpop.f32.mrf.mxu1 }
 0xd91   :  { %v15920_v36 = vadd.f32 %v15884_v53, %v5743_v49  ;;  %13178 = vmatmul.mubr.msk.bf16.vlgmr.msra.gmra.mxu1 %vm388_vm2, %v5763_v23  ;;  %v6304_v20 = vsel %vm865_vm3, %v5775_v50, 0 }
 0xd92   :  { %v13144_v47 = vpop.f32.mrf.mxu1  ;;  %13188 = vmatpush3.bf16.xpose.msra.mxu1 %v6108_v27  ;;  %13189 = vmatprep.mubr.msk.bf16.mxu1 %vm13924_vm1, %v17660_v26 }
 0xd93   :  { %v15927_v18 = vadd.f32 %v13144_v47, %v15884_v53  ;;  %13199 = vmatprep.subr.bf16.mxu1 %v17660_v26 }
 0xd94   :  { %v15940_v38 = vpop.f32.mrf.mxu1 }
 0xd95   :  { %13184 = vmatmul.mubr.msk.bf16.vlgmr.msra.gmra.mxu0 %vm388_vm2, %v5764_v46 }
 0xd96   :  { %13194 = vmatpush3.bf16.msra.mxu0 %v6258_v5  ;;  %13195 = vmatprep.mubr.msk.bf16.mxu0 %vm13924_vm1, %v17660_v26 }
 0xd97   :  { %13205 = vmatprep.subr.bf16.mxu0 %v17660_v26 }
 0xd99   :  { %13190 = vmatmul.mubr.msk.bf16.vlgmr.msra.gmra.mxu1 %vm388_vm2, %v5765_v41 }
 0xd9a   :  { %13200 = vmatpush3.bf16.msra.mxu1 %v6304_v20  ;;  %13201 = vmatprep.mubr.msk.bf16.mxu1 %vm13924_vm1, %v17660_v26 }
 0xd9b   :  { %13211 = vmatprep.subr.bf16.mxu1 %v17660_v26 }
 0xe3d   :  { %v5822_v48 = vpop.f32.mrf.mxu0 }
 0xe3e   :  { %v6150_v39 = vmul.f32 0.25, %v5822_v48 }
 0xe3f   :  { %v13149_v30 = vpop.f32.mrf.mxu0 }
 0xe40   :  { %v6158_v43 = vsel %vm765_vm4, %v6150_v39, -inf }
 0xe41   :  { %6159 = vmax.xlane.f32.xlu0 %v6158_v43  ;;  %v5825_v34 = vpop.f32.mrf.mxu0  ;;  %v5868_v6 = vpop.f32.mrf.mxu1 }
 0xe42   :  { %v6151_v9 = vmul.f32 0.25, %v5868_v6 }
 0xe43   :  { %v13150_v0 = vpop.f32.mrf.mxu0  ;;  %v13155_v11 = vpop.f32.mrf.mxu1 }
 0xe44   :  { %v6161_v40 = vsel %vm765_vm4, %v6151_v9, -inf }
 0xe45   :  { %v5914_v59 = vpop.f32.mrf.mxu0  ;;  %6162 = vmax.xlane.f32.xlu1 %v6161_v40  ;;  %v5871_v35 = vpop.f32.mrf.mxu1 }
 0xe46   :  { %v6152_v8 = vmul.f32 0.25, %v5914_v59 }
 0xe47   :  { %v13156_v25 = vpop.f32.mrf.mxu1  ;;  %v13161_v24 = vpop.f32.mrf.mxu0 }
 0xe48   :  { %v6164_v54 = vsel %vm765_vm4, %v6152_v8, -inf }
 0xe49   :  { %6165 = vmax.xlane.f32.xlu0 %v6164_v54  ;;  %v5917_v62 = vpop.f32.mrf.mxu0  ;;  %v5960_v55 = vpop.f32.mrf.mxu1 }
 0xe4a   :  { %v6153_v52 = vmul.f32 0.25, %v5960_v55 }
 0xe4b   :  { %v13162_v21 = vpop.f32.mrf.mxu0  ;;  %v13167_v42 = vpop.f32.mrf.mxu1 }
 0xe4c   :  { %v6167_v51 = vsel %vm765_vm4, %v6153_v52, -inf }
 0xe4d   :  { %6168 = vmax.xlane.f32.xlu1 %v6167_v51  ;;  %v5963_v1 = vpop.f32.mrf.mxu1  ;;  %v6006_v32 = vpop.f32.mrf.mxu0 }
 0xe4e   :  { %v6154_v14 = vmul.f32 0.25, %v6006_v32 }
 0xe4f   :  { %v13168_v29 = vpop.f32.mrf.mxu1  ;;  %v13173_v58 = vpop.f32.mrf.mxu0 }
 0xe50   :  { %v6170_v37 = vsel %vm765_vm4, %v6154_v14, -inf }
 0xe51   :  { %v6052_v2 = vpop.f32.mrf.mxu1  ;;  %6171 = vmax.xlane.f32.xlu0 %v6170_v37  ;;  %v6009_v63 = vpop.f32.mrf.mxu0 }
 0xe52   :  { %v6155_v56 = vmul.f32 0.25, %v6052_v2 }
 0xe53   :  { %v13174_v31 = vpop.f32.mrf.mxu0  ;;  %v13179_v23 = vpop.f32.mrf.mxu1 }
 0xe54   :  { %v6173_v49 = vsel %vm765_vm4, %v6155_v56, -inf }
 0xe55   :  { %6174 = vmax.xlane.f32.xlu1 %v6173_v49  ;;  %v6055_v27 = vpop.f32.mrf.mxu1  ;;  %v6098_v4 = vpop.f32.mrf.mxu0 }
 0xe56   :  { %v6156_v60 = vmul.f32 0.25, %v6098_v4 }
 0xe57   :  { %v13180_v47 = vpop.f32.mrf.mxu1  ;;  %v13185_v46 = vpop.f32.mrf.mxu0 }
 0xe58   :  { %v6176_v12 = vsel %vm765_vm4, %v6156_v60, -inf }
 0xe59   :  { %v6144_v5 = vpop.f32.mrf.mxu1  ;;  %6177 = vmax.xlane.f32.xlu0 %v6176_v12  ;;  %v6101_v50 = vpop.f32.mrf.mxu0 }
 0xe5a   :  { %v6157_v41 = vmul.f32 0.25, %v6144_v5 }
 0xe5b   :  { %v13186_v20 = vpop.f32.mrf.mxu0  ;;  %v13191_v48 = vpop.f32.mrf.mxu1 }
 0xe5c   :  { %v6179_v30 = vsel %vm765_vm4, %v6157_v41, -inf }
 0xe5d   :  { %6180 = vmax.xlane.f32.xlu1 %v6179_v30  ;;  %v6147_v43 = vpop.f32.mrf.mxu1 }
 0xe5f   :  { %v13192_v34 = vpop.f32.mrf.mxu1 }
 0xeca   :  { %v6160_v6 = vpop.xlane.xlu0 %6159 }
 0xecb   :  { %v6182_v0 = vsub.f32 %v6150_v39, %v6160_v6 }
 0xecd   :  { %v6190_v11 = vmul.f32 1.442695, %v6182_v0  ;;  %v5776_v0 = vpack.c.bf16 %v15894_v57, %v15894_v57 }
 0xece   :  { %v6163_v40 = vpop.xlane.xlu1 %6162 }
 0xecf   :  { %13781 = vpow2.f32 %v6190_v11  ;;  %v6183_v59 = vsub.f32 %v6151_v9, %v6163_v40 }
 0xed1   :  { %v6192_v35 = vmul.f32 1.442695, %v6183_v59 }
 0xed2   :  { %v6166_v25 = vpop.xlane.xlu0 %6165 }
 0xed3   :  { %13783 = vpow2.f32 %v6192_v35  ;;  %v6184_v24 = vsub.f32 %v6152_v8, %v6166_v25  ;;  %v6350_v25 = vsel %vm865_vm3, %v5776_v0, 0 }
 0xed5   :  { %v6194_v54 = vmul.f32 1.442695, %v6184_v24  ;;  %v5777_v24 = vpack.c.bf16 %v15904_v44, %v15904_v44  ;;  %v5747_v44 = vadd.f32 %v15884_v53, %v15940_v38 }
 0xed6   :  { %v6169_v62 = vpop.xlane.xlu1 %6168 }
 0xed7   :  { %13785 = vpow2.f32 %v6194_v54  ;;  %v6185_v55 = vsub.f32 %v6153_v52, %v6169_v62 }
 0xed9   :  { %v6196_v21 = vmul.f32 1.442695, %v6185_v55 }
 0xeda   :  { %v6172_v42 = vpop.xlane.xlu0 %6171 }
 0xedb   :  { %13787 = vpow2.f32 %v6196_v21  ;;  %v6186_v51 = vsub.f32 %v6154_v14, %v6172_v42  ;;  %v6396_v21 = vsel %vm865_vm3, %v5777_v24, 0  ;;  %v5778_v42 = vpack.c.bf16 %v15920_v36, %v15920_v36 }
 0xedc   :  { %v13782_v1 = vpop.eup %13781 }
 0xedd   :  { %v6198_v32 = vmul.f32 1.442695, %v6186_v51  ;;  %v6206_v39 = vsel %vm765_vm4, %v13782_v1, 0.0 }
 0xede   :  { %v6175_v29 = vpop.xlane.xlu1 %6174  ;;  %6207 = vadd.xlane.f32.xlu0 %v6206_v39 }
 0xedf   :  { %13789 = vpow2.f32 %v6198_v32  ;;  %v6187_v9 = vsub.f32 %v6155_v56, %v6175_v29  ;;  %v6442_v29 = vsel %vm865_vm3, %v5778_v42, 0 }
 0xee0   :  { %v13784_v58 = vpop.eup %13783 }
 0xee1   :  { %v6200_v37 = vmul.f32 1.442695, %v6187_v9  ;;  %v6209_v8 = vsel %vm765_vm4, %v13784_v58, 0.0  ;;  %v5779_v9 = vpack.c.bf16 %v5747_v44, %v5747_v44 }
 0xee2   :  { %6210 = vadd.xlane.f32.xlu1 %v6209_v8  ;;  %v6178_v2 = vpop.xlane.xlu0 %6177 }
 0xee3   :  { %13791 = vpow2.f32 %v6200_v37  ;;  %v6188_v52 = vsub.f32 %v6156_v60, %v6178_v2  ;;  %v5780_v37 = vpack.c.bf16 %v15914_v19, %v15914_v19  ;;  %v6488_v2 = vsel %vm865_vm3, %v5779_v9, 0 }
 0xee4   :  { %v13786_v63 = vpop.eup %13785 }
 0xee5   :  { %v6202_v31 = vmul.f32 1.442695, %v6188_v52  ;;  %v6212_v14 = vsel %vm765_vm4, %v13786_v63, 0.0 }
 0xee6   :  { %v6181_v23 = vpop.xlane.xlu1 %6180  ;;  %6213 = vadd.xlane.f32.xlu0 %v6212_v14  ;;  %v5781_v14 = vpack.c.bf16 %v15927_v18, %v15927_v18 }
 0xee7   :  { %13793 = vpow2.f32 %v6202_v31  ;;  %v6189_v49 = vsub.f32 %v6157_v41, %v6181_v23  ;;  %v6534_v31 = vsel %vm865_vm3, %v5780_v37, 0 }
 0xee8   :  { %v13788_v27 = vpop.eup %13787 }
 0xee9   :  { %v6204_v4 = vmul.f32 1.442695, %v6189_v49  ;;  %v6215_v56 = vsel %vm765_vm4, %v13788_v27, 0.0  ;;  %v13549_v49 = vld [vmem:[%s17601_s4 + $0x38] sm:$0xff]  }
 0xeea   :  { %6216 = vadd.xlane.f32.xlu1 %v6215_v56 }
 0xeeb   :  { %13795 = vpow2.f32 %v6204_v4  ;;  %v6580_v4 = vsel %vm865_vm3, %v5781_v14, 0 }
 0xeec   :  { %v13790_v47 = vpop.eup %13789 }
 0xeed   :  { %v6218_v46 = vsel %vm765_vm4, %v13790_v47, 0.0 }
 0xeee   :  { %6219 = vadd.xlane.f32.xlu0 %v6218_v46 }
 0xef0   :  { %v15955_v12 = vpop.eup %13791 }
 0xef1   :  { %v6221_v60 = vsel %vm765_vm4, %v15955_v12, 0.0 }
 0xef2   :  { %6222 = vadd.xlane.f32.xlu1 %v6221_v60  ;;  %v13550_v60 = vld [vmem:[%s17601_s4 + $0x30] sm:$0xff]  }
 0xef4   :  { %v15959_v5 = vpop.eup %13793 }
 0xef5   :  { %v6224_v50 = vsel %vm765_vm4, %v15959_v5, 0.0 }
 0xef6   :  { %6225 = vadd.xlane.f32.xlu0 %v6224_v50  ;;  %v13552_v50 = vld [vmem:[%s17604_s28 + $0x30] sm:$0xff]  }
 0xef8   :  { %v15963_v41 = vpop.eup %13795 }
 0xef9   :  { %v6227_v20 = vsel %vm765_vm4, %v15963_v41, 0.0 }
 0xefa   :  { %6228 = vadd.xlane.f32.xlu1 %v6227_v20  ;;  %v13554_v20 = vld [vmem:[%s17603_s29 + $0x38] sm:$0xff]  }
 0xf67   :  { %v6208_v48 = vpop.xlane.xlu0 %6207 }
 0xf68   :  { %13797 = vrcp.f32 %v6208_v48 }
 0xf6b   :  { %v6211_v30 = vpop.xlane.xlu1 %6210 }
 0xf6c   :  { %13799 = vrcp.f32 %v6211_v30 }
 0xf6f   :  { %v6214_v43 = vpop.xlane.xlu0 %6213 }
 0xf70   :  { %13801 = vrcp.f32 %v6214_v43 }
 0xf73   :  { %v6217_v34 = vpop.xlane.xlu1 %6216 }
 0xf74   :  { %13803 = vrcp.f32 %v6217_v34 }
 0xf75   :  { %v13798_v6 = vpop.eup %13797 }
 0xf76   :  { %v6238_v11 = vmul.f32 %v13798_v6, %v13782_v1 }
 0xf77   :  { %v6220_v40 = vpop.xlane.xlu0 %6219 }
 0xf78   :  { %v6246_v59 = vpack.c.bf16 %v6238_v11, %v6238_v11  ;;  %13805 = vrcp.f32 %v6220_v40 }
 0xf79   :  { %v13800_v35 = vpop.eup %13799 }
 0xf7a   :  { %v6239_v54 = vmul.f32 %v13800_v35, %v13784_v58  ;;  %13196 = vmatmul.mubr.msk.bf16.vlgmr.msra.gmra.mxu0 %vm765_vm4, %v6246_v59 }
 0xf7b   :  { %13206 = vmatpush3.bf16.msra.mxu0 %v6350_v25  ;;  %v6223_v62 = vpop.xlane.xlu1 %6222  ;;  %13207 = vmatprep.mubr.msk.bf16.mxu0 %vm13924_vm1, %v17660_v26 }
 0xf7c   :  { %v6247_v55 = vpack.c.bf16 %v6239_v54, %v6239_v54  ;;  %13807 = vrcp.f32 %v6223_v62  ;;  %13217 = vmatprep.subr.bf16.mxu0 %v17660_v26 }
 0xf7d   :  { %v13802_v57 = vpop.eup %13801 }
 0xf7e   :  { %v6240_v51 = vmul.f32 %v13802_v57, %v13786_v63  ;;  %13202 = vmatmul.mubr.msk.bf16.vlgmr.msra.gmra.mxu1 %vm765_vm4, %v6247_v55  ;;  %v13555_v55 = vld [vmem:[%s17603_s29 + $0x30] sm:$0xff]  }
 0xf7f   :  { %13212 = vmatpush3.bf16.msra.mxu1 %v6396_v21  ;;  %v6226_v1 = vpop.xlane.xlu0 %6225  ;;  %13213 = vmatprep.mubr.msk.bf16.mxu1 %vm13924_vm1, %v17660_v26 }
 0xf80   :  { %v6248_v32 = vpack.c.bf16 %v6240_v51, %v6240_v51  ;;  %13809 = vrcp.f32 %v6226_v1  ;;  %13223 = vmatprep.subr.bf16.mxu1 %v17660_v26 }
 0xf81   :  { %v13804_v39 = vpop.eup %13803 }
 0xf82   :  { %v6241_v36 = vmul.f32 %v13804_v39, %v13788_v27  ;;  %13208 = vmatmul.mubr.msk.bf16.vlgmr.msra.gmra.mxu0 %vm765_vm4, %v6248_v32 }
 0xf83   :  { %13218 = vmatpush3.bf16.msra.mxu0 %v6442_v29  ;;  %v6229_v53 = vpop.xlane.xlu1 %6228  ;;  %13219 = vmatprep.mubr.msk.bf16.mxu0 %vm13924_vm1, %v17660_v26 }
 0xf84   :  { %v6249_v38 = vpack.c.bf16 %v6241_v36, %v6241_v36  ;;  %13811 = vrcp.f32 %v6229_v53  ;;  %13229 = vmatprep.subr.bf16.mxu0 %v17660_v26 }
 0xf85   :  { %v13806_v58 = vpop.eup %13805 }
 0xf86   :  { %v6242_v8 = vmul.f32 %v13806_v58, %v13790_v47  ;;  %13214 = vmatmul.mubr.msk.bf16.vlgmr.msra.gmra.mxu1 %vm765_vm4, %v6249_v38 }
 0xf87   :  { %13224 = vmatpush3.bf16.msra.mxu1 %v6488_v2  ;;  %13225 = vmatprep.mubr.msk.bf16.mxu1 %vm13924_vm1, %v17660_v26 }
 0xf88   :  { %v6250_v52 = vpack.c.bf16 %v6242_v8, %v6242_v8  ;;  %13235 = vmatprep.subr.bf16.mxu1 %v17660_v26 }
 0xf89   :  { %v13808_v63 = vpop.eup %13807 }
 0xf8a   :  { %v6243_v19 = vmul.f32 %v13808_v63, %v15955_v12  ;;  %13220 = vmatmul.mubr.msk.bf16.vlgmr.msra.gmra.mxu0 %vm765_vm4, %v6250_v52 }
 0xf8b   :  { %13230 = vmatpush3.bf16.msra.mxu0 %v6534_v31  ;;  %13231 = vmatprep.mubr.msk.bf16.mxu0 %vm13924_vm1, %v17660_v26 }
 0xf8c   :  { %v6251_v23 = vpack.c.bf16 %v6243_v19, %v6243_v19 }
 0xf8d   :  { %v13810_v27 = vpop.eup %13809 }
 0xf8e   :  { %v6244_v56 = vmul.f32 %v13810_v27, %v15959_v5  ;;  %13226 = vmatmul.mubr.msk.bf16.vlgmr.msra.gmra.mxu1 %vm765_vm4, %v6251_v23  ;;  %v13551_v5 = vld [vmem:[%s17604_s28 + $0x38] sm:$0xff]  }
 0xf8f   :  { %13236 = vmatpush3.bf16.msra.mxu1 %v6580_v4  ;;  %13237 = vmatprep.mubr.msk.bf16.mxu1 %vm13924_vm1, %v17660_v26 }
 0xf90   :  { %v6252_v18 = vpack.c.bf16 %v6244_v56, %v6244_v56  ;;  %13251 = vmatprep.subr.bf16.mxu1 %v13549_v49 }
 0xf91   :  { %v13812_v47 = vpop.eup %13811 }
 0xf92   :  { %v6245_v46 = vmul.f32 %v13812_v47, %v15963_v41  ;;  %13232 = vmatmul.mubr.msk.bf16.vlgmr.msra.gmra.mxu0 %vm765_vm4, %v6252_v18  ;;  %v13553_v41 = vld [vmem:[%s17539_s7 + $0x10] sm:$0xff]  }
 0xf93   :  { %13241 = vmatprep.subr.bf16.mxu0 %v13553_v41 }
 0xf94   :  { %v6253_v12 = vpack.c.bf16 %v6245_v46, %v6245_v46  ;;  %13242 = vmatpush3.bf16.msra.mxu0 %v13553_v41 }
 0xf95   :  { %13263 = vmatprep.subr.bf16.mxu0 %v13554_v20 }
 0xf96   :  { %13238 = vmatmul.mubr.msk.bf16.vlgmr.msra.gmra.mxu1 %vm765_vm4, %v6253_v12 }
 0xf97   :  { %13252 = vmatpush3.bf16.msra.mxu1 %v13549_v49  ;;  %13255 = vmatprep.mubr.msk.bf16.mxu1 %vm110_vm0, %v15784_v10 }
 0xf98   :  { %13253 = vmatprep.subr.bf16.mxu1 %v13550_v60 }
 0xf9b   :  { %13254 = vmatpush3.bf16.msra.mxu1 %v13550_v60 }
 0xf9c   :  { %13275 = vmatprep.subr.bf16.mxu1 %v13551_v5 }
 0xf9e   :  { %13256 = vmatmul.mubr.msk.bf16.vlgmr.msra.gmra.mxu1 %vm110_vm0, %v15798_v33 }
 0xf9f   :  { %13259 = vmatprep.mubr.msk.bf16.mxu1 %vm110_vm0, %v15816_v15  ;;  %13276 = vmatpush3.bf16.msra.mxu1 %v13551_v5 }
 0xfa0   :  { %13277 = vmatprep.subr.bf16.mxu1 %v13552_v50 }
 0xfa3   :  { %13278 = vmatpush3.bf16.msra.mxu1 %v13552_v50 }
 0xfa4   :  { %13293 = vmatprep.subr.bf16.mxu1 %v17660_v26 }
 0xfa6   :  { %13260 = vmatmul.mubr.msk.bf16.gmra.mxu1 %vm110_vm0, %v15830_v3 }
 0xfa7   :  { %13279 = vmatprep.mubr.msk.bf16.mxu1 %vm110_vm0, %v15784_v10 }
 0xfae   :  { %13280 = vmatmul.mubr.msk.bf16.vlgmr.msra.gmra.mxu1 %vm110_vm0, %v15798_v33 }
 0xfaf   :  { %13283 = vmatprep.mubr.msk.bf16.mxu1 %vm110_vm0, %v15816_v15 }
 0xfb6   :  { %13284 = vmatmul.mubr.msk.bf16.gmra.mxu1 %vm110_vm0, %v15830_v3 }
 0xfb7   :  { %13295 = vmatprep.mubr.msk.bf16.mxu1 %vm13924_vm1, %v17660_v26 }
0x103a   :  { %v6294_v48 = vpop.f32.mrf.mxu0 }
0x103c   :  { %v13197_v30 = vpop.f32.mrf.mxu0 }
0x103e   :  { %v6297_v43 = vpop.f32.mrf.mxu0  ;;  %v6340_v34 = vpop.f32.mrf.mxu1 }
0x103f   :  { %v6622_v6 = vpack.c.bf16 %v6340_v34, %v6294_v48 }
0x1040   :  { %v13198_v0 = vpop.f32.mrf.mxu0  ;;  %v13203_v11 = vpop.f32.mrf.mxu1 }
0x1041   :  { %13243 = vmatprep.mubr.msk.bf16.mxu0 %vm388_vm2, %v6622_v6 }
0x1042   :  { %v6343_v40 = vpop.f32.mrf.mxu1  ;;  %v6386_v59 = vpop.f32.mrf.mxu0 }
0x1044   :  { %v13204_v35 = vpop.f32.mrf.mxu1  ;;  %v13209_v25 = vpop.f32.mrf.mxu0 }
0x1046   :  { %v6389_v24 = vpop.f32.mrf.mxu0  ;;  %v6432_v54 = vpop.f32.mrf.mxu1 }
0x1047   :  { %v6623_v62 = vpack.c.bf16 %v6432_v54, %v6386_v59  ;;  %v11427_v54 = vld [vmem:[%s17605_s5 + $0x3] ss:$0 sm:$0xff] }
0x1048   :  { %v13210_v57 = vpop.f32.mrf.mxu0  ;;  %v13215_v21 = vpop.f32.mrf.mxu1 }
0x1049   :  { %13244 = vmatmul.mubr.msk.bf16.vlgmr.msra.gmra.mxu0 %vm388_vm2, %v6623_v62 }
0x104a   :  { %v6435_v42 = vpop.f32.mrf.mxu1  ;;  %v6478_v44 = vpop.f32.mrf.mxu0  ;;  %13264 = vmatpush3.bf16.msra.mxu0 %v13554_v20 }
0x104b   :  { %13265 = vmatprep.subr.bf16.mxu0 %v13555_v55 }
0x104c   :  { %v13216_v51 = vpop.f32.mrf.mxu1  ;;  %v13221_v1 = vpop.f32.mrf.mxu0 }
0x104e   :  { %v6481_v32 = vpop.f32.mrf.mxu0  ;;  %v6524_v39 = vpop.f32.mrf.mxu1  ;;  %13266 = vmatpush3.bf16.msra.mxu0 %v13555_v55 }
0x104f   :  { %v6624_v29 = vpack.c.bf16 %v6524_v39, %v6478_v44  ;;  %13287 = vmatprep.subr.bf16.mxu0 %v17660_v26  ;;  %v16126_v32 = vld [vmem:[%s17606_s20 + $0x3] ss:$0 sm:$0xff] }
0x1050   :  { %v13222_v9 = vpop.f32.mrf.mxu0  ;;  %v13227_v36 = vpop.f32.mrf.mxu1 }
0x1051   :  { %13247 = vmatprep.mubr.msk.bf16.mxu0 %vm388_vm2, %v6624_v29 }
0x1052   :  { %v6527_v53 = vpop.f32.mrf.mxu1  ;;  %v6570_v38 = vpop.f32.mrf.mxu0 }
0x1054   :  { %v13228_v58 = vpop.f32.mrf.mxu1  ;;  %v13233_v37 = vpop.f32.mrf.mxu0 }
0x1056   :  { %v6573_v8 = vpop.f32.mrf.mxu0  ;;  %v6616_v2 = vpop.f32.mrf.mxu1 }
0x1057   :  { %v6625_v52 = vpack.c.bf16 %v6616_v2, %v6570_v38 }
0x1058   :  { %v13234_v63 = vpop.f32.mrf.mxu0  ;;  %v13239_v31 = vpop.f32.mrf.mxu1 }
0x1059   :  { %13248 = vmatmul.mubr.msk.bf16.gmra.mxu0 %vm388_vm2, %v6625_v52 }
0x105a   :  { %v6619_v14 = vpop.f32.mrf.mxu1  ;;  %13267 = vmatprep.mubr.msk.bf16.mxu0 %vm110_vm0, %v15784_v10 }
0x105c   :  { %v13240_v19 = vpop.f32.mrf.mxu1 }
0x105e   :  { %v16059_v23 = vpop.f32.mrf.mxu1 }
0x105f   :  { %v6794_v19 = vadd.f32 %v16059_v23, %v16126_v32 }
0x1060   :  { %v6785_v49 = vpop.f32.mrf.mxu1 }
0x1061   :  { %13268 = vmatmul.mubr.msk.bf16.vlgmr.msra.gmra.mxu0 %vm110_vm0, %v15798_v33  ;;  %v16082_v33 = vld [vmem:[%s17607_s27 + $0x3] ss:$0 sm:$0xff]  ;;  %v6786_v29 = vadd.f32 %v16126_v32, %v6785_v49 }
0x1062   :  { %v16063_v27 = vpop.f32.mrf.mxu1  ;;  %13271 = vmatprep.mubr.msk.bf16.mxu0 %vm110_vm0, %v15816_v15 }
0x1063   :  { %v6996_v8 = vpack.c.bf16 %v6786_v29, %v6786_v29 }
0x1064   :  { %v6788_v4 = vpop.f32.mrf.mxu1 }
0x1065   :  { %v6789_v2 = vadd.f32 %v16126_v32, %v6788_v4 }
0x1066   :  { %v16067_v56 = vpop.f32.mrf.mxu1 }
0x1067   :  { %v6997_v49 = vpack.c.bf16 %v6789_v2, %v6789_v2 }
0x1068   :  { %v16069_v18 = vpop.f32.mrf.mxu1 }
0x1069   :  { %13272 = vmatmul.mubr.msk.bf16.gmra.mxu0 %vm110_vm0, %v15830_v3 }
0x106a   :  { %v16073_v10 = vpop.f32.mrf.mxu1  ;;  %13289 = vmatprep.mubr.msk.bf16.mxu0 %vm13924_vm1, %v17660_v26 }
0x106c   :  { %v16077_v47 = vpop.f32.mrf.mxu1 }
0x106e   :  { %v13281_v15 = vpop.f32.mrf.mxu1 }
0x106f   :  { %v16085_v46 = vadd.f32 %v13281_v15, %v16082_v33 }
0x1070   :  { %v16087_v12 = vpop.f32.mrf.mxu1 }
0x1072   :  { %v13282_v60 = vpop.f32.mrf.mxu1 }
0x1073   :  { %v16090_v3 = vadd.f32 %v13282_v60, %v16082_v33 }
0x1074   :  { %v16092_v5 = vpop.f32.mrf.mxu1 }
0x1075   :  { %v6969_v29 = vadd.f32 %v16082_v33, %v16092_v5 }
0x1076   :  { %v13285_v50 = vpop.f32.mrf.mxu1 }
0x1077   :  { %v16095_v41 = vadd.f32 %v13285_v50, %v16082_v33  ;;  %v6998_v50 = vpack.c.bf16 %v6794_v19, %v6794_v19 }
0x1078   :  { %v6981_v20 = vpop.f32.mrf.mxu1 }
0x1079   :  { %v16098_v48 = vadd.f32 %v16082_v33, %v6981_v20  ;;  %v6797_v20 = vadd.f32 %v16063_v27, %v16126_v32 }
0x107a   :  { %v13286_v30 = vpop.f32.mrf.mxu1 }
0x107b   :  { %v16101_v43 = vadd.f32 %v13286_v30, %v16082_v33 }
0x1109   :  { %v16103_v34 = vpop.f32.mrf.mxu0 }
0x110b   :  { %v16105_v6 = vpop.f32.mrf.mxu0 }
0x110d   :  { %v16107_v0 = vpop.f32.mrf.mxu0 }
0x110f   :  { %v16109_v11 = vpop.f32.mrf.mxu0 }
0x1119   :  { %v16111_v40 = vpop.f32.mrf.mxu0 }
0x111b   :  { %v16113_v59 = vpop.f32.mrf.mxu0 }
0x111d   :  { %v16115_v35 = vpop.f32.mrf.mxu0 }
0x111f   :  { %v16117_v25 = vpop.f32.mrf.mxu0 }
0x1121   :  { %v13269_v24 = vpop.f32.mrf.mxu0 }
0x1122   :  { %v6884_v44 = vadd.f32 %v13269_v24, %v11427_v54 }
0x1123   :  { %v6875_v62 = vpop.f32.mrf.mxu0 }
0x1124   :  { %v6876_v55 = vadd.f32 %v11427_v54, %v6875_v62  ;;  %v7006_v53 = vpack.c.bf16 %v6884_v44, %v6884_v44  ;;  %v6999_v62 = vpack.c.bf16 %v6797_v20, %v6797_v20  ;;  %v6805_v44 = vadd.f32 %v16126_v32, %v16077_v47 }
0x1125   :  { %v13270_v57 = vpop.f32.mrf.mxu0 }
0x1126   :  { %v7004_v21 = vpack.c.bf16 %v6876_v55, %v6876_v55  ;;  %v6887_v38 = vadd.f32 %v13270_v57, %v11427_v54  ;;  %v7116_v52 = vsel %vm388_vm2, %v7006_v53, 0  ;;  %v6802_v55 = vadd.f32 %v16126_v32, %v16069_v18 }
0x1127   :  { %v6878_v42 = vpop.f32.mrf.mxu0  ;;  %v6966_v18 = vadd.f32 %v16082_v33, %v16087_v12  ;;  %v7013_v53 = vpack.c.bf16 %v6969_v29, %v6969_v29 }
0x1128   :  { %v7024_v51 = vsel %vm388_vm2, %v7004_v21, 0  ;;  %v6879_v1 = vadd.f32 %v11427_v54, %v6878_v42  ;;  %v7007_v63 = vpack.c.bf16 %v6887_v38, %v6887_v38  ;;  %v7000_v42 = vpack.c.bf16 %v6802_v55, %v6802_v55 }
0x1129   :  { %v13273_v39 = vpop.f32.mrf.mxu0  ;;  %13288 = vmatpush3.bf16.xpose.msra.mxu0 %v7024_v51  ;;  %v7012_v47 = vpack.c.bf16 %v6966_v18, %v6966_v18  ;;  %v7542_v38 = vsel %vm865_vm3, %v7013_v53, 0 }
0x112a   :  { %v7005_v9 = vpack.c.bf16 %v6879_v1, %v6879_v1  ;;  %13299 = vmatprep.subr.bf16.mxu0 %v17660_v26  ;;  %v7162_v4 = vsel %vm388_vm2, %v7007_v63, 0  ;;  %v6900_v23 = vadd.f32 %v13273_v39, %v11427_v54  ;;  %v6810_v1 = vadd.f32 %v16067_v56, %v16126_v32 }
0x112b   :  { %v6891_v36 = vpop.f32.mrf.mxu0  ;;  %v7001_v39 = vpack.c.bf16 %v6805_v44, %v6805_v44  ;;  %v7496_v56 = vsel %vm865_vm3, %v7012_v47, 0 }
0x112c   :  { %v7070_v58 = vsel %vm388_vm2, %v7005_v9, 0  ;;  %v6892_v31 = vadd.f32 %v11427_v54, %v6891_v36  ;;  %v7010_v57 = vpack.c.bf16 %v6900_v23, %v6900_v23  ;;  %v7002_v9 = vpack.c.bf16 %v6810_v1, %v6810_v1 }
0x112d   :  { %v13274_v37 = vpop.f32.mrf.mxu0  ;;  %13294 = vmatpush3.bf16.xpose.msra.mxu1 %v7070_v58  ;;  %v6813_v36 = vadd.f32 %v16073_v10, %v16126_v32  ;;  %v16189_v58 = vpop.f32.mrf.mxu1 }
0x112e   :  { %13305 = vmatprep.subr.bf16.mxu1 %v17660_v26  ;;  %v7008_v15 = vpack.c.bf16 %v6892_v31, %v6892_v31  ;;  %v6903_v27 = vadd.f32 %v13274_v37, %v11427_v54  ;;  %v7300_v51 = vsel %vm388_vm2, %v7010_v57, 0 }
0x112f   :  { %v6894_v14 = vpop.f32.mrf.mxu0  ;;  %v7003_v5 = vpack.c.bf16 %v6813_v36, %v6813_v36 }
0x1130   :  { %13290 = vmatmul.mubr.msk.bf16.vlgmr.msra.gmra.mxu0 %vm388_vm2, %v6996_v8  ;;  %v6895_v60 = vadd.f32 %v11427_v54, %v6894_v14  ;;  %v7208_v30 = vsel %vm388_vm2, %v7008_v15, 0  ;;  %v7011_v54 = vpack.c.bf16 %v6903_v27, %v6903_v27 }
0x1131   :  { %13300 = vmatpush3.bf16.xpose.msra.mxu0 %v7116_v52  ;;  %13301 = vmatprep.mubr.msk.bf16.mxu0 %vm13924_vm1, %v17660_v26 }
0x1132   :  { %13311 = vmatprep.subr.bf16.mxu0 %v17660_v26  ;;  %v7009_v24 = vpack.c.bf16 %v6895_v60, %v6895_v60  ;;  %v7346_v12 = vsel %vm388_vm2, %v7011_v54, 0 }
0x1134   :  { %13296 = vmatmul.mubr.msk.bf16.vlgmr.msra.gmra.mxu1 %vm388_vm2, %v6997_v49  ;;  %v7254_v21 = vsel %vm388_vm2, %v7009_v24, 0 }
0x1135   :  { %13306 = vmatpush3.bf16.xpose.msra.mxu1 %v7162_v4  ;;  %13307 = vmatprep.mubr.msk.bf16.mxu1 %vm13924_vm1, %v17660_v26 }
0x1136   :  { %13317 = vmatprep.subr.bf16.mxu1 %v17660_v26 }
0x1138   :  { %13302 = vmatmul.mubr.msk.bf16.vlgmr.msra.gmra.mxu0 %vm388_vm2, %v6998_v50 }
0x1139   :  { %13312 = vmatpush3.bf16.xpose.msra.mxu0 %v7208_v30  ;;  %13313 = vmatprep.mubr.msk.bf16.mxu0 %vm13924_vm1, %v17660_v26 }
0x113a   :  { %13323 = vmatprep.subr.bf16.mxu0 %v17660_v26 }
0x113c   :  { %13308 = vmatmul.mubr.msk.bf16.vlgmr.msra.gmra.mxu1 %vm388_vm2, %v6999_v62 }
0x113d   :  { %13318 = vmatpush3.bf16.xpose.msra.mxu1 %v7254_v21  ;;  %13319 = vmatprep.mubr.msk.bf16.mxu1 %vm13924_vm1, %v17660_v26 }
0x113e   :  { %13329 = vmatprep.subr.bf16.mxu1 %v17660_v26 }
0x1140   :  { %13314 = vmatmul.mubr.msk.bf16.vlgmr.msra.gmra.mxu0 %vm388_vm2, %v7000_v42 }
0x1141   :  { %13324 = vmatpush3.bf16.xpose.msra.mxu0 %v7300_v51  ;;  %13325 = vmatprep.mubr.msk.bf16.mxu0 %vm13924_vm1, %v17660_v26 }
0x1142   :  { %13335 = vmatprep.subr.bf16.mxu0 %v17660_v26 }
0x1144   :  { %13320 = vmatmul.mubr.msk.bf16.vlgmr.msra.gmra.mxu1 %vm388_vm2, %v7001_v39 }
0x1145   :  { %13330 = vmatpush3.bf16.xpose.msra.mxu1 %v7346_v12  ;;  %13331 = vmatprep.mubr.msk.bf16.mxu1 %vm13924_vm1, %v17660_v26 }
0x1146   :  { %13341 = vmatprep.subr.bf16.mxu1 %v17660_v26 }
0x1148   :  { %13326 = vmatmul.mubr.msk.bf16.vlgmr.msra.gmra.mxu0 %vm388_vm2, %v7002_v9 }
0x1149   :  { %13336 = vmatpush3.bf16.msra.mxu0 %v7496_v56  ;;  %13337 = vmatprep.mubr.msk.bf16.mxu0 %vm13924_vm1, %v17660_v26 }
0x114a   :  { %13347 = vmatprep.subr.bf16.mxu0 %v17660_v26 }
0x114c   :  { %13332 = vmatmul.mubr.msk.bf16.vlgmr.msra.gmra.mxu1 %vm388_vm2, %v7003_v5 }
0x114d   :  { %13342 = vmatpush3.bf16.msra.mxu1 %v7542_v38  ;;  %13343 = vmatprep.mubr.msk.bf16.mxu1 %vm13924_vm1, %v17660_v26 }
0x114e   :  { %13353 = vmatprep.subr.bf16.mxu1 %v17660_v26 }
0x11f0   :  { %v7060_v10 = vpop.f32.mrf.mxu0 }
0x11f1   :  { %v7388_v32 = vmul.f32 0.25, %v7060_v10 }
0x11f2   :  { %v13291_v37 = vpop.f32.mrf.mxu0 }
0x11f3   :  { %v7396_v8 = vsel %vm765_vm4, %v7388_v32, -inf }
0x11f4   :  { %v7106_v2 = vpop.f32.mrf.mxu1  ;;  %7397 = vmax.xlane.f32.xlu0 %v7396_v8  ;;  %v7063_v52 = vpop.f32.mrf.mxu0 }
0x11f5   :  { %v7389_v63 = vmul.f32 0.25, %v7106_v2 }
0x11f6   :  { %v13292_v31 = vpop.f32.mrf.mxu0  ;;  %v13297_v14 = vpop.f32.mrf.mxu1 }
0x11f7   :  { %v7399_v19 = vsel %vm765_vm4, %v7389_v63, -inf }
0x11f8   :  { %7400 = vmax.xlane.f32.xlu1 %v7399_v19  ;;  %v7109_v49 = vpop.f32.mrf.mxu1  ;;  %v7152_v4 = vpop.f32.mrf.mxu0 }
0x11f9   :  { %v7390_v15 = vmul.f32 0.25, %v7152_v4 }
0x11fa   :  { %v13298_v60 = vpop.f32.mrf.mxu1  ;;  %v13303_v50 = vpop.f32.mrf.mxu0 }
0x11fb   :  { %v7402_v20 = vsel %vm765_vm4, %v7390_v15, -inf }
0x11fc   :  { %v7198_v23 = vpop.f32.mrf.mxu1  ;;  %7403 = vmax.xlane.f32.xlu0 %v7402_v20  ;;  %v7155_v30 = vpop.f32.mrf.mxu0 }
0x11fd   :  { %v7391_v24 = vmul.f32 0.25, %v7198_v23 }
0x11fe   :  { %v13304_v62 = vpop.f32.mrf.mxu0  ;;  %v13309_v55 = vpop.f32.mrf.mxu1 }
0x11ff   :  { %v7405_v57 = vsel %vm765_vm4, %v7391_v24, -inf }
0x1200   :  { %7406 = vmax.xlane.f32.xlu1 %v7405_v57  ;;  %v7201_v27 = vpop.f32.mrf.mxu1  ;;  %v7244_v21 = vpop.f32.mrf.mxu0 }
0x1201   :  { %v7392_v42 = vmul.f32 0.25, %v7244_v21 }
0x1202   :  { %v13310_v44 = vpop.f32.mrf.mxu1  ;;  %v13315_v18 = vpop.f32.mrf.mxu0 }
0x1203   :  { %v7408_v51 = vsel %vm765_vm4, %v7392_v42, -inf }
0x1204   :  { %v7290_v54 = vpop.f32.mrf.mxu1  ;;  %7409 = vmax.xlane.f32.xlu0 %v7408_v51  ;;  %v7247_v1 = vpop.f32.mrf.mxu0 }
0x1205   :  { %v7393_v39 = vmul.f32 0.25, %v7290_v54 }
0x1206   :  { %v13316_v47 = vpop.f32.mrf.mxu0  ;;  %v13321_v29 = vpop.f32.mrf.mxu1 }
0x1207   :  { %v7411_v12 = vsel %vm765_vm4, %v7393_v39, -inf }
0x1208   :  { %7412 = vmax.xlane.f32.xlu1 %v7411_v12  ;;  %v7293_v9 = vpop.f32.mrf.mxu1  ;;  %v7336_v36 = vpop.f32.mrf.mxu0 }
0x1209   :  { %v7394_v56 = vmul.f32 0.25, %v7336_v36 }
0x120a   :  { %v13322_v53 = vpop.f32.mrf.mxu1  ;;  %v13327_v5 = vpop.f32.mrf.mxu0 }
0x120b   :  { %v7414_v38 = vsel %vm765_vm4, %v7394_v56, -inf }
0x120c   :  { %v7382_v10 = vpop.f32.mrf.mxu1  ;;  %7415 = vmax.xlane.f32.xlu0 %v7414_v38  ;;  %v7339_v37 = vpop.f32.mrf.mxu0 }
0x120d   :  { %v7395_v8 = vmul.f32 0.25, %v7382_v10 }
0x120e   :  { %v13328_v2 = vpop.f32.mrf.mxu0  ;;  %v13333_v52 = vpop.f32.mrf.mxu1 }
0x120f   :  { %v7417_v31 = vsel %vm765_vm4, %v7395_v8, -inf }
0x1210   :  { %7418 = vmax.xlane.f32.xlu1 %v7417_v31  ;;  %v7385_v14 = vpop.f32.mrf.mxu1 }
0x1212   :  { %v13334_v19 = vpop.f32.mrf.mxu1 }
0x127d   :  { %v7398_v49 = vpop.xlane.xlu0 %7397 }
0x127e   :  { %v7420_v4 = vsub.f32 %v7388_v32, %v7398_v49 }
0x1280   :  { %v7428_v60 = vmul.f32 1.442695, %v7420_v4 }
0x1281   :  { %v7401_v50 = vpop.xlane.xlu1 %7400 }
0x1282   :  { %13813 = vpow2.f32 %v7428_v60  ;;  %v7421_v20 = vsub.f32 %v7389_v63, %v7401_v50 }
0x1284   :  { %v7430_v23 = vmul.f32 1.442695, %v7421_v20 }
0x1285   :  { %v7404_v30 = vpop.xlane.xlu0 %7403 }
0x1286   :  { %13815 = vpow2.f32 %v7430_v23  ;;  %v7422_v62 = vsub.f32 %v7390_v15, %v7404_v30  ;;  %v7014_v23 = vpack.c.bf16 %v16085_v46, %v16085_v46 }
0x1288   :  { %v7432_v55 = vmul.f32 1.442695, %v7422_v62 }
0x1289   :  { %v7407_v57 = vpop.xlane.xlu1 %7406 }
0x128a   :  { %13817 = vpow2.f32 %v7432_v55  ;;  %v7423_v27 = vsub.f32 %v7391_v24, %v7407_v57 }
0x128c   :  { %v7434_v21 = vmul.f32 1.442695, %v7423_v27  ;;  %v7588_v27 = vsel %vm865_vm3, %v7014_v23, 0 }
0x128d   :  { %v7410_v44 = vpop.xlane.xlu0 %7409 }
0x128e   :  { %13819 = vpow2.f32 %v7434_v21  ;;  %v7424_v18 = vsub.f32 %v7392_v42, %v7410_v44  ;;  %v7015_v21 = vpack.c.bf16 %v16090_v3, %v16090_v3  ;;  %v6985_v3 = vadd.f32 %v16082_v33, %v16189_v58 }
0x128f   :  { %v13814_v51 = vpop.eup %13813 }
0x1290   :  { %v7436_v54 = vmul.f32 1.442695, %v7424_v18  ;;  %v7444_v32 = vsel %vm765_vm4, %v13814_v51, 0.0 }
0x1291   :  { %v7413_v1 = vpop.xlane.xlu1 %7412  ;;  %7445 = vadd.xlane.f32.xlu0 %v7444_v32  ;;  %v7016_v32 = vpack.c.bf16 %v16098_v48, %v16098_v48 }
0x1292   :  { %13821 = vpow2.f32 %v7436_v54  ;;  %v7425_v63 = vsub.f32 %v7393_v39, %v7413_v1 }
0x1293   :  { %v13816_v47 = vpop.eup %13815 }
0x1294   :  { %v7438_v29 = vmul.f32 1.442695, %v7425_v63  ;;  %v7447_v15 = vsel %vm765_vm4, %v13816_v47, 0.0 }
0x1295   :  { %7448 = vadd.xlane.f32.xlu1 %v7447_v15  ;;  %v7416_v12 = vpop.xlane.xlu0 %7415  ;;  %v7680_v15 = vsel %vm865_vm3, %v7016_v32, 0 }
0x1296   :  { %13823 = vpow2.f32 %v7438_v29  ;;  %v7426_v24 = vsub.f32 %v7394_v56, %v7416_v12  ;;  %v7017_v12 = vpack.c.bf16 %v6985_v3, %v6985_v3 }
0x1297   :  { %v13818_v9 = vpop.eup %13817 }
0x1298   :  { %v7440_v36 = vmul.f32 1.442695, %v7426_v24  ;;  %v7450_v42 = vsel %vm765_vm4, %v13818_v9, 0.0 }
0x1299   :  { %v7419_v53 = vpop.xlane.xlu1 %7418  ;;  %7451 = vadd.xlane.f32.xlu0 %v7450_v42  ;;  %v7726_v42 = vsel %vm865_vm3, %v7017_v12, 0 }
0x129a   :  { %13825 = vpow2.f32 %v7440_v36  ;;  %v7427_v5 = vsub.f32 %v7395_v8, %v7419_v53 }
0x129b   :  { %v13820_v38 = vpop.eup %13819 }
0x129c   :  { %v7442_v10 = vmul.f32 1.442695, %v7427_v5  ;;  %v7453_v39 = vsel %vm765_vm4, %v13820_v38, 0.0 }
0x129d   :  { %7454 = vadd.xlane.f32.xlu1 %v7453_v39 }
0x129e   :  { %13827 = vpow2.f32 %v7442_v10  ;;  %v7019_v10 = vpack.c.bf16 %v16101_v43, %v16101_v43 }
0x129f   :  { %v13822_v37 = vpop.eup %13821 }
0x12a0   :  { %v7456_v2 = vsel %vm765_vm4, %v13822_v37, 0.0 }
0x12a1   :  { %7457 = vadd.xlane.f32.xlu0 %v7456_v2  ;;  %v7818_v2 = vsel %vm865_vm3, %v7019_v10, 0  ;;  %v11409_v10 = vld [vmem:[%s17540_s8 + $0x1] ss:$0 sm:$0xff] }
0x12a3   :  { %v16204_v52 = vpop.eup %13823 }
0x12a4   :  { %v7459_v56 = vsel %vm765_vm4, %v16204_v52, 0.0 }
0x12a5   :  { %7460 = vadd.xlane.f32.xlu1 %v7459_v56 }
0x12a7   :  { %v16208_v31 = vpop.eup %13825 }
0x12a8   :  { %v7462_v8 = vsel %vm765_vm4, %v16208_v31, 0.0 }
0x12a9   :  { %7463 = vadd.xlane.f32.xlu0 %v7462_v8 }
0x12ab   :  { %v16212_v14 = vpop.eup %13827 }
0x12ac   :  { %v7465_v19 = vsel %vm765_vm4, %v16212_v14, 0.0 }
0x12ad   :  { %7466 = vadd.xlane.f32.xlu1 %v7465_v19 }
0x131a   :  { %v7446_v49 = vpop.xlane.xlu0 %7445 }
0x131b   :  { %13829 = vrcp.f32 %v7446_v49  ;;  %v17661_v49 = vmov 0  }
0x131e   :  { %v7449_v4 = vpop.xlane.xlu1 %7448 }
0x131f   :  { %13831 = vrcp.f32 %v7449_v4 }
0x1322   :  { %v7452_v60 = vpop.xlane.xlu0 %7451 }
0x1323   :  { %13833 = vrcp.f32 %v7452_v60 }
0x1326   :  { %v7455_v50 = vpop.xlane.xlu1 %7454 }
0x1327   :  { %13835 = vrcp.f32 %v7455_v50 }
0x1328   :  { %v13830_v20 = vpop.eup %13829 }
0x1329   :  { %v7476_v30 = vmul.f32 %v13830_v20, %v13814_v51  ;;  %v7634_v51 = vsel %vm865_vm3, %v7015_v21, 0 }
0x132a   :  { %v7458_v62 = vpop.xlane.xlu0 %7457 }
0x132b   :  { %v7484_v55 = vpack.c.bf16 %v7476_v30, %v7476_v30  ;;  %13837 = vrcp.f32 %v7458_v62 }
0x132c   :  { %v13832_v57 = vpop.eup %13831 }
0x132d   :  { %v7477_v44 = vmul.f32 %v13832_v57, %v13816_v47  ;;  %13338 = vmatmul.mubr.msk.bf16.vlgmr.msra.gmra.mxu0 %vm765_vm4, %v7484_v55 }
0x132e   :  { %13348 = vmatpush3.bf16.msra.mxu0 %v7588_v27  ;;  %v7461_v18 = vpop.xlane.xlu1 %7460  ;;  %13349 = vmatprep.mubr.msk.bf16.mxu0 %vm13924_vm1, %v17660_v26 }
0x132f   :  { %v7485_v54 = vpack.c.bf16 %v7477_v44, %v7477_v44  ;;  %13839 = vrcp.f32 %v7461_v18  ;;  %13359 = vmatprep.subr.bf16.mxu0 %v17660_v26 }
0x1330   :  { %v13834_v46 = vpop.eup %13833 }
0x1331   :  { %v7478_v1 = vmul.f32 %v13834_v46, %v13818_v9  ;;  %13344 = vmatmul.mubr.msk.bf16.vlgmr.msra.gmra.mxu1 %vm765_vm4, %v7485_v54  ;;  %v7018_v9 = vpack.c.bf16 %v16095_v41, %v16095_v41 }
0x1332   :  { %13354 = vmatpush3.bf16.msra.mxu1 %v7634_v51  ;;  %v7464_v63 = vpop.xlane.xlu0 %7463  ;;  %13355 = vmatprep.mubr.msk.bf16.mxu1 %vm13924_vm1, %v17660_v26 }
0x1333   :  { %v7486_v47 = vpack.c.bf16 %v7478_v1, %v7478_v1  ;;  %13841 = vrcp.f32 %v7464_v63  ;;  %13365 = vmatprep.subr.bf16.mxu1 %v17660_v26 }
0x1334   :  { %v13836_v29 = vpop.eup %13835 }
0x1335   :  { %v7479_v48 = vmul.f32 %v13836_v29, %v13820_v38  ;;  %13350 = vmatmul.mubr.msk.bf16.vlgmr.msra.gmra.mxu0 %vm765_vm4, %v7486_v47  ;;  %v7772_v38 = vsel %vm865_vm3, %v7018_v9, 0 }
0x1336   :  { %13360 = vmatpush3.bf16.msra.mxu0 %v7680_v15  ;;  %v7467_v33 = vpop.xlane.xlu1 %7466  ;;  %13361 = vmatprep.mubr.msk.bf16.mxu0 %vm13924_vm1, %v17660_v26 }
0x1337   :  { %v7487_v58 = vpack.c.bf16 %v7479_v48, %v7479_v48  ;;  %13843 = vrcp.f32 %v7467_v33  ;;  %13371 = vmatprep.subr.bf16.mxu0 %v17660_v26 }
0x1338   :  { %v13838_v24 = vpop.eup %13837 }
0x1339   :  { %v7480_v36 = vmul.f32 %v13838_v24, %v13822_v37  ;;  %13356 = vmatmul.mubr.msk.bf16.vlgmr.msra.gmra.mxu1 %vm765_vm4, %v7487_v58 }
0x133a   :  { %13366 = vmatpush3.bf16.msra.mxu1 %v7726_v42  ;;  %13367 = vmatprep.mubr.msk.bf16.mxu1 %vm13924_vm1, %v17660_v26 }
0x133b   :  { %v7488_v53 = vpack.c.bf16 %v7480_v36, %v7480_v36  ;;  %13377 = vmatprep.subr.bf16.mxu1 %v17660_v26 }
0x133c   :  { %v13840_v5 = vpop.eup %13839 }
0x133d   :  { %v7481_v41 = vmul.f32 %v13840_v5, %v16204_v52  ;;  %13362 = vmatmul.mubr.msk.bf16.vlgmr.msra.gmra.mxu0 %vm765_vm4, %v7488_v53 }
0x133e   :  { %13372 = vmatpush3.bf16.msra.mxu0 %v7772_v38  ;;  %13373 = vmatprep.mubr.msk.bf16.mxu0 %vm13924_vm1, %v17660_v26 }
0x133f   :  { %v7489_v39 = vpack.c.bf16 %v7481_v41, %v7481_v41 }
0x1340   :  { %v13842_v37 = vpop.eup %13841 }
0x1341   :  { %v7482_v56 = vmul.f32 %v13842_v37, %v16208_v31  ;;  %13368 = vmatmul.mubr.msk.bf16.vlgmr.msra.gmra.mxu1 %vm765_vm4, %v7489_v39  ;;  %v13556_v31 = vld [vmem:[%s17539_s7 + $0x18] sm:$0xff]   ;;  %v6720_v39 = vadd.f32 %v16103_v34, %v11409_v10  ;;  %v6718_v37 = vadd.f32 %v11409_v10, %v16105_v6 }
0x1342   :  { %13378 = vmatpush3.bf16.msra.mxu1 %v7818_v2  ;;  %13379 = vmatprep.mubr.msk.bf16.mxu1 %vm13924_vm1, %v17660_v26 }
0x1343   :  { %v7490_v43 = vpack.c.bf16 %v7482_v56, %v7482_v56  ;;  %13383 = vmatprep.subr.bf16.mxu0 %v13556_v31 }
0x1344   :  { %v13844_v52 = vpop.eup %13843 }
0x1345   :  { %v7483_v8 = vmul.f32 %v13844_v52, %v16212_v14  ;;  %13374 = vmatmul.mubr.msk.bf16.vlgmr.msra.gmra.mxu0 %vm765_vm4, %v7490_v43 }
0x1346   :  { %13384 = vmatpush3.bf16.msra.mxu0 %v13556_v31 }
0x1347   :  { %v7491_v19 = vpack.c.bf16 %v7483_v8, %v7483_v8  ;;  %v6721_v8 = vadd.f32 %v16107_v0, %v11409_v10 }
0x1349   :  { %13380 = vmatmul.mubr.msk.bf16.vlgmr.msra.gmra.mxu1 %vm765_vm4, %v7491_v19  ;;  %v6719_v19 = vadd.f32 %v11409_v10, %v16109_v11 }
0x134a   :  { %8428 = vmatprep.mubr.bf16.mxu1 %v17661_v49 }
0x13ed   :  { %v7532_v4 = vpop.f32.mrf.mxu0 }
0x13ef   :  { %v13339_v60 = vpop.f32.mrf.mxu0 }
0x13f1   :  { %v7535_v26 = vpop.f32.mrf.mxu0  ;;  %v7578_v50 = vpop.f32.mrf.mxu1 }
0x13f2   :  { %v7860_v20 = vpack.c.bf16 %v7578_v50, %v7532_v4 }
0x13f3   :  { %v13340_v23 = vpop.f32.mrf.mxu0  ;;  %v13345_v14 = vpop.f32.mrf.mxu1 }
0x13f4   :  { %13385 = vmatprep.mubr.msk.bf16.mxu0 %vm388_vm2, %v7860_v20  ;;  %v6722_v14 = vadd.f32 %v11409_v10, %v16113_v59 }
0x13f5   :  { %v7581_v30 = vpop.f32.mrf.mxu1  ;;  %v7624_v62 = vpop.f32.mrf.mxu0 }
0x13f7   :  { %v13346_v55 = vpop.f32.mrf.mxu1  ;;  %v13351_v57 = vpop.f32.mrf.mxu0 }
0x13f8   :  { %v6723_v57 = vadd.f32 %v11409_v10, %v16117_v25 }
0x13f9   :  { %v7627_v27 = vpop.f32.mrf.mxu0  ;;  %v7670_v21 = vpop.f32.mrf.mxu1 }
0x13fa   :  { %v7861_v44 = vpack.c.bf16 %v7670_v21, %v7624_v62 }
0x13fb   :  { %v13352_v18 = vpop.f32.mrf.mxu0  ;;  %v13357_v54 = vpop.f32.mrf.mxu1 }
0x13fc   :  { %13386 = vmatmul.mubr.msk.bf16.vlgmr.msra.gmra.mxu0 %vm388_vm2, %v7861_v44 }
0x13fd   :  { %v7673_v46 = vpop.f32.mrf.mxu1  ;;  %v7716_v51 = vpop.f32.mrf.mxu0 }
0x13ff   :  { %v13358_v32 = vpop.f32.mrf.mxu1  ;;  %v13363_v3 = vpop.f32.mrf.mxu0 }
0x1401   :  { %v7719_v1 = vpop.f32.mrf.mxu0  ;;  %v7762_v63 = vpop.f32.mrf.mxu1 }
0x1402   :  { %v7862_v47 = vpack.c.bf16 %v7762_v63, %v7716_v51 }
0x1403   :  { %v13364_v29 = vpop.f32.mrf.mxu0  ;;  %v13369_v15 = vpop.f32.mrf.mxu1 }
0x1404   :  { %13389 = vmatprep.mubr.msk.bf16.mxu0 %vm388_vm2, %v7862_v47 }
0x1405   :  { %v7765_v12 = vpop.f32.mrf.mxu1  ;;  %v7808_v48 = vpop.f32.mrf.mxu0 }
0x1407   :  { %v13370_v33 = vpop.f32.mrf.mxu1  ;;  %v13375_v58 = vpop.f32.mrf.mxu0 }
0x1409   :  { %v7811_v24 = vpop.f32.mrf.mxu0  ;;  %v7854_v9 = vpop.f32.mrf.mxu1 }
0x140a   :  { %v7863_v36 = vpack.c.bf16 %v7854_v9, %v7808_v48 }
0x140b   :  { %v13376_v42 = vpop.f32.mrf.mxu0  ;;  %v13381_v53 = vpop.f32.mrf.mxu1 }
0x140c   :  { %13390 = vmatmul.mubr.msk.bf16.gmra.mxu0 %vm388_vm2, %v7863_v36 }
0x140d   :  { %v7857_v5 = vpop.f32.mrf.mxu1  ;;  %8501 = vmatprep.mubr.bf16.mxu0 %v17661_v49 }
0x140f   :  { %v13382_v38 = vpop.f32.mrf.mxu1 }
0x14bc   :  { %v13387_v41 = vpop.f32.mrf.mxu0 }
0x14bd   :  { %v7952_v56 = vadd.f32 %v13387_v41, %v6720_v39 }
0x14be   :  { %v7919_v2 = vpop.f32.mrf.mxu0 }
0x14bf   :  { %v7950_v43 = vadd.f32 %v7919_v2, %v6718_v37  ;;  %v7960_v60 = vadd.f32 %v7952_v56, %v15791_v28  ;;  %v6724_v28 = vadd.f32 %v16111_v40, %v11409_v10 }
0x14c0   :  { %v13388_v52 = vpop.f32.mrf.mxu0 }
0x14c1   :  { %v7958_v31 = vadd.f32 %v7950_v43, %v15778_v7  ;;  %v7953_v26 = vadd.f32 %v13388_v52, %v6721_v8  ;;  %v7976_v23 = vsel %vm110_vm0, %v7960_v60, 0.0 }
0x14c2   :  { %v7922_v4 = vpop.f32.mrf.mxu0 }
0x14c3   :  { %v7951_v50 = vadd.f32 %v7922_v4, %v6719_v19  ;;  %v7970_v20 = vsel %vm110_vm0, %v7958_v31, 0.0  ;;  %v7961_v6 = vadd.f32 %v7953_v26, %v15793_v22  ;;  %v6725_v22 = vadd.f32 %v16115_v35, %v11409_v10 }
0x14c4   :  { %7971 = vadd.xlane.f32.xlu0 %v7970_v20 }
0x14c5   :  { %v7959_v34 = vadd.f32 %v7951_v50, %v15780_v16  ;;  %v7979_v7 = vsel %vm110_vm0, %v7961_v6, 0.0 }
0x14c7   :  { %v7973_v0 = vsel %vm110_vm0, %v7959_v34, 0.0 }
0x14c8   :  { %7977 = vadd.xlane.f32.xlu0 %v7976_v23  ;;  %7974 = vadd.xlane.f32.xlu1 %v7973_v0  ;;  %v11489_v23 = vld [vmem:[%s17541_s9 + $0x180] sm:$0xff] }
0x14c9   :  { %v11497_v0 = vld [vmem:[%s17541_s9 + $0x1c0] sm:$0xff] }
0x14cc   :  { %7980 = vadd.xlane.f32.xlu1 %v7979_v7  ;;  %v13391_v11 = vpop.f32.mrf.mxu0  ;;  %v11490_v7 = vld [vmem:[%s17541_s9 + $0x188] sm:$0xff] }
0x14cd   :  { %v7956_v62 = vadd.f32 %v13391_v11, %v6724_v28  ;;  %v11524_v11 = vcombine.high %v11489_v23, %v11497_v0  ;;  %v11498_v28 = vld [vmem:[%s17541_s9 + $0x1c8] sm:$0xff] }
0x14ce   :  { %v7935_v30 = vpop.f32.mrf.mxu0 }
0x14cf   :  { %v7954_v55 = vadd.f32 %v7935_v30, %v6722_v14  ;;  %v7964_v44 = vadd.f32 %v7956_v62, %v15824_v45  ;;  %v11523_v14 = vcombine.low %v11489_v23, %v11497_v0  ;;  %v11525_v30 = vcombine.low %v11490_v7, %v11498_v28  ;;  %8408 = vmatprep.subr.bf16.mxu1 %v11524_v11 }
0x14d0   :  { %v13392_v16 = vpop.f32.mrf.mxu0  ;;  %v11526_v62 = vcombine.high %v11490_v7, %v11498_v28 }
0x14d1   :  { %v7962_v27 = vadd.f32 %v7954_v55, %v15810_v61  ;;  %v7957_v18 = vadd.f32 %v13392_v16, %v6725_v22  ;;  %v7988_v51 = vsel %vm110_vm0, %v7964_v44, 0.0  ;;  %8409 = vmatpush1.bf16.msra.mxu1 %v11523_v14  ;;  %v11473_v55 = vld [vmem:[%s17541_s9 + $0x100] sm:$0xff]  ;;  %v11474_v22 = vld [vmem:[%s17541_s9 + $0x108] sm:$0xff] }
0x14d2   :  { %v7938_v21 = vpop.f32.mrf.mxu0  ;;  %8481 = vmatprep.subr.bf16.mxu0 %v11526_v62  ;;  %v11481_v16 = vld [vmem:[%s17541_s9 + $0x140] sm:$0xff]  ;;  %v11484_v62 = vld [vmem:[%s17541_s9 + $0x158] sm:$0xff] }
0x14d3   :  { %v7955_v54 = vadd.f32 %v7938_v21, %v6723_v57  ;;  %v7982_v46 = vsel %vm110_vm0, %v7962_v27, 0.0  ;;  %v7965_v59 = vadd.f32 %v7957_v18, %v15826_v17  ;;  %8482 = vmatpush1.bf16.msra.mxu0 %v11525_v30  ;;  %v11508_v57 = vcombine.high %v11473_v55, %v11481_v16  ;;  %v11483_v30 = vld [vmem:[%s17541_s9 + $0x150] sm:$0xff] }
0x14d4   :  { %7983 = vadd.xlane.f32.xlu0 %v7982_v46  ;;  %v11507_v21 = vcombine.low %v11473_v55, %v11481_v16  ;;  %v16369_v46 = vld [vmem:[%s17541_s9 + $0x1d0] sm:$0xff] }
0x14d5   :  { %v7963_v40 = vadd.f32 %v7955_v54, %v15812_v13  ;;  %v7991_v61 = vsel %vm110_vm0, %v7965_v59, 0.0  ;;  %8410 = vmatprep.subr.bf16.mxu1 %v11508_v57  ;;  %v16364_v54 = vld [vmem:[%s17541_s9 + $0x190] sm:$0xff]  ;;  %v16431_v57 = vld [vmem:[%s17541_s9 + $0x1a0] sm:$0xff] }
0x14d6   :  { %8411 = vmatpush1.bf16.msra.mxu1 %v11507_v21  ;;  %v16441_v21 = vld [vmem:[%s17541_s9 + $0x1e0] sm:$0xff] }
0x14d7   :  { %v7985_v35 = vsel %vm110_vm0, %v7963_v40, 0.0 }
0x14d8   :  { %7989 = vadd.xlane.f32.xlu0 %v7988_v51  ;;  %7986 = vadd.xlane.f32.xlu1 %v7985_v35  ;;  %v11528_v51 = vcombine.high %v16364_v54, %v16369_v46  ;;  %v16383_v35 = vld [vmem:[%s17541_s9 + $0x1d8] sm:$0xff] }
0x14da   :  { %8554 = vmatprep.subr.bf16.mxu1 %v11528_v51 }
0x14dc   :  { %7992 = vadd.xlane.f32.xlu1 %v7991_v61 }
0x154d   :  { %v7972_v25 = vpop.xlane.xlu0 %7971 }
0x154e   :  { %v7994_v45 = vmul.f32 0.03125, %v7972_v25 }
0x1550   :  { %v16297_v32 = vsub.f32 %v7958_v31, %v7994_v45 }
0x1551   :  { %v7978_v3 = vpop.xlane.xlu0 %7977  ;;  %v7975_v1 = vpop.xlane.xlu1 %7974 }
0x1552   :  { %v7996_v63 = vmul.f32 0.03125, %v7978_v3  ;;  %v7995_v47 = vmul.f32 0.03125, %v7975_v1  ;;  %v8010_v13 = vmul.f32 %v16297_v32, %v16297_v32 }
0x1554   :  { %v16301_v17 = vsub.f32 %v7960_v60, %v7996_v63  ;;  %v16303_v29 = vsub.f32 %v7959_v34, %v7995_v47  ;;  %v8018_v15 = vsel %vm110_vm0, %v8010_v13, 0.0 }
0x1555   :  { %v7981_v12 = vpop.xlane.xlu1 %7980  ;;  %8019 = vadd.xlane.f32.xlu0 %v8018_v15 }
0x1556   :  { %v7997_v48 = vmul.f32 0.03125, %v7981_v12  ;;  %v8012_v33 = vmul.f32 %v16301_v17, %v16301_v17  ;;  %v8011_v58 = vmul.f32 %v16303_v29, %v16303_v29 }
0x1558   :  { %v16310_v24 = vsub.f32 %v7961_v6, %v7997_v48  ;;  %v8024_v9 = vsel %vm110_vm0, %v8012_v33, 0.0  ;;  %v8021_v36 = vsel %vm110_vm0, %v8011_v58, 0.0 }
0x1559   :  { %8025 = vadd.xlane.f32.xlu0 %v8024_v9  ;;  %8022 = vadd.xlane.f32.xlu1 %v8021_v36 }
0x155a   :  { %v8013_v42 = vmul.f32 %v16310_v24, %v16310_v24 }
0x155c   :  { %v8027_v53 = vsel %vm110_vm0, %v8013_v42, 0.0 }
0x155d   :  { %v7984_v5 = vpop.xlane.xlu0 %7983  ;;  %8028 = vadd.xlane.f32.xlu1 %v8027_v53 }
0x155e   :  { %v7998_v38 = vmul.f32 0.03125, %v7984_v5 }
0x1560   :  { %v16317_v10 = vsub.f32 %v7962_v27, %v7998_v38  ;;  %v11482_v27 = vld [vmem:[%s17541_s9 + $0x148] sm:$0xff] }
0x1561   :  { %v7990_v41 = vpop.xlane.xlu0 %7989  ;;  %v7987_v39 = vpop.xlane.xlu1 %7986  ;;  %v11510_v18 = vcombine.high %v11474_v22, %v11482_v27 }
0x1562   :  { %v8000_v37 = vmul.f32 0.03125, %v7990_v41  ;;  %v7999_v2 = vmul.f32 0.03125, %v7987_v39  ;;  %v8014_v56 = vmul.f32 %v16317_v10, %v16317_v10 }
0x1563   :  { %8483 = vmatprep.subr.bf16.mxu0 %v11510_v18  ;;  %v16451_v18 = vld [vmem:[%s17541_s9 + $0x1e8] sm:$0xff] }
0x1564   :  { %v16321_v43 = vsub.f32 %v7964_v44, %v8000_v37  ;;  %v16323_v52 = vsub.f32 %v7963_v40, %v7999_v2  ;;  %v8030_v8 = vsel %vm110_vm0, %v8014_v56, 0.0  ;;  %v11509_v44 = vcombine.low %v11474_v22, %v11482_v27  ;;  %v16374_v40 = vld [vmem:[%s17541_s9 + $0x198] sm:$0xff]  ;;  %v16393_v37 = vld [vmem:[%s17545_s13 + $0x1] ss:$0 sm:$0xff] }
0x1565   :  { %8031 = vadd.xlane.f32.xlu0 %v8030_v8  ;;  %v7993_v19 = vpop.xlane.xlu1 %7992  ;;  %v11529_v61 = vcombine.low %v16374_v40, %v16383_v35  ;;  %v11530_v25 = vcombine.high %v16374_v40, %v16383_v35 }
0x1566   :  { %v8001_v31 = vmul.f32 0.03125, %v7993_v19  ;;  %v8016_v4 = vmul.f32 %v16321_v43, %v16321_v43  ;;  %v8015_v60 = vmul.f32 %v16323_v52, %v16323_v52  ;;  %8484 = vmatpush1.bf16.msra.mxu0 %v11509_v44  ;;  %v16446_v44 = vld [vmem:[%s17541_s9 + $0x1a8] sm:$0xff] }
0x1567   :  { %8627 = vmatprep.subr.bf16.mxu0 %v11530_v25 }
0x1568   :  { %v16330_v26 = vsub.f32 %v7965_v59, %v8001_v31  ;;  %v8036_v50 = vsel %vm110_vm0, %v8016_v4, 0.0  ;;  %v8033_v20 = vsel %vm110_vm0, %v8015_v60, 0.0  ;;  %v11527_v59 = vcombine.low %v16364_v54, %v16369_v46 }
0x1569   :  { %8037 = vadd.xlane.f32.xlu0 %v8036_v50  ;;  %8034 = vadd.xlane.f32.xlu1 %v8033_v20 }
0x156a   :  { %v8017_v34 = vmul.f32 %v16330_v26, %v16330_v26 }
0x156c   :  { %v8039_v6 = vsel %vm110_vm0, %v8017_v34, 0.0 }
0x156d   :  { %8040 = vadd.xlane.f32.xlu1 %v8039_v6 }
0x15de   :  { %v8020_v45 = vpop.xlane.xlu0 %8019 }
0x15df   :  { %v8042_v3 = vmul.f32 0.03125, %v8020_v45 }
0x15e1   :  { %v8050_v1 = vadd.f32 1e-05, %v8042_v3 }
0x15e2   :  { %v8026_v63 = vpop.xlane.xlu0 %8025  ;;  %v8023_v47 = vpop.xlane.xlu1 %8022 }
0x15e3   :  { %13845 = vrsqrt.f32 %v8050_v1  ;;  %v8044_v13 = vmul.f32 0.03125, %v8026_v63  ;;  %v8043_v15 = vmul.f32 0.03125, %v8023_v47  ;;  %v11532_v1 = vcombine.high %v16431_v57, %v16441_v21 }
0x15e4   :  { %v11534_v63 = vcombine.high %v16446_v44, %v16451_v18 }
0x15e5   :  { %v8051_v12 = vadd.f32 1e-05, %v8043_v15  ;;  %v8052_v48 = vadd.f32 1e-05, %v8044_v13 }
0x15e6   :  { %v8029_v33 = vpop.xlane.xlu1 %8028 }
0x15e7   :  { %v8045_v58 = vmul.f32 0.03125, %v8029_v33  ;;  %13847 = vrsqrt.f32 %v8051_v12 }
0x15e8   :  { %13849 = vrsqrt.f32 %v8052_v48 }
0x15e9   :  { %v8053_v9 = vadd.f32 1e-05, %v8045_v58 }
0x15eb   :  { %13851 = vrsqrt.f32 %v8053_v9 }
0x15ee   :  { %v8032_v36 = vpop.xlane.xlu0 %8031 }
0x15ef   :  { %v8046_v42 = vmul.f32 0.03125, %v8032_v36 }
0x15f0   :  { %v13846_v53 = vpop.eup %13845 }
0x15f1   :  { %v8054_v5 = vadd.f32 1e-05, %v8046_v42  ;;  %v8066_v38 = vmul.f32 %v13846_v53, %v16297_v32  ;;  %v16400_v32 = vld [vmem:[%s17546_s14 + $0x1] ss:$0 sm:$0xff] }
0x15f2   :  { %v8038_v41 = vpop.xlane.xlu0 %8037  ;;  %v8035_v39 = vpop.xlane.xlu1 %8034  ;;  %v11477_v42 = vld [vmem:[%s17541_s9 + $0x120] sm:$0xff] }
0x15f3   :  { %13853 = vrsqrt.f32 %v8054_v5  ;;  %v8048_v2 = vmul.f32 0.03125, %v8038_v41  ;;  %v8047_v56 = vmul.f32 0.03125, %v8035_v39  ;;  %v8080_v31 = vmul.f32 %v16393_v37, %v8066_v38  ;;  %v11485_v53 = vld [vmem:[%s17541_s9 + $0x160] sm:$0xff]  ;;  %v11478_v5 = vld [vmem:[%s17541_s9 + $0x128] sm:$0xff] }
0x15f4   :  { %v13848_v8 = vpop.eup %13847  ;;  %v11486_v38 = vld [vmem:[%s17541_s9 + $0x168] sm:$0xff]  ;;  %v11531_v41 = vcombine.low %v16431_v57, %v16441_v21  ;;  %v11533_v39 = vcombine.low %v16446_v44, %v16451_v18  ;;  %v13561_v57 = vld [vmem:[%s17543_s11 + $0x470] sm:$0xff]  }
0x15f5   :  { %v8055_v19 = vadd.f32 1e-05, %v8047_v56  ;;  %v8067_v4 = vmul.f32 %v13848_v8, %v16303_v29  ;;  %v8056_v60 = vadd.f32 1e-05, %v8048_v2  ;;  %v13850_v20 = vpop.eup %13849  ;;  %v11475_v29 = vld [vmem:[%s17541_s9 + $0x110] sm:$0xff]  ;;  %v16408_v11 = vadd.f32 %v16400_v32, %v8080_v31  ;;  %v11504_v31 = vld [vmem:[%s17541_s9 + $0x1f8] sm:$0xff] }
0x15f6   :  { %v8041_v50 = vpop.xlane.xlu1 %8040  ;;  %v8068_v28 = vmul.f32 %v13850_v20, %v16301_v17  ;;  %v11512_v16 = vcombine.high %v11475_v29, %v11483_v30  ;;  %v11511_v45 = vcombine.low %v11475_v29, %v11483_v30  ;;  %v11518_v2 = vcombine.high %v11478_v5, %v11486_v38  ;;  %v11495_v56 = vld [vmem:[%s17541_s9 + $0x1b0] sm:$0xff]  ;;  %v13566_v18 = vld [vmem:[%s17543_s11 + $0x4e8] sm:$0xff]  }
0x15f7   :  { %v8049_v34 = vmul.f32 0.03125, %v8041_v50  ;;  %v8081_v23 = vmul.f32 %v16393_v37, %v8067_v4  ;;  %13855 = vrsqrt.f32 %v8055_v19  ;;  %v11503_v8 = vld [vmem:[%s17541_s9 + $0x1f0] sm:$0xff]  ;;  %v11496_v19 = vld [vmem:[%s17541_s9 + $0x1b8] sm:$0xff]  ;;  %v11515_v4 = vcombine.low %v11477_v42, %v11485_v53 }
0x15f8   :  { %v13852_v6 = vpop.eup %13851  ;;  %13857 = vrsqrt.f32 %v8056_v60  ;;  %v8082_v27 = vmul.f32 %v16393_v37, %v8068_v28  ;;  %v11517_v60 = vcombine.low %v11478_v5, %v11486_v38  ;;  %v11536_v50 = vcombine.high %v11495_v56, %v11503_v8  ;;  %v13563_v21 = vld [vmem:[%s17543_s11 + $0x430] sm:$0xff]   ;;  %v13588_v5 = vld [vmem:[%s17543_s11 + $0x480] sm:$0xff]   ;;  %v13589_v38 = vld [vmem:[%s17543_s11 + $0x578] sm:$0xff]  }
0x15f9   :  { %v8069_v0 = vmul.f32 %v13852_v6, %v16310_v24  ;;  %v8057_v7 = vadd.f32 1e-05, %v8049_v34  ;;  %v16412_v14 = vadd.f32 %v16400_v32, %v8081_v23  ;;  %v11476_v24 = vld [vmem:[%s17541_s9 + $0x118] sm:$0xff]  ;;  %v11538_v20 = vcombine.high %v11496_v19, %v11504_v31  ;;  %v11487_v34 = vld [vmem:[%s17541_s9 + $0x170] sm:$0xff] }
0x15fa   :  { %v11514_v22 = vcombine.high %v11476_v24, %v11484_v62  ;;  %v11513_v3 = vcombine.low %v11476_v24, %v11484_v62  ;;  %v16469_v47 = vadd.f32 %v16400_v32, %v8082_v27  ;;  %v11480_v6 = vld [vmem:[%s17541_s9 + $0x138] sm:$0xff]  ;;  %v13562_v27 = vld [vmem:[%s17543_s11 + $0x4f0] sm:$0xff]  }
0x15fb   :  { %13859 = vrsqrt.f32 %v8057_v7  ;;  %v16425_v17 = vpack.c.bf16 %v16412_v14, %v16408_v11  ;;  %v8083_v55 = vmul.f32 %v16393_v37, %v8069_v0  ;;  %v11488_v23 = vld [vmem:[%s17541_s9 + $0x178] sm:$0xff]  ;;  %v11535_v0 = vcombine.low %v11495_v56, %v11503_v8  ;;  %v13564_v44 = vld [vmem:[%s17543_s11 + $0x4b0] sm:$0xff]   ;;  %v17669_v8 = vld [vmem:[#allocation13_spill] sm:$0xff] }
0x15fc   :  { %17663 = vst [vmem:[#allocation32_spill] sm:$0xff] %v16469_v47  ;;  %v11537_v7 = vcombine.low %v11496_v19, %v11504_v31  ;;  %v11522_v28 = vcombine.high %v11480_v6, %v11488_v23  ;;  %v11521_v24 = vcombine.low %v11480_v6, %v11488_v23  ;;  %v13557_v62 = vld [vmem:[%s17543_s11 + $0x478] sm:$0xff]   ;;  %v17670_v31 = vld [vmem:[#allocation14_spill] sm:$0xff] }
0x15fd   :  { %11539 = vmatmul.mubr.msk.bf16.vlgmr.msra.gmra.mxu1 %vm110_vm0, %v16425_v17  ;;  %11543 = vmatmul.mubr.msk.bf16.vlgmr.msra.gmra.mxu0 %vm110_vm0, %v16425_v17  ;;  %v16456_v25 = vadd.f32 %v16400_v32, %v8083_v55  ;;  %v13558_v55 = vld [vmem:[%s17543_s11 + $0x4f8] sm:$0xff]  }
0x15fe   :  { %8438 = vmatprep.mubr.bf16.mxu1 %v17661_v49  ;;  %8511 = vmatprep.mubr.bf16.mxu0 %v17661_v49 }
0x15ff   :  { %17662 = vst [vmem:[#allocation22_spill] sm:$0xff] %v16456_v25  ;;  %8555 = vmatpush1.bf16.msra.mxu1 %v11527_v59  ;;  %8628 = vmatpush1.bf16.msra.mxu0 %v11529_v61  ;;  %v16474_v46 = vpack.c.bf16 %v16456_v25, %v16469_v47 }
0x1600   :  { %v13854_v51 = vpop.eup %13853  ;;  %8556 = vmatprep.subr.bf16.mxu1 %v11512_v16  ;;  %8629 = vmatprep.subr.bf16.mxu0 %v11514_v22  ;;  %v13559_v16 = vld [vmem:[%s17543_s11 + $0x438] sm:$0xff]  }
0x1601   :  { %v8070_v54 = vmul.f32 %v13854_v51, %v16317_v10  ;;  %v13560_v22 = vld [vmem:[%s17543_s11 + $0x4b8] sm:$0xff]   ;;  %v13567_v51 = vld [vmem:[%s17543_s11 + $0x428] sm:$0xff]  }
0x1603   :  { %8557 = vmatpush1.bf16.msra.mxu1 %v11511_v45  ;;  %8630 = vmatpush1.bf16.msra.mxu0 %v11513_v3  ;;  %v8084_v59 = vmul.f32 %v16393_v37, %v8070_v54  ;;  %v13568_v45 = vld [vmem:[%s17543_s11 + $0x4a8] sm:$0xff]   ;;  %v13569_v3 = vld [vmem:[%s17543_s11 + $0x460] sm:$0xff]  }
0x1604   :  { %v13856_v40 = vpop.eup %13855  ;;  %8700 = vmatprep.subr.bf16.mxu1 %v11532_v1  ;;  %8773 = vmatprep.subr.bf16.mxu0 %v11534_v63  ;;  %v13570_v1 = vld [vmem:[%s17543_s11 + $0x4e0] sm:$0xff]  }
0x1605   :  { %v8071_v35 = vmul.f32 %v13856_v40, %v16323_v52  ;;  %11540 = vmatmul.mubr.msk.bf16.gmra.mxu1 %vm110_vm0, %v16474_v46  ;;  %11544 = vmatmul.mubr.msk.bf16.gmra.mxu0 %vm110_vm0, %v16474_v46  ;;  %v13858_v10 = vpop.eup %13857  ;;  %v16487_v12 = vadd.f32 %v16400_v32, %v8084_v59  ;;  %v13571_v63 = vld [vmem:[%s17543_s11 + $0x420] sm:$0xff]   ;;  %v13574_v40 = vld [vmem:[%s17543_s11 + $0x4d8] sm:$0xff]  }
0x1606   :  { %8448 = vmatprep.mubr.bf16.mxu1 %v17661_v49  ;;  %8521 = vmatprep.mubr.bf16.mxu0 %v17661_v49  ;;  %v8072_v52 = vmul.f32 %v13858_v10, %v16321_v43  ;;  %v13572_v54 = vld [vmem:[%s17543_s11 + $0x4a0] sm:$0xff]   ;;  %v13575_v59 = vld [vmem:[%s17543_s11 + $0x418] sm:$0xff]   ;;  %v13577_v10 = vld [vmem:[%s17543_s11 + $0x450] sm:$0xff]  }
0x1607   :  { %v8085_v13 = vmul.f32 %v16393_v37, %v8071_v35  ;;  %17664 = vst [vmem:[#allocation20_spill] sm:$0xff] %v16487_v12  ;;  %v13576_v35 = vld [vmem:[%s17543_s11 + $0x498] sm:$0xff]  }
0x1608   :  { %v13860_v61 = vpop.eup %13859  ;;  %v8086_v9 = vmul.f32 %v16393_v37, %v8072_v52  ;;  %v13581_v52 = vld [vmem:[%s17543_s11 + $0x448] sm:$0xff]  }
0x1609   :  { %v8073_v15 = vmul.f32 %v13860_v61, %v16330_v26  ;;  %v16491_v48 = vadd.f32 %v16400_v32, %v8085_v13  ;;  %v13578_v61 = vld [vmem:[%s17543_s11 + $0x4d0] sm:$0xff]  }
0x160a   :  { %v16509_v26 = vadd.f32 %v16400_v32, %v8086_v9  ;;  %v13579_v13 = vld [vmem:[%s17543_s11 + $0x410] sm:$0xff]   ;;  %v13585_v9 = vld [vmem:[%s17543_s11 + $0x440] sm:$0xff]  }
0x160b   :  { %17665 = vst [vmem:[#allocation25_spill] sm:$0xff] %v16491_v48  ;;  %v16495_v33 = vpack.c.bf16 %v16491_v48, %v16487_v12  ;;  %v8087_v58 = vmul.f32 %v16393_v37, %v8073_v15  ;;  %v11516_v37 = vcombine.high %v11477_v42, %v11485_v53  ;;  %v13580_v15 = vld [vmem:[%s17543_s11 + $0x490] sm:$0xff]   ;;  %v13586_v42 = vld [vmem:[%s17543_s11 + $0x4c0] sm:$0xff]  }
0x160c   :  { %17667 = vst [vmem:[#allocation29_spill] sm:$0xff] %v16509_v26  ;;  %v13587_v53 = vld [vmem:[%s17543_s11 + $0x400] sm:$0xff]  }
0x160d   :  { %11541 = vmatmul.mubr.msk.bf16.gmra.mxu1 %vm110_vm0, %v16495_v33  ;;  %11545 = vmatmul.mubr.msk.bf16.gmra.mxu0 %vm110_vm0, %v16495_v33  ;;  %v16506_v43 = vadd.f32 %v16400_v32, %v8087_v58  ;;  %v11479_v32 = vld [vmem:[%s17541_s9 + $0x130] sm:$0xff]  ;;  %v13584_v58 = vld [vmem:[%s17543_s11 + $0x488] sm:$0xff]  }
0x160e   :  { %8458 = vmatprep.mubr.bf16.mxu1 %v17661_v49  ;;  %8531 = vmatprep.mubr.bf16.mxu0 %v17661_v49  ;;  %v11520_v29 = vcombine.high %v11479_v32, %v11487_v34  ;;  %v11519_v30 = vcombine.low %v11479_v32, %v11487_v34 }
0x160f   :  { %17666 = vst [vmem:[#allocation27_spill] sm:$0xff] %v16506_v43  ;;  %v16513_v36 = vpack.c.bf16 %v16506_v43, %v16509_v26 }
0x1615   :  { %11542 = vmatmul.mubr.msk.bf16.gmra.mxu1 %vm110_vm0, %v16513_v36  ;;  %11546 = vmatmul.mubr.msk.bf16.gmra.mxu0 %vm110_vm0, %v16513_v36 }
0x1616   :  { %8574 = vmatprep.mubr.bf16.mxu1 %v17661_v49  ;;  %8647 = vmatprep.mubr.bf16.mxu0 %v17661_v49 }
0x161d   :  { %11547 = vmatmul.mubr.msk.bf16.vlgmr.msra.gmra.mxu1 %vm110_vm0, %v16425_v17  ;;  %11551 = vmatmul.mubr.msk.bf16.vlgmr.msra.gmra.mxu0 %vm110_vm0, %v16425_v17 }
0x161e   :  { %8584 = vmatprep.mubr.bf16.mxu1 %v17661_v49  ;;  %8657 = vmatprep.mubr.bf16.mxu0 %v17661_v49 }
0x161f   :  { %8701 = vmatpush1.bf16.msra.mxu1 %v11531_v41  ;;  %8774 = vmatpush1.bf16.msra.mxu0 %v11533_v39  ;;  %v16736_v41 = vld [vmem:[%s17542_s10 + $0x10] sm:$0xff] }
0x1620   :  { %8702 = vmatprep.subr.bf16.mxu1 %v11516_v37  ;;  %8775 = vmatprep.subr.bf16.mxu0 %v11518_v2  ;;  %v17668_v2 = vld [vmem:[#allocation12_spill] sm:$0xff]  ;;  %v16744_v19 = vrot.slane %v16736_v41, %v17669_v8 }
0x1621   :  { %v16740_v56 = vrot.slane %v16736_v41, %v17668_v2 }
0x1623   :  { %8703 = vmatpush1.bf16.msra.mxu1 %v11515_v4  ;;  %8776 = vmatpush1.bf16.msra.mxu0 %v11517_v60  ;;  %v16748_v4 = vrot.slane %v16736_v41, %v17670_v31  ;;  %v17671_v60 = vld [vmem:[#allocation15_spill] sm:$0xff] }
0x1624   :  { %8846 = vmatprep.subr.bf16.mxu1 %v11536_v50  ;;  %8919 = vmatprep.subr.bf16.mxu0 %v11538_v20  ;;  %v16752_v50 = vrot.slane %v16736_v41, %v17671_v60 }
0x1625   :  { %11548 = vmatmul.mubr.msk.bf16.gmra.mxu1 %vm110_vm0, %v16474_v46  ;;  %11552 = vmatmul.mubr.msk.bf16.gmra.mxu0 %vm110_vm0, %v16474_v46 }
0x1626   :  { %8594 = vmatprep.mubr.bf16.mxu1 %v17661_v49  ;;  %8667 = vmatprep.mubr.bf16.mxu0 %v17661_v49 }
0x162d   :  { %11549 = vmatmul.mubr.msk.bf16.gmra.mxu1 %vm110_vm0, %v16495_v33  ;;  %11553 = vmatmul.mubr.msk.bf16.gmra.mxu0 %vm110_vm0, %v16495_v33 }
0x162e   :  { %8604 = vmatprep.mubr.bf16.mxu1 %v17661_v49  ;;  %8677 = vmatprep.mubr.bf16.mxu0 %v17661_v49 }
0x1635   :  { %11550 = vmatmul.mubr.msk.bf16.gmra.mxu1 %vm110_vm0, %v16513_v36  ;;  %11554 = vmatmul.mubr.msk.bf16.gmra.mxu0 %vm110_vm0, %v16513_v36 }
0x1636   :  { %8720 = vmatprep.mubr.bf16.mxu1 %v17661_v49  ;;  %8793 = vmatprep.mubr.bf16.mxu0 %v17661_v49 }
0x163d   :  { %11555 = vmatmul.mubr.msk.bf16.vlgmr.msra.gmra.mxu1 %vm110_vm0, %v16425_v17  ;;  %11559 = vmatmul.mubr.msk.bf16.vlgmr.msra.gmra.mxu0 %vm110_vm0, %v16425_v17 }
0x163e   :  { %8730 = vmatprep.mubr.bf16.mxu1 %v17661_v49  ;;  %8803 = vmatprep.mubr.bf16.mxu0 %v17661_v49 }
0x163f   :  { %8847 = vmatpush1.bf16.msra.mxu1 %v11535_v0  ;;  %8920 = vmatpush1.bf16.msra.mxu0 %v11537_v7 }
0x1640   :  { %8848 = vmatprep.subr.bf16.mxu1 %v11520_v29  ;;  %8921 = vmatprep.subr.bf16.mxu0 %v11522_v28 }
0x1643   :  { %8849 = vmatpush1.bf16.msra.mxu1 %v11519_v30  ;;  %8922 = vmatpush1.bf16.msra.mxu0 %v11521_v24 }
0x1644   :  { %12505 = vmatprep.subr.bf16.mxu1 %v13557_v62  ;;  %12545 = vmatprep.subr.bf16.mxu0 %v13558_v55 }
0x1645   :  { %11556 = vmatmul.mubr.msk.bf16.gmra.mxu1 %vm110_vm0, %v16474_v46  ;;  %11560 = vmatmul.mubr.msk.bf16.gmra.mxu0 %vm110_vm0, %v16474_v46 }
0x1646   :  { %8740 = vmatprep.mubr.bf16.mxu1 %v17661_v49  ;;  %8813 = vmatprep.mubr.bf16.mxu0 %v17661_v49 }
0x164d   :  { %11557 = vmatmul.mubr.msk.bf16.gmra.mxu1 %vm110_vm0, %v16495_v33  ;;  %11561 = vmatmul.mubr.msk.bf16.gmra.mxu0 %vm110_vm0, %v16495_v33 }
0x164e   :  { %8750 = vmatprep.mubr.bf16.mxu1 %v17661_v49  ;;  %8823 = vmatprep.mubr.bf16.mxu0 %v17661_v49 }
0x1655   :  { %11558 = vmatmul.mubr.msk.bf16.gmra.mxu1 %vm110_vm0, %v16513_v36  ;;  %11562 = vmatmul.mubr.msk.bf16.gmra.mxu0 %vm110_vm0, %v16513_v36 }
0x1656   :  { %8866 = vmatprep.mubr.bf16.mxu1 %v17661_v49  ;;  %8939 = vmatprep.mubr.bf16.mxu0 %v17661_v49 }
0x165d   :  { %11563 = vmatmul.mubr.msk.bf16.vlgmr.msra.gmra.mxu1 %vm110_vm0, %v16425_v17  ;;  %11567 = vmatmul.mubr.msk.bf16.vlgmr.msra.gmra.mxu0 %vm110_vm0, %v16425_v17  ;;  %v13565_v17 = vld [vmem:[%s17543_s11 + $0x468] sm:$0xff]  }
0x165e   :  { %8876 = vmatprep.mubr.bf16.mxu1 %v17661_v49  ;;  %8949 = vmatprep.mubr.bf16.mxu0 %v17661_v49 }
0x165f   :  { %12506 = vmatpush3.bf16.msra.mxu1 %v13559_v16  ;;  %12546 = vmatpush3.bf16.msra.mxu0 %v13560_v22 }
0x1660   :  { %12507 = vmatprep.subr.bf16.mxu1 %v13561_v57  ;;  %12547 = vmatprep.subr.bf16.mxu0 %v13562_v27 }
0x1663   :  { %12508 = vmatpush3.bf16.msra.mxu1 %v13563_v21  ;;  %12548 = vmatpush3.bf16.msra.mxu0 %v13564_v44 }
0x1664   :  { %12509 = vmatprep.subr.bf16.mxu1 %v13565_v17  ;;  %12549 = vmatprep.subr.bf16.mxu0 %v13566_v18 }
0x1665   :  { %11564 = vmatmul.mubr.msk.bf16.gmra.mxu1 %vm110_vm0, %v16474_v46  ;;  %11568 = vmatmul.mubr.msk.bf16.gmra.mxu0 %vm110_vm0, %v16474_v46  ;;  %v13573_v46 = vld [vmem:[%s17543_s11 + $0x458] sm:$0xff]  }
0x1666   :  { %8886 = vmatprep.mubr.bf16.mxu1 %v17661_v49  ;;  %8959 = vmatprep.mubr.bf16.mxu0 %v17661_v49 }
0x1667   :  { %12510 = vmatpush3.bf16.msra.mxu1 %v13567_v51  ;;  %12550 = vmatpush3.bf16.msra.mxu0 %v13568_v45 }
0x1668   :  { %12511 = vmatprep.subr.bf16.mxu1 %v13569_v3  ;;  %12551 = vmatprep.subr.bf16.mxu0 %v13570_v1 }
0x166b   :  { %12512 = vmatpush3.bf16.msra.mxu1 %v13571_v63  ;;  %12552 = vmatpush3.bf16.msra.mxu0 %v13572_v54 }
0x166c   :  { %12513 = vmatprep.subr.bf16.mxu1 %v13573_v46  ;;  %12553 = vmatprep.subr.bf16.mxu0 %v13574_v40  ;;  %v13591_v40 = vld [vmem:[%s17543_s11 + $0x538] sm:$0xff]  }
0x166d   :  { %11565 = vmatmul.mubr.msk.bf16.gmra.mxu1 %vm110_vm0, %v16495_v33  ;;  %11569 = vmatmul.mubr.msk.bf16.gmra.mxu0 %vm110_vm0, %v16495_v33  ;;  %v13583_v33 = vld [vmem:[%s17543_s11 + $0x408] sm:$0xff]  }
0x166e   :  { %8896 = vmatprep.mubr.bf16.mxu1 %v17661_v49  ;;  %8969 = vmatprep.mubr.bf16.mxu0 %v17661_v49  ;;  %v13582_v49 = vld [vmem:[%s17543_s11 + $0x4c8] sm:$0xff]  }
0x166f   :  { %12514 = vmatpush3.bf16.msra.mxu1 %v13575_v59  ;;  %12554 = vmatpush3.bf16.msra.mxu0 %v13576_v35  ;;  %v13592_v59 = vld [vmem:[%s17543_s11 + $0x5b8] sm:$0xff]  }
0x1670   :  { %12515 = vmatprep.subr.bf16.mxu1 %v13577_v10  ;;  %12555 = vmatprep.subr.bf16.mxu0 %v13578_v61 }
0x1673   :  { %12516 = vmatpush3.bf16.msra.mxu1 %v13579_v13  ;;  %12556 = vmatpush3.bf16.msra.mxu0 %v13580_v15  ;;  %v13593_v15 = vld [vmem:[%s17543_s11 + $0x570] sm:$0xff]  }
0x1674   :  { %12517 = vmatprep.subr.bf16.mxu1 %v13581_v52  ;;  %12557 = vmatprep.subr.bf16.mxu0 %v13582_v49  ;;  %v13594_v52 = vld [vmem:[%s17543_s11 + $0x5f0] sm:$0xff]  }
0x1675   :  { %11566 = vmatmul.mubr.msk.bf16.gmra.mxu1 %vm110_vm0, %v16513_v36  ;;  %11570 = vmatmul.mubr.msk.bf16.gmra.mxu0 %vm110_vm0, %v16513_v36  ;;  %v13590_v36 = vld [vmem:[%s17543_s11 + $0x5f8] sm:$0xff]  }
0x1677   :  { %12518 = vmatpush3.bf16.msra.mxu1 %v13583_v33  ;;  %12558 = vmatpush3.bf16.msra.mxu0 %v13584_v58 }
0x1678   :  { %12519 = vmatprep.subr.bf16.mxu1 %v13585_v9  ;;  %12559 = vmatprep.subr.bf16.mxu0 %v13586_v42 }
0x167b   :  { %12520 = vmatpush3.bf16.msra.mxu1 %v13587_v53  ;;  %12560 = vmatpush3.bf16.msra.mxu0 %v13588_v5 }
0x167c   :  { %12585 = vmatprep.subr.bf16.mxu1 %v13589_v38  ;;  %12625 = vmatprep.subr.bf16.mxu0 %v13590_v36 }
0x16bd   :  { %v8430_v39 = vpop.f32.mrf.mxu1  ;;  %v8503_v37 = vpop.f32.mrf.mxu0 }
0x16be   :  { %v8431_v28 = vadd.f32 %v8430_v39, %v16748_v4  ;;  %v8504_v30 = vadd.f32 %v8503_v37, %v16752_v50  ;;  %v13595_v37 = vld [vmem:[%s17543_s11 + $0x530] sm:$0xff]  }
0x16bf   :  { %v8432_v20 = vpop.f32.mrf.mxu1  ;;  %v8505_v32 = vpop.f32.mrf.mxu0 }
0x16c0   :  { %v8433_v23 = vadd.f32 %v8432_v20, %v16740_v56  ;;  %v8506_v0 = vadd.f32 %v8505_v32, %v16744_v19  ;;  %v8980_v45 = vmax.f32 %v8431_v28, 0.0  ;;  %v8982_v3 = vmax.f32 %v8504_v30, 0.0  ;;  %v13596_v20 = vld [vmem:[%s17543_s11 + $0x5b0] sm:$0xff]  }
0x16c1   :  { %v8434_v34 = vpop.f32.mrf.mxu1  ;;  %v8507_v6 = vpop.f32.mrf.mxu0 }
0x16c2   :  { %v8435_v7 = vadd.f32 %v8434_v34, %v16748_v4  ;;  %v8508_v29 = vadd.f32 %v8507_v6, %v16752_v50  ;;  %v8981_v44 = vmax.f32 %v8433_v23, 0.0  ;;  %v8983_v17 = vmax.f32 %v8506_v0, 0.0  ;;  %v13597_v0 = vld [vmem:[%s17543_s11 + $0x568] sm:$0xff]  }
0x16c3   :  { %v8436_v24 = vpop.f32.mrf.mxu1  ;;  %v8509_v62 = vpop.f32.mrf.mxu0 }
0x16c4   :  { %v8437_v55 = vadd.f32 %v8436_v24, %v16740_v56  ;;  %v8510_v16 = vadd.f32 %v8509_v62, %v16744_v19  ;;  %v8996_v22 = vmax.f32 %v8435_v7, 0.0  ;;  %v8998_v57 = vmax.f32 %v8508_v29, 0.0  ;;  %v13598_v7 = vld [vmem:[%s17543_s11 + $0x5e8] sm:$0xff]  }
0x16c5   :  { %v8440_v27 = vpop.f32.mrf.mxu1  ;;  %v8513_v21 = vpop.f32.mrf.mxu0 }
0x16c6   :  { %v8997_v18 = vmax.f32 %v8437_v55, 0.0  ;;  %v8999_v51 = vmax.f32 %v8510_v16, 0.0  ;;  %v9108_v35 = vpack.c.bf16 %v8996_v22, %v8980_v45  ;;  %v9110_v10 = vpack.c.bf16 %v8998_v57, %v8982_v3  ;;  %v13600_v45 = vld [vmem:[%s17543_s11 + $0x5a8] sm:$0xff]   ;;  %v13601_v3 = vld [vmem:[%s17543_s11 + $0x560] sm:$0xff]  }
0x16c7   :  { %v8442_v1 = vpop.f32.mrf.mxu1  ;;  %v8515_v63 = vpop.f32.mrf.mxu0  ;;  %v8441_v9 = vadd.f32 %v8440_v27, %v16748_v4  ;;  %v8514_v42 = vadd.f32 %v8513_v21, %v16752_v50  ;;  %v13599_v27 = vld [vmem:[%s17543_s11 + $0x528] sm:$0xff]  }
0x16c8   :  { %v9109_v54 = vpack.c.bf16 %v8997_v18, %v8981_v44  ;;  %v9111_v46 = vpack.c.bf16 %v8999_v51, %v8983_v17  ;;  %v8443_v49 = vadd.f32 %v8442_v1, %v16740_v56  ;;  %v8516_v53 = vadd.f32 %v8515_v63, %v16744_v19 }
0x16c9   :  { %v8444_v61 = vpop.f32.mrf.mxu1  ;;  %v8517_v13 = vpop.f32.mrf.mxu0  ;;  %v9012_v24 = vmax.f32 %v8441_v9, 0.0  ;;  %v9014_v62 = vmax.f32 %v8514_v42, 0.0  ;;  %v13604_v42 = vld [vmem:[%s17543_s11 + $0x5a0] sm:$0xff]  }
0x16ca   :  { %v8445_v33 = vadd.f32 %v8444_v61, %v16748_v4  ;;  %v8518_v58 = vadd.f32 %v8517_v13, %v16752_v50  ;;  %10237 = vmatprep.mubr.bf16.mxu1 %v9109_v54  ;;  %10302 = vmatprep.mubr.bf16.mxu0 %v9111_v46  ;;  %v9013_v29 = vmax.f32 %v8443_v49, 0.0  ;;  %v9015_v55 = vmax.f32 %v8516_v53, 0.0  ;;  %v13605_v53 = vld [vmem:[%s17543_s11 + $0x558] sm:$0xff]  }
0x16cb   :  { %v8446_v5 = vpop.f32.mrf.mxu1  ;;  %v8519_v38 = vpop.f32.mrf.mxu0  ;;  %10238 = vmatmul.mubr.bf16.vlgmr.msra.gmra.mxu1 %v9108_v35  ;;  %10303 = vmatmul.mubr.bf16.vlgmr.msra.gmra.mxu0 %v9110_v10 }
0x16cc   :  { %v8447_v36 = vadd.f32 %v8446_v5, %v16740_v56  ;;  %v8520_v39 = vadd.f32 %v8519_v38, %v16744_v19  ;;  %12586 = vmatpush3.bf16.msra.mxu1 %v13591_v40  ;;  %12626 = vmatpush3.bf16.msra.mxu0 %v13592_v59  ;;  %v9028_v32 = vmax.f32 %v8445_v33, 0.0  ;;  %v9030_v34 = vmax.f32 %v8518_v58, 0.0  ;;  %v13602_v40 = vld [vmem:[%s17543_s11 + $0x5e0] sm:$0xff]  }
0x16cd   :  { %v8450_v6 = vpop.f32.mrf.mxu1  ;;  %v8523_v23 = vpop.f32.mrf.mxu0  ;;  %12587 = vmatprep.subr.bf16.mxu1 %v13593_v15  ;;  %12627 = vmatprep.subr.bf16.mxu0 %v13594_v52  ;;  %v13603_v52 = vld [vmem:[%s17543_s11 + $0x520] sm:$0xff]  }
0x16ce   :  { %v9029_v28 = vmax.f32 %v8447_v36, 0.0  ;;  %v9031_v30 = vmax.f32 %v8520_v39, 0.0  ;;  %v9124_v21 = vpack.c.bf16 %v9028_v32, %v9012_v24  ;;  %v9126_v44 = vpack.c.bf16 %v9030_v34, %v9014_v62 }
0x16cf   :  { %v8452_v16 = vpop.f32.mrf.mxu1  ;;  %v8525_v22 = vpop.f32.mrf.mxu0  ;;  %v8451_v59 = vadd.f32 %v8450_v6, %v16748_v4  ;;  %v8524_v35 = vadd.f32 %v8523_v23, %v16752_v50  ;;  %v13606_v6 = vld [vmem:[%s17543_s11 + $0x5d8] sm:$0xff]  }
0x16d0   :  { %12588 = vmatpush3.bf16.msra.mxu1 %v13595_v37  ;;  %12628 = vmatpush3.bf16.msra.mxu0 %v13596_v20  ;;  %v9125_v57 = vpack.c.bf16 %v9029_v28, %v9013_v29  ;;  %v9127_v51 = vpack.c.bf16 %v9031_v30, %v9015_v55  ;;  %v8453_v1 = vadd.f32 %v8452_v16, %v16740_v56  ;;  %v13608_v55 = vld [vmem:[%s17543_s11 + $0x598] sm:$0xff]   ;;  %v13609_v16 = vld [vmem:[%s17543_s11 + $0x550] sm:$0xff]  }
0x16d1   :  { %v8454_v17 = vpop.f32.mrf.mxu1  ;;  %v8527_v18 = vpop.f32.mrf.mxu0  ;;  %12589 = vmatprep.subr.bf16.mxu1 %v13597_v0  ;;  %12629 = vmatprep.subr.bf16.mxu0 %v13598_v7  ;;  %v8526_v63 = vadd.f32 %v8525_v22, %v16744_v19  ;;  %v9044_v37 = vmax.f32 %v8451_v59, 0.0  ;;  %v9046_v20 = vmax.f32 %v8524_v35, 0.0  ;;  %v13607_v7 = vld [vmem:[%s17543_s11 + $0x518] sm:$0xff]   ;;  %v17673_v59 = vld [vmem:[#allocation17_spill] sm:$0xff] }
0x16d2   :  { %v8455_v54 = vadd.f32 %v8454_v17, %v16748_v4  ;;  %v8528_v46 = vadd.f32 %v8527_v18, %v16752_v50  ;;  %10245 = vmatprep.mubr.bf16.mxu1 %v9125_v57  ;;  %10310 = vmatprep.mubr.bf16.mxu0 %v9127_v51  ;;  %v9045_v5 = vmax.f32 %v8453_v1, 0.0  ;;  %v13611_v1 = vld [vmem:[%s17543_s11 + $0x510] sm:$0xff]   ;;  %v13613_v35 = vld [vmem:[%s17543_s11 + $0x548] sm:$0xff]  }
0x16d3   :  { %v8456_v10 = vpop.f32.mrf.mxu1  ;;  %v8529_v61 = vpop.f32.mrf.mxu0  ;;  %10246 = vmatmul.mubr.bf16.gmra.mxu1 %v9124_v21  ;;  %10311 = vmatmul.mubr.bf16.gmra.mxu0 %v9126_v44  ;;  %v9047_v38 = vmax.f32 %v8526_v63, 0.0  ;;  %v13610_v21 = vld [vmem:[%s17543_s11 + $0x5d0] sm:$0xff]  }
0x16d4   :  { %v8457_v13 = vadd.f32 %v8456_v10, %v16740_v56  ;;  %v8530_v15 = vadd.f32 %v8529_v61, %v16744_v19  ;;  %12590 = vmatpush3.bf16.msra.mxu1 %v13599_v27  ;;  %v9060_v49 = vmax.f32 %v8455_v54, 0.0  ;;  %v9062_v33 = vmax.f32 %v8528_v46, 0.0  ;;  %12630 = vmatpush3.bf16.msra.mxu0 %v13600_v45 }
0x16d5   :  { %v8460_v58 = vpop.f32.mrf.mxu1  ;;  %v8533_v9 = vpop.f32.mrf.mxu0  ;;  %12591 = vmatprep.subr.bf16.mxu1 %v13601_v3  ;;  %12631 = vmatprep.subr.bf16.mxu0 %v13602_v40 }
0x16d6   :  { %v9061_v36 = vmax.f32 %v8457_v13, 0.0  ;;  %v9063_v39 = vmax.f32 %v8530_v15, 0.0  ;;  %v9140_v29 = vpack.c.bf16 %v9060_v49, %v9044_v37  ;;  %v9142_v28 = vpack.c.bf16 %v9062_v33, %v9046_v20  ;;  %v17674_v33 = vld [vmem:[#allocation18_spill] sm:$0xff] }
0x16d7   :  { %v8462_v32 = vpop.f32.mrf.mxu1  ;;  %v8535_v34 = vpop.f32.mrf.mxu0  ;;  %v8461_v44 = vadd.f32 %v8460_v58, %v16748_v4  ;;  %v8534_v17 = vadd.f32 %v8533_v9, %v16752_v50  ;;  %v16865_v58 = vrot.slane %v16736_v41, %v17674_v33  ;;  %v17675_v9 = vld [vmem:[#allocation19_spill] sm:$0xff]  ;;  %v13615_v37 = vld [vmem:[%s17543_s11 + $0x508] sm:$0xff]  }
0x16d8   :  { %12592 = vmatpush3.bf16.msra.mxu1 %v13603_v52  ;;  %v9141_v23 = vpack.c.bf16 %v9061_v36, %v9045_v5  ;;  %v9143_v0 = vpack.c.bf16 %v9063_v39, %v9047_v38  ;;  %v8463_v30 = vadd.f32 %v8462_v32, %v16740_v56  ;;  %12632 = vmatpush3.bf16.msra.mxu0 %v13604_v42  ;;  %v13614_v38 = vld [vmem:[%s17543_s11 + $0x5c8] sm:$0xff]  }
0x16d9   :  { %v8464_v24 = vpop.f32.mrf.mxu1  ;;  %v8537_v62 = vpop.f32.mrf.mxu0  ;;  %12593 = vmatprep.subr.bf16.mxu1 %v13605_v53  ;;  %v8536_v22 = vadd.f32 %v8535_v34, %v16744_v19  ;;  %12633 = vmatprep.subr.bf16.mxu0 %v13606_v6  ;;  %v9076_v52 = vmax.f32 %v8461_v44, 0.0  ;;  %v9078_v49 = vmax.f32 %v8534_v17, 0.0  ;;  %v16869_v42 = vrot.slane %v16736_v41, %v17675_v9 }
0x16da   :  { %v8465_v57 = vadd.f32 %v8464_v24, %v16748_v4  ;;  %v8538_v27 = vadd.f32 %v8537_v62, %v16752_v50  ;;  %10253 = vmatprep.mubr.bf16.mxu1 %v9141_v23  ;;  %10318 = vmatprep.mubr.bf16.mxu0 %v9143_v0  ;;  %v17672_v50 = vld [vmem:[#allocation16_spill] sm:$0xff]  ;;  %v9077_v10 = vmax.f32 %v8463_v30, 0.0  ;;  %v13616_v23 = vld [vmem:[%s17543_s11 + $0x588] sm:$0xff]  }
0x16db   :  { %v8466_v18 = vpop.f32.mrf.mxu1  ;;  %v8539_v51 = vpop.f32.mrf.mxu0  ;;  %10254 = vmatmul.mubr.bf16.gmra.mxu1 %v9140_v29  ;;  %10319 = vmatmul.mubr.bf16.gmra.mxu0 %v9142_v28  ;;  %v16851_v40 = vrot.slane %v16736_v41, %v17672_v50  ;;  %v9079_v61 = vmax.f32 %v8536_v22, 0.0  ;;  %v13617_v0 = vld [vmem:[%s17543_s11 + $0x540] sm:$0xff]  }
0x16dc   :  { %v8467_v45 = vadd.f32 %v8466_v18, %v16740_v56  ;;  %v8540_v3 = vadd.f32 %v8539_v51, %v16744_v19  ;;  %12594 = vmatpush3.bf16.msra.mxu1 %v13607_v7  ;;  %v9092_v63 = vmax.f32 %v8465_v57, 0.0  ;;  %v9094_v54 = vmax.f32 %v8538_v27, 0.0  ;;  %12634 = vmatpush3.bf16.msra.mxu0 %v13608_v55  ;;  %v13612_v19 = vld [vmem:[%s17543_s11 + $0x590] sm:$0xff]   ;;  %v13618_v30 = vld [vmem:[%s17543_s11 + $0x5c0] sm:$0xff]  }
0x16dd   :  { %v8576_v4 = vpop.f32.mrf.mxu1  ;;  %v8649_v46 = vpop.f32.mrf.mxu0  ;;  %v16855_v56 = vrot.slane %v16736_v41, %v17673_v59  ;;  %12595 = vmatprep.subr.bf16.mxu1 %v13609_v16  ;;  %12635 = vmatprep.subr.bf16.mxu0 %v13610_v21  ;;  %v13619_v27 = vld [vmem:[%s17543_s11 + $0x500] sm:$0xff]  }
0x16de   :  { %v9093_v13 = vmax.f32 %v8467_v45, 0.0  ;;  %v9095_v15 = vmax.f32 %v8540_v3, 0.0  ;;  %v9156_v20 = vpack.c.bf16 %v9092_v63, %v9076_v52  ;;  %v9158_v32 = vpack.c.bf16 %v9094_v54, %v9078_v49  ;;  %v13620_v51 = vld [vmem:[%s17543_s11 + $0x580] sm:$0xff]   ;;  %v13621_v45 = vld [vmem:[%s17543_s11 + $0x678] sm:$0xff]  }
0x16df   :  { %v8578_v53 = vpop.f32.mrf.mxu1  ;;  %v8651_v5 = vpop.f32.mrf.mxu0  ;;  %v8577_v24 = vadd.f32 %v8576_v4, %v16865_v58  ;;  %v8650_v62 = vadd.f32 %v8649_v46, %v16869_v42 }
0x16e0   :  { %12596 = vmatpush3.bf16.msra.mxu1 %v13611_v1  ;;  %v9157_v36 = vpack.c.bf16 %v9093_v13, %v9077_v10  ;;  %v9159_v39 = vpack.c.bf16 %v9095_v15, %v9079_v61  ;;  %v8579_v34 = vadd.f32 %v8578_v53, %v16851_v40  ;;  %12636 = vmatpush3.bf16.msra.mxu0 %v13612_v19  ;;  %v13622_v10 = vld [vmem:[%s17543_s11 + $0x6f8] sm:$0xff]  }
0x16e1   :  { %v8580_v41 = vpop.f32.mrf.mxu1  ;;  %v8653_v6 = vpop.f32.mrf.mxu0  ;;  %12597 = vmatprep.subr.bf16.mxu1 %v13613_v35  ;;  %v8652_v7 = vadd.f32 %v8651_v5, %v16855_v56  ;;  %12637 = vmatprep.subr.bf16.mxu0 %v13614_v38  ;;  %v8984_v4 = vmax.f32 %v8577_v24, 0.0  ;;  %v8986_v46 = vmax.f32 %v8650_v62, 0.0  ;;  %v13623_v15 = vld [vmem:[%s17543_s11 + $0x638] sm:$0xff]  }
0x16e2   :  { %v8581_v29 = vadd.f32 %v8580_v41, %v16865_v58  ;;  %v8654_v28 = vadd.f32 %v8653_v6, %v16869_v42  ;;  %10261 = vmatprep.mubr.bf16.mxu1 %v9157_v36  ;;  %10326 = vmatprep.mubr.bf16.mxu0 %v9159_v39  ;;  %v8985_v3 = vmax.f32 %v8579_v34, 0.0  ;;  %v13624_v36 = vld [vmem:[%s17543_s11 + $0x6b8] sm:$0xff]   ;;  %v13625_v39 = vld [vmem:[%s17543_s11 + $0x670] sm:$0xff]  }
0x16e3   :  { %v8582_v55 = vpop.f32.mrf.mxu1  ;;  %v8655_v16 = vpop.f32.mrf.mxu0  ;;  %10262 = vmatmul.mubr.bf16.gmra.mxu1 %v9156_v20  ;;  %10327 = vmatmul.mubr.bf16.gmra.mxu0 %v9158_v32  ;;  %v8987_v1 = vmax.f32 %v8652_v7, 0.0  ;;  %v13626_v34 = vld [vmem:[%s17543_s11 + $0x6f0] sm:$0xff]  }
0x16e4   :  { %v8583_v22 = vadd.f32 %v8582_v55, %v16851_v40  ;;  %v8656_v57 = vadd.f32 %v8655_v16, %v16855_v56  ;;  %12598 = vmatpush3.bf16.msra.mxu1 %v13615_v37  ;;  %v9000_v21 = vmax.f32 %v8581_v29, 0.0  ;;  %v9002_v44 = vmax.f32 %v8654_v28, 0.0  ;;  %12638 = vmatpush3.bf16.msra.mxu0 %v13616_v23  ;;  %v13627_v28 = vld [vmem:[%s17543_s11 + $0x630] sm:$0xff]  }
0x16e5   :  { %v8586_v17 = vpop.f32.mrf.mxu1  ;;  %v8659_v18 = vpop.f32.mrf.mxu0  ;;  %12599 = vmatprep.subr.bf16.mxu1 %v13617_v0  ;;  %12639 = vmatprep.subr.bf16.mxu0 %v13618_v30  ;;  %v13628_v16 = vld [vmem:[%s17543_s11 + $0x6b0] sm:$0xff]  }
0x16e6   :  { %v9001_v63 = vmax.f32 %v8583_v22, 0.0  ;;  %v9003_v54 = vmax.f32 %v8656_v57, 0.0  ;;  %v9112_v52 = vpack.c.bf16 %v9000_v21, %v8984_v4  ;;  %v9114_v49 = vpack.c.bf16 %v9002_v44, %v8986_v46  ;;  %v13629_v22 = vld [vmem:[%s17543_s11 + $0x668] sm:$0xff]  }
0x16e7   :  { %v8588_v19 = vpop.f32.mrf.mxu1  ;;  %v8661_v35 = vpop.f32.mrf.mxu0  ;;  %v8587_v41 = vadd.f32 %v8586_v17, %v16865_v58  ;;  %v8660_v6 = vadd.f32 %v8659_v18, %v16869_v42 }
0x16e8   :  { %v9113_v61 = vpack.c.bf16 %v9001_v63, %v8985_v3  ;;  %v9115_v13 = vpack.c.bf16 %v9003_v54, %v8987_v1  ;;  %12600 = vmatpush3.bf16.msra.mxu1 %v13619_v27  ;;  %v8589_v53 = vadd.f32 %v8588_v19, %v16851_v40  ;;  %12640 = vmatpush3.bf16.msra.mxu0 %v13620_v51  ;;  %v13630_v3 = vld [vmem:[%s17543_s11 + $0x6e8] sm:$0xff]  }
0x16e9   :  { %v8590_v5 = vpop.f32.mrf.mxu1  ;;  %v8663_v38 = vpop.f32.mrf.mxu0  ;;  %12665 = vmatprep.subr.bf16.mxu1 %v13621_v45  ;;  %v8662_v37 = vadd.f32 %v8661_v35, %v16855_v56  ;;  %12705 = vmatprep.subr.bf16.mxu0 %v13622_v10  ;;  %v9016_v17 = vmax.f32 %v8587_v41, 0.0  ;;  %v9018_v18 = vmax.f32 %v8660_v6, 0.0  ;;  %v13631_v54 = vld [vmem:[%s17543_s11 + $0x628] sm:$0xff]  }
0x16ea   :  { %v8591_v20 = vadd.f32 %v8590_v5, %v16865_v58  ;;  %v8664_v32 = vadd.f32 %v8663_v38, %v16869_v42  ;;  %10367 = vmatprep.mubr.bf16.mxu1 %v9113_v61  ;;  %10432 = vmatprep.mubr.bf16.mxu0 %v9115_v13  ;;  %v9017_v57 = vmax.f32 %v8589_v53, 0.0  ;;  %v13632_v61 = vld [vmem:[%s17543_s11 + $0x6a8] sm:$0xff]   ;;  %v13633_v13 = vld [vmem:[%s17543_s11 + $0x660] sm:$0xff]  }
0x16eb   :  { %v8592_v23 = vpop.f32.mrf.mxu1  ;;  %v8665_v0 = vpop.f32.mrf.mxu0  ;;  %10368 = vmatmul.mubr.bf16.vlgmr.msra.gmra.mxu1 %v9112_v52  ;;  %10433 = vmatmul.mubr.bf16.vlgmr.msra.gmra.mxu0 %v9114_v49  ;;  %v9019_v27 = vmax.f32 %v8662_v37, 0.0  ;;  %v13634_v53 = vld [vmem:[%s17543_s11 + $0x6e0] sm:$0xff]  }
0x16ec   :  { %v8593_v7 = vadd.f32 %v8592_v23, %v16851_v40  ;;  %v8666_v29 = vadd.f32 %v8665_v0, %v16855_v56  ;;  %12666 = vmatpush3.bf16.msra.mxu1 %v13623_v15  ;;  %v9032_v30 = vmax.f32 %v8591_v20, 0.0  ;;  %v9034_v24 = vmax.f32 %v8664_v32, 0.0  ;;  %12706 = vmatpush3.bf16.msra.mxu0 %v13624_v36  ;;  %v13635_v32 = vld [vmem:[%s17543_s11 + $0x620] sm:$0xff]  }
0x16ed   :  { %v8596_v62 = vpop.f32.mrf.mxu1  ;;  %v8669_v55 = vpop.f32.mrf.mxu0  ;;  %12667 = vmatprep.subr.bf16.mxu1 %v13625_v39  ;;  %12707 = vmatprep.subr.bf16.mxu0 %v13626_v34  ;;  %v13636_v0 = vld [vmem:[%s17543_s11 + $0x6a0] sm:$0xff]  }
0x16ee   :  { %v9033_v21 = vmax.f32 %v8593_v7, 0.0  ;;  %v9035_v44 = vmax.f32 %v8666_v29, 0.0  ;;  %v9128_v4 = vpack.c.bf16 %v9032_v30, %v9016_v17  ;;  %v9130_v46 = vpack.c.bf16 %v9034_v24, %v9018_v18  ;;  %v13637_v7 = vld [vmem:[%s17543_s11 + $0x658] sm:$0xff]  }
0x16ef   :  { %v8598_v51 = vpop.f32.mrf.mxu1  ;;  %v8671_v45 = vpop.f32.mrf.mxu0  ;;  %v8597_v5 = vadd.f32 %v8596_v62, %v16865_v58  ;;  %v8670_v38 = vadd.f32 %v8669_v55, %v16869_v42 }
0x16f0   :  { %v9129_v1 = vpack.c.bf16 %v9033_v21, %v9017_v57  ;;  %v9131_v63 = vpack.c.bf16 %v9035_v44, %v9019_v27  ;;  %12668 = vmatpush3.bf16.msra.mxu1 %v13627_v28  ;;  %v8599_v19 = vadd.f32 %v8598_v51, %v16851_v40  ;;  %12708 = vmatpush3.bf16.msra.mxu0 %v13628_v16  ;;  %v13638_v57 = vld [vmem:[%s17543_s11 + $0x6d8] sm:$0xff]  }
0x16f1   :  { %v8600_v35 = vpop.f32.mrf.mxu1  ;;  %v8673_v10 = vpop.f32.mrf.mxu0  ;;  %12669 = vmatprep.subr.bf16.mxu1 %v13629_v22  ;;  %v8672_v15 = vadd.f32 %v8671_v45, %v16855_v56  ;;  %12709 = vmatprep.subr.bf16.mxu0 %v13630_v3  ;;  %v9048_v62 = vmax.f32 %v8597_v5, 0.0  ;;  %v9050_v55 = vmax.f32 %v8670_v38, 0.0  ;;  %v13639_v44 = vld [vmem:[%s17543_s11 + $0x618] sm:$0xff]  }
0x16f2   :  { %v8601_v52 = vadd.f32 %v8600_v35, %v16865_v58  ;;  %v8674_v49 = vadd.f32 %v8673_v10, %v16869_v42  ;;  %10375 = vmatprep.mubr.bf16.mxu1 %v9129_v1  ;;  %10440 = vmatprep.mubr.bf16.mxu0 %v9131_v63  ;;  %v9049_v29 = vmax.f32 %v8599_v19, 0.0  ;;  %v13640_v1 = vld [vmem:[%s17543_s11 + $0x698] sm:$0xff]   ;;  %v13641_v63 = vld [vmem:[%s17543_s11 + $0x650] sm:$0xff]  }
0x16f3   :  { %v8602_v36 = vpop.f32.mrf.mxu1  ;;  %v8675_v39 = vpop.f32.mrf.mxu0  ;;  %10376 = vmatmul.mubr.bf16.gmra.mxu1 %v9128_v4  ;;  %10441 = vmatmul.mubr.bf16.gmra.mxu0 %v9130_v46  ;;  %v9051_v28 = vmax.f32 %v8672_v15, 0.0  ;;  %v13642_v19 = vld [vmem:[%s17543_s11 + $0x6d0] sm:$0xff]  }
0x16f4   :  { %v8603_v37 = vadd.f32 %v8602_v36, %v16851_v40  ;;  %v8676_v20 = vadd.f32 %v8675_v39, %v16855_v56  ;;  %12670 = vmatpush3.bf16.msra.mxu1 %v13631_v54  ;;  %v9064_v34 = vmax.f32 %v8601_v52, 0.0  ;;  %v9066_v41 = vmax.f32 %v8674_v49, 0.0  ;;  %12710 = vmatpush3.bf16.msra.mxu0 %v13632_v61  ;;  %v16993_v49 = vld [vmem:[%s17542_s10 + $0x18] sm:$0xff]  ;;  %v13644_v36 = vld [vmem:[%s17543_s11 + $0x690] sm:$0xff]   ;;  %v13645_v39 = vld [vmem:[%s17543_s11 + $0x648] sm:$0xff]   ;;  %s13926_s10 = smov [#allocation3]  }
0x16f5   :  { %v8606_v6 = vpop.f32.mrf.mxu1  ;;  %v8679_v23 = vpop.f32.mrf.mxu0  ;;  %12671 = vmatprep.subr.bf16.mxu1 %v13633_v13  ;;  %12711 = vmatprep.subr.bf16.mxu0 %v13634_v53  ;;  %s11038_s0 = sshll.u32 %s13926_s10, 4  ;;  %s11039_s0 = int_to_ptr.vmem [resolvable:$true] %s11038_s0 }
0x16f6   :  { %v9065_v30 = vmax.f32 %v8603_v37, 0.0  ;;  %v9067_v24 = vmax.f32 %v8676_v20, 0.0  ;;  %v9144_v17 = vpack.c.bf16 %v9064_v34, %v9048_v62  ;;  %v9146_v18 = vpack.c.bf16 %v9066_v41, %v9050_v55  ;;  %s13901_s8 = scalar_lea.vmem %s11039_s0, 128  ;;  %p13906_p1 = scmp.lt.s32.totalorder %s11039_s0, %s11039_s0 }
0x16f7   :  { %v8608_v16 = vpop.f32.mrf.mxu1  ;;  %v8681_v22 = vpop.f32.mrf.mxu0  ;;  %v8607_v35 = vadd.f32 %v8606_v6, %v16865_v58  ;;  %v8680_v10 = vadd.f32 %v8679_v23, %v16869_v42  ;;  %v17018_v6 = vrot.slane %v16993_v49, %v17671_v60  ;;  %p13902_p0 = scmp.ne.s32.totalorder %s11039_s0, %s13901_s8  ;;  %p13907_p2 = scmp.lt.s32.totalorder %s13901_s8, %s13901_s8 }
0x16f8   :  { %v9145_v27 = vpack.c.bf16 %v9065_v30, %v9049_v29  ;;  %v9147_v21 = vpack.c.bf16 %v9067_v24, %v9051_v28  ;;  %12672 = vmatpush3.bf16.msra.mxu1 %v13635_v32  ;;  %v8609_v51 = vadd.f32 %v8608_v16, %v16851_v40  ;;  %12712 = vmatpush3.bf16.msra.mxu0 %v13636_v0  ;;  %v13647_v30 = vld [vmem:[%s17543_s11 + $0x608] sm:$0xff]  }
0x16f9   :  { %v8610_v45 = vpop.f32.mrf.mxu1  ;;  %v8683_v3 = vpop.f32.mrf.mxu0  ;;  %12673 = vmatprep.subr.bf16.mxu1 %v13637_v7  ;;  %v8682_v54 = vadd.f32 %v8681_v22, %v16855_v56  ;;  %12713 = vmatprep.subr.bf16.mxu0 %v13638_v57  ;;  %v9082_v41 = vmax.f32 %v8680_v10, 0.0  ;;  %v13646_v7 = vld [vmem:[%s17543_s11 + $0x6c8] sm:$0xff]   ;;  %v13649_v22 = vld [vmem:[%s17543_s11 + $0x640] sm:$0xff]   ;;  %v13653_v10 = vld [vmem:[%s17543_s11 + $0x778] sm:$0xff]   ;;  %p13908_p3 = por %p13907_p2, %p13906_p1 }
0x16fa   :  { %v8611_v4 = vadd.f32 %v8610_v45, %v16865_v58  ;;  %v8684_v46 = vadd.f32 %v8683_v3, %v16869_v42  ;;  %10383 = vmatprep.mubr.bf16.mxu1 %v9145_v27  ;;  %10448 = vmatprep.mubr.bf16.mxu0 %v9147_v21  ;;  %v13643_v58 = vld [vmem:[%s17543_s11 + $0x610] sm:$0xff]   ;;  %v9081_v37 = vmax.f32 %v8609_v51, 0.0  ;;  %v13648_v16 = vld [vmem:[%s17543_s11 + $0x688] sm:$0xff]  }
0x16fb   :  { %v8612_v61 = vpop.f32.mrf.mxu1  ;;  %v8685_v13 = vpop.f32.mrf.mxu0  ;;  %10384 = vmatmul.mubr.bf16.gmra.mxu1 %v9144_v17  ;;  %10449 = vmatmul.mubr.bf16.gmra.mxu0 %v9146_v18  ;;  %v9083_v20 = vmax.f32 %v8682_v54, 0.0  ;;  %p13909_p4 = pnand %p13908_p3, %p13902_p0 }
0x16fc   :  { %v8613_v15 = vadd.f32 %v8612_v61, %v16851_v40  ;;  %v8686_v52 = vadd.f32 %v8685_v13, %v16855_v56  ;;  %12674 = vmatpush3.bf16.msra.mxu1 %v13639_v44  ;;  %v9096_v42 = vmax.f32 %v8611_v4, 0.0  ;;  %v9098_v53 = vmax.f32 %v8684_v46, 0.0  ;;  %12714 = vmatpush3.bf16.msra.mxu0 %v13640_v1  ;;  %v13650_v44 = vld [vmem:[%s17543_s11 + $0x6c0] sm:$0xff]  }
0x16fd   :  { %v8722_v5 = vpop.f32.mrf.mxu1  ;;  %v8795_v38 = vpop.f32.mrf.mxu0  ;;  %v17000_v40 = vrot.slane %v16993_v49, %v17668_v2  ;;  %v17004_v56 = vrot.slane %v16993_v49, %v17669_v8  ;;  %12675 = vmatprep.subr.bf16.mxu1 %v13641_v63  ;;  %12715 = vmatprep.subr.bf16.mxu0 %v13642_v19  ;;  %v9080_v2 = vmax.f32 %v8607_v35, 0.0  ;;  %v17014_v8 = vrot.slane %v16993_v49, %v17670_v31  ;;  %v13651_v63 = vld [vmem:[%s17543_s11 + $0x600] sm:$0xff]  }
0x16fe   :  { %v9097_v32 = vmax.f32 %v8613_v15, 0.0  ;;  %v9099_v34 = vmax.f32 %v8686_v52, 0.0  ;;  %v9162_v31 = vpack.c.bf16 %v9098_v53, %v9082_v41  ;;  %v8796_v18 = vadd.f32 %v8795_v38, %v17018_v6  ;;  %v13652_v35 = vld [vmem:[%s17543_s11 + $0x680] sm:$0xff]   ;;  %v13654_v38 = vld [vmem:[%s17543_s11 + $0x7f8] sm:$0xff]  }
0x16ff   :  { %v8724_v23 = vpop.f32.mrf.mxu1  ;;  %v8797_v0 = vpop.f32.mrf.mxu0  ;;  %v9160_v24 = vpack.c.bf16 %v9096_v42, %v9080_v2  ;;  %v8723_v17 = vadd.f32 %v8722_v5, %v17014_v8 }
0x1700   :  { %v9161_v29 = vpack.c.bf16 %v9097_v32, %v9081_v37  ;;  %v9163_v28 = vpack.c.bf16 %v9099_v34, %v9083_v20  ;;  %12676 = vmatpush3.bf16.msra.mxu1 %v13643_v58  ;;  %v8725_v62 = vadd.f32 %v8724_v23, %v17000_v40  ;;  %12716 = vmatpush3.bf16.msra.mxu0 %v13644_v36  ;;  %v8990_v42 = vmax.f32 %v8796_v18, 0.0  ;;  %v13655_v37 = vld [vmem:[%s17543_s11 + $0x738] sm:$0xff]   ;;  %v13661_v18 = vld [vmem:[%s17543_s11 + $0x768] sm:$0xff]  }
0x1701   :  { %v8726_v60 = vpop.f32.mrf.mxu1  ;;  %v8799_v55 = vpop.f32.mrf.mxu0  ;;  %12677 = vmatprep.subr.bf16.mxu1 %v13645_v39  ;;  %v8798_v57 = vadd.f32 %v8797_v0, %v17004_v56  ;;  %12717 = vmatprep.subr.bf16.mxu0 %v13646_v7  ;;  %v8988_v58 = vmax.f32 %v8723_v17, 0.0  ;;  %v13656_v23 = vld [vmem:[%s17543_s11 + $0x7b8] sm:$0xff]   ;;  %v13657_v0 = vld [vmem:[%s17543_s11 + $0x770] sm:$0xff]  }
0x1702   :  { %v8727_v27 = vadd.f32 %v8726_v60, %v17014_v8  ;;  %v8800_v21 = vadd.f32 %v8799_v55, %v17018_v6  ;;  %10391 = vmatprep.mubr.bf16.mxu1 %v9161_v29  ;;  %10456 = vmatprep.mubr.bf16.mxu0 %v9163_v28  ;;  %v8989_v61 = vmax.f32 %v8725_v62, 0.0  ;;  %v13660_v17 = vld [vmem:[%s17543_s11 + $0x7b0] sm:$0xff]  }
0x1703   :  { %v8728_v51 = vpop.f32.mrf.mxu1  ;;  %v8801_v45 = vpop.f32.mrf.mxu0  ;;  %10392 = vmatmul.mubr.bf16.gmra.mxu1 %v9160_v24  ;;  %10457 = vmatmul.mubr.bf16.gmra.mxu0 %v9162_v31  ;;  %v8991_v13 = vmax.f32 %v8798_v57, 0.0 }
0x1704   :  { %v8729_v3 = vadd.f32 %v8728_v51, %v17000_v40  ;;  %v8802_v1 = vadd.f32 %v8801_v45, %v17004_v56  ;;  %12678 = vmatpush3.bf16.msra.mxu1 %v13647_v30  ;;  %v9004_v54 = vmax.f32 %v8727_v27, 0.0  ;;  %v9006_v4 = vmax.f32 %v8800_v21, 0.0  ;;  %12718 = vmatpush3.bf16.msra.mxu0 %v13648_v16  ;;  %v13658_v30 = vld [vmem:[%s17543_s11 + $0x7f0] sm:$0xff]  }
0x1705   :  { %v8732_v46 = vpop.f32.mrf.mxu1  ;;  %v8805_v19 = vpop.f32.mrf.mxu0  ;;  %12679 = vmatprep.subr.bf16.mxu1 %v13649_v22  ;;  %12719 = vmatprep.subr.bf16.mxu0 %v13650_v44  ;;  %v13659_v22 = vld [vmem:[%s17543_s11 + $0x730] sm:$0xff]  }
0x1706   :  { %v9005_v15 = vmax.f32 %v8729_v3, 0.0  ;;  %v9007_v52 = vmax.f32 %v8802_v1, 0.0  ;;  %v9116_v20 = vpack.c.bf16 %v9004_v54, %v8988_v58  ;;  %v9118_v32 = vpack.c.bf16 %v9006_v4, %v8990_v42 }
0x1707   :  { %v8734_v53 = vpop.f32.mrf.mxu1  ;;  %v8807_v5 = vpop.f32.mrf.mxu0  ;;  %v8733_v24 = vadd.f32 %v8732_v46, %v17014_v8  ;;  %v8806_v31 = vadd.f32 %v8805_v19, %v17018_v6  ;;  %v13662_v19 = vld [vmem:[%s17543_s11 + $0x7e8] sm:$0xff]  }
0x1708   :  { %v9117_v36 = vpack.c.bf16 %v9005_v15, %v8989_v61  ;;  %v9119_v39 = vpack.c.bf16 %v9007_v52, %v8991_v13  ;;  %12680 = vmatpush3.bf16.msra.mxu1 %v13651_v63  ;;  %v8735_v34 = vadd.f32 %v8734_v53, %v17000_v40  ;;  %12720 = vmatpush3.bf16.msra.mxu0 %v13652_v35  ;;  %v13663_v61 = vld [vmem:[%s17543_s11 + $0x728] sm:$0xff]  }
0x1709   :  { %v8736_v2 = vpop.f32.mrf.mxu1  ;;  %v8809_v41 = vpop.f32.mrf.mxu0  ;;  %12745 = vmatprep.subr.bf16.mxu1 %v13653_v10  ;;  %v8808_v7 = vadd.f32 %v8807_v5, %v17004_v56  ;;  %12785 = vmatprep.subr.bf16.mxu0 %v13654_v38  ;;  %v9020_v63 = vmax.f32 %v8733_v24, 0.0  ;;  %v9022_v54 = vmax.f32 %v8806_v31, 0.0  ;;  %v13664_v53 = vld [vmem:[%s17543_s11 + $0x7a8] sm:$0xff]   ;;  %v13665_v5 = vld [vmem:[%s17543_s11 + $0x760] sm:$0xff]   ;;  %v13669_v31 = vld [vmem:[%s17543_s11 + $0x758] sm:$0xff]  }
0x170a   :  { %v8737_v29 = vadd.f32 %v8736_v2, %v17014_v8  ;;  %v8810_v28 = vadd.f32 %v8809_v41, %v17018_v6  ;;  %10497 = vmatprep.mubr.bf16.mxu1 %v9117_v36  ;;  %10562 = vmatprep.mubr.bf16.mxu0 %v9119_v39  ;;  %v9021_v51 = vmax.f32 %v8735_v34, 0.0  ;;  %v13668_v24 = vld [vmem:[%s17543_s11 + $0x7a0] sm:$0xff]  }
0x170b   :  { %v8738_v62 = vpop.f32.mrf.mxu1  ;;  %v8811_v60 = vpop.f32.mrf.mxu0  ;;  %10498 = vmatmul.mubr.bf16.vlgmr.msra.gmra.mxu1 %v9116_v20  ;;  %10563 = vmatmul.mubr.bf16.vlgmr.msra.gmra.mxu0 %v9118_v32  ;;  %v9023_v45 = vmax.f32 %v8808_v7, 0.0 }
0x170c   :  { %v8739_v55 = vadd.f32 %v8738_v62, %v17000_v40  ;;  %v8812_v16 = vadd.f32 %v8811_v60, %v17004_v56  ;;  %12746 = vmatpush3.bf16.msra.mxu1 %v13655_v37  ;;  %v9036_v57 = vmax.f32 %v8737_v29, 0.0  ;;  %v9038_v27 = vmax.f32 %v8810_v28, 0.0  ;;  %12786 = vmatpush3.bf16.msra.mxu0 %v13656_v23  ;;  %v13666_v37 = vld [vmem:[%s17543_s11 + $0x7e0] sm:$0xff]  }
0x170d   :  { %v8742_v21 = vpop.f32.mrf.mxu1  ;;  %v8815_v44 = vpop.f32.mrf.mxu0  ;;  %12747 = vmatprep.subr.bf16.mxu1 %v13657_v0  ;;  %12787 = vmatprep.subr.bf16.mxu0 %v13658_v30  ;;  %v13667_v0 = vld [vmem:[%s17543_s11 + $0x720] sm:$0xff]  }
0x170e   :  { %v9037_v3 = vmax.f32 %v8739_v55, 0.0  ;;  %v9039_v1 = vmax.f32 %v8812_v16, 0.0  ;;  %v9132_v13 = vpack.c.bf16 %v9036_v57, %v9020_v63  ;;  %v9134_v15 = vpack.c.bf16 %v9038_v27, %v9022_v54 }
0x170f   :  { %v8744_v4 = vpop.f32.mrf.mxu1  ;;  %v8817_v46 = vpop.f32.mrf.mxu0  ;;  %v8743_v20 = vadd.f32 %v8742_v21, %v17014_v8  ;;  %v8816_v32 = vadd.f32 %v8815_v44, %v17018_v6  ;;  %v13670_v44 = vld [vmem:[%s17543_s11 + $0x7d8] sm:$0xff]  }
0x1710   :  { %v9133_v35 = vpack.c.bf16 %v9037_v3, %v9021_v51  ;;  %v9135_v10 = vpack.c.bf16 %v9039_v1, %v9023_v45  ;;  %12748 = vmatpush3.bf16.msra.mxu1 %v13659_v22  ;;  %v8745_v52 = vadd.f32 %v8744_v4, %v17000_v40  ;;  %12788 = vmatpush3.bf16.msra.mxu0 %v13660_v17  ;;  %v13671_v51 = vld [vmem:[%s17543_s11 + $0x718] sm:$0xff]  }
0x1711   :  { %v8746_v58 = vpop.f32.mrf.mxu1  ;;  %v8819_v42 = vpop.f32.mrf.mxu0  ;;  %12749 = vmatprep.subr.bf16.mxu1 %v13661_v18  ;;  %v8818_v38 = vadd.f32 %v8817_v46, %v17004_v56  ;;  %12789 = vmatprep.subr.bf16.mxu0 %v13662_v19  ;;  %v9052_v22 = vmax.f32 %v8743_v20, 0.0  ;;  %v9054_v57 = vmax.f32 %v8816_v32, 0.0  ;;  %v13672_v4 = vld [vmem:[%s17543_s11 + $0x798] sm:$0xff]   ;;  %v13673_v46 = vld [vmem:[%s17543_s11 + $0x750] sm:$0xff]  }
0x1712   :  { %v8747_v36 = vadd.f32 %v8746_v58, %v17014_v8  ;;  %v8820_v39 = vadd.f32 %v8819_v42, %v17018_v6  ;;  %10505 = vmatprep.mubr.bf16.mxu1 %v9133_v35  ;;  %10570 = vmatprep.mubr.bf16.mxu0 %v9135_v10  ;;  %v9053_v62 = vmax.f32 %v8745_v52, 0.0 }
0x1713   :  { %v8748_v34 = vpop.f32.mrf.mxu1  ;;  %v8821_v2 = vpop.f32.mrf.mxu0  ;;  %10506 = vmatmul.mubr.bf16.gmra.mxu1 %v9132_v13  ;;  %10571 = vmatmul.mubr.bf16.gmra.mxu0 %v9134_v15  ;;  %v9055_v60 = vmax.f32 %v8818_v38, 0.0 }
0x1714   :  { %v8749_v41 = vadd.f32 %v8748_v34, %v17000_v40  ;;  %v8822_v23 = vadd.f32 %v8821_v2, %v17004_v56  ;;  %12750 = vmatpush3.bf16.msra.mxu1 %v13663_v61  ;;  %v9068_v7 = vmax.f32 %v8747_v36, 0.0  ;;  %v9070_v29 = vmax.f32 %v8820_v39, 0.0  ;;  %12790 = vmatpush3.bf16.msra.mxu0 %v13664_v53  ;;  %v13674_v61 = vld [vmem:[%s17543_s11 + $0x7d0] sm:$0xff]  }
0x1715   :  { %v8752_v28 = vpop.f32.mrf.mxu1  ;;  %v8825_v30 = vpop.f32.mrf.mxu0  ;;  %12751 = vmatprep.subr.bf16.mxu1 %v13665_v5  ;;  %12791 = vmatprep.subr.bf16.mxu0 %v13666_v37  ;;  %v13675_v5 = vld [vmem:[%s17543_s11 + $0x710] sm:$0xff]   ;;  %v13677_v37 = vld [vmem:[%s17543_s11 + $0x748] sm:$0xff]  }
0x1716   :  { %v9069_v55 = vmax.f32 %v8749_v41, 0.0  ;;  %v9071_v16 = vmax.f32 %v8822_v23, 0.0  ;;  %v9148_v45 = vpack.c.bf16 %v9068_v7, %v9052_v22  ;;  %v9150_v3 = vpack.c.bf16 %v9070_v29, %v9054_v57  ;;  %v13678_v29 = vld [vmem:[%s17543_s11 + $0x7c8] sm:$0xff]  }
0x1717   :  { %v8754_v27 = vpop.f32.mrf.mxu1  ;;  %v8827_v21 = vpop.f32.mrf.mxu0  ;;  %v8753_v13 = vadd.f32 %v8752_v28, %v17014_v8  ;;  %v8826_v15 = vadd.f32 %v8825_v30, %v17018_v6  ;;  %v17162_v23 = vrot.slane %v16993_v49, %v17675_v9 }
0x1718   :  { %v9149_v17 = vpack.c.bf16 %v9069_v55, %v9053_v62  ;;  %v9151_v18 = vpack.c.bf16 %v9071_v16, %v9055_v60  ;;  %12752 = vmatpush3.bf16.msra.mxu1 %v13667_v0  ;;  %v8755_v1 = vadd.f32 %v8754_v27, %v17000_v40  ;;  %12792 = vmatpush3.bf16.msra.mxu0 %v13668_v24  ;;  %v13679_v24 = vld [vmem:[%s17543_s11 + $0x708] sm:$0xff]   ;;  %v13681_v55 = vld [vmem:[%s17543_s11 + $0x740] sm:$0xff]  }
0x1719   :  { %v8756_v63 = vpop.f32.mrf.mxu1  ;;  %v8829_v54 = vpop.f32.mrf.mxu0  ;;  %12753 = vmatprep.subr.bf16.mxu1 %v13669_v31  ;;  %v8828_v19 = vadd.f32 %v8827_v21, %v17004_v56  ;;  %12793 = vmatprep.subr.bf16.mxu0 %v13670_v44  ;;  %v9086_v41 = vmax.f32 %v8826_v15, 0.0  ;;  %v13680_v60 = vld [vmem:[%s17543_s11 + $0x788] sm:$0xff]   ;;  %v13682_v27 = vld [vmem:[%s17543_s11 + $0x7c0] sm:$0xff]  }
0x171a   :  { %v8757_v35 = vadd.f32 %v8756_v63, %v17014_v8  ;;  %v8830_v10 = vadd.f32 %v8829_v54, %v17018_v6  ;;  %10513 = vmatprep.mubr.bf16.mxu1 %v9149_v17  ;;  %10578 = vmatprep.mubr.bf16.mxu0 %v9151_v18  ;;  %v17144_v6 = vrot.slane %v16993_v49, %v17672_v50  ;;  %v9085_v20 = vmax.f32 %v8755_v1, 0.0 }
0x171b   :  { %v8758_v52 = vpop.f32.mrf.mxu1  ;;  %v8831_v58 = vpop.f32.mrf.mxu0  ;;  %10514 = vmatmul.mubr.bf16.gmra.mxu1 %v9148_v45  ;;  %10579 = vmatmul.mubr.bf16.gmra.mxu0 %v9150_v3  ;;  %v9087_v32 = vmax.f32 %v8828_v19, 0.0  ;;  %v9084_v50 = vmax.f32 %v8753_v13, 0.0  ;;  %v13683_v3 = vld [vmem:[%s17543_s11 + $0x700] sm:$0xff]  }
0x171c   :  { %v8759_v42 = vadd.f32 %v8758_v52, %v17000_v40  ;;  %v8832_v53 = vadd.f32 %v8831_v58, %v17004_v56  ;;  %12754 = vmatpush3.bf16.msra.mxu1 %v13671_v51  ;;  %v9100_v38 = vmax.f32 %v8757_v35, 0.0  ;;  %v9102_v36 = vmax.f32 %v8830_v10, 0.0  ;;  %12794 = vmatpush3.bf16.msra.mxu0 %v13672_v4  ;;  %v13676_v56 = vld [vmem:[%s17543_s11 + $0x790] sm:$0xff]  }
0x171d   :  { %v8868_v8 = vpop.f32.mrf.mxu1  ;;  %v8941_v39 = vpop.f32.mrf.mxu0  ;;  %v17148_v40 = vrot.slane %v16993_v49, %v17673_v59  ;;  %12755 = vmatprep.subr.bf16.mxu1 %v13673_v46  ;;  %12795 = vmatprep.subr.bf16.mxu0 %v13674_v61  ;;  %v17158_v59 = vrot.slane %v16993_v49, %v17674_v33  ;;  %v13684_v46 = vld [vmem:[%s17543_s11 + $0x780] sm:$0xff]  }
0x171e   :  { %v9101_v34 = vmax.f32 %v8759_v42, 0.0  ;;  %v9103_v2 = vmax.f32 %v8832_v53, 0.0  ;;  %v9164_v31 = vpack.c.bf16 %v9100_v38, %v9084_v50  ;;  %v9166_v33 = vpack.c.bf16 %v9102_v36, %v9086_v41 }
0x171f   :  { %v8870_v0 = vpop.f32.mrf.mxu1  ;;  %v8943_v7 = vpop.f32.mrf.mxu0  ;;  %v8869_v21 = vadd.f32 %v8868_v8, %v17158_v59  ;;  %v8942_v44 = vadd.f32 %v8941_v39, %v17162_v23 }
0x1720   :  { %v9165_v28 = vpack.c.bf16 %v9101_v34, %v9085_v20  ;;  %v9167_v30 = vpack.c.bf16 %v9103_v2, %v9087_v32  ;;  %12756 = vmatpush3.bf16.msra.mxu1 %v13675_v5  ;;  %v8871_v62 = vadd.f32 %v8870_v0, %v17144_v6  ;;  %12796 = vmatpush3.bf16.msra.mxu0 %v13676_v56 }
0x1721   :  { %v8872_v9 = vpop.f32.mrf.mxu1  ;;  %v8945_v49 = vpop.f32.mrf.mxu0  ;;  %12757 = vmatprep.subr.bf16.mxu1 %v13677_v37  ;;  %v8944_v16 = vadd.f32 %v8943_v7, %v17148_v40  ;;  %12797 = vmatprep.subr.bf16.mxu0 %v13678_v29  ;;  %v8992_v13 = vmax.f32 %v8869_v21, 0.0  ;;  %v8994_v15 = vmax.f32 %v8942_v44, 0.0 }
0x1722   :  { %v8873_v22 = vadd.f32 %v8872_v9, %v17158_v59  ;;  %v8946_v57 = vadd.f32 %v8945_v49, %v17162_v23  ;;  %10521 = vmatprep.mubr.bf16.mxu1 %v9165_v28  ;;  %10586 = vmatprep.mubr.bf16.mxu0 %v9167_v30  ;;  %v8993_v19 = vmax.f32 %v8871_v62, 0.0 }
0x1723   :  { %v8874_v17 = vpop.f32.mrf.mxu1  ;;  %v8947_v18 = vpop.f32.mrf.mxu0  ;;  %10522 = vmatmul.mubr.bf16.gmra.mxu1 %v9164_v31  ;;  %10587 = vmatmul.mubr.bf16.gmra.mxu0 %v9166_v33  ;;  %v8995_v35 = vmax.f32 %v8944_v16, 0.0 }
0x1724   :  { %v8875_v51 = vadd.f32 %v8874_v17, %v17144_v6  ;;  %v8948_v45 = vadd.f32 %v8947_v18, %v17148_v40  ;;  %12758 = vmatpush3.bf16.msra.mxu1 %v13679_v24  ;;  %v9008_v1 = vmax.f32 %v8873_v22, 0.0  ;;  %v9010_v63 = vmax.f32 %v8946_v57, 0.0  ;;  %12798 = vmatpush3.bf16.msra.mxu0 %v13680_v60 }
0x1725   :  { %v8878_v54 = vpop.f32.mrf.mxu1  ;;  %v8951_v4 = vpop.f32.mrf.mxu0  ;;  %12759 = vmatprep.subr.bf16.mxu1 %v13681_v55  ;;  %12799 = vmatprep.subr.bf16.mxu0 %v13682_v27 }
0x1726   :  { %v9009_v10 = vmax.f32 %v8875_v51, 0.0  ;;  %v9011_v61 = vmax.f32 %v8948_v45, 0.0  ;;  %v9120_v5 = vpack.c.bf16 %v9008_v1, %v8992_v13  ;;  %v9122_v38 = vpack.c.bf16 %v9010_v63, %v8994_v15 }
0x1727   :  { %v8880_v52 = vpop.f32.mrf.mxu1  ;;  %v8953_v58 = vpop.f32.mrf.mxu0  ;;  %v8879_v32 = vadd.f32 %v8878_v54, %v17158_v59  ;;  %v8952_v34 = vadd.f32 %v8951_v4, %v17162_v23 }
0x1728   :  { %v9121_v42 = vpack.c.bf16 %v9009_v10, %v8993_v19  ;;  %v9123_v53 = vpack.c.bf16 %v9011_v61, %v8995_v35  ;;  %12760 = vmatpush3.bf16.msra.mxu1 %v13683_v3  ;;  %v8881_v36 = vadd.f32 %v8880_v52, %v17144_v6  ;;  %12800 = vmatpush3.bf16.msra.mxu0 %v13684_v46 }
0x1729   :  { %v8882_v8 = vpop.f32.mrf.mxu1  ;;  %v8955_v39 = vpop.f32.mrf.mxu0  ;;  %v8954_v56 = vadd.f32 %v8953_v58, %v17148_v40  ;;  %v9024_v9 = vmax.f32 %v8879_v32, 0.0  ;;  %v9026_v49 = vmax.f32 %v8952_v34, 0.0 }
0x172a   :  { %v8883_v37 = vadd.f32 %v8882_v8, %v17158_v59  ;;  %v8956_v20 = vadd.f32 %v8955_v39, %v17162_v23  ;;  %10627 = vmatprep.mubr.bf16.mxu1 %v9121_v42  ;;  %10692 = vmatprep.mubr.bf16.mxu0 %v9123_v53  ;;  %v9025_v24 = vmax.f32 %v8881_v36, 0.0 }
0x172b   :  { %v8884_v2 = vpop.f32.mrf.mxu1  ;;  %v8957_v50 = vpop.f32.mrf.mxu0  ;;  %10628 = vmatmul.mubr.bf16.vlgmr.msra.gmra.mxu1 %v9120_v5  ;;  %10693 = vmatmul.mubr.bf16.vlgmr.msra.gmra.mxu0 %v9122_v38  ;;  %v9027_v31 = vmax.f32 %v8954_v56, 0.0 }
0x172c   :  { %v8885_v41 = vadd.f32 %v8884_v2, %v17144_v6  ;;  %v8958_v0 = vadd.f32 %v8957_v50, %v17148_v40  ;;  %v9040_v7 = vmax.f32 %v8883_v37, 0.0  ;;  %v9042_v29 = vmax.f32 %v8956_v20, 0.0 }
0x172d   :  { %v8888_v28 = vpop.f32.mrf.mxu1  ;;  %v8961_v30 = vpop.f32.mrf.mxu0 }
0x172e   :  { %v9041_v33 = vmax.f32 %v8885_v41, 0.0  ;;  %v9043_v62 = vmax.f32 %v8958_v0, 0.0  ;;  %v9136_v57 = vpack.c.bf16 %v9040_v7, %v9024_v9  ;;  %v9138_v27 = vpack.c.bf16 %v9042_v29, %v9026_v49 }
0x172f   :  { %v8890_v60 = vpop.f32.mrf.mxu1  ;;  %v8963_v55 = vpop.f32.mrf.mxu0  ;;  %v8889_v3 = vadd.f32 %v8888_v28, %v17158_v59  ;;  %v8962_v1 = vadd.f32 %v8961_v30, %v17162_v23 }
0x1730   :  { %v9137_v16 = vpack.c.bf16 %v9041_v33, %v9025_v24  ;;  %v9139_v22 = vpack.c.bf16 %v9043_v62, %v9027_v31  ;;  %v8891_v21 = vadd.f32 %v8890_v60, %v17144_v6  ;;  %v8964_v18 = vadd.f32 %v8963_v55, %v17148_v40 }
0x1731   :  { %v8892_v44 = vpop.f32.mrf.mxu1  ;;  %v8965_v17 = vpop.f32.mrf.mxu0  ;;  %v9056_v42 = vmax.f32 %v8889_v3, 0.0  ;;  %v9058_v53 = vmax.f32 %v8962_v1, 0.0 }
0x1732   :  { %v8893_v51 = vadd.f32 %v8892_v44, %v17158_v59  ;;  %v8966_v45 = vadd.f32 %v8965_v17, %v17162_v23  ;;  %10635 = vmatprep.mubr.bf16.mxu1 %v9137_v16  ;;  %10700 = vmatprep.mubr.bf16.mxu0 %v9139_v22  ;;  %v9057_v13 = vmax.f32 %v8891_v21, 0.0  ;;  %v9059_v15 = vmax.f32 %v8964_v18, 0.0 }
0x1733   :  { %v8894_v63 = vpop.f32.mrf.mxu1  ;;  %v8967_v54 = vpop.f32.mrf.mxu0  ;;  %10636 = vmatmul.mubr.bf16.gmra.mxu1 %v9136_v57  ;;  %10701 = vmatmul.mubr.bf16.gmra.mxu0 %v9138_v27 }
0x1734   :  { %v8895_v4 = vadd.f32 %v8894_v63, %v17144_v6  ;;  %v8968_v46 = vadd.f32 %v8967_v54, %v17148_v40  ;;  %v9072_v19 = vmax.f32 %v8893_v51, 0.0  ;;  %v9074_v35 = vmax.f32 %v8966_v45, 0.0 }
0x1735   :  { %v8898_v10 = vpop.f32.mrf.mxu1  ;;  %v8971_v61 = vpop.f32.mrf.mxu0 }
0x1736   :  { %v9073_v52 = vmax.f32 %v8895_v4, 0.0  ;;  %v9075_v58 = vmax.f32 %v8968_v46, 0.0  ;;  %v9152_v39 = vpack.c.bf16 %v9072_v19, %v9056_v42  ;;  %v9154_v56 = vpack.c.bf16 %v9074_v35, %v9058_v53 }
0x1737   :  { %v8900_v5 = vpop.f32.mrf.mxu1  ;;  %v8973_v38 = vpop.f32.mrf.mxu0  ;;  %v8899_v41 = vadd.f32 %v8898_v10, %v17158_v59  ;;  %v8972_v29 = vadd.f32 %v8971_v61, %v17162_v23 }
0x1738   :  { %v9153_v36 = vpack.c.bf16 %v9073_v52, %v9057_v13  ;;  %v9155_v8 = vpack.c.bf16 %v9075_v58, %v9059_v15  ;;  %v8901_v37 = vadd.f32 %v8900_v5, %v17144_v6  ;;  %v8974_v34 = vadd.f32 %v8973_v38, %v17148_v40 }
0x1739   :  { %v8902_v20 = vpop.f32.mrf.mxu1  ;;  %v8975_v32 = vpop.f32.mrf.mxu0  ;;  %v9088_v60 = vmax.f32 %v8899_v41, 0.0  ;;  %v9090_v55 = vmax.f32 %v8972_v29, 0.0 }
0x173a   :  { %v8903_v2 = vadd.f32 %v8902_v20, %v17158_v59  ;;  %v8976_v50 = vadd.f32 %v8975_v32, %v17162_v23  ;;  %10643 = vmatprep.mubr.bf16.mxu1 %v9153_v36  ;;  %10708 = vmatprep.mubr.bf16.mxu0 %v9155_v8  ;;  %v9089_v24 = vmax.f32 %v8901_v37, 0.0  ;;  %v9091_v33 = vmax.f32 %v8974_v34, 0.0 }
0x173b   :  { %v8904_v0 = vpop.f32.mrf.mxu1  ;;  %v8977_v7 = vpop.f32.mrf.mxu0  ;;  %10644 = vmatmul.mubr.bf16.gmra.mxu1 %v9152_v39  ;;  %10709 = vmatmul.mubr.bf16.gmra.mxu0 %v9154_v56 }
0x173c   :  { %v8905_v28 = vadd.f32 %v8904_v0, %v17144_v6  ;;  %v8978_v30 = vadd.f32 %v8977_v7, %v17148_v40  ;;  %v9104_v31 = vmax.f32 %v8903_v2, 0.0  ;;  %v9106_v62 = vmax.f32 %v8976_v50, 0.0  ;;  %v11828_v40 = vld [vmem:[%s17544_s12 + $0x1] ss:$0 sm:$0xff] }
0x173e   :  { %v9105_v9 = vmax.f32 %v8905_v28, 0.0  ;;  %v9107_v49 = vmax.f32 %v8978_v30, 0.0  ;;  %v9168_v22 = vpack.c.bf16 %v9104_v31, %v9088_v60  ;;  %v9170_v57 = vpack.c.bf16 %v9106_v62, %v9090_v55 }
0x1740   :  { %v9169_v16 = vpack.c.bf16 %v9105_v9, %v9089_v24  ;;  %v9171_v59 = vpack.c.bf16 %v9107_v49, %v9091_v33 }
0x1742   :  { %10651 = vmatprep.mubr.bf16.mxu1 %v9169_v16  ;;  %10716 = vmatprep.mubr.bf16.mxu0 %v9171_v59 }
0x1743   :  { %10652 = vmatmul.mubr.bf16.gmra.mxu1 %v9168_v22  ;;  %10717 = vmatmul.mubr.bf16.gmra.mxu0 %v9170_v57 }
0x178b   :  { %v12521_v6 = vpop.f32.mrf.mxu1  ;;  %v12561_v23 = vpop.f32.mrf.mxu0 }
0x178d   :  { %v12522_v27 = vpop.f32.mrf.mxu1  ;;  %v12562_v21 = vpop.f32.mrf.mxu0 }
0x178e   :  { %v12523_v44 = vadd.f32 %v12522_v27, %v12521_v6  ;;  %v12563_v17 = vadd.f32 %v12562_v21, %v12561_v23 }
0x178f   :  { %v12524_v18 = vpop.f32.mrf.mxu1  ;;  %v12564_v51 = vpop.f32.mrf.mxu0 }
0x1790   :  { %v10240_v45 = vadd.f32 %v12523_v44, %v11828_v40 }
0x1791   :  { %v12525_v3 = vpop.f32.mrf.mxu1  ;;  %v12565_v1 = vpop.f32.mrf.mxu0 }
0x1792   :  { %v17220_v63 = vadd.f32 %v12563_v17, %v10240_v45  ;;  %v12526_v54 = vadd.f32 %v12525_v3, %v12524_v18  ;;  %v12566_v4 = vadd.f32 %v12565_v1, %v12564_v51 }
0x1793   :  { %v12527_v46 = vpop.f32.mrf.mxu1  ;;  %v12567_v35 = vpop.f32.mrf.mxu0 }
0x1794   :  { %v10243_v19 = vadd.f32 %v12526_v54, %v11828_v40 }
0x1795   :  { %v12528_v10 = vpop.f32.mrf.mxu1  ;;  %v12568_v15 = vpop.f32.mrf.mxu0 }
0x1796   :  { %v17222_v61 = vadd.f32 %v12566_v4, %v10243_v19  ;;  %v12529_v13 = vadd.f32 %v12528_v10, %v12527_v46  ;;  %v12569_v52 = vadd.f32 %v12568_v15, %v12567_v35 }
0x1797   :  { %v12530_v58 = vpop.f32.mrf.mxu1  ;;  %v12570_v53 = vpop.f32.mrf.mxu0 }
0x1798   :  { %v10248_v42 = vadd.f32 %v12529_v13, %v11828_v40 }
0x1799   :  { %v12531_v5 = vpop.f32.mrf.mxu1  ;;  %v12571_v8 = vpop.f32.mrf.mxu0 }
0x179a   :  { %v17224_v38 = vadd.f32 %v12569_v52, %v10248_v42  ;;  %v12532_v36 = vadd.f32 %v12531_v5, %v12530_v58  ;;  %v12572_v39 = vadd.f32 %v12571_v8, %v12570_v53 }
0x179b   :  { %v12533_v56 = vpop.f32.mrf.mxu1  ;;  %v12573_v20 = vpop.f32.mrf.mxu0 }
0x179c   :  { %v10251_v37 = vadd.f32 %v12532_v36, %v11828_v40 }
0x179d   :  { %v12534_v32 = vpop.f32.mrf.mxu1  ;;  %v12574_v50 = vpop.f32.mrf.mxu0 }
0x179e   :  { %v17226_v34 = vadd.f32 %v12572_v39, %v10251_v37  ;;  %v12535_v2 = vadd.f32 %v12534_v32, %v12533_v56  ;;  %v12575_v41 = vadd.f32 %v12574_v50, %v12573_v20 }
0x179f   :  { %v12536_v0 = vpop.f32.mrf.mxu1  ;;  %v12576_v29 = vpop.f32.mrf.mxu0 }
0x17a0   :  { %v10256_v7 = vadd.f32 %v12535_v2, %v11828_v40 }
0x17a1   :  { %v12537_v28 = vpop.f32.mrf.mxu1  ;;  %v12577_v31 = vpop.f32.mrf.mxu0 }
0x17a2   :  { %v17228_v30 = vadd.f32 %v12575_v41, %v10256_v7  ;;  %v12538_v24 = vadd.f32 %v12537_v28, %v12536_v0  ;;  %v12578_v33 = vadd.f32 %v12577_v31, %v12576_v29 }
0x17a3   :  { %v12539_v62 = vpop.f32.mrf.mxu1  ;;  %v12579_v49 = vpop.f32.mrf.mxu0 }
0x17a4   :  { %v10259_v9 = vadd.f32 %v12538_v24, %v11828_v40 }
0x17a5   :  { %v12540_v60 = vpop.f32.mrf.mxu1  ;;  %v12580_v59 = vpop.f32.mrf.mxu0 }
0x17a6   :  { %v17230_v55 = vadd.f32 %v12578_v33, %v10259_v9  ;;  %v12541_v16 = vadd.f32 %v12540_v60, %v12539_v62  ;;  %v12581_v22 = vadd.f32 %v12580_v59, %v12579_v49 }
0x17a7   :  { %v12542_v57 = vpop.f32.mrf.mxu1  ;;  %v12582_v23 = vpop.f32.mrf.mxu0 }
0x17a8   :  { %v10264_v6 = vadd.f32 %v12541_v16, %v11828_v40 }
0x17a9   :  { %v12543_v27 = vpop.f32.mrf.mxu1  ;;  %v12583_v17 = vpop.f32.mrf.mxu0 }
0x17aa   :  { %v17232_v21 = vadd.f32 %v12581_v22, %v10264_v6  ;;  %v12544_v44 = vadd.f32 %v12543_v27, %v12542_v57  ;;  %v12584_v18 = vadd.f32 %v12583_v17, %v12582_v23 }
0x17ab   :  { %v12601_v51 = vpop.f32.mrf.mxu1  ;;  %v12641_v3 = vpop.f32.mrf.mxu0 }
0x17ac   :  { %17676 = vst [vmem:[#allocation30_spill] sm:$0xff] %v17232_v21  ;;  %v10267_v45 = vadd.f32 %v12544_v44, %v11828_v40 }
0x17ad   :  { %v12602_v1 = vpop.f32.mrf.mxu1  ;;  %v12642_v4 = vpop.f32.mrf.mxu0 }
0x17ae   :  { %v17234_v54 = vadd.f32 %v12584_v18, %v10267_v45  ;;  %v12643_v21 = vadd.f32 %v12642_v4, %v12641_v3 }
0x17af   :  { %v12604_v46 = vpop.f32.mrf.mxu1  ;;  %v17236_v19 = vpop.f32.mrf.mxu0 }
0x17b0   :  { %17677 = vst [vmem:[#allocation7_spill] sm:$0xff] %v17234_v54 }
0x17b1   :  { %v12605_v35 = vpop.f32.mrf.mxu1  ;;  %v17238_v10 = vpop.f32.mrf.mxu0 }
0x17b3   :  { %v12607_v13 = vpop.f32.mrf.mxu1  ;;  %v17240_v15 = vpop.f32.mrf.mxu0 }
0x17b5   :  { %v12608_v52 = vpop.f32.mrf.mxu1  ;;  %v17242_v58 = vpop.f32.mrf.mxu0 }
0x17b7   :  { %v17244_v42 = vpop.f32.mrf.mxu1  ;;  %v17246_v40 = vpop.f32.mrf.mxu0 }
0x17b9   :  { %v12611_v53 = vpop.f32.mrf.mxu1  ;;  %v17248_v5 = vpop.f32.mrf.mxu0 }
0x17ba   :  { %v12612_v4 = vadd.f32 %v12611_v53, %v17244_v42 }
0x17bb   :  { %v17250_v36 = vpop.f32.mrf.mxu1  ;;  %v17252_v8 = vpop.f32.mrf.mxu0 }
0x17bd   :  { %v17254_v39 = vpop.f32.mrf.mxu1  ;;  %v17256_v56 = vpop.f32.mrf.mxu0 }
0x17bf   :  { %v17258_v37 = vpop.f32.mrf.mxu1  ;;  %v17260_v20 = vpop.f32.mrf.mxu0 }
0x17c1   :  { %v17262_v32 = vpop.f32.mrf.mxu1  ;;  %v17264_v2 = vpop.f32.mrf.mxu0 }
0x17c2   :  { %17678 = vst [vmem:[#allocation23_spill] sm:$0xff] %v17264_v2 }
0x17c3   :  { %v17266_v50 = vpop.f32.mrf.mxu1  ;;  %v17268_v41 = vpop.f32.mrf.mxu0 }
0x17c4   :  { %17679 = vst [vmem:[#allocation24_spill] sm:$0xff] %v17268_v41 }
0x17c5   :  { %v17270_v0 = vpop.f32.mrf.mxu1  ;;  %v17272_v7 = vpop.f32.mrf.mxu0 }
0x17c6   :  { %17680 = vst [vmem:[#allocation34_spill] sm:$0xff] %v17272_v7 }
0x17c7   :  { %v17274_v29 = vpop.f32.mrf.mxu1  ;;  %v17276_v28 = vpop.f32.mrf.mxu0 }
0x17c8   :  { %17681 = vst [vmem:[#allocation31_spill] sm:$0xff] %v17274_v29  ;;  %17682 = vst [vmem:[#allocation33_spill] sm:$0xff] %v17276_v28  ;;  %v12603_v28 = vadd.f32 %v12602_v1, %v12601_v51  ;;  %v12609_v51 = vadd.f32 %v12608_v52, %v12607_v13 }
0x17c9   :  { %v17278_v24 = vpop.f32.mrf.mxu1  ;;  %v17280_v31 = vpop.f32.mrf.mxu0 }
0x17ca   :  { %17683 = vst [vmem:[#allocation21_spill] sm:$0xff] %v17278_v24  ;;  %17684 = vst [vmem:[#allocation6_spill] sm:$0xff] %v17280_v31  ;;  %v10370_v47 = vadd.f32 %v12603_v28, %v17220_v63  ;;  %v12606_v24 = vadd.f32 %v12605_v35, %v12604_v46  ;;  %v12646_v63 = vadd.f32 %v17238_v10, %v17236_v19 }
0x17cb   :  { %v12681_v33 = vpop.f32.mrf.mxu1  ;;  %v12721_v62 = vpop.f32.mrf.mxu0  ;;  %v10378_v3 = vadd.f32 %v12609_v51, %v17224_v38  ;;  %v10381_v10 = vadd.f32 %v12612_v4, %v17226_v34  ;;  %v12615_v38 = vadd.f32 %v17254_v39, %v17250_v36  ;;  %v12618_v34 = vadd.f32 %v17262_v32, %v17258_v37 }
0x17cd   :  { %v12682_v9 = vpop.f32.mrf.mxu1  ;;  %v12722_v49 = vpop.f32.mrf.mxu0  ;;  %v10389_v4 = vadd.f32 %v12618_v34, %v17230_v55 }
0x17cf   :  { %v12684_v60 = vpop.f32.mrf.mxu1  ;;  %v12724_v16 = vpop.f32.mrf.mxu0 }
0x17d1   :  { %v12685_v59 = vpop.f32.mrf.mxu1  ;;  %v12725_v22 = vpop.f32.mrf.mxu0 }
0x17d2   :  { %v12686_v35 = vadd.f32 %v12685_v59, %v12684_v60  ;;  %v12726_v42 = vadd.f32 %v12725_v22, %v12724_v16  ;;  %v10386_v16 = vadd.f32 %v12615_v38, %v17228_v30 }
0x17d3   :  { %v12687_v57 = vpop.f32.mrf.mxu1  ;;  %v17282_v6 = vpop.f32.mrf.mxu0 }
0x17d5   :  { %v12688_v23 = vpop.f32.mrf.mxu1  ;;  %v17284_v27 = vpop.f32.mrf.mxu0 }
0x17d6   :  { %v12729_v36 = vadd.f32 %v17284_v27, %v17282_v6 }
0x17d7   :  { %v12690_v44 = vpop.f32.mrf.mxu1  ;;  %v17286_v17 = vpop.f32.mrf.mxu0 }
0x17d9   :  { %v12691_v18 = vpop.f32.mrf.mxu1  ;;  %v17288_v45 = vpop.f32.mrf.mxu0 }
0x17db   :  { %v17290_v43 = vpop.f32.mrf.mxu1  ;;  %v17292_v26 = vpop.f32.mrf.mxu0 }
0x17dc   :  { %17685 = vst [vmem:[#allocation26_spill] sm:$0xff] %v17292_v26 }
0x17dd   :  { %v17294_v48 = vpop.f32.mrf.mxu1  ;;  %v17296_v12 = vpop.f32.mrf.mxu0 }
0x17de   :  { %17686 = vst [vmem:[#allocation28_spill] sm:$0xff] %v17296_v12  ;;  %v12683_v12 = vadd.f32 %v12682_v9, %v12681_v33  ;;  %v12695_v37 = vadd.f32 %v17294_v48, %v17290_v43 }
0x17df   :  { %v17298_v31 = vpop.f32.mrf.mxu1  ;;  %v17300_v25 = vpop.f32.mrf.mxu0 }
0x17e0   :  { %17687 = vst [vmem:[#allocation8_spill] sm:$0xff] %v17300_v25  ;;  %v10435_v25 = vadd.f32 %v12643_v21, %v10370_v47  ;;  %v12723_v47 = vadd.f32 %v12722_v49, %v12721_v62  ;;  %v12692_v49 = vadd.f32 %v12691_v18, %v12690_v44 }
0x17e1   :  { %v17302_v54 = vpop.f32.mrf.mxu1  ;;  %v17304_v7 = vpop.f32.mrf.mxu0 }
0x17e2   :  { %17688 = vst [vmem:[#allocation35_spill] sm:$0xff] %v17302_v54  ;;  %17689 = vst [vmem:[#allocation9_spill] sm:$0xff] %v17304_v7  ;;  %v10373_v54 = vadd.f32 %v12606_v24, %v17222_v61  ;;  %v10500_v46 = vadd.f32 %v12683_v12, %v10435_v25  ;;  %v12649_v61 = vadd.f32 %v17242_v58, %v17240_v15 }
0x17e3   :  { %v17306_v41 = vpop.f32.mrf.mxu1  ;;  %v17309_v29 = vpop.f32.mrf.mxu0  ;;  %v12689_v24 = vadd.f32 %v12688_v23, %v12687_v57  ;;  %v12652_v15 = vadd.f32 %v17248_v5, %v17246_v40 }
0x17e4   :  { %17690 = vst [vmem:[#allocation11_spill] sm:$0xff] %v17306_v41  ;;  %v10438_v52 = vadd.f32 %v12646_v63, %v10373_v54  ;;  %v10565_v9 = vadd.f32 %v12723_v47, %v10500_v46  ;;  %v10443_v12 = vadd.f32 %v12649_v61, %v10378_v3 }
0x17e5   :  { %v17311_v26 = vpop.f32.mrf.mxu1  ;;  %v17313_v2 = vpop.f32.mrf.mxu0  ;;  %v10446_v46 = vadd.f32 %v12652_v15, %v10381_v10 }
0x17e6   :  { %v10508_v58 = vadd.f32 %v12689_v24, %v10443_v12  ;;  %v17694_v12 = vld [vmem:[#allocation30_spill] sm:$0xff] }
0x17e7   :  { %v17315_v1 = vpop.f32.mrf.mxu1  ;;  %v17318_v7 = vpop.f32.mrf.mxu0  ;;  %v10511_v18 = vadd.f32 %v12692_v49, %v10446_v46 }
0x17e8   :  { %17691 = vst [vmem:[#allocation10_spill] sm:$0xff] %v17318_v7  ;;  %v10503_v7 = vadd.f32 %v12686_v35, %v10438_v52  ;;  %v10573_v44 = vadd.f32 %v12729_v36, %v10508_v58  ;;  %v17699_v58 = vld [vmem:[#allocation32_spill] sm:$0xff] }
0x17e9   :  { %v17320_v41 = vpop.f32.mrf.mxu1  ;;  %v17324_v28 = vpop.f32.mrf.mxu0  ;;  %v17693_v55 = vld [vmem:[#allocation35_spill] sm:$0xff] }
0x17ea   :  { %v10568_v57 = vadd.f32 %v12726_v42, %v10503_v7  ;;  %v12655_v7 = vadd.f32 %v17256_v56, %v17252_v8  ;;  %v12732_v8 = vadd.f32 %v17288_v45, %v17286_v17 }
0x17eb   :  { %v12761_v13 = vpop.f32.mrf.mxu1  ;;  %v12801_v21 = vpop.f32.mrf.mxu0 }
0x17ec   :  { %v10576_v24 = vadd.f32 %v12732_v8, %v10511_v18  ;;  %v17708_v8 = vld [vmem:[#allocation6_spill] sm:$0xff] }
0x17ed   :  { %v12762_v33 = vpop.f32.mrf.mxu1  ;;  %v12802_v25 = vpop.f32.mrf.mxu0 }
0x17ee   :  { %v12763_v19 = vadd.f32 %v12762_v33, %v12761_v13  ;;  %v12803_v53 = vadd.f32 %v12802_v25, %v12801_v21  ;;  %v10451_v13 = vadd.f32 %v12655_v7, %v10386_v16  ;;  %v17692_v21 = vld [vmem:[#allocation23_spill] sm:$0xff]  ;;  %v12698_v33 = vadd.f32 %v17693_v55, %v17298_v31  ;;  %v17703_v7 = vld [vmem:[#allocation8_spill] sm:$0xff] }
0x17ef   :  { %v12764_v60 = vpop.f32.mrf.mxu1  ;;  %v12804_v62 = vpop.f32.mrf.mxu0  ;;  %v12658_v61 = vadd.f32 %v17692_v21, %v17260_v20  ;;  %v17697_v20 = vld [vmem:[#allocation26_spill] sm:$0xff] }
0x17f0   :  { %v10630_v54 = vadd.f32 %v12763_v19, %v10565_v9 }
0x17f1   :  { %v12765_v59 = vpop.f32.mrf.mxu1  ;;  %v12805_v63 = vpop.f32.mrf.mxu0  ;;  %v10454_v25 = vadd.f32 %v12658_v61, %v10389_v4 }
0x17f2   :  { %v10695_v23 = vadd.f32 %v12803_v53, %v10630_v54  ;;  %v12766_v51 = vadd.f32 %v12765_v59, %v12764_v60  ;;  %v12806_v35 = vadd.f32 %v12805_v63, %v12804_v62  ;;  %v17696_v60 = vld [vmem:[#allocation21_spill] sm:$0xff]  ;;  %v17698_v54 = vld [vmem:[#allocation28_spill] sm:$0xff]  ;;  %v17702_v63 = vld [vmem:[#allocation11_spill] sm:$0xff] }
0x17f3   :  { %v12767_v39 = vpop.f32.mrf.mxu1  ;;  %v12807_v40 = vpop.f32.mrf.mxu0  ;;  %v12735_v53 = vadd.f32 %v17698_v54, %v17697_v20  ;;  %v17700_v59 = vld [vmem:[#allocation24_spill] sm:$0xff]  ;;  %v12701_v46 = vadd.f32 %v17311_v26, %v17702_v63  ;;  %v17706_v26 = vld [vmem:[#allocation22_spill] sm:$0xff] }
0x17f4   :  { %v10633_v22 = vadd.f32 %v12766_v51, %v10568_v57  ;;  %v17341_v5 = vadd.f32 %v10695_v23, %v16408_v11  ;;  %v12621_v11 = vadd.f32 %v17270_v0, %v17266_v50  ;;  %v10516_v0 = vadd.f32 %v12695_v37, %v10451_v13  ;;  %v17701_v57 = vld [vmem:[#allocation34_spill] sm:$0xff]  ;;  %v17705_v37 = vld [vmem:[#allocation7_spill] sm:$0xff] }
0x17f5   :  { %v12768_v3 = vpop.f32.mrf.mxu1  ;;  %v12808_v27 = vpop.f32.mrf.mxu0  ;;  %v12661_v23 = vadd.f32 %v17701_v57, %v17700_v59  ;;  %v10519_v51 = vadd.f32 %v12698_v33, %v10454_v25  ;;  %v12741_v33 = vadd.f32 %v17313_v2, %v17309_v29  ;;  %v17710_v20 = vld [vmem:[#allocation10_spill] sm:$0xff] }
0x17f6   :  { %v10698_v32 = vadd.f32 %v12806_v35, %v10633_v22  ;;  %v12769_v6 = vadd.f32 %v12768_v3, %v12767_v39  ;;  %v10737_v30 = vsel %vm110_vm0, %v17341_v5, 0.0  ;;  %v12809_v47 = vadd.f32 %v12808_v27, %v12807_v40 }
0x17f7   :  { %v12770_v56 = vpop.f32.mrf.mxu1  ;;  %10738 = vadd.xlane.f32.xlu0 %v10737_v30  ;;  %v12810_v48 = vpop.f32.mrf.mxu0  ;;  %v10394_v10 = vadd.f32 %v12621_v11, %v17694_v12  ;;  %v10581_v36 = vadd.f32 %v12735_v53, %v10516_v0  ;;  %v17707_v11 = vld [vmem:[#allocation33_spill] sm:$0xff]  ;;  %v12744_v2 = vadd.f32 %v17324_v28, %v17710_v20 }
0x17f8   :  { %v10638_v52 = vadd.f32 %v12769_v6, %v10573_v44  ;;  %v17355_v43 = vadd.f32 %v10698_v32, %v16412_v14  ;;  %v17695_v14 = vld [vmem:[#allocation31_spill] sm:$0xff]  ;;  %v17704_v44 = vld [vmem:[#allocation9_spill] sm:$0xff] }
0x17f9   :  { %v12771_v50 = vpop.f32.mrf.mxu1  ;;  %v12811_v45 = vpop.f32.mrf.mxu0  ;;  %v12624_v38 = vadd.f32 %v17696_v60, %v17695_v14  ;;  %v10459_v40 = vadd.f32 %v12661_v23, %v10394_v10  ;;  %v12738_v18 = vadd.f32 %v17704_v44, %v17703_v7 }
0x17fa   :  { %v10703_v9 = vadd.f32 %v12809_v47, %v10638_v52  ;;  %v12772_v17 = vadd.f32 %v12771_v50, %v12770_v56  ;;  %v10740_v19 = vsel %vm110_vm0, %v17355_v43, 0.0  ;;  %v12812_v62 = vadd.f32 %v12811_v45, %v12810_v48 }
0x17fb   :  { %v12773_v42 = vpop.f32.mrf.mxu1  ;;  %10741 = vadd.xlane.f32.xlu1 %v10740_v19  ;;  %v12813_v15 = vpop.f32.mrf.mxu0  ;;  %v10397_v32 = vadd.f32 %v12624_v38, %v17705_v37  ;;  %v12664_v56 = vadd.f32 %v17708_v8, %v17707_v11  ;;  %v10584_v13 = vadd.f32 %v12738_v18, %v10519_v51  ;;  %v10524_v52 = vadd.f32 %v12701_v46, %v10459_v40  ;;  %v17709_v19 = vld [vmem:[#allocation20_spill] sm:$0xff] }
0x17fc   :  { %v10641_v31 = vadd.f32 %v12772_v17, %v10576_v24  ;;  %v17369_v49 = vadd.f32 %v10703_v9, %v17699_v58  ;;  %v12704_v48 = vadd.f32 %v17320_v41, %v17315_v1 }
0x17fd   :  { %v12774_v34 = vpop.f32.mrf.mxu1  ;;  %v12814_v22 = vpop.f32.mrf.mxu0  ;;  %v10462_v0 = vadd.f32 %v12664_v56, %v10397_v32  ;;  %v10589_v12 = vadd.f32 %v12741_v33, %v10524_v52 }
0x17fe   :  { %v10706_v39 = vadd.f32 %v12812_v62, %v10641_v31  ;;  %v12775_v16 = vadd.f32 %v12774_v34, %v12773_v42  ;;  %v10743_v35 = vsel %vm110_vm0, %v17369_v49, 0.0  ;;  %v12815_v27 = vadd.f32 %v12814_v22, %v12813_v15  ;;  %v17711_v31 = vld [vmem:[#allocation25_spill] sm:$0xff] }
0x17ff   :  { %v12776_v3 = vpop.f32.mrf.mxu1  ;;  %10744 = vadd.xlane.f32.xlu0 %v10743_v35  ;;  %v12816_v30 = vpop.f32.mrf.mxu0  ;;  %v10527_v41 = vadd.f32 %v12704_v48, %v10462_v0  ;;  %v17712_v34 = vld [vmem:[#allocation29_spill] sm:$0xff] }
0x1800   :  { %v10646_v6 = vadd.f32 %v12775_v16, %v10581_v36  ;;  %v17381_v4 = vadd.f32 %v10706_v39, %v17706_v26  ;;  %v17713_v16 = vld [vmem:[#allocation27_spill] sm:$0xff] }
0x1801   :  { %v12777_v47 = vpop.f32.mrf.mxu1  ;;  %v12817_v24 = vpop.f32.mrf.mxu0  ;;  %v10592_v58 = vadd.f32 %v12744_v2, %v10527_v41 }
0x1802   :  { %v10711_v21 = vadd.f32 %v12815_v27, %v10646_v6  ;;  %v12778_v61 = vadd.f32 %v12777_v47, %v12776_v3  ;;  %v10746_v55 = vsel %vm110_vm0, %v17381_v4, 0.0  ;;  %v12818_v17 = vadd.f32 %v12817_v24, %v12816_v30 }
0x1803   :  { %v12779_v50 = vpop.f32.mrf.mxu1  ;;  %10747 = vadd.xlane.f32.xlu1 %v10746_v55  ;;  %v12819_v45 = vpop.f32.mrf.mxu0 }
0x1804   :  { %v10649_v9 = vadd.f32 %v12778_v61, %v10584_v13  ;;  %v10729_v25 = vadd.f32 %v10711_v21, %v17709_v19 }
0x1805   :  { %v12780_v10 = vpop.f32.mrf.mxu1  ;;  %v12820_v60 = vpop.f32.mrf.mxu0 }
0x1806   :  { %v10714_v1 = vadd.f32 %v12818_v17, %v10649_v9  ;;  %v12781_v14 = vadd.f32 %v12780_v10, %v12779_v50  ;;  %v10749_v38 = vsel %vm110_vm0, %v10729_v25, 0.0  ;;  %v12821_v54 = vadd.f32 %v12820_v60, %v12819_v45 }
0x1807   :  { %v12782_v42 = vpop.f32.mrf.mxu1  ;;  %10750 = vadd.xlane.f32.xlu0 %v10749_v38  ;;  %v12822_v53 = vpop.f32.mrf.mxu0 }
0x1808   :  { %v10654_v29 = vadd.f32 %v12781_v14, %v10589_v12  ;;  %v10730_v62 = vadd.f32 %v10714_v1, %v17711_v31 }
0x1809   :  { %v12783_v15 = vpop.f32.mrf.mxu1  ;;  %v12823_v23 = vpop.f32.mrf.mxu0 }
0x180a   :  { %v10719_v59 = vadd.f32 %v12821_v54, %v10654_v29  ;;  %v12784_v57 = vadd.f32 %v12783_v15, %v12782_v42  ;;  %v10752_v51 = vsel %vm110_vm0, %v10730_v62, 0.0  ;;  %v12824_v46 = vadd.f32 %v12823_v23, %v12822_v53 }
0x180b   :  { %10753 = vadd.xlane.f32.xlu1 %v10752_v51 }
0x180c   :  { %v10657_v63 = vadd.f32 %v12784_v57, %v10592_v58  ;;  %v10731_v36 = vadd.f32 %v10719_v59, %v17712_v34 }
0x180e   :  { %v10722_v39 = vadd.f32 %v12824_v46, %v10657_v63  ;;  %v10755_v28 = vsel %vm110_vm0, %v10731_v36, 0.0  ;;  %v11959_v63 = vld [vmem:[%s17547_s15 + $0x1] ss:$0 sm:$0xff] }
0x180f   :  { %10756 = vadd.xlane.f32.xlu0 %v10755_v28 }
0x1810   :  { %v10732_v22 = vadd.f32 %v10722_v39, %v17713_v16  ;;  %v11960_v39 = vld [vmem:[%s17548_s16 + $0x1] ss:$0 sm:$0xff] }
0x1812   :  { %v10758_v35 = vsel %vm110_vm0, %v10732_v22, 0.0 }
0x1813   :  { %10759 = vadd.xlane.f32.xlu1 %v10758_v35 }
0x1880   :  { %v10739_v40 = vpop.xlane.xlu0 %10738 }
0x1881   :  { %v10761_v7 = vmul.f32 0.03125, %v10739_v40 }
0x1883   :  { %v17402_v44 = vsub.f32 %v17341_v5, %v10761_v7 }
0x1884   :  { %v10742_v18 = vpop.xlane.xlu1 %10741 }
0x1885   :  { %v10762_v3 = vmul.f32 0.03125, %v10742_v18  ;;  %v10777_v37 = vmul.f32 %v17402_v44, %v17402_v44 }
0x1887   :  { %v17407_v32 = vsub.f32 %v17355_v43, %v10762_v3  ;;  %v10785_v6 = vsel %vm110_vm0, %v10777_v37, 0.0 }
0x1888   :  { %v10745_v27 = vpop.xlane.xlu0 %10744  ;;  %10786 = vadd.xlane.f32.xlu0 %v10785_v6 }
0x1889   :  { %v10763_v30 = vmul.f32 0.03125, %v10745_v27  ;;  %v10778_v26 = vmul.f32 %v17407_v32, %v17407_v32 }
0x188b   :  { %v17413_v11 = vsub.f32 %v17369_v49, %v10763_v30  ;;  %v10788_v5 = vsel %vm110_vm0, %v10778_v26, 0.0 }
0x188c   :  { %v10748_v8 = vpop.xlane.xlu1 %10747  ;;  %10789 = vadd.xlane.f32.xlu1 %v10788_v5 }
0x188d   :  { %v10764_v56 = vmul.f32 0.03125, %v10748_v8  ;;  %v10779_v43 = vmul.f32 %v17413_v11, %v17413_v11 }
0x188f   :  { %v17419_v13 = vsub.f32 %v17381_v4, %v10764_v56  ;;  %v10791_v52 = vsel %vm110_vm0, %v10779_v43, 0.0 }
0x1890   :  { %v10751_v47 = vpop.xlane.xlu0 %10750  ;;  %10792 = vadd.xlane.f32.xlu0 %v10791_v52 }
0x1891   :  { %v10765_v48 = vmul.f32 0.03125, %v10751_v47  ;;  %v10780_v49 = vmul.f32 %v17419_v13, %v17419_v13 }
0x1893   :  { %v17424_v21 = vsub.f32 %v10729_v25, %v10765_v48  ;;  %v10794_v61 = vsel %vm110_vm0, %v10780_v49, 0.0 }
0x1894   :  { %v10754_v24 = vpop.xlane.xlu1 %10753  ;;  %10795 = vadd.xlane.f32.xlu1 %v10794_v61 }
0x1895   :  { %v10766_v55 = vmul.f32 0.03125, %v10754_v24  ;;  %v10781_v33 = vmul.f32 %v17424_v21, %v17424_v21 }
0x1897   :  { %v17429_v4 = vsub.f32 %v10730_v62, %v10766_v55  ;;  %v10797_v50 = vsel %vm110_vm0, %v10781_v33, 0.0 }
0x1898   :  { %10798 = vadd.xlane.f32.xlu0 %v10797_v50  ;;  %v10757_v0 = vpop.xlane.xlu0 %10756 }
0x1899   :  { %v10767_v9 = vmul.f32 0.03125, %v10757_v0  ;;  %v10782_v17 = vmul.f32 %v17429_v4, %v17429_v4 }
0x189b   :  { %v17434_v45 = vsub.f32 %v10731_v36, %v10767_v9  ;;  %v10800_v19 = vsel %vm110_vm0, %v10782_v17, 0.0 }
0x189c   :  { %10801 = vadd.xlane.f32.xlu1 %v10800_v19  ;;  %v10760_v25 = vpop.xlane.xlu1 %10759 }
0x189d   :  { %v10768_v12 = vmul.f32 0.03125, %v10760_v25  ;;  %v10783_v10 = vmul.f32 %v17434_v45, %v17434_v45 }
0x189f   :  { %v17439_v41 = vsub.f32 %v10732_v22, %v10768_v12  ;;  %v10803_v1 = vsel %vm110_vm0, %v10783_v10, 0.0 }
0x18a0   :  { %10804 = vadd.xlane.f32.xlu0 %v10803_v1 }
0x18a1   :  { %v10784_v14 = vmul.f32 %v17439_v41, %v17439_v41 }
0x18a3   :  { %v10806_v60 = vsel %vm110_vm0, %v10784_v14, 0.0 }
0x18a4   :  { %10807 = vadd.xlane.f32.xlu1 %v10806_v60 }
0x1911   :  { %v10787_v38 = vpop.xlane.xlu0 %10786 }
0x1912   :  { %v10809_v42 = vmul.f32 0.03125, %v10787_v38 }
0x1914   :  { %v10817_v20 = vadd.f32 1e-05, %v10809_v42 }
0x1915   :  { %v10790_v2 = vpop.xlane.xlu1 %10789 }
0x1916   :  { %13861 = vrsqrt.f32 %v10817_v20  ;;  %v10810_v29 = vmul.f32 0.03125, %v10790_v2 }
0x1918   :  { %v10818_v54 = vadd.f32 1e-05, %v10810_v29 }
0x1919   :  { %v10793_v53 = vpop.xlane.xlu0 %10792 }
0x191a   :  { %13863 = vrsqrt.f32 %v10818_v54  ;;  %v10811_v31 = vmul.f32 0.03125, %v10793_v53 }
0x191c   :  { %v10819_v62 = vadd.f32 1e-05, %v10811_v31 }
0x191d   :  { %v10796_v15 = vpop.xlane.xlu1 %10795 }
0x191e   :  { %13865 = vrsqrt.f32 %v10819_v62  ;;  %v10812_v58 = vmul.f32 0.03125, %v10796_v15 }
0x1920   :  { %v10820_v59 = vadd.f32 1e-05, %v10812_v58 }
0x1921   :  { %v10799_v57 = vpop.xlane.xlu0 %10798 }
0x1922   :  { %13867 = vrsqrt.f32 %v10820_v59  ;;  %v10813_v23 = vmul.f32 0.03125, %v10799_v57 }
0x1923   :  { %v13862_v51 = vpop.eup %13861 }
0x1924   :  { %v10821_v46 = vadd.f32 1e-05, %v10813_v23  ;;  %v10833_v34 = vmul.f32 %v13862_v51, %v17402_v44 }
0x1925   :  { %v10802_v36 = vpop.xlane.xlu1 %10801 }
0x1926   :  { %13869 = vrsqrt.f32 %v10821_v46  ;;  %v10814_v28 = vmul.f32 0.03125, %v10802_v36  ;;  %v10847_v16 = vmul.f32 %v11959_v63, %v10833_v34 }
0x1927   :  { %v13864_v22 = vpop.eup %13863 }
0x1928   :  { %v10822_v35 = vadd.f32 1e-05, %v10814_v28  ;;  %v10861_v40 = vadd.f32 %v11960_v39, %v10847_v16  ;;  %v10834_v7 = vmul.f32 %v13864_v22, %v17407_v32 }
0x1929   :  { %v10805_v18 = vpop.xlane.xlu0 %10804 }
0x192a   :  { %13871 = vrsqrt.f32 %v10822_v35  ;;  %v10815_v3 = vmul.f32 0.03125, %v10805_v18  ;;  %v10871_v37 = vsel %vm110_vm0, %v10861_v40, 0.0  ;;  %v10848_v6 = vmul.f32 %v11959_v63, %v10834_v7 }
0x192b   :  { %v13866_v44 = vpop.eup %13865  ;;  %10872 = vadd.xlane.f32.xlu0 %v10871_v37 }
0x192c   :  { %v10823_v27 = vadd.f32 1e-05, %v10815_v3  ;;  %v10862_v30 = vadd.f32 %v11960_v39, %v10848_v6  ;;  %v10835_v26 = vmul.f32 %v13866_v44, %v17413_v11 }
0x192d   :  { %v10808_v5 = vpop.xlane.xlu1 %10807 }
0x192e   :  { %13873 = vrsqrt.f32 %v10823_v27  ;;  %v10816_v8 = vmul.f32 0.03125, %v10808_v5  ;;  %v10874_v56 = vsel %vm110_vm0, %v10862_v30, 0.0  ;;  %v10849_v43 = vmul.f32 %v11959_v63, %v10835_v26 }
0x192f   :  { %v13868_v52 = vpop.eup %13867  ;;  %10875 = vadd.xlane.f32.xlu1 %v10874_v56 }
0x1930   :  { %v10824_v32 = vadd.f32 1e-05, %v10816_v8  ;;  %v10863_v47 = vadd.f32 %v11960_v39, %v10849_v43  ;;  %v10836_v48 = vmul.f32 %v13868_v52, %v17419_v13 }
0x1932   :  { %13875 = vrsqrt.f32 %v10824_v32  ;;  %v10877_v49 = vsel %vm110_vm0, %v10863_v47, 0.0  ;;  %v10850_v61 = vmul.f32 %v11959_v63, %v10836_v48 }
0x1933   :  { %v13870_v24 = vpop.eup %13869  ;;  %10878 = vadd.xlane.f32.xlu0 %v10877_v49 }
0x1934   :  { %v10864_v55 = vadd.f32 %v11960_v39, %v10850_v61  ;;  %v10837_v11 = vmul.f32 %v13870_v24, %v17424_v21 }
0x1936   :  { %v10880_v33 = vsel %vm110_vm0, %v10864_v55, 0.0  ;;  %v10851_v50 = vmul.f32 %v11959_v63, %v10837_v11 }
0x1937   :  { %v13872_v0 = vpop.eup %13871  ;;  %10881 = vadd.xlane.f32.xlu1 %v10880_v33 }
0x1938   :  { %v10865_v9 = vadd.f32 %v11960_v39, %v10851_v50  ;;  %v10838_v17 = vmul.f32 %v13872_v0, %v17429_v4 }
0x193a   :  { %v10883_v19 = vsel %vm110_vm0, %v10865_v9, 0.0  ;;  %v10852_v13 = vmul.f32 %v11959_v63, %v10838_v17 }
0x193b   :  { %v13874_v25 = vpop.eup %13873  ;;  %10884 = vadd.xlane.f32.xlu0 %v10883_v19 }
0x193c   :  { %v10866_v12 = vadd.f32 %v11960_v39, %v10852_v13  ;;  %v10839_v10 = vmul.f32 %v13874_v25, %v17434_v45 }
0x193e   :  { %v10886_v1 = vsel %vm110_vm0, %v10866_v12, 0.0  ;;  %v10853_v14 = vmul.f32 %v11959_v63, %v10839_v10 }
0x193f   :  { %v13876_v21 = vpop.eup %13875  ;;  %10887 = vadd.xlane.f32.xlu1 %v10886_v1 }
0x1940   :  { %v10867_v60 = vadd.f32 %v11960_v39, %v10853_v14  ;;  %v10840_v38 = vmul.f32 %v13876_v21, %v17439_v41 }
0x1942   :  { %v10889_v42 = vsel %vm110_vm0, %v10867_v60, 0.0  ;;  %v10854_v20 = vmul.f32 %v11959_v63, %v10840_v38 }
0x1943   :  { %10890 = vadd.xlane.f32.xlu0 %v10889_v42 }
0x1944   :  { %v10868_v4 = vadd.f32 %v11960_v39, %v10854_v20 }
0x1946   :  { %v10892_v2 = vsel %vm110_vm0, %v10868_v4, 0.0 }
0x1947   :  { %10893 = vadd.xlane.f32.xlu1 %v10892_v2 }
0x19b4   :  { %v10873_v29 = vpop.xlane.xlu0 %10872 }
0x19b5   :  { %v10895_v54 = vmul.f32 0.03125, %v10873_v29 }
0x19b7   :  { %v17467_v53 = vsub.f32 %v10861_v40, %v10895_v54 }
0x19b8   :  { %v10876_v45 = vpop.xlane.xlu1 %10875 }
0x19b9   :  { %v10896_v31 = vmul.f32 0.03125, %v10876_v45  ;;  %v10911_v62 = vmul.f32 %v17467_v53, %v17467_v53 }
0x19bb   :  { %v17471_v15 = vsub.f32 %v10862_v30, %v10896_v31  ;;  %v10919_v41 = vsel %vm110_vm0, %v10911_v62, 0.0 }
0x19bc   :  { %10920 = vadd.xlane.f32.xlu0 %v10919_v41  ;;  %v10879_v58 = vpop.xlane.xlu0 %10878 }
0x19bd   :  { %v10897_v59 = vmul.f32 0.03125, %v10879_v58  ;;  %v10912_v57 = vmul.f32 %v17471_v15, %v17471_v15 }
0x19bf   :  { %v17476_v23 = vsub.f32 %v10863_v47, %v10897_v59  ;;  %v10922_v51 = vsel %vm110_vm0, %v10912_v57, 0.0  ;;  %v11961_v59 = vld [vmem:[%s17549_s17] ss:$0 sm:$0xff] }
0x19c0   :  { %10923 = vadd.xlane.f32.xlu1 %v10922_v51  ;;  %v10882_v63 = vpop.xlane.xlu1 %10881 }
0x19c1   :  { %v10898_v46 = vmul.f32 0.03125, %v10882_v63  ;;  %v10913_v34 = vmul.f32 %v17476_v23, %v17476_v23 }
0x19c3   :  { %v17481_v36 = vsub.f32 %v10864_v55, %v10898_v46  ;;  %v10925_v39 = vsel %vm110_vm0, %v10913_v34, 0.0 }
0x19c4   :  { %10926 = vadd.xlane.f32.xlu0 %v10925_v39  ;;  %v10885_v28 = vpop.xlane.xlu0 %10884 }
0x19c5   :  { %v10899_v16 = vmul.f32 0.03125, %v10885_v28  ;;  %v10914_v22 = vmul.f32 %v17481_v36, %v17481_v36 }
0x19c7   :  { %v17486_v35 = vsub.f32 %v10865_v9, %v10899_v16  ;;  %v10928_v40 = vsel %vm110_vm0, %v10914_v22, 0.0 }
0x19c8   :  { %10929 = vadd.xlane.f32.xlu1 %v10928_v40  ;;  %v10888_v7 = vpop.xlane.xlu1 %10887 }
0x19c9   :  { %v10900_v18 = vmul.f32 0.03125, %v10888_v7  ;;  %v10915_v3 = vmul.f32 %v17486_v35, %v17486_v35 }
0x19cb   :  { %v17491_v37 = vsub.f32 %v10866_v12, %v10900_v18  ;;  %v10931_v6 = vsel %vm110_vm0, %v10915_v3, 0.0 }
0x19cc   :  { %10932 = vadd.xlane.f32.xlu0 %v10931_v6  ;;  %v10891_v44 = vpop.xlane.xlu0 %10890 }
0x19cd   :  { %v10901_v27 = vmul.f32 0.03125, %v10891_v44  ;;  %v10916_v30 = vmul.f32 %v17491_v37, %v17491_v37 }
0x19cf   :  { %v17496_v26 = vsub.f32 %v10867_v60, %v10901_v27  ;;  %v10934_v5 = vsel %vm110_vm0, %v10916_v30, 0.0 }
0x19d0   :  { %10935 = vadd.xlane.f32.xlu1 %v10934_v5  ;;  %v10894_v8 = vpop.xlane.xlu1 %10893 }
0x19d1   :  { %v10902_v56 = vmul.f32 0.03125, %v10894_v8  ;;  %v10917_v43 = vmul.f32 %v17496_v26, %v17496_v26 }
0x19d3   :  { %v17501_v52 = vsub.f32 %v10868_v4, %v10902_v56  ;;  %v10937_v32 = vsel %vm110_vm0, %v10917_v43, 0.0 }
0x19d4   :  { %10938 = vadd.xlane.f32.xlu0 %v10937_v32 }
0x19d5   :  { %v10918_v47 = vmul.f32 %v17501_v52, %v17501_v52 }
0x19d7   :  { %v10940_v48 = vsel %vm110_vm0, %v10918_v47, 0.0 }
0x19d8   :  { %10941 = vadd.xlane.f32.xlu1 %v10940_v48 }
0x1a45   :  { %v10921_v49 = vpop.xlane.xlu0 %10920 }
0x1a46   :  { %v10943_v55 = vmul.f32 0.03125, %v10921_v49 }
0x1a48   :  { %v10951_v0 = vadd.f32 1e-05, %v10943_v55 }
0x1a49   :  { %v10924_v61 = vpop.xlane.xlu1 %10923 }
0x1a4a   :  { %v10944_v24 = vmul.f32 0.03125, %v10924_v61 }
0x1a4c   :  { %v10952_v33 = vadd.f32 1e-05, %v10944_v24  ;;  %v11963_v24 = vld [vmem:[%s17551_s19] ss:$0 sm:$0xff] }
0x1a4d   :  { %v10927_v11 = vpop.xlane.xlu0 %10926 }
0x1a4e   :  { %v10945_v50 = vmul.f32 0.03125, %v10927_v11  ;;  %13877 = vrsqrt.f32 %v10952_v33 }
0x1a4f   :  { %13879 = vrsqrt.f32 %v10951_v0 }
0x1a50   :  { %v10953_v9 = vadd.f32 1e-05, %v10945_v50 }
0x1a51   :  { %v10930_v17 = vpop.xlane.xlu1 %10929 }
0x1a52   :  { %v10946_v19 = vmul.f32 0.03125, %v10930_v17  ;;  %13881 = vrsqrt.f32 %v10953_v9 }
0x1a54   :  { %v10954_v13 = vadd.f32 1e-05, %v10946_v19 }
0x1a55   :  { %v10933_v25 = vpop.xlane.xlu0 %10932 }
0x1a56   :  { %13883 = vrsqrt.f32 %v10954_v13  ;;  %v10947_v12 = vmul.f32 0.03125, %v10933_v25 }
0x1a58   :  { %v10955_v10 = vadd.f32 1e-05, %v10947_v12 }
0x1a59   :  { %v10936_v1 = vpop.xlane.xlu1 %10935 }
0x1a5a   :  { %13885 = vrsqrt.f32 %v10955_v10  ;;  %v10948_v14 = vmul.f32 0.03125, %v10936_v1 }
0x1a5b   :  { %v13878_v42 = vpop.eup %13877 }
0x1a5c   :  { %v10956_v21 = vadd.f32 1e-05, %v10948_v14  ;;  %v13880_v20 = vpop.eup %13879  ;;  %v10968_v54 = vmul.f32 %v13878_v42, %v17471_v15 }
0x1a5d   :  { %v10939_v60 = vpop.xlane.xlu0 %10938  ;;  %v10967_v62 = vmul.f32 %v13880_v20, %v17467_v53  ;;  %v11962_v53 = vld [vmem:[%s17550_s18] ss:$0 sm:$0xff] }
0x1a5e   :  { %13887 = vrsqrt.f32 %v10956_v21  ;;  %v10949_v38 = vmul.f32 0.03125, %v10939_v60  ;;  %v10982_v57 = vmul.f32 %v11961_v59, %v10968_v54 }
0x1a5f   :  { %v13882_v2 = vpop.eup %13881  ;;  %v10981_v46 = vmul.f32 %v11961_v59, %v10967_v62 }
0x1a60   :  { %v10957_v4 = vadd.f32 1e-05, %v10949_v38  ;;  %v10969_v41 = vmul.f32 %v13882_v2, %v17476_v23  ;;  %v10996_v39 = vadd.f32 %v11962_v53, %v10982_v57 }
0x1a61   :  { %v10942_v29 = vpop.xlane.xlu1 %10941  ;;  %v10995_v16 = vadd.f32 %v11962_v53, %v10981_v46 }
0x1a62   :  { %13889 = vrsqrt.f32 %v10957_v4  ;;  %v10950_v45 = vmul.f32 0.03125, %v10942_v29  ;;  %v10983_v34 = vmul.f32 %v11961_v59, %v10969_v41 }
0x1a63   :  { %v13884_v31 = vpop.eup %13883  ;;  %v11003_v3 = vadd.f32 %v10996_v39, %v10995_v16 }
0x1a64   :  { %v10958_v58 = vadd.f32 1e-05, %v10950_v45  ;;  %v10970_v51 = vmul.f32 %v13884_v31, %v17481_v36  ;;  %v10997_v7 = vadd.f32 %v11962_v53, %v10983_v34 }
0x1a66   :  { %13891 = vrsqrt.f32 %v10958_v58  ;;  %v10984_v23 = vmul.f32 %v11961_v59, %v10970_v51 }
0x1a67   :  { %v13886_v63 = vpop.eup %13885 }
0x1a68   :  { %v10971_v15 = vmul.f32 %v13886_v63, %v17486_v35  ;;  %v10998_v36 = vadd.f32 %v11962_v53, %v10984_v23  ;;  %v11004_v35 = vadd.f32 %v11003_v3, %v10997_v7 }
0x1a6a   :  { %v10985_v40 = vmul.f32 %v11961_v59, %v10971_v15  ;;  %v11005_v8 = vadd.f32 %v11004_v35, %v10998_v36 }
0x1a6b   :  { %v13888_v28 = vpop.eup %13887 }
0x1a6c   :  { %v10972_v22 = vmul.f32 %v13888_v28, %v17491_v37  ;;  %v10999_v27 = vadd.f32 %v11962_v53, %v10985_v40 }
0x1a6e   :  { %v10986_v18 = vmul.f32 %v11961_v59, %v10972_v22  ;;  %v11006_v47 = vadd.f32 %v11005_v8, %v10999_v27 }
0x1a6f   :  { %v13890_v6 = vpop.eup %13889 }
0x1a70   :  { %v10973_v44 = vmul.f32 %v13890_v6, %v17496_v26  ;;  %v11000_v5 = vadd.f32 %v11962_v53, %v10986_v18 }
0x1a72   :  { %v10987_v30 = vmul.f32 %v11961_v59, %v10973_v44  ;;  %v11007_v37 = vadd.f32 %v11006_v47, %v11000_v5 }
0x1a73   :  { %v13892_v56 = vpop.eup %13891 }
0x1a74   :  { %v10974_v43 = vmul.f32 %v13892_v56, %v17501_v52  ;;  %v11001_v32 = vadd.f32 %v11962_v53, %v10987_v30 }
0x1a76   :  { %v10988_v48 = vmul.f32 %v11961_v59, %v10974_v43  ;;  %v11008_v61 = vadd.f32 %v11007_v37, %v11001_v32 }
0x1a78   :  { %v11002_v49 = vadd.f32 %v11962_v53, %v10988_v48 }
0x1a7a   :  { %v11009_v55 = vadd.f32 %v11008_v61, %v11002_v49 }
0x1a7c   :  { %v11018_v26 = vmul.f32 %v11963_v24, %v11009_v55  ;;  %11010 = vst.msk [vmem:[#allocation3] sm:$0xff] %vm110_vm0, %v11009_v55 }
0x1a7e   :  { %v11019_v11 = vsel %vm110_vm0, %v11018_v26, 0.0 }
0x1a7f   :  { %11020 = vadd.xlane.f32.xlu0 %v11019_v11 }
0x1a80   :  { %13912 = shalt.err (!%p13909_p4)
}
0x1a81   :  { %11041 = dma.vmem_to_hbm [thread:$0]  %s11039_s0, 128, %s17553_s21, [#allocation4]   ;;  %v11964_v52 = vld [vmem:[#allocation2] ss:$0 sm:$0xff]  ;;  %vm11030_vm5 = vcmask 7168  }
0x1b08   :  { %v11021_v33 = vpop.xlane.xlu0 %11020 }
0x1b09   :  { %v11029_v50 = vadd.f32 %v11964_v52, %v11021_v33 }
0x1b0b   :  { %11031 = vst.msk [vmem:[%s17554_s22] sm:$0xff] %vm11030_vm5, %v11029_v50 }
0x1b0c   :  { %13921 = dma.done.wait [#allocation4], 128  }
0x1b0d   :  { %13922 = vsyncadd [#allocation4], 4294967168 }
0x1b0e   :  { %11049 = vsyncpa [#allocation4], 1 }

</bundles_post_ra>
